<compile_context>
chip_gen: v7x
topology: tpu7x:2x2x1
jax: 0.10.0
libtpu: 0.0.40
codegen_flags: <defaults>
</compile_context>

<pallas_src>
import math

import jax
import jax.numpy as jnp
from jax.experimental import pallas as pl
from jax.experimental.pallas import tpu as pltpu

# Scaled-down config (original: HIDDEN_DIM=256, MAX_LEN=100, POS_EMBED=50,
# POS_VOCAB=45, WORD_EMBED=100, num_layers=4, bidirectional).
HIDDEN_DIM = 32
MAX_SENTENCE_LENGTH = 8
POS_EMBED_SIZE = 16
POS_VOCAB_SIZE = 12
WORD_EMBED_SIZE = 16
NUM_LAYERS = 4
BATCH = 8          # 8 sentences per call -> full sublane / MXU-row occupancy


# ----------------------------------------------------------------------------
# Fused kernel: 4-layer BiLSTM -> factorized PosTagFC pairwise (head, dep) scores
# ----------------------------------------------------------------------------
def _fused_tagger_kernel(
    x_ref,                                       # (L*B, D0) f32, time-major rows t*B+b
    w0i_ref, w0h_ref, b0_ref,                    # layer 0: (D0,8H) bf16, (2H,8H) bf16 blockdiag, (1,8H) f32
    w1i_ref, w1h_ref, b1_ref,                    # layer 1
    w2i_ref, w2h_ref, b2_ref,                    # layer 2
    w3i_ref, w3h_ref, b3_ref,                    # layer 3
    hw1h_ref, hw1d_ref, hb1_ref,                 # PosTagFC layer1 split head/dep halves
    hw2_ref, hb2_ref,                            # PosTagFC layer2
    hw3_ref, hb3_ref,                            # PosTagFC layer3 (row vector + scalar bias)
    out_ref,                                     # (L+1, L*B) f32: score[dep, head*B + b]
    xa_ref, xb_ref,                              # (L*B, 2H) f32 inter-layer activations
    xp_ref,                                      # (L*B, 8H) f32 hoisted input projection
    t1_ref):                                     # ((L+1)*L*B, 2H) bf16 head layer-1 acts
  LB, H2 = xa_ref.shape
  H = H2 // 2
  B = BATCH
  L = LB // B
  H4, H8 = 4 * H, 8 * H
  HH = hw2_ref.shape[1]                          # H // 2
  Lp1 = out_ref.shape[0]

  def lstm_layer(src_ref, wih_ref, whh_ref, bias_ref, dst_ref):
    # Non-recurrent input projection for BOTH directions, hoisted out of the
    # recurrence (one MXU matmul per layer) and spilled to VMEM scratch.
    xp_ref[...] = (jnp.dot(src_ref[...].astype(jnp.bfloat16), wih_ref[...],
                           preferred_element_type=jnp.float32) + bias_ref[...])
    W = whh_ref[...]                             # hoisted: identical RHS for all steps
    h_f = jnp.zeros((B, H), jnp.float32)
    c_f = jnp.zeros((B, H), jnp.float32)
    h_b = jnp.zeros((B, H), jnp.float32)
    c_b = jnp.zeros((B, H), jnp.float32)
    # Fwd step t and bwd step L-1-t fused into ONE (B,2H)x(2H,8H) block-diagonal
    # matmul per iteration; loop fully unrolled (static L=8).
    for t in range(L):
      tb = L - 1 - t
      hc = jnp.concatenate([h_f, h_b], axis=1).astype(jnp.bfloat16)   # (B, 2H)
      gh = jnp.dot(hc, W, preferred_element_type=jnp.float32)         # (B, 8H)
      g_f = xp_ref[t * B:(t + 1) * B, 0:H4] + gh[:, 0:H4]             # (B, 4H)
      g_b = xp_ref[tb * B:(tb + 1) * B, H4:H8] + gh[:, H4:H8]         # (B, 4H)
      # forward direction (time t), PyTorch gate order i,f,g,o
      i1 = jax.nn.sigmoid(g_f[:, 0:H])
      f1 = jax.nn.sigmoid(g_f[:, H:2 * H])
      z1 = jnp.tanh(g_f[:, 2 * H:3 * H])
      o1 = jax.nn.sigmoid(g_f[:, 3 * H:4 * H])
      c_f = f1 * c_f + i1 * z1
      h_f = o1 * jnp.tanh(c_f)
      # backward direction (time L-1-t)
      i2 = jax.nn.sigmoid(g_b[:, 0:H])
      f2 = jax.nn.sigmoid(g_b[:, H:2 * H])
      z2 = jnp.tanh(g_b[:, 2 * H:3 * H])
      o2 = jax.nn.sigmoid(g_b[:, 3 * H:4 * H])
      c_b = f2 * c_b + i2 * z2
      h_b = o2 * jnp.tanh(c_b)
      dst_ref[t * B:(t + 1) * B, 0:H] = h_f          # fwd output lanes [0:H]
      dst_ref[tb * B:(tb + 1) * B, H:2 * H] = h_b    # bwd output lanes [H:2H]

  lstm_layer(x_ref, w0i_ref, w0h_ref, b0_ref, xa_ref)
  lstm_layer(xa_ref, w1i_ref, w1h_ref, b1_ref, xb_ref)
  lstm_layer(xb_ref, w2i_ref, w2h_ref, b2_ref, xa_ref)
  lstm_layer(xa_ref, w3i_ref, w3h_ref, b3_ref, xb_ref)

  # --- PosTagFC head, batched over ALL (head, dep) pairs ----------------------
  # layer1(concat(out[h], rooted[d])) = out[h] @ W1_head + rooted[d] @ W1_dep + b1
  lstm_out = xb_ref[...].astype(jnp.bfloat16)                          # (L*B, 2H)
  a_head = (jnp.dot(lstm_out, hw1h_ref[...],
                    preferred_element_type=jnp.float32) + hb1_ref[...])  # (L*B, 2H)
  d_dep = jnp.dot(lstm_out, hw1d_ref[...],
                  preferred_element_type=jnp.float32)                  # (L*B, 2H)
  a3 = a_head.reshape(L, B, H2)
  # dep = 0 is the ROOT token (zero vector -> zero dep contribution, as in the ref).
  t1_ref[0:LB, :] = jnp.maximum(a_head, 0.0).astype(jnp.bfloat16)
  for d in range(1, Lp1):
    blk = d_dep[(d - 1) * B:d * B, :].reshape(1, B, H2)                # (1, B, 2H)
    t1_ref[d * LB:(d + 1) * LB, :] = (
        jnp.maximum(a3 + blk, 0.0).reshape(LB, H2).astype(jnp.bfloat16))
  # ONE layer-2 matmul over all Lp1*L*B pair rows (M=576), then layer-3
  # (HH -> 1) as a VPU row multiply + lane reduction (an N=1 MXU matmul would
  # waste all but one output lane).
  t2 = jnp.maximum(
      jnp.dot(t1_ref[...], hw2_ref[...], preferred_element_type=jnp.float32)
      + hb2_ref[...], 0.0)                                             # (Lp1*L*B, HH)
  s = jnp.sum((t2 * hw3_ref[...]).reshape(Lp1, LB, HH), axis=-1)       # (Lp1, L*B)
  out_ref[...] = s + hb3_ref[...]


# ----------------------------------------------------------------------------
# Parameters (deterministic PyTorch-style uniform init).  Weights are stored
# transposed, direction-fused and (for whh) block-diagonal so the kernel
# computes x @ W directly.
# ----------------------------------------------------------------------------
def init_params(key):
  keys = iter(jax.random.split(key, 64))

  def unif(shape, bound):
    return jax.random.uniform(next(keys), shape, jnp.float32, -bound, bound)

  params = {}
  params["pos_embedding"] = jax.random.normal(
      next(keys), (POS_VOCAB_SIZE + 1, POS_EMBED_SIZE), jnp.float32)

  H = HIDDEN_DIM
  k = 1.0 / math.sqrt(H)
  lstm = []
  in_size = WORD_EMBED_SIZE + POS_EMBED_SIZE
  for _layer in range(NUM_LAYERS):
    wih_f = unif((in_size, 4 * H), k)                  # weight_ih.T (fwd), gates i,f,g,o
    wih_b = unif((in_size, 4 * H), k)                  # weight_ih.T (bwd)
    whh_f = unif((H, 4 * H), k)                        # weight_hh.T (fwd)
    whh_b = unif((H, 4 * H), k)                        # weight_hh.T (bwd)
    bias_f = unif((1, 4 * H), k) + unif((1, 4 * H), k)     # b_ih + b_hh (fwd)
    bias_b = unif((1, 4 * H), k) + unif((1, 4 * H), k)     # b_ih + b_hh (bwd)
    wih = jnp.concatenate([wih_f, wih_b], axis=1).astype(jnp.bfloat16)   # (Din, 8H)
    whh = jnp.zeros((2 * H, 8 * H), jnp.float32)
    whh = whh.at[0:H, 0:4 * H].set(whh_f)              # block-diag: [h_f|h_b] @ whh
    whh = whh.at[H:2 * H, 4 * H:8 * H].set(whh_b)      #   = [h_f@whh_f | h_b@whh_b]
    bias = jnp.concatenate([bias_f, bias_b], axis=1)                     # (1, 8H) f32
    lstm.append((wih, whh.astype(jnp.bfloat16), bias))
    in_size = 2 * H
  params["lstm"] = lstm

  # PosTagFC(input=4H, hidden=H, output=1): layer1 4H->2H (split head/dep halves),
  # layer2 2H->H//2, layer3 H//2->1.
  k1 = 1.0 / math.sqrt(4 * H)
  params["w1h"] = unif((2 * H, 2 * H), k1).astype(jnp.bfloat16)
  params["w1d"] = unif((2 * H, 2 * H), k1).astype(jnp.bfloat16)
  params["fb1"] = unif((1, 2 * H), k1)
  k2 = 1.0 / math.sqrt(2 * H)
  params["fw2"] = unif((2 * H, H // 2), k2).astype(jnp.bfloat16)
  params["fb2"] = unif((1, H // 2), k2)
  k3 = 1.0 / math.sqrt(H // 2)
  params["fw3"] = unif((1, H // 2), k3)                # f32 row vector (VPU multiply)
  params["fb3"] = unif((1, 1), k3)
  return params


# ----------------------------------------------------------------------------
# Forward pass: tiny glue in JAX (gather / concat / masking), everything heavy
# in the single fused Pallas kernel.
# ----------------------------------------------------------------------------
def new_dnn_pos_tagger_forward(params, word_embeds, pos_idx, sen_lens):
  # word_embeds: (B, L, W) f32; pos_idx: (B, L) int32; sen_lens: (B,) int32
  B, L, _ = word_embeds.shape
  Lp1 = L + 1
  H = HIDDEN_DIM

  pos_embeds = jnp.take(params["pos_embedding"], pos_idx, axis=0)      # (B, L, P)
  embeds = jnp.concatenate([word_embeds, pos_embeds], axis=-1)         # (B, L, W+P)
  x = jnp.transpose(embeds, (1, 0, 2)).reshape(L * B, -1)              # (L*B, D0) time-major

  flat_inputs = [x]
  for (wih, whh, bias) in params["lstm"]:
    flat_inputs.extend([wih, whh, bias])
  flat_inputs.extend([params["w1h"], params["w1d"], params["fb1"],
                      params["fw2"], params["fb2"],
                      params["fw3"], params["fb3"]])

  raw = pl.pallas_call(
      _fused_tagger_kernel,
      out_shape=jax.ShapeDtypeStruct((Lp1, L * B), jnp.float32),
      in_specs=[pl.BlockSpec(memory_space=pltpu.MemorySpace.VMEM)] * len(flat_inputs),
      out_specs=pl.BlockSpec(memory_space=pltpu.MemorySpace.VMEM),
      scratch_shapes=[pltpu.VMEM((L * B, 2 * H), jnp.float32),      # xa
                      pltpu.VMEM((L * B, 2 * H), jnp.float32),      # xb
                      pltpu.VMEM((L * B, 8 * H), jnp.float32),      # xp (input projection)
                      pltpu.VMEM((Lp1 * L * B, 2 * H), jnp.bfloat16)],  # t1 (head acts)
  )(*flat_inputs)

  # raw[d, t*B + b] = score(head=t, dep=d) for sentence b  ->  (B, L, L+1)
  scores = jnp.transpose(raw.reshape(Lp1, L, B), (2, 1, 0))

  # Per-sentence masking (reference copies only [:len, :len+1] into a zero matrix).
  h_ids = jnp.arange(L)[None, :, None]
  d_ids = jnp.arange(Lp1)[None, None, :]
  lens = sen_lens[:, None, None]
  scores = jnp.where((h_ids < lens) & (d_ids < lens + 1), scores, 0.0)
  # fill_diagonal_(0) on the (N,1) fc output zeroes only flat element 0 == [0,0].
  scores = scores.at[:, 0, 0].set(0.0)
  # Pad to (B, MAX_LEN+1, MAX_LEN+1) like score_matrices.
  pad = jnp.zeros((B, 1, Lp1), scores.dtype)
  return jnp.concatenate([scores, pad], axis=1)


if __name__ == "__main__":
  key = jax.random.PRNGKey(0)
  kp, kw, ki = jax.random.split(key, 3)
  params = init_params(kp)
  word_embeds = jax.random.normal(
      kw, (BATCH, MAX_SENTENCE_LENGTH, WORD_EMBED_SIZE), jnp.float32)
  pos_idx = jax.random.randint(
      ki, (BATCH, MAX_SENTENCE_LENGTH), 0, POS_VOCAB_SIZE + 1, jnp.int32)
  sen_lens = jnp.array([8, 5, 8, 3, 7, 6, 8, 4], jnp.int32)

  fwd = jax.jit(new_dnn_pos_tagger_forward)
  out = jax.block_until_ready(fwd(params, word_embeds, pos_idx, sen_lens))
  assert out.shape == (BATCH, MAX_SENTENCE_LENGTH + 1, MAX_SENTENCE_LENGTH + 1)
  assert bool(jnp.all(jnp.isfinite(out)))
  print("KERNEL_OK")
</pallas_src>

<mosaic_0001>
module attributes {stable_mosaic.version = 11 : i64} {
  func.func @_fused_tagger_kernel(%arg0: memref<64x32xf32, #tpu.memory_space<vmem>>, %arg1: memref<32x256xbf16, #tpu.memory_space<vmem>>, %arg2: memref<64x256xbf16, #tpu.memory_space<vmem>>, %arg3: memref<1x256xf32, #tpu.memory_space<vmem>>, %arg4: memref<64x256xbf16, #tpu.memory_space<vmem>>, %arg5: memref<64x256xbf16, #tpu.memory_space<vmem>>, %arg6: memref<1x256xf32, #tpu.memory_space<vmem>>, %arg7: memref<64x256xbf16, #tpu.memory_space<vmem>>, %arg8: memref<64x256xbf16, #tpu.memory_space<vmem>>, %arg9: memref<1x256xf32, #tpu.memory_space<vmem>>, %arg10: memref<64x256xbf16, #tpu.memory_space<vmem>>, %arg11: memref<64x256xbf16, #tpu.memory_space<vmem>>, %arg12: memref<1x256xf32, #tpu.memory_space<vmem>>, %arg13: memref<64x64xbf16, #tpu.memory_space<vmem>>, %arg14: memref<64x64xbf16, #tpu.memory_space<vmem>>, %arg15: memref<1x64xf32, #tpu.memory_space<vmem>>, %arg16: memref<64x16xbf16, #tpu.memory_space<vmem>>, %arg17: memref<1x16xf32, #tpu.memory_space<vmem>>, %arg18: memref<1x16xf32, #tpu.memory_space<vmem>>, %arg19: memref<1x1xf32, #tpu.memory_space<vmem>>, %arg20: memref<9x64xf32, #tpu.memory_space<vmem>>, %arg21: memref<64x64xf32, #tpu.memory_space<vmem>>, %arg22: memref<64x64xf32, #tpu.memory_space<vmem>>, %arg23: memref<64x256xf32, #tpu.memory_space<vmem>>, %arg24: memref<576x64xbf16, #tpu.memory_space<vmem>>) attributes {dimension_semantics = [], scalar_prefetch = 0 : i64, scratch_operands = 4 : i64, tpu.core_type = #tpu.core_type<tc>} {
    %c0 = arith.constant 0 : index
    %c0_0 = arith.constant 0 : index
    %0 = vector.load %arg0[%c0, %c0_0] : memref<64x32xf32, #tpu.memory_space<vmem>>, vector<64x32xf32>
    %1 = arith.truncf %0 : vector<64x32xf32> to vector<64x32xbf16>
    %c0_1 = arith.constant 0 : index
    %c0_2 = arith.constant 0 : index
    %2 = vector.load %arg1[%c0_1, %c0_2] : memref<32x256xbf16, #tpu.memory_space<vmem>>, vector<32x256xbf16>
    %cst = arith.constant dense<0.000000e+00> : vector<64x256xf32>
    %3 = tpu.matmul %1, %2, %cst {dimension_numbers = #tpu.dot_dimension_numbers<[1], [0], [0], [1], [0, 0, 1, 1], [], []>} : vector<64x32xbf16>, vector<32x256xbf16>, vector<64x256xf32> -> vector<64x256xf32>
    %c0_3 = arith.constant 0 : index
    %c0_4 = arith.constant 0 : index
    %4 = vector.load %arg3[%c0_3, %c0_4] : memref<1x256xf32, #tpu.memory_space<vmem>>, vector<1x256xf32>
    %5 = vector.broadcast %4 : vector<1x256xf32> to vector<64x256xf32>
    %6 = arith.addf %3, %5 : vector<64x256xf32>
    %c0_5 = arith.constant 0 : index
    %c0_6 = arith.constant 0 : index
    %7 = vector.load %arg23[%c0_5, %c0_6] : memref<64x256xf32, #tpu.memory_space<vmem>>, vector<64x256xf32>
    tpu.vector_store %arg23[%c0_5, %c0_6], %6 {strides = array<i32>} : memref<64x256xf32, #tpu.memory_space<vmem>>, vector<64x256xf32>,
    %c0_7 = arith.constant 0 : index
    %c0_8 = arith.constant 0 : index
    %8 = vector.load %arg2[%c0_7, %c0_8] : memref<64x256xbf16, #tpu.memory_space<vmem>>, vector<64x256xbf16>
    %cst_9 = arith.constant 0.000000e+00 : f32
    %9 = vector.broadcast %cst_9 : f32 to vector<8x32xf32>
    %cst_10 = arith.constant 0.000000e+00 : f32
    %10 = vector.broadcast %cst_10 : f32 to vector<8x32xf32>
    %cst_11 = arith.constant 0.000000e+00 : f32
    %11 = vector.broadcast %cst_11 : f32 to vector<8x32xf32>
    %cst_12 = arith.constant 0.000000e+00 : f32
    %12 = vector.broadcast %cst_12 : f32 to vector<8x32xf32>
    %13 = tpu.concatenate %9, %11 in 1 : vector<8x32xf32>, vector<8x32xf32> -> vector<8x64xf32>
    %14 = arith.truncf %13 : vector<8x64xf32> to vector<8x64xbf16>
    %cst_13 = arith.constant dense<0.000000e+00> : vector<8x256xf32>
    %15 = tpu.matmul %14, %8, %cst_13 {dimension_numbers = #tpu.dot_dimension_numbers<[1], [0], [0], [1], [0, 0, 1, 1], [], []>} : vector<8x64xbf16>, vector<64x256xbf16>, vector<8x256xf32> -> vector<8x256xf32>
    %c0_14 = arith.constant 0 : index
    %c0_15 = arith.constant 0 : index
    %16 = vector.load %arg23[%c0_14, %c0_15] : memref<64x256xf32, #tpu.memory_space<vmem>>, vector<8x128xf32>
    %17 = vector.extract_strided_slice %15 {offsets = [0, 0], sizes = [8, 128], strides = [1, 1]} : vector<8x256xf32> to vector<8x128xf32>
    %18 = arith.addf %16, %17 : vector<8x128xf32>
    %c56 = arith.constant 56 : index
    %c128 = arith.constant 128 : index
    %19 = vector.load %arg23[%c56, %c128] : memref<64x256xf32, #tpu.memory_space<vmem>>, vector<8x128xf32>
    %20 = vector.extract_strided_slice %15 {offsets = [0, 128], sizes = [8, 128], strides = [1, 1]} : vector<8x256xf32> to vector<8x128xf32>
    %21 = arith.addf %19, %20 : vector<8x128xf32>
    %22 = vector.extract_strided_slice %18 {offsets = [0, 0], sizes = [8, 32], strides = [1, 1]} : vector<8x128xf32> to vector<8x32xf32>
    %23 = arith.negf %22 : vector<8x32xf32>
    %24 = math.exp %23 : vector<8x32xf32>
    %cst_16 = arith.constant 1.000000e+00 : f32
    %25 = vector.broadcast %cst_16 : f32 to vector<8x32xf32>
    %26 = arith.addf %25, %24 : vector<8x32xf32>
    %27 = arith.divf %25, %26 : vector<8x32xf32>
    %28 = vector.extract_strided_slice %18 {offsets = [0, 32], sizes = [8, 32], strides = [1, 1]} : vector<8x128xf32> to vector<8x32xf32>
    %29 = arith.negf %28 : vector<8x32xf32>
    %30 = math.exp %29 : vector<8x32xf32>
    %cst_17 = arith.constant 1.000000e+00 : f32
    %31 = vector.broadcast %cst_17 : f32 to vector<8x32xf32>
    %32 = arith.addf %31, %30 : vector<8x32xf32>
    %33 = arith.divf %31, %32 : vector<8x32xf32>
    %34 = vector.extract_strided_slice %18 {offsets = [0, 64], sizes = [8, 32], strides = [1, 1]} : vector<8x128xf32> to vector<8x32xf32>
    %35 = math.tanh %34 : vector<8x32xf32>
    %36 = vector.extract_strided_slice %18 {offsets = [0, 96], sizes = [8, 32], strides = [1, 1]} : vector<8x128xf32> to vector<8x32xf32>
    %37 = arith.negf %36 : vector<8x32xf32>
    %38 = math.exp %37 : vector<8x32xf32>
    %cst_18 = arith.constant 1.000000e+00 : f32
    %39 = vector.broadcast %cst_18 : f32 to vector<8x32xf32>
    %40 = arith.addf %39, %38 : vector<8x32xf32>
    %41 = arith.divf %39, %40 : vector<8x32xf32>
    %42 = arith.mulf %33, %10 : vector<8x32xf32>
    %43 = arith.mulf %27, %35 : vector<8x32xf32>
    %44 = arith.addf %42, %43 : vector<8x32xf32>
    %45 = math.tanh %44 : vector<8x32xf32>
    %46 = arith.mulf %41, %45 : vector<8x32xf32>
    %47 = vector.extract_strided_slice %21 {offsets = [0, 0], sizes = [8, 32], strides = [1, 1]} : vector<8x128xf32> to vector<8x32xf32>
    %48 = arith.negf %47 : vector<8x32xf32>
    %49 = math.exp %48 : vector<8x32xf32>
    %cst_19 = arith.constant 1.000000e+00 : f32
    %50 = vector.broadcast %cst_19 : f32 to vector<8x32xf32>
    %51 = arith.addf %50, %49 : vector<8x32xf32>
    %52 = arith.divf %50, %51 : vector<8x32xf32>
    %53 = vector.extract_strided_slice %21 {offsets = [0, 32], sizes = [8, 32], strides = [1, 1]} : vector<8x128xf32> to vector<8x32xf32>
    %54 = arith.negf %53 : vector<8x32xf32>
    %55 = math.exp %54 : vector<8x32xf32>
    %cst_20 = arith.constant 1.000000e+00 : f32
    %56 = vector.broadcast %cst_20 : f32 to vector<8x32xf32>
    %57 = arith.addf %56, %55 : vector<8x32xf32>
    %58 = arith.divf %56, %57 : vector<8x32xf32>
    %59 = vector.extract_strided_slice %21 {offsets = [0, 64], sizes = [8, 32], strides = [1, 1]} : vector<8x128xf32> to vector<8x32xf32>
    %60 = math.tanh %59 : vector<8x32xf32>
    %61 = vector.extract_strided_slice %21 {offsets = [0, 96], sizes = [8, 32], strides = [1, 1]} : vector<8x128xf32> to vector<8x32xf32>
    %62 = arith.negf %61 : vector<8x32xf32>
    %63 = math.exp %62 : vector<8x32xf32>
    %cst_21 = arith.constant 1.000000e+00 : f32
    %64 = vector.broadcast %cst_21 : f32 to vector<8x32xf32>
    %65 = arith.addf %64, %63 : vector<8x32xf32>
    %66 = arith.divf %64, %65 : vector<8x32xf32>
    %67 = arith.mulf %58, %12 : vector<8x32xf32>
    %68 = arith.mulf %52, %60 : vector<8x32xf32>
    %69 = arith.addf %67, %68 : vector<8x32xf32>
    %70 = math.tanh %69 : vector<8x32xf32>
    %71 = arith.mulf %66, %70 : vector<8x32xf32>
    %c0_22 = arith.constant 0 : index
    %c0_23 = arith.constant 0 : index
    %72 = vector.load %arg21[%c0_22, %c0_23] : memref<64x64xf32, #tpu.memory_space<vmem>>, vector<8x32xf32>
    tpu.vector_store %arg21[%c0_22, %c0_23], %46 {strides = array<i32>} : memref<64x64xf32, #tpu.memory_space<vmem>>, vector<8x32xf32>,
    %c56_24 = arith.constant 56 : index
    %c32 = arith.constant 32 : index
    %73 = vector.load %arg21[%c56_24, %c32] : memref<64x64xf32, #tpu.memory_space<vmem>>, vector<8x32xf32>
    tpu.vector_store %arg21[%c56_24, %c32], %71 {strides = array<i32>} : memref<64x64xf32, #tpu.memory_space<vmem>>, vector<8x32xf32>,
    %74 = tpu.concatenate %46, %71 in 1 : vector<8x32xf32>, vector<8x32xf32> -> vector<8x64xf32>
    %75 = arith.truncf %74 : vector<8x64xf32> to vector<8x64xbf16>
    %cst_25 = arith.constant dense<0.000000e+00> : vector<8x256xf32>
    %76 = tpu.matmul %75, %8, %cst_25 {dimension_numbers = #tpu.dot_dimension_numbers<[1], [0], [0], [1], [0, 0, 1, 1], [], []>} : vector<8x64xbf16>, vector<64x256xbf16>, vector<8x256xf32> -> vector<8x256xf32>
    %c8 = arith.constant 8 : index
    %c0_26 = arith.constant 0 : index
    %77 = vector.load %arg23[%c8, %c0_26] : memref<64x256xf32, #tpu.memory_space<vmem>>, vector<8x128xf32>
    %78 = vector.extract_strided_slice %76 {offsets = [0, 0], sizes = [8, 128], strides = [1, 1]} : vector<8x256xf32> to vector<8x128xf32>
    %79 = arith.addf %77, %78 : vector<8x128xf32>
    %c48 = arith.constant 48 : index
    %c128_27 = arith.constant 128 : index
    %80 = vector.load %arg23[%c48, %c128_27] : memref<64x256xf32, #tpu.memory_space<vmem>>, vector<8x128xf32>
    %81 = vector.extract_strided_slice %76 {offsets = [0, 128], sizes = [8, 128], strides = [1, 1]} : vector<8x256xf32> to vector<8x128xf32>
    %82 = arith.addf %80, %81 : vector<8x128xf32>
    %83 = vector.extract_strided_slice %79 {offsets = [0, 0], sizes = [8, 32], strides = [1, 1]} : vector<8x128xf32> to vector<8x32xf32>
    %84 = arith.negf %83 : vector<8x32xf32>
    %85 = math.exp %84 : vector<8x32xf32>
    %cst_28 = arith.constant 1.000000e+00 : f32
    %86 = vector.broadcast %cst_28 : f32 to vector<8x32xf32>
    %87 = arith.addf %86, %85 : vector<8x32xf32>
    %88 = arith.divf %86, %87 : vector<8x32xf32>
    %89 = vector.extract_strided_slice %79 {offsets = [0, 32], sizes = [8, 32], strides = [1, 1]} : vector<8x128xf32> to vector<8x32xf32>
    %90 = arith.negf %89 : vector<8x32xf32>
    %91 = math.exp %90 : vector<8x32xf32>
    %cst_29 = arith.constant 1.000000e+00 : f32
    %92 = vector.broadcast %cst_29 : f32 to vector<8x32xf32>
    %93 = arith.addf %92, %91 : vector<8x32xf32>
    %94 = arith.divf %92, %93 : vector<8x32xf32>
    %95 = vector.extract_strided_slice %79 {offsets = [0, 64], sizes = [8, 32], strides = [1, 1]} : vector<8x128xf32> to vector<8x32xf32>
    %96 = math.tanh %95 : vector<8x32xf32>
    %97 = vector.extract_strided_slice %79 {offsets = [0, 96], sizes = [8, 32], strides = [1, 1]} : vector<8x128xf32> to vector<8x32xf32>
    %98 = arith.negf %97 : vector<8x32xf32>
    %99 = math.exp %98 : vector<8x32xf32>
    %cst_30 = arith.constant 1.000000e+00 : f32
    %100 = vector.broadcast %cst_30 : f32 to vector<8x32xf32>
    %101 = arith.addf %100, %99 : vector<8x32xf32>
    %102 = arith.divf %100, %101 : vector<8x32xf32>
    %103 = arith.mulf %94, %44 : vector<8x32xf32>
    %104 = arith.mulf %88, %96 : vector<8x32xf32>
    %105 = arith.addf %103, %104 : vector<8x32xf32>
    %106 = math.tanh %105 : vector<8x32xf32>
    %107 = arith.mulf %102, %106 : vector<8x32xf32>
    %108 = vector.extract_strided_slice %82 {offsets = [0, 0], sizes = [8, 32], strides = [1, 1]} : vector<8x128xf32> to vector<8x32xf32>
    %109 = arith.negf %108 : vector<8x32xf32>
    %110 = math.exp %109 : vector<8x32xf32>
    %cst_31 = arith.constant 1.000000e+00 : f32
    %111 = vector.broadcast %cst_31 : f32 to vector<8x32xf32>
    %112 = arith.addf %111, %110 : vector<8x32xf32>
    %113 = arith.divf %111, %112 : vector<8x32xf32>
    %114 = vector.extract_strided_slice %82 {offsets = [0, 32], sizes = [8, 32], strides = [1, 1]} : vector<8x128xf32> to vector<8x32xf32>
    %115 = arith.negf %114 : vector<8x32xf32>
    %116 = math.exp %115 : vector<8x32xf32>
    %cst_32 = arith.constant 1.000000e+00 : f32
    %117 = vector.broadcast %cst_32 : f32 to vector<8x32xf32>
    %118 = arith.addf %117, %116 : vector<8x32xf32>
    %119 = arith.divf %117, %118 : vector<8x32xf32>
    %120 = vector.extract_strided_slice %82 {offsets = [0, 64], sizes = [8, 32], strides = [1, 1]} : vector<8x128xf32> to vector<8x32xf32>
    %121 = math.tanh %120 : vector<8x32xf32>
    %122 = vector.extract_strided_slice %82 {offsets = [0, 96], sizes = [8, 32], strides = [1, 1]} : vector<8x128xf32> to vector<8x32xf32>
    %123 = arith.negf %122 : vector<8x32xf32>
    %124 = math.exp %123 : vector<8x32xf32>
    %cst_33 = arith.constant 1.000000e+00 : f32
    %125 = vector.broadcast %cst_33 : f32 to vector<8x32xf32>
    %126 = arith.addf %125, %124 : vector<8x32xf32>
    %127 = arith.divf %125, %126 : vector<8x32xf32>
    %128 = arith.mulf %119, %69 : vector<8x32xf32>
    %129 = arith.mulf %113, %121 : vector<8x32xf32>
    %130 = arith.addf %128, %129 : vector<8x32xf32>
    %131 = math.tanh %130 : vector<8x32xf32>
    %132 = arith.mulf %127, %131 : vector<8x32xf32>
    %c8_34 = arith.constant 8 : index
    %c0_35 = arith.constant 0 : index
    %133 = vector.load %arg21[%c8_34, %c0_35] : memref<64x64xf32, #tpu.memory_space<vmem>>, vector<8x32xf32>
    tpu.vector_store %arg21[%c8_34, %c0_35], %107 {strides = array<i32>} : memref<64x64xf32, #tpu.memory_space<vmem>>, vector<8x32xf32>,
    %c48_36 = arith.constant 48 : index
    %c32_37 = arith.constant 32 : index
    %134 = vector.load %arg21[%c48_36, %c32_37] : memref<64x64xf32, #tpu.memory_space<vmem>>, vector<8x32xf32>
    tpu.vector_store %arg21[%c48_36, %c32_37], %132 {strides = array<i32>} : memref<64x64xf32, #tpu.memory_space<vmem>>, vector<8x32xf32>,
    %135 = tpu.concatenate %107, %132 in 1 : vector<8x32xf32>, vector<8x32xf32> -> vector<8x64xf32>
    %136 = arith.truncf %135 : vector<8x64xf32> to vector<8x64xbf16>
    %cst_38 = arith.constant dense<0.000000e+00> : vector<8x256xf32>
    %137 = tpu.matmul %136, %8, %cst_38 {dimension_numbers = #tpu.dot_dimension_numbers<[1], [0], [0], [1], [0, 0, 1, 1], [], []>} : vector<8x64xbf16>, vector<64x256xbf16>, vector<8x256xf32> -> vector<8x256xf32>
    %c16 = arith.constant 16 : index
    %c0_39 = arith.constant 0 : index
    %138 = vector.load %arg23[%c16, %c0_39] : memref<64x256xf32, #tpu.memory_space<vmem>>, vector<8x128xf32>
    %139 = vector.extract_strided_slice %137 {offsets = [0, 0], sizes = [8, 128], strides = [1, 1]} : vector<8x256xf32> to vector<8x128xf32>
    %140 = arith.addf %138, %139 : vector<8x128xf32>
    %c40 = arith.constant 40 : index
    %c128_40 = arith.constant 128 : index
    %141 = vector.load %arg23[%c40, %c128_40] : memref<64x256xf32, #tpu.memory_space<vmem>>, vector<8x128xf32>
    %142 = vector.extract_strided_slice %137 {offsets = [0, 128], sizes = [8, 128], strides = [1, 1]} : vector<8x256xf32> to vector<8x128xf32>
    %143 = arith.addf %141, %142 : vector<8x128xf32>
    %144 = vector.extract_strided_slice %140 {offsets = [0, 0], sizes = [8, 32], strides = [1, 1]} : vector<8x128xf32> to vector<8x32xf32>
    %145 = arith.negf %144 : vector<8x32xf32>
    %146 = math.exp %145 : vector<8x32xf32>
    %cst_41 = arith.constant 1.000000e+00 : f32
    %147 = vector.broadcast %cst_41 : f32 to vector<8x32xf32>
    %148 = arith.addf %147, %146 : vector<8x32xf32>
    %149 = arith.divf %147, %148 : vector<8x32xf32>
    %150 = vector.extract_strided_slice %140 {offsets = [0, 32], sizes = [8, 32], strides = [1, 1]} : vector<8x128xf32> to vector<8x32xf32>
    %151 = arith.negf %150 : vector<8x32xf32>
    %152 = math.exp %151 : vector<8x32xf32>
    %cst_42 = arith.constant 1.000000e+00 : f32
    %153 = vector.broadcast %cst_42 : f32 to vector<8x32xf32>
    %154 = arith.addf %153, %152 : vector<8x32xf32>
    %155 = arith.divf %153, %154 : vector<8x32xf32>
    %156 = vector.extract_strided_slice %140 {offsets = [0, 64], sizes = [8, 32], strides = [1, 1]} : vector<8x128xf32> to vector<8x32xf32>
    %157 = math.tanh %156 : vector<8x32xf32>
    %158 = vector.extract_strided_slice %140 {offsets = [0, 96], sizes = [8, 32], strides = [1, 1]} : vector<8x128xf32> to vector<8x32xf32>
    %159 = arith.negf %158 : vector<8x32xf32>
    %160 = math.exp %159 : vector<8x32xf32>
    %cst_43 = arith.constant 1.000000e+00 : f32
    %161 = vector.broadcast %cst_43 : f32 to vector<8x32xf32>
    %162 = arith.addf %161, %160 : vector<8x32xf32>
    %163 = arith.divf %161, %162 : vector<8x32xf32>
    %164 = arith.mulf %155, %105 : vector<8x32xf32>
    %165 = arith.mulf %149, %157 : vector<8x32xf32>
    %166 = arith.addf %164, %165 : vector<8x32xf32>
    %167 = math.tanh %166 : vector<8x32xf32>
    %168 = arith.mulf %163, %167 : vector<8x32xf32>
    %169 = vector.extract_strided_slice %143 {offsets = [0, 0], sizes = [8, 32], strides = [1, 1]} : vector<8x128xf32> to vector<8x32xf32>
    %170 = arith.negf %169 : vector<8x32xf32>
    %171 = math.exp %170 : vector<8x32xf32>
    %cst_44 = arith.constant 1.000000e+00 : f32
    %172 = vector.broadcast %cst_44 : f32 to vector<8x32xf32>
    %173 = arith.addf %172, %171 : vector<8x32xf32>
    %174 = arith.divf %172, %173 : vector<8x32xf32>
    %175 = vector.extract_strided_slice %143 {offsets = [0, 32], sizes = [8, 32], strides = [1, 1]} : vector<8x128xf32> to vector<8x32xf32>
    %176 = arith.negf %175 : vector<8x32xf32>
    %177 = math.exp %176 : vector<8x32xf32>
    %cst_45 = arith.constant 1.000000e+00 : f32
    %178 = vector.broadcast %cst_45 : f32 to vector<8x32xf32>
    %179 = arith.addf %178, %177 : vector<8x32xf32>
    %180 = arith.divf %178, %179 : vector<8x32xf32>
    %181 = vector.extract_strided_slice %143 {offsets = [0, 64], sizes = [8, 32], strides = [1, 1]} : vector<8x128xf32> to vector<8x32xf32>
    %182 = math.tanh %181 : vector<8x32xf32>
    %183 = vector.extract_strided_slice %143 {offsets = [0, 96], sizes = [8, 32], strides = [1, 1]} : vector<8x128xf32> to vector<8x32xf32>
    %184 = arith.negf %183 : vector<8x32xf32>
    %185 = math.exp %184 : vector<8x32xf32>
    %cst_46 = arith.constant 1.000000e+00 : f32
    %186 = vector.broadcast %cst_46 : f32 to vector<8x32xf32>
    %187 = arith.addf %186, %185 : vector<8x32xf32>
    %188 = arith.divf %186, %187 : vector<8x32xf32>
    %189 = arith.mulf %180, %130 : vector<8x32xf32>
    %190 = arith.mulf %174, %182 : vector<8x32xf32>
    %191 = arith.addf %189, %190 : vector<8x32xf32>
    %192 = math.tanh %191 : vector<8x32xf32>
    %193 = arith.mulf %188, %192 : vector<8x32xf32>
    %c16_47 = arith.constant 16 : index
    %c0_48 = arith.constant 0 : index
    %194 = vector.load %arg21[%c16_47, %c0_48] : memref<64x64xf32, #tpu.memory_space<vmem>>, vector<8x32xf32>
    tpu.vector_store %arg21[%c16_47, %c0_48], %168 {strides = array<i32>} : memref<64x64xf32, #tpu.memory_space<vmem>>, vector<8x32xf32>,
    %c40_49 = arith.constant 40 : index
    %c32_50 = arith.constant 32 : index
    %195 = vector.load %arg21[%c40_49, %c32_50] : memref<64x64xf32, #tpu.memory_space<vmem>>, vector<8x32xf32>
    tpu.vector_store %arg21[%c40_49, %c32_50], %193 {strides = array<i32>} : memref<64x64xf32, #tpu.memory_space<vmem>>, vector<8x32xf32>,
    %196 = tpu.concatenate %168, %193 in 1 : vector<8x32xf32>, vector<8x32xf32> -> vector<8x64xf32>
    %197 = arith.truncf %196 : vector<8x64xf32> to vector<8x64xbf16>
    %cst_51 = arith.constant dense<0.000000e+00> : vector<8x256xf32>
    %198 = tpu.matmul %197, %8, %cst_51 {dimension_numbers = #tpu.dot_dimension_numbers<[1], [0], [0], [1], [0, 0, 1, 1], [], []>} : vector<8x64xbf16>, vector<64x256xbf16>, vector<8x256xf32> -> vector<8x256xf32>
    %c24 = arith.constant 24 : index
    %c0_52 = arith.constant 0 : index
    %199 = vector.load %arg23[%c24, %c0_52] : memref<64x256xf32, #tpu.memory_space<vmem>>, vector<8x128xf32>
    %200 = vector.extract_strided_slice %198 {offsets = [0, 0], sizes = [8, 128], strides = [1, 1]} : vector<8x256xf32> to vector<8x128xf32>
    %201 = arith.addf %199, %200 : vector<8x128xf32>
    %c32_53 = arith.constant 32 : index
    %c128_54 = arith.constant 128 : index
    %202 = vector.load %arg23[%c32_53, %c128_54] : memref<64x256xf32, #tpu.memory_space<vmem>>, vector<8x128xf32>
    %203 = vector.extract_strided_slice %198 {offsets = [0, 128], sizes = [8, 128], strides = [1, 1]} : vector<8x256xf32> to vector<8x128xf32>
    %204 = arith.addf %202, %203 : vector<8x128xf32>
    %205 = vector.extract_strided_slice %201 {offsets = [0, 0], sizes = [8, 32], strides = [1, 1]} : vector<8x128xf32> to vector<8x32xf32>
    %206 = arith.negf %205 : vector<8x32xf32>
    %207 = math.exp %206 : vector<8x32xf32>
    %cst_55 = arith.constant 1.000000e+00 : f32
    %208 = vector.broadcast %cst_55 : f32 to vector<8x32xf32>
    %209 = arith.addf %208, %207 : vector<8x32xf32>
    %210 = arith.divf %208, %209 : vector<8x32xf32>
    %211 = vector.extract_strided_slice %201 {offsets = [0, 32], sizes = [8, 32], strides = [1, 1]} : vector<8x128xf32> to vector<8x32xf32>
    %212 = arith.negf %211 : vector<8x32xf32>
    %213 = math.exp %212 : vector<8x32xf32>
    %cst_56 = arith.constant 1.000000e+00 : f32
    %214 = vector.broadcast %cst_56 : f32 to vector<8x32xf32>
    %215 = arith.addf %214, %213 : vector<8x32xf32>
    %216 = arith.divf %214, %215 : vector<8x32xf32>
    %217 = vector.extract_strided_slice %201 {offsets = [0, 64], sizes = [8, 32], strides = [1, 1]} : vector<8x128xf32> to vector<8x32xf32>
    %218 = math.tanh %217 : vector<8x32xf32>
    %219 = vector.extract_strided_slice %201 {offsets = [0, 96], sizes = [8, 32], strides = [1, 1]} : vector<8x128xf32> to vector<8x32xf32>
    %220 = arith.negf %219 : vector<8x32xf32>
    %221 = math.exp %220 : vector<8x32xf32>
    %cst_57 = arith.constant 1.000000e+00 : f32
    %222 = vector.broadcast %cst_57 : f32 to vector<8x32xf32>
    %223 = arith.addf %222, %221 : vector<8x32xf32>
    %224 = arith.divf %222, %223 : vector<8x32xf32>
    %225 = arith.mulf %216, %166 : vector<8x32xf32>
    %226 = arith.mulf %210, %218 : vector<8x32xf32>
    %227 = arith.addf %225, %226 : vector<8x32xf32>
    %228 = math.tanh %227 : vector<8x32xf32>
    %229 = arith.mulf %224, %228 : vector<8x32xf32>
    %230 = vector.extract_strided_slice %204 {offsets = [0, 0], sizes = [8, 32], strides = [1, 1]} : vector<8x128xf32> to vector<8x32xf32>
    %231 = arith.negf %230 : vector<8x32xf32>
    %232 = math.exp %231 : vector<8x32xf32>
    %cst_58 = arith.constant 1.000000e+00 : f32
    %233 = vector.broadcast %cst_58 : f32 to vector<8x32xf32>
    %234 = arith.addf %233, %232 : vector<8x32xf32>
    %235 = arith.divf %233, %234 : vector<8x32xf32>
    %236 = vector.extract_strided_slice %204 {offsets = [0, 32], sizes = [8, 32], strides = [1, 1]} : vector<8x128xf32> to vector<8x32xf32>
    %237 = arith.negf %236 : vector<8x32xf32>
    %238 = math.exp %237 : vector<8x32xf32>
    %cst_59 = arith.constant 1.000000e+00 : f32
    %239 = vector.broadcast %cst_59 : f32 to vector<8x32xf32>
    %240 = arith.addf %239, %238 : vector<8x32xf32>
    %241 = arith.divf %239, %240 : vector<8x32xf32>
    %242 = vector.extract_strided_slice %204 {offsets = [0, 64], sizes = [8, 32], strides = [1, 1]} : vector<8x128xf32> to vector<8x32xf32>
    %243 = math.tanh %242 : vector<8x32xf32>
    %244 = vector.extract_strided_slice %204 {offsets = [0, 96], sizes = [8, 32], strides = [1, 1]} : vector<8x128xf32> to vector<8x32xf32>
    %245 = arith.negf %244 : vector<8x32xf32>
    %246 = math.exp %245 : vector<8x32xf32>
    %cst_60 = arith.constant 1.000000e+00 : f32
    %247 = vector.broadcast %cst_60 : f32 to vector<8x32xf32>
    %248 = arith.addf %247, %246 : vector<8x32xf32>
    %249 = arith.divf %247, %248 : vector<8x32xf32>
    %250 = arith.mulf %241, %191 : vector<8x32xf32>
    %251 = arith.mulf %235, %243 : vector<8x32xf32>
    %252 = arith.addf %250, %251 : vector<8x32xf32>
    %253 = math.tanh %252 : vector<8x32xf32>
    %254 = arith.mulf %249, %253 : vector<8x32xf32>
    %c24_61 = arith.constant 24 : index
    %c0_62 = arith.constant 0 : index
    %255 = vector.load %arg21[%c24_61, %c0_62] : memref<64x64xf32, #tpu.memory_space<vmem>>, vector<8x32xf32>
    tpu.vector_store %arg21[%c24_61, %c0_62], %229 {strides = array<i32>} : memref<64x64xf32, #tpu.memory_space<vmem>>, vector<8x32xf32>,
    %c32_63 = arith.constant 32 : index
    %c32_64 = arith.constant 32 : index
    %256 = vector.load %arg21[%c32_63, %c32_64] : memref<64x64xf32, #tpu.memory_space<vmem>>, vector<8x32xf32>
    tpu.vector_store %arg21[%c32_63, %c32_64], %254 {strides = array<i32>} : memref<64x64xf32, #tpu.memory_space<vmem>>, vector<8x32xf32>,
    %257 = tpu.concatenate %229, %254 in 1 : vector<8x32xf32>, vector<8x32xf32> -> vector<8x64xf32>
    %258 = arith.truncf %257 : vector<8x64xf32> to vector<8x64xbf16>
    %cst_65 = arith.constant dense<0.000000e+00> : vector<8x256xf32>
    %259 = tpu.matmul %258, %8, %cst_65 {dimension_numbers = #tpu.dot_dimension_numbers<[1], [0], [0], [1], [0, 0, 1, 1], [], []>} : vector<8x64xbf16>, vector<64x256xbf16>, vector<8x256xf32> -> vector<8x256xf32>
    %c32_66 = arith.constant 32 : index
    %c0_67 = arith.constant 0 : index
    %260 = vector.load %arg23[%c32_66, %c0_67] : memref<64x256xf32, #tpu.memory_space<vmem>>, vector<8x128xf32>
    %261 = vector.extract_strided_slice %259 {offsets = [0, 0], sizes = [8, 128], strides = [1, 1]} : vector<8x256xf32> to vector<8x128xf32>
    %262 = arith.addf %260, %261 : vector<8x128xf32>
    %c24_68 = arith.constant 24 : index
    %c128_69 = arith.constant 128 : index
    %263 = vector.load %arg23[%c24_68, %c128_69] : memref<64x256xf32, #tpu.memory_space<vmem>>, vector<8x128xf32>
    %264 = vector.extract_strided_slice %259 {offsets = [0, 128], sizes = [8, 128], strides = [1, 1]} : vector<8x256xf32> to vector<8x128xf32>
    %265 = arith.addf %263, %264 : vector<8x128xf32>
    %266 = vector.extract_strided_slice %262 {offsets = [0, 0], sizes = [8, 32], strides = [1, 1]} : vector<8x128xf32> to vector<8x32xf32>
    %267 = arith.negf %266 : vector<8x32xf32>
    %268 = math.exp %267 : vector<8x32xf32>
    %cst_70 = arith.constant 1.000000e+00 : f32
    %269 = vector.broadcast %cst_70 : f32 to vector<8x32xf32>
    %270 = arith.addf %269, %268 : vector<8x32xf32>
    %271 = arith.divf %269, %270 : vector<8x32xf32>
    %272 = vector.extract_strided_slice %262 {offsets = [0, 32], sizes = [8, 32], strides = [1, 1]} : vector<8x128xf32> to vector<8x32xf32>
    %273 = arith.negf %272 : vector<8x32xf32>
    %274 = math.exp %273 : vector<8x32xf32>
    %cst_71 = arith.constant 1.000000e+00 : f32
    %275 = vector.broadcast %cst_71 : f32 to vector<8x32xf32>
    %276 = arith.addf %275, %274 : vector<8x32xf32>
    %277 = arith.divf %275, %276 : vector<8x32xf32>
    %278 = vector.extract_strided_slice %262 {offsets = [0, 64], sizes = [8, 32], strides = [1, 1]} : vector<8x128xf32> to vector<8x32xf32>
    %279 = math.tanh %278 : vector<8x32xf32>
    %280 = vector.extract_strided_slice %262 {offsets = [0, 96], sizes = [8, 32], strides = [1, 1]} : vector<8x128xf32> to vector<8x32xf32>
    %281 = arith.negf %280 : vector<8x32xf32>
    %282 = math.exp %281 : vector<8x32xf32>
    %cst_72 = arith.constant 1.000000e+00 : f32
    %283 = vector.broadcast %cst_72 : f32 to vector<8x32xf32>
    %284 = arith.addf %283, %282 : vector<8x32xf32>
    %285 = arith.divf %283, %284 : vector<8x32xf32>
    %286 = arith.mulf %277, %227 : vector<8x32xf32>
    %287 = arith.mulf %271, %279 : vector<8x32xf32>
    %288 = arith.addf %286, %287 : vector<8x32xf32>
    %289 = math.tanh %288 : vector<8x32xf32>
    %290 = arith.mulf %285, %289 : vector<8x32xf32>
    %291 = vector.extract_strided_slice %265 {offsets = [0, 0], sizes = [8, 32], strides = [1, 1]} : vector<8x128xf32> to vector<8x32xf32>
    %292 = arith.negf %291 : vector<8x32xf32>
    %293 = math.exp %292 : vector<8x32xf32>
    %cst_73 = arith.constant 1.000000e+00 : f32
    %294 = vector.broadcast %cst_73 : f32 to vector<8x32xf32>
    %295 = arith.addf %294, %293 : vector<8x32xf32>
    %296 = arith.divf %294, %295 : vector<8x32xf32>
    %297 = vector.extract_strided_slice %265 {offsets = [0, 32], sizes = [8, 32], strides = [1, 1]} : vector<8x128xf32> to vector<8x32xf32>
    %298 = arith.negf %297 : vector<8x32xf32>
    %299 = math.exp %298 : vector<8x32xf32>
    %cst_74 = arith.constant 1.000000e+00 : f32
    %300 = vector.broadcast %cst_74 : f32 to vector<8x32xf32>
    %301 = arith.addf %300, %299 : vector<8x32xf32>
    %302 = arith.divf %300, %301 : vector<8x32xf32>
    %303 = vector.extract_strided_slice %265 {offsets = [0, 64], sizes = [8, 32], strides = [1, 1]} : vector<8x128xf32> to vector<8x32xf32>
    %304 = math.tanh %303 : vector<8x32xf32>
    %305 = vector.extract_strided_slice %265 {offsets = [0, 96], sizes = [8, 32], strides = [1, 1]} : vector<8x128xf32> to vector<8x32xf32>
    %306 = arith.negf %305 : vector<8x32xf32>
    %307 = math.exp %306 : vector<8x32xf32>
    %cst_75 = arith.constant 1.000000e+00 : f32
    %308 = vector.broadcast %cst_75 : f32 to vector<8x32xf32>
    %309 = arith.addf %308, %307 : vector<8x32xf32>
    %310 = arith.divf %308, %309 : vector<8x32xf32>
    %311 = arith.mulf %302, %252 : vector<8x32xf32>
    %312 = arith.mulf %296, %304 : vector<8x32xf32>
    %313 = arith.addf %311, %312 : vector<8x32xf32>
    %314 = math.tanh %313 : vector<8x32xf32>
    %315 = arith.mulf %310, %314 : vector<8x32xf32>
    %c32_76 = arith.constant 32 : index
    %c0_77 = arith.constant 0 : index
    %316 = vector.load %arg21[%c32_76, %c0_77] : memref<64x64xf32, #tpu.memory_space<vmem>>, vector<8x32xf32>
    tpu.vector_store %arg21[%c32_76, %c0_77], %290 {strides = array<i32>} : memref<64x64xf32, #tpu.memory_space<vmem>>, vector<8x32xf32>,
    %c24_78 = arith.constant 24 : index
    %c32_79 = arith.constant 32 : index
    %317 = vector.load %arg21[%c24_78, %c32_79] : memref<64x64xf32, #tpu.memory_space<vmem>>, vector<8x32xf32>
    tpu.vector_store %arg21[%c24_78, %c32_79], %315 {strides = array<i32>} : memref<64x64xf32, #tpu.memory_space<vmem>>, vector<8x32xf32>,
    %318 = tpu.concatenate %290, %315 in 1 : vector<8x32xf32>, vector<8x32xf32> -> vector<8x64xf32>
    %319 = arith.truncf %318 : vector<8x64xf32> to vector<8x64xbf16>
    %cst_80 = arith.constant dense<0.000000e+00> : vector<8x256xf32>
    %320 = tpu.matmul %319, %8, %cst_80 {dimension_numbers = #tpu.dot_dimension_numbers<[1], [0], [0], [1], [0, 0, 1, 1], [], []>} : vector<8x64xbf16>, vector<64x256xbf16>, vector<8x256xf32> -> vector<8x256xf32>
    %c40_81 = arith.constant 40 : index
    %c0_82 = arith.constant 0 : index
    %321 = vector.load %arg23[%c40_81, %c0_82] : memref<64x256xf32, #tpu.memory_space<vmem>>, vector<8x128xf32>
    %322 = vector.extract_strided_slice %320 {offsets = [0, 0], sizes = [8, 128], strides = [1, 1]} : vector<8x256xf32> to vector<8x128xf32>
    %323 = arith.addf %321, %322 : vector<8x128xf32>
    %c16_83 = arith.constant 16 : index
    %c128_84 = arith.constant 128 : index
    %324 = vector.load %arg23[%c16_83, %c128_84] : memref<64x256xf32, #tpu.memory_space<vmem>>, vector<8x128xf32>
    %325 = vector.extract_strided_slice %320 {offsets = [0, 128], sizes = [8, 128], strides = [1, 1]} : vector<8x256xf32> to vector<8x128xf32>
    %326 = arith.addf %324, %325 : vector<8x128xf32>
    %327 = vector.extract_strided_slice %323 {offsets = [0, 0], sizes = [8, 32], strides = [1, 1]} : vector<8x128xf32> to vector<8x32xf32>
    %328 = arith.negf %327 : vector<8x32xf32>
    %329 = math.exp %328 : vector<8x32xf32>
    %cst_85 = arith.constant 1.000000e+00 : f32
    %330 = vector.broadcast %cst_85 : f32 to vector<8x32xf32>
    %331 = arith.addf %330, %329 : vector<8x32xf32>
    %332 = arith.divf %330, %331 : vector<8x32xf32>
    %333 = vector.extract_strided_slice %323 {offsets = [0, 32], sizes = [8, 32], strides = [1, 1]} : vector<8x128xf32> to vector<8x32xf32>
    %334 = arith.negf %333 : vector<8x32xf32>
    %335 = math.exp %334 : vector<8x32xf32>
    %cst_86 = arith.constant 1.000000e+00 : f32
    %336 = vector.broadcast %cst_86 : f32 to vector<8x32xf32>
    %337 = arith.addf %336, %335 : vector<8x32xf32>
    %338 = arith.divf %336, %337 : vector<8x32xf32>
    %339 = vector.extract_strided_slice %323 {offsets = [0, 64], sizes = [8, 32], strides = [1, 1]} : vector<8x128xf32> to vector<8x32xf32>
    %340 = math.tanh %339 : vector<8x32xf32>
    %341 = vector.extract_strided_slice %323 {offsets = [0, 96], sizes = [8, 32], strides = [1, 1]} : vector<8x128xf32> to vector<8x32xf32>
    %342 = arith.negf %341 : vector<8x32xf32>
    %343 = math.exp %342 : vector<8x32xf32>
    %cst_87 = arith.constant 1.000000e+00 : f32
    %344 = vector.broadcast %cst_87 : f32 to vector<8x32xf32>
    %345 = arith.addf %344, %343 : vector<8x32xf32>
    %346 = arith.divf %344, %345 : vector<8x32xf32>
    %347 = arith.mulf %338, %288 : vector<8x32xf32>
    %348 = arith.mulf %332, %340 : vector<8x32xf32>
    %349 = arith.addf %347, %348 : vector<8x32xf32>
    %350 = math.tanh %349 : vector<8x32xf32>
    %351 = arith.mulf %346, %350 : vector<8x32xf32>
    %352 = vector.extract_strided_slice %326 {offsets = [0, 0], sizes = [8, 32], strides = [1, 1]} : vector<8x128xf32> to vector<8x32xf32>
    %353 = arith.negf %352 : vector<8x32xf32>
    %354 = math.exp %353 : vector<8x32xf32>
    %cst_88 = arith.constant 1.000000e+00 : f32
    %355 = vector.broadcast %cst_88 : f32 to vector<8x32xf32>
    %356 = arith.addf %355, %354 : vector<8x32xf32>
    %357 = arith.divf %355, %356 : vector<8x32xf32>
    %358 = vector.extract_strided_slice %326 {offsets = [0, 32], sizes = [8, 32], strides = [1, 1]} : vector<8x128xf32> to vector<8x32xf32>
    %359 = arith.negf %358 : vector<8x32xf32>
    %360 = math.exp %359 : vector<8x32xf32>
    %cst_89 = arith.constant 1.000000e+00 : f32
    %361 = vector.broadcast %cst_89 : f32 to vector<8x32xf32>
    %362 = arith.addf %361, %360 : vector<8x32xf32>
    %363 = arith.divf %361, %362 : vector<8x32xf32>
    %364 = vector.extract_strided_slice %326 {offsets = [0, 64], sizes = [8, 32], strides = [1, 1]} : vector<8x128xf32> to vector<8x32xf32>
    %365 = math.tanh %364 : vector<8x32xf32>
    %366 = vector.extract_strided_slice %326 {offsets = [0, 96], sizes = [8, 32], strides = [1, 1]} : vector<8x128xf32> to vector<8x32xf32>
    %367 = arith.negf %366 : vector<8x32xf32>
    %368 = math.exp %367 : vector<8x32xf32>
    %cst_90 = arith.constant 1.000000e+00 : f32
    %369 = vector.broadcast %cst_90 : f32 to vector<8x32xf32>
    %370 = arith.addf %369, %368 : vector<8x32xf32>
    %371 = arith.divf %369, %370 : vector<8x32xf32>
    %372 = arith.mulf %363, %313 : vector<8x32xf32>
    %373 = arith.mulf %357, %365 : vector<8x32xf32>
    %374 = arith.addf %372, %373 : vector<8x32xf32>
    %375 = math.tanh %374 : vector<8x32xf32>
    %376 = arith.mulf %371, %375 : vector<8x32xf32>
    %c40_91 = arith.constant 40 : index
    %c0_92 = arith.constant 0 : index
    %377 = vector.load %arg21[%c40_91, %c0_92] : memref<64x64xf32, #tpu.memory_space<vmem>>, vector<8x32xf32>
    tpu.vector_store %arg21[%c40_91, %c0_92], %351 {strides = array<i32>} : memref<64x64xf32, #tpu.memory_space<vmem>>, vector<8x32xf32>,
    %c16_93 = arith.constant 16 : index
    %c32_94 = arith.constant 32 : index
    %378 = vector.load %arg21[%c16_93, %c32_94] : memref<64x64xf32, #tpu.memory_space<vmem>>, vector<8x32xf32>
    tpu.vector_store %arg21[%c16_93, %c32_94], %376 {strides = array<i32>} : memref<64x64xf32, #tpu.memory_space<vmem>>, vector<8x32xf32>,
    %379 = tpu.concatenate %351, %376 in 1 : vector<8x32xf32>, vector<8x32xf32> -> vector<8x64xf32>
    %380 = arith.truncf %379 : vector<8x64xf32> to vector<8x64xbf16>
    %cst_95 = arith.constant dense<0.000000e+00> : vector<8x256xf32>
    %381 = tpu.matmul %380, %8, %cst_95 {dimension_numbers = #tpu.dot_dimension_numbers<[1], [0], [0], [1], [0, 0, 1, 1], [], []>} : vector<8x64xbf16>, vector<64x256xbf16>, vector<8x256xf32> -> vector<8x256xf32>
    %c48_96 = arith.constant 48 : index
    %c0_97 = arith.constant 0 : index
    %382 = vector.load %arg23[%c48_96, %c0_97] : memref<64x256xf32, #tpu.memory_space<vmem>>, vector<8x128xf32>
    %383 = vector.extract_strided_slice %381 {offsets = [0, 0], sizes = [8, 128], strides = [1, 1]} : vector<8x256xf32> to vector<8x128xf32>
    %384 = arith.addf %382, %383 : vector<8x128xf32>
    %c8_98 = arith.constant 8 : index
    %c128_99 = arith.constant 128 : index
    %385 = vector.load %arg23[%c8_98, %c128_99] : memref<64x256xf32, #tpu.memory_space<vmem>>, vector<8x128xf32>
    %386 = vector.extract_strided_slice %381 {offsets = [0, 128], sizes = [8, 128], strides = [1, 1]} : vector<8x256xf32> to vector<8x128xf32>
    %387 = arith.addf %385, %386 : vector<8x128xf32>
    %388 = vector.extract_strided_slice %384 {offsets = [0, 0], sizes = [8, 32], strides = [1, 1]} : vector<8x128xf32> to vector<8x32xf32>
    %389 = arith.negf %388 : vector<8x32xf32>
    %390 = math.exp %389 : vector<8x32xf32>
    %cst_100 = arith.constant 1.000000e+00 : f32
    %391 = vector.broadcast %cst_100 : f32 to vector<8x32xf32>
    %392 = arith.addf %391, %390 : vector<8x32xf32>
    %393 = arith.divf %391, %392 : vector<8x32xf32>
    %394 = vector.extract_strided_slice %384 {offsets = [0, 32], sizes = [8, 32], strides = [1, 1]} : vector<8x128xf32> to vector<8x32xf32>
    %395 = arith.negf %394 : vector<8x32xf32>
    %396 = math.exp %395 : vector<8x32xf32>
    %cst_101 = arith.constant 1.000000e+00 : f32
    %397 = vector.broadcast %cst_101 : f32 to vector<8x32xf32>
    %398 = arith.addf %397, %396 : vector<8x32xf32>
    %399 = arith.divf %397, %398 : vector<8x32xf32>
    %400 = vector.extract_strided_slice %384 {offsets = [0, 64], sizes = [8, 32], strides = [1, 1]} : vector<8x128xf32> to vector<8x32xf32>
    %401 = math.tanh %400 : vector<8x32xf32>
    %402 = vector.extract_strided_slice %384 {offsets = [0, 96], sizes = [8, 32], strides = [1, 1]} : vector<8x128xf32> to vector<8x32xf32>
    %403 = arith.negf %402 : vector<8x32xf32>
    %404 = math.exp %403 : vector<8x32xf32>
    %cst_102 = arith.constant 1.000000e+00 : f32
    %405 = vector.broadcast %cst_102 : f32 to vector<8x32xf32>
    %406 = arith.addf %405, %404 : vector<8x32xf32>
    %407 = arith.divf %405, %406 : vector<8x32xf32>
    %408 = arith.mulf %399, %349 : vector<8x32xf32>
    %409 = arith.mulf %393, %401 : vector<8x32xf32>
    %410 = arith.addf %408, %409 : vector<8x32xf32>
    %411 = math.tanh %410 : vector<8x32xf32>
    %412 = arith.mulf %407, %411 : vector<8x32xf32>
    %413 = vector.extract_strided_slice %387 {offsets = [0, 0], sizes = [8, 32], strides = [1, 1]} : vector<8x128xf32> to vector<8x32xf32>
    %414 = arith.negf %413 : vector<8x32xf32>
    %415 = math.exp %414 : vector<8x32xf32>
    %cst_103 = arith.constant 1.000000e+00 : f32
    %416 = vector.broadcast %cst_103 : f32 to vector<8x32xf32>
    %417 = arith.addf %416, %415 : vector<8x32xf32>
    %418 = arith.divf %416, %417 : vector<8x32xf32>
    %419 = vector.extract_strided_slice %387 {offsets = [0, 32], sizes = [8, 32], strides = [1, 1]} : vector<8x128xf32> to vector<8x32xf32>
    %420 = arith.negf %419 : vector<8x32xf32>
    %421 = math.exp %420 : vector<8x32xf32>
    %cst_104 = arith.constant 1.000000e+00 : f32
    %422 = vector.broadcast %cst_104 : f32 to vector<8x32xf32>
    %423 = arith.addf %422, %421 : vector<8x32xf32>
    %424 = arith.divf %422, %423 : vector<8x32xf32>
    %425 = vector.extract_strided_slice %387 {offsets = [0, 64], sizes = [8, 32], strides = [1, 1]} : vector<8x128xf32> to vector<8x32xf32>
    %426 = math.tanh %425 : vector<8x32xf32>
    %427 = vector.extract_strided_slice %387 {offsets = [0, 96], sizes = [8, 32], strides = [1, 1]} : vector<8x128xf32> to vector<8x32xf32>
    %428 = arith.negf %427 : vector<8x32xf32>
    %429 = math.exp %428 : vector<8x32xf32>
    %cst_105 = arith.constant 1.000000e+00 : f32
    %430 = vector.broadcast %cst_105 : f32 to vector<8x32xf32>
    %431 = arith.addf %430, %429 : vector<8x32xf32>
    %432 = arith.divf %430, %431 : vector<8x32xf32>
    %433 = arith.mulf %424, %374 : vector<8x32xf32>
    %434 = arith.mulf %418, %426 : vector<8x32xf32>
    %435 = arith.addf %433, %434 : vector<8x32xf32>
    %436 = math.tanh %435 : vector<8x32xf32>
    %437 = arith.mulf %432, %436 : vector<8x32xf32>
    %c48_106 = arith.constant 48 : index
    %c0_107 = arith.constant 0 : index
    %438 = vector.load %arg21[%c48_106, %c0_107] : memref<64x64xf32, #tpu.memory_space<vmem>>, vector<8x32xf32>
    tpu.vector_store %arg21[%c48_106, %c0_107], %412 {strides = array<i32>} : memref<64x64xf32, #tpu.memory_space<vmem>>, vector<8x32xf32>,
    %c8_108 = arith.constant 8 : index
    %c32_109 = arith.constant 32 : index
    %439 = vector.load %arg21[%c8_108, %c32_109] : memref<64x64xf32, #tpu.memory_space<vmem>>, vector<8x32xf32>
    tpu.vector_store %arg21[%c8_108, %c32_109], %437 {strides = array<i32>} : memref<64x64xf32, #tpu.memory_space<vmem>>, vector<8x32xf32>,
    %440 = tpu.concatenate %412, %437 in 1 : vector<8x32xf32>, vector<8x32xf32> -> vector<8x64xf32>
    %441 = arith.truncf %440 : vector<8x64xf32> to vector<8x64xbf16>
    %cst_110 = arith.constant dense<0.000000e+00> : vector<8x256xf32>
    %442 = tpu.matmul %441, %8, %cst_110 {dimension_numbers = #tpu.dot_dimension_numbers<[1], [0], [0], [1], [0, 0, 1, 1], [], []>} : vector<8x64xbf16>, vector<64x256xbf16>, vector<8x256xf32> -> vector<8x256xf32>
    %c56_111 = arith.constant 56 : index
    %c0_112 = arith.constant 0 : index
    %443 = vector.load %arg23[%c56_111, %c0_112] : memref<64x256xf32, #tpu.memory_space<vmem>>, vector<8x128xf32>
    %444 = vector.extract_strided_slice %442 {offsets = [0, 0], sizes = [8, 128], strides = [1, 1]} : vector<8x256xf32> to vector<8x128xf32>
    %445 = arith.addf %443, %444 : vector<8x128xf32>
    %c0_113 = arith.constant 0 : index
    %c128_114 = arith.constant 128 : index
    %446 = vector.load %arg23[%c0_113, %c128_114] : memref<64x256xf32, #tpu.memory_space<vmem>>, vector<8x128xf32>
    %447 = vector.extract_strided_slice %442 {offsets = [0, 128], sizes = [8, 128], strides = [1, 1]} : vector<8x256xf32> to vector<8x128xf32>
    %448 = arith.addf %446, %447 : vector<8x128xf32>
    %449 = vector.extract_strided_slice %445 {offsets = [0, 0], sizes = [8, 32], strides = [1, 1]} : vector<8x128xf32> to vector<8x32xf32>
    %450 = arith.negf %449 : vector<8x32xf32>
    %451 = math.exp %450 : vector<8x32xf32>
    %cst_115 = arith.constant 1.000000e+00 : f32
    %452 = vector.broadcast %cst_115 : f32 to vector<8x32xf32>
    %453 = arith.addf %452, %451 : vector<8x32xf32>
    %454 = arith.divf %452, %453 : vector<8x32xf32>
    %455 = vector.extract_strided_slice %445 {offsets = [0, 32], sizes = [8, 32], strides = [1, 1]} : vector<8x128xf32> to vector<8x32xf32>
    %456 = arith.negf %455 : vector<8x32xf32>
    %457 = math.exp %456 : vector<8x32xf32>
    %cst_116 = arith.constant 1.000000e+00 : f32
    %458 = vector.broadcast %cst_116 : f32 to vector<8x32xf32>
    %459 = arith.addf %458, %457 : vector<8x32xf32>
    %460 = arith.divf %458, %459 : vector<8x32xf32>
    %461 = vector.extract_strided_slice %445 {offsets = [0, 64], sizes = [8, 32], strides = [1, 1]} : vector<8x128xf32> to vector<8x32xf32>
    %462 = math.tanh %461 : vector<8x32xf32>
    %463 = vector.extract_strided_slice %445 {offsets = [0, 96], sizes = [8, 32], strides = [1, 1]} : vector<8x128xf32> to vector<8x32xf32>
    %464 = arith.negf %463 : vector<8x32xf32>
    %465 = math.exp %464 : vector<8x32xf32>
    %cst_117 = arith.constant 1.000000e+00 : f32
    %466 = vector.broadcast %cst_117 : f32 to vector<8x32xf32>
    %467 = arith.addf %466, %465 : vector<8x32xf32>
    %468 = arith.divf %466, %467 : vector<8x32xf32>
    %469 = arith.mulf %460, %410 : vector<8x32xf32>
    %470 = arith.mulf %454, %462 : vector<8x32xf32>
    %471 = arith.addf %469, %470 : vector<8x32xf32>
    %472 = math.tanh %471 : vector<8x32xf32>
    %473 = arith.mulf %468, %472 : vector<8x32xf32>
    %474 = vector.extract_strided_slice %448 {offsets = [0, 0], sizes = [8, 32], strides = [1, 1]} : vector<8x128xf32> to vector<8x32xf32>
    %475 = arith.negf %474 : vector<8x32xf32>
    %476 = math.exp %475 : vector<8x32xf32>
    %cst_118 = arith.constant 1.000000e+00 : f32
    %477 = vector.broadcast %cst_118 : f32 to vector<8x32xf32>
    %478 = arith.addf %477, %476 : vector<8x32xf32>
    %479 = arith.divf %477, %478 : vector<8x32xf32>
    %480 = vector.extract_strided_slice %448 {offsets = [0, 32], sizes = [8, 32], strides = [1, 1]} : vector<8x128xf32> to vector<8x32xf32>
    %481 = arith.negf %480 : vector<8x32xf32>
    %482 = math.exp %481 : vector<8x32xf32>
    %cst_119 = arith.constant 1.000000e+00 : f32
    %483 = vector.broadcast %cst_119 : f32 to vector<8x32xf32>
    %484 = arith.addf %483, %482 : vector<8x32xf32>
    %485 = arith.divf %483, %484 : vector<8x32xf32>
    %486 = vector.extract_strided_slice %448 {offsets = [0, 64], sizes = [8, 32], strides = [1, 1]} : vector<8x128xf32> to vector<8x32xf32>
    %487 = math.tanh %486 : vector<8x32xf32>
    %488 = vector.extract_strided_slice %448 {offsets = [0, 96], sizes = [8, 32], strides = [1, 1]} : vector<8x128xf32> to vector<8x32xf32>
    %489 = arith.negf %488 : vector<8x32xf32>
    %490 = math.exp %489 : vector<8x32xf32>
    %cst_120 = arith.constant 1.000000e+00 : f32
    %491 = vector.broadcast %cst_120 : f32 to vector<8x32xf32>
    %492 = arith.addf %491, %490 : vector<8x32xf32>
    %493 = arith.divf %491, %492 : vector<8x32xf32>
    %494 = arith.mulf %485, %435 : vector<8x32xf32>
    %495 = arith.mulf %479, %487 : vector<8x32xf32>
    %496 = arith.addf %494, %495 : vector<8x32xf32>
    %497 = math.tanh %496 : vector<8x32xf32>
    %498 = arith.mulf %493, %497 : vector<8x32xf32>
    %c56_121 = arith.constant 56 : index
    %c0_122 = arith.constant 0 : index
    %499 = vector.load %arg21[%c56_121, %c0_122] : memref<64x64xf32, #tpu.memory_space<vmem>>, vector<8x32xf32>
    tpu.vector_store %arg21[%c56_121, %c0_122], %473 {strides = array<i32>} : memref<64x64xf32, #tpu.memory_space<vmem>>, vector<8x32xf32>,
    %c0_123 = arith.constant 0 : index
    %c32_124 = arith.constant 32 : index
    %500 = vector.load %arg21[%c0_123, %c32_124] : memref<64x64xf32, #tpu.memory_space<vmem>>, vector<8x32xf32>
    tpu.vector_store %arg21[%c0_123, %c32_124], %498 {strides = array<i32>} : memref<64x64xf32, #tpu.memory_space<vmem>>, vector<8x32xf32>,
    %c0_125 = arith.constant 0 : index
    %c0_126 = arith.constant 0 : index
    %501 = vector.load %arg21[%c0_125, %c0_126] : memref<64x64xf32, #tpu.memory_space<vmem>>, vector<64x64xf32>
    %502 = arith.truncf %501 : vector<64x64xf32> to vector<64x64xbf16>
    %c0_127 = arith.constant 0 : index
    %c0_128 = arith.constant 0 : index
    %503 = vector.load %arg4[%c0_127, %c0_128] : memref<64x256xbf16, #tpu.memory_space<vmem>>, vector<64x256xbf16>
    %cst_129 = arith.constant dense<0.000000e+00> : vector<64x256xf32>
    %504 = tpu.matmul %502, %503, %cst_129 {dimension_numbers = #tpu.dot_dimension_numbers<[1], [0], [0], [1], [0, 0, 1, 1], [], []>} : vector<64x64xbf16>, vector<64x256xbf16>, vector<64x256xf32> -> vector<64x256xf32>
    %c0_130 = arith.constant 0 : index
    %c0_131 = arith.constant 0 : index
    %505 = vector.load %arg6[%c0_130, %c0_131] : memref<1x256xf32, #tpu.memory_space<vmem>>, vector<1x256xf32>
    %506 = vector.broadcast %505 : vector<1x256xf32> to vector<64x256xf32>
    %507 = arith.addf %504, %506 : vector<64x256xf32>
    %c0_132 = arith.constant 0 : index
    %c0_133 = arith.constant 0 : index
    %508 = vector.load %arg23[%c0_132, %c0_133] : memref<64x256xf32, #tpu.memory_space<vmem>>, vector<64x256xf32>
    tpu.vector_store %arg23[%c0_132, %c0_133], %507 {strides = array<i32>} : memref<64x256xf32, #tpu.memory_space<vmem>>, vector<64x256xf32>,
    %c0_134 = arith.constant 0 : index
    %c0_135 = arith.constant 0 : index
    %509 = vector.load %arg5[%c0_134, %c0_135] : memref<64x256xbf16, #tpu.memory_space<vmem>>, vector<64x256xbf16>
    %cst_136 = arith.constant 0.000000e+00 : f32
    %510 = vector.broadcast %cst_136 : f32 to vector<8x32xf32>
    %cst_137 = arith.constant 0.000000e+00 : f32
    %511 = vector.broadcast %cst_137 : f32 to vector<8x32xf32>
    %cst_138 = arith.constant 0.000000e+00 : f32
    %512 = vector.broadcast %cst_138 : f32 to vector<8x32xf32>
    %cst_139 = arith.constant 0.000000e+00 : f32
    %513 = vector.broadcast %cst_139 : f32 to vector<8x32xf32>
    %514 = tpu.concatenate %510, %512 in 1 : vector<8x32xf32>, vector<8x32xf32> -> vector<8x64xf32>
    %515 = arith.truncf %514 : vector<8x64xf32> to vector<8x64xbf16>
    %cst_140 = arith.constant dense<0.000000e+00> : vector<8x256xf32>
    %516 = tpu.matmul %515, %509, %cst_140 {dimension_numbers = #tpu.dot_dimension_numbers<[1], [0], [0], [1], [0, 0, 1, 1], [], []>} : vector<8x64xbf16>, vector<64x256xbf16>, vector<8x256xf32> -> vector<8x256xf32>
    %c0_141 = arith.constant 0 : index
    %c0_142 = arith.constant 0 : index
    %517 = vector.load %arg23[%c0_141, %c0_142] : memref<64x256xf32, #tpu.memory_space<vmem>>, vector<8x128xf32>
    %518 = vector.extract_strided_slice %516 {offsets = [0, 0], sizes = [8, 128], strides = [1, 1]} : vector<8x256xf32> to vector<8x128xf32>
    %519 = arith.addf %517, %518 : vector<8x128xf32>
    %c56_143 = arith.constant 56 : index
    %c128_144 = arith.constant 128 : index
    %520 = vector.load %arg23[%c56_143, %c128_144] : memref<64x256xf32, #tpu.memory_space<vmem>>, vector<8x128xf32>
    %521 = vector.extract_strided_slice %516 {offsets = [0, 128], sizes = [8, 128], strides = [1, 1]} : vector<8x256xf32> to vector<8x128xf32>
    %522 = arith.addf %520, %521 : vector<8x128xf32>
    %523 = vector.extract_strided_slice %519 {offsets = [0, 0], sizes = [8, 32], strides = [1, 1]} : vector<8x128xf32> to vector<8x32xf32>
    %524 = arith.negf %523 : vector<8x32xf32>
    %525 = math.exp %524 : vector<8x32xf32>
    %cst_145 = arith.constant 1.000000e+00 : f32
    %526 = vector.broadcast %cst_145 : f32 to vector<8x32xf32>
    %527 = arith.addf %526, %525 : vector<8x32xf32>
    %528 = arith.divf %526, %527 : vector<8x32xf32>
    %529 = vector.extract_strided_slice %519 {offsets = [0, 32], sizes = [8, 32], strides = [1, 1]} : vector<8x128xf32> to vector<8x32xf32>
    %530 = arith.negf %529 : vector<8x32xf32>
    %531 = math.exp %530 : vector<8x32xf32>
    %cst_146 = arith.constant 1.000000e+00 : f32
    %532 = vector.broadcast %cst_146 : f32 to vector<8x32xf32>
    %533 = arith.addf %532, %531 : vector<8x32xf32>
    %534 = arith.divf %532, %533 : vector<8x32xf32>
    %535 = vector.extract_strided_slice %519 {offsets = [0, 64], sizes = [8, 32], strides = [1, 1]} : vector<8x128xf32> to vector<8x32xf32>
    %536 = math.tanh %535 : vector<8x32xf32>
    %537 = vector.extract_strided_slice %519 {offsets = [0, 96], sizes = [8, 32], strides = [1, 1]} : vector<8x128xf32> to vector<8x32xf32>
    %538 = arith.negf %537 : vector<8x32xf32>
    %539 = math.exp %538 : vector<8x32xf32>
    %cst_147 = arith.constant 1.000000e+00 : f32
    %540 = vector.broadcast %cst_147 : f32 to vector<8x32xf32>
    %541 = arith.addf %540, %539 : vector<8x32xf32>
    %542 = arith.divf %540, %541 : vector<8x32xf32>
    %543 = arith.mulf %534, %511 : vector<8x32xf32>
    %544 = arith.mulf %528, %536 : vector<8x32xf32>
    %545 = arith.addf %543, %544 : vector<8x32xf32>
    %546 = math.tanh %545 : vector<8x32xf32>
    %547 = arith.mulf %542, %546 : vector<8x32xf32>
    %548 = vector.extract_strided_slice %522 {offsets = [0, 0], sizes = [8, 32], strides = [1, 1]} : vector<8x128xf32> to vector<8x32xf32>
    %549 = arith.negf %548 : vector<8x32xf32>
    %550 = math.exp %549 : vector<8x32xf32>
    %cst_148 = arith.constant 1.000000e+00 : f32
    %551 = vector.broadcast %cst_148 : f32 to vector<8x32xf32>
    %552 = arith.addf %551, %550 : vector<8x32xf32>
    %553 = arith.divf %551, %552 : vector<8x32xf32>
    %554 = vector.extract_strided_slice %522 {offsets = [0, 32], sizes = [8, 32], strides = [1, 1]} : vector<8x128xf32> to vector<8x32xf32>
    %555 = arith.negf %554 : vector<8x32xf32>
    %556 = math.exp %555 : vector<8x32xf32>
    %cst_149 = arith.constant 1.000000e+00 : f32
    %557 = vector.broadcast %cst_149 : f32 to vector<8x32xf32>
    %558 = arith.addf %557, %556 : vector<8x32xf32>
    %559 = arith.divf %557, %558 : vector<8x32xf32>
    %560 = vector.extract_strided_slice %522 {offsets = [0, 64], sizes = [8, 32], strides = [1, 1]} : vector<8x128xf32> to vector<8x32xf32>
    %561 = math.tanh %560 : vector<8x32xf32>
    %562 = vector.extract_strided_slice %522 {offsets = [0, 96], sizes = [8, 32], strides = [1, 1]} : vector<8x128xf32> to vector<8x32xf32>
    %563 = arith.negf %562 : vector<8x32xf32>
    %564 = math.exp %563 : vector<8x32xf32>
    %cst_150 = arith.constant 1.000000e+00 : f32
    %565 = vector.broadcast %cst_150 : f32 to vector<8x32xf32>
    %566 = arith.addf %565, %564 : vector<8x32xf32>
    %567 = arith.divf %565, %566 : vector<8x32xf32>
    %568 = arith.mulf %559, %513 : vector<8x32xf32>
    %569 = arith.mulf %553, %561 : vector<8x32xf32>
    %570 = arith.addf %568, %569 : vector<8x32xf32>
    %571 = math.tanh %570 : vector<8x32xf32>
    %572 = arith.mulf %567, %571 : vector<8x32xf32>
    %c0_151 = arith.constant 0 : index
    %c0_152 = arith.constant 0 : index
    %573 = vector.load %arg22[%c0_151, %c0_152] : memref<64x64xf32, #tpu.memory_space<vmem>>, vector<8x32xf32>
    tpu.vector_store %arg22[%c0_151, %c0_152], %547 {strides = array<i32>} : memref<64x64xf32, #tpu.memory_space<vmem>>, vector<8x32xf32>,
    %c56_153 = arith.constant 56 : index
    %c32_154 = arith.constant 32 : index
    %574 = vector.load %arg22[%c56_153, %c32_154] : memref<64x64xf32, #tpu.memory_space<vmem>>, vector<8x32xf32>
    tpu.vector_store %arg22[%c56_153, %c32_154], %572 {strides = array<i32>} : memref<64x64xf32, #tpu.memory_space<vmem>>, vector<8x32xf32>,
    %575 = tpu.concatenate %547, %572 in 1 : vector<8x32xf32>, vector<8x32xf32> -> vector<8x64xf32>
    %576 = arith.truncf %575 : vector<8x64xf32> to vector<8x64xbf16>
    %cst_155 = arith.constant dense<0.000000e+00> : vector<8x256xf32>
    %577 = tpu.matmul %576, %509, %cst_155 {dimension_numbers = #tpu.dot_dimension_numbers<[1], [0], [0], [1], [0, 0, 1, 1], [], []>} : vector<8x64xbf16>, vector<64x256xbf16>, vector<8x256xf32> -> vector<8x256xf32>
    %c8_156 = arith.constant 8 : index
    %c0_157 = arith.constant 0 : index
    %578 = vector.load %arg23[%c8_156, %c0_157] : memref<64x256xf32, #tpu.memory_space<vmem>>, vector<8x128xf32>
    %579 = vector.extract_strided_slice %577 {offsets = [0, 0], sizes = [8, 128], strides = [1, 1]} : vector<8x256xf32> to vector<8x128xf32>
    %580 = arith.addf %578, %579 : vector<8x128xf32>
    %c48_158 = arith.constant 48 : index
    %c128_159 = arith.constant 128 : index
    %581 = vector.load %arg23[%c48_158, %c128_159] : memref<64x256xf32, #tpu.memory_space<vmem>>, vector<8x128xf32>
    %582 = vector.extract_strided_slice %577 {offsets = [0, 128], sizes = [8, 128], strides = [1, 1]} : vector<8x256xf32> to vector<8x128xf32>
    %583 = arith.addf %581, %582 : vector<8x128xf32>
    %584 = vector.extract_strided_slice %580 {offsets = [0, 0], sizes = [8, 32], strides = [1, 1]} : vector<8x128xf32> to vector<8x32xf32>
    %585 = arith.negf %584 : vector<8x32xf32>
    %586 = math.exp %585 : vector<8x32xf32>
    %cst_160 = arith.constant 1.000000e+00 : f32
    %587 = vector.broadcast %cst_160 : f32 to vector<8x32xf32>
    %588 = arith.addf %587, %586 : vector<8x32xf32>
    %589 = arith.divf %587, %588 : vector<8x32xf32>
    %590 = vector.extract_strided_slice %580 {offsets = [0, 32], sizes = [8, 32], strides = [1, 1]} : vector<8x128xf32> to vector<8x32xf32>
    %591 = arith.negf %590 : vector<8x32xf32>
    %592 = math.exp %591 : vector<8x32xf32>
    %cst_161 = arith.constant 1.000000e+00 : f32
    %593 = vector.broadcast %cst_161 : f32 to vector<8x32xf32>
    %594 = arith.addf %593, %592 : vector<8x32xf32>
    %595 = arith.divf %593, %594 : vector<8x32xf32>
    %596 = vector.extract_strided_slice %580 {offsets = [0, 64], sizes = [8, 32], strides = [1, 1]} : vector<8x128xf32> to vector<8x32xf32>
    %597 = math.tanh %596 : vector<8x32xf32>
    %598 = vector.extract_strided_slice %580 {offsets = [0, 96], sizes = [8, 32], strides = [1, 1]} : vector<8x128xf32> to vector<8x32xf32>
    %599 = arith.negf %598 : vector<8x32xf32>
    %600 = math.exp %599 : vector<8x32xf32>
    %cst_162 = arith.constant 1.000000e+00 : f32
    %601 = vector.broadcast %cst_162 : f32 to vector<8x32xf32>
    %602 = arith.addf %601, %600 : vector<8x32xf32>
    %603 = arith.divf %601, %602 : vector<8x32xf32>
    %604 = arith.mulf %595, %545 : vector<8x32xf32>
    %605 = arith.mulf %589, %597 : vector<8x32xf32>
    %606 = arith.addf %604, %605 : vector<8x32xf32>
    %607 = math.tanh %606 : vector<8x32xf32>
    %608 = arith.mulf %603, %607 : vector<8x32xf32>
    %609 = vector.extract_strided_slice %583 {offsets = [0, 0], sizes = [8, 32], strides = [1, 1]} : vector<8x128xf32> to vector<8x32xf32>
    %610 = arith.negf %609 : vector<8x32xf32>
    %611 = math.exp %610 : vector<8x32xf32>
    %cst_163 = arith.constant 1.000000e+00 : f32
    %612 = vector.broadcast %cst_163 : f32 to vector<8x32xf32>
    %613 = arith.addf %612, %611 : vector<8x32xf32>
    %614 = arith.divf %612, %613 : vector<8x32xf32>
    %615 = vector.extract_strided_slice %583 {offsets = [0, 32], sizes = [8, 32], strides = [1, 1]} : vector<8x128xf32> to vector<8x32xf32>
    %616 = arith.negf %615 : vector<8x32xf32>
    %617 = math.exp %616 : vector<8x32xf32>
    %cst_164 = arith.constant 1.000000e+00 : f32
    %618 = vector.broadcast %cst_164 : f32 to vector<8x32xf32>
    %619 = arith.addf %618, %617 : vector<8x32xf32>
    %620 = arith.divf %618, %619 : vector<8x32xf32>
    %621 = vector.extract_strided_slice %583 {offsets = [0, 64], sizes = [8, 32], strides = [1, 1]} : vector<8x128xf32> to vector<8x32xf32>
    %622 = math.tanh %621 : vector<8x32xf32>
    %623 = vector.extract_strided_slice %583 {offsets = [0, 96], sizes = [8, 32], strides = [1, 1]} : vector<8x128xf32> to vector<8x32xf32>
    %624 = arith.negf %623 : vector<8x32xf32>
    %625 = math.exp %624 : vector<8x32xf32>
    %cst_165 = arith.constant 1.000000e+00 : f32
    %626 = vector.broadcast %cst_165 : f32 to vector<8x32xf32>
    %627 = arith.addf %626, %625 : vector<8x32xf32>
    %628 = arith.divf %626, %627 : vector<8x32xf32>
    %629 = arith.mulf %620, %570 : vector<8x32xf32>
    %630 = arith.mulf %614, %622 : vector<8x32xf32>
    %631 = arith.addf %629, %630 : vector<8x32xf32>
    %632 = math.tanh %631 : vector<8x32xf32>
    %633 = arith.mulf %628, %632 : vector<8x32xf32>
    %c8_166 = arith.constant 8 : index
    %c0_167 = arith.constant 0 : index
    %634 = vector.load %arg22[%c8_166, %c0_167] : memref<64x64xf32, #tpu.memory_space<vmem>>, vector<8x32xf32>
    tpu.vector_store %arg22[%c8_166, %c0_167], %608 {strides = array<i32>} : memref<64x64xf32, #tpu.memory_space<vmem>>, vector<8x32xf32>,
    %c48_168 = arith.constant 48 : index
    %c32_169 = arith.constant 32 : index
    %635 = vector.load %arg22[%c48_168, %c32_169] : memref<64x64xf32, #tpu.memory_space<vmem>>, vector<8x32xf32>
    tpu.vector_store %arg22[%c48_168, %c32_169], %633 {strides = array<i32>} : memref<64x64xf32, #tpu.memory_space<vmem>>, vector<8x32xf32>,
    %636 = tpu.concatenate %608, %633 in 1 : vector<8x32xf32>, vector<8x32xf32> -> vector<8x64xf32>
    %637 = arith.truncf %636 : vector<8x64xf32> to vector<8x64xbf16>
    %cst_170 = arith.constant dense<0.000000e+00> : vector<8x256xf32>
    %638 = tpu.matmul %637, %509, %cst_170 {dimension_numbers = #tpu.dot_dimension_numbers<[1], [0], [0], [1], [0, 0, 1, 1], [], []>} : vector<8x64xbf16>, vector<64x256xbf16>, vector<8x256xf32> -> vector<8x256xf32>
    %c16_171 = arith.constant 16 : index
    %c0_172 = arith.constant 0 : index
    %639 = vector.load %arg23[%c16_171, %c0_172] : memref<64x256xf32, #tpu.memory_space<vmem>>, vector<8x128xf32>
    %640 = vector.extract_strided_slice %638 {offsets = [0, 0], sizes = [8, 128], strides = [1, 1]} : vector<8x256xf32> to vector<8x128xf32>
    %641 = arith.addf %639, %640 : vector<8x128xf32>
    %c40_173 = arith.constant 40 : index
    %c128_174 = arith.constant 128 : index
    %642 = vector.load %arg23[%c40_173, %c128_174] : memref<64x256xf32, #tpu.memory_space<vmem>>, vector<8x128xf32>
    %643 = vector.extract_strided_slice %638 {offsets = [0, 128], sizes = [8, 128], strides = [1, 1]} : vector<8x256xf32> to vector<8x128xf32>
    %644 = arith.addf %642, %643 : vector<8x128xf32>
    %645 = vector.extract_strided_slice %641 {offsets = [0, 0], sizes = [8, 32], strides = [1, 1]} : vector<8x128xf32> to vector<8x32xf32>
    %646 = arith.negf %645 : vector<8x32xf32>
    %647 = math.exp %646 : vector<8x32xf32>
    %cst_175 = arith.constant 1.000000e+00 : f32
    %648 = vector.broadcast %cst_175 : f32 to vector<8x32xf32>
    %649 = arith.addf %648, %647 : vector<8x32xf32>
    %650 = arith.divf %648, %649 : vector<8x32xf32>
    %651 = vector.extract_strided_slice %641 {offsets = [0, 32], sizes = [8, 32], strides = [1, 1]} : vector<8x128xf32> to vector<8x32xf32>
    %652 = arith.negf %651 : vector<8x32xf32>
    %653 = math.exp %652 : vector<8x32xf32>
    %cst_176 = arith.constant 1.000000e+00 : f32
    %654 = vector.broadcast %cst_176 : f32 to vector<8x32xf32>
    %655 = arith.addf %654, %653 : vector<8x32xf32>
    %656 = arith.divf %654, %655 : vector<8x32xf32>
    %657 = vector.extract_strided_slice %641 {offsets = [0, 64], sizes = [8, 32], strides = [1, 1]} : vector<8x128xf32> to vector<8x32xf32>
    %658 = math.tanh %657 : vector<8x32xf32>
    %659 = vector.extract_strided_slice %641 {offsets = [0, 96], sizes = [8, 32], strides = [1, 1]} : vector<8x128xf32> to vector<8x32xf32>
    %660 = arith.negf %659 : vector<8x32xf32>
    %661 = math.exp %660 : vector<8x32xf32>
    %cst_177 = arith.constant 1.000000e+00 : f32
    %662 = vector.broadcast %cst_177 : f32 to vector<8x32xf32>
    %663 = arith.addf %662, %661 : vector<8x32xf32>
    %664 = arith.divf %662, %663 : vector<8x32xf32>
    %665 = arith.mulf %656, %606 : vector<8x32xf32>
    %666 = arith.mulf %650, %658 : vector<8x32xf32>
    %667 = arith.addf %665, %666 : vector<8x32xf32>
    %668 = math.tanh %667 : vector<8x32xf32>
    %669 = arith.mulf %664, %668 : vector<8x32xf32>
    %670 = vector.extract_strided_slice %644 {offsets = [0, 0], sizes = [8, 32], strides = [1, 1]} : vector<8x128xf32> to vector<8x32xf32>
    %671 = arith.negf %670 : vector<8x32xf32>
    %672 = math.exp %671 : vector<8x32xf32>
    %cst_178 = arith.constant 1.000000e+00 : f32
    %673 = vector.broadcast %cst_178 : f32 to vector<8x32xf32>
    %674 = arith.addf %673, %672 : vector<8x32xf32>
    %675 = arith.divf %673, %674 : vector<8x32xf32>
    %676 = vector.extract_strided_slice %644 {offsets = [0, 32], sizes = [8, 32], strides = [1, 1]} : vector<8x128xf32> to vector<8x32xf32>
    %677 = arith.negf %676 : vector<8x32xf32>
    %678 = math.exp %677 : vector<8x32xf32>
    %cst_179 = arith.constant 1.000000e+00 : f32
    %679 = vector.broadcast %cst_179 : f32 to vector<8x32xf32>
    %680 = arith.addf %679, %678 : vector<8x32xf32>
    %681 = arith.divf %679, %680 : vector<8x32xf32>
    %682 = vector.extract_strided_slice %644 {offsets = [0, 64], sizes = [8, 32], strides = [1, 1]} : vector<8x128xf32> to vector<8x32xf32>
    %683 = math.tanh %682 : vector<8x32xf32>
    %684 = vector.extract_strided_slice %644 {offsets = [0, 96], sizes = [8, 32], strides = [1, 1]} : vector<8x128xf32> to vector<8x32xf32>
    %685 = arith.negf %684 : vector<8x32xf32>
    %686 = math.exp %685 : vector<8x32xf32>
    %cst_180 = arith.constant 1.000000e+00 : f32
    %687 = vector.broadcast %cst_180 : f32 to vector<8x32xf32>
    %688 = arith.addf %687, %686 : vector<8x32xf32>
    %689 = arith.divf %687, %688 : vector<8x32xf32>
    %690 = arith.mulf %681, %631 : vector<8x32xf32>
    %691 = arith.mulf %675, %683 : vector<8x32xf32>
    %692 = arith.addf %690, %691 : vector<8x32xf32>
    %693 = math.tanh %692 : vector<8x32xf32>
    %694 = arith.mulf %689, %693 : vector<8x32xf32>
    %c16_181 = arith.constant 16 : index
    %c0_182 = arith.constant 0 : index
    %695 = vector.load %arg22[%c16_181, %c0_182] : memref<64x64xf32, #tpu.memory_space<vmem>>, vector<8x32xf32>
    tpu.vector_store %arg22[%c16_181, %c0_182], %669 {strides = array<i32>} : memref<64x64xf32, #tpu.memory_space<vmem>>, vector<8x32xf32>,
    %c40_183 = arith.constant 40 : index
    %c32_184 = arith.constant 32 : index
    %696 = vector.load %arg22[%c40_183, %c32_184] : memref<64x64xf32, #tpu.memory_space<vmem>>, vector<8x32xf32>
    tpu.vector_store %arg22[%c40_183, %c32_184], %694 {strides = array<i32>} : memref<64x64xf32, #tpu.memory_space<vmem>>, vector<8x32xf32>,
    %697 = tpu.concatenate %669, %694 in 1 : vector<8x32xf32>, vector<8x32xf32> -> vector<8x64xf32>
    %698 = arith.truncf %697 : vector<8x64xf32> to vector<8x64xbf16>
    %cst_185 = arith.constant dense<0.000000e+00> : vector<8x256xf32>
    %699 = tpu.matmul %698, %509, %cst_185 {dimension_numbers = #tpu.dot_dimension_numbers<[1], [0], [0], [1], [0, 0, 1, 1], [], []>} : vector<8x64xbf16>, vector<64x256xbf16>, vector<8x256xf32> -> vector<8x256xf32>
    %c24_186 = arith.constant 24 : index
    %c0_187 = arith.constant 0 : index
    %700 = vector.load %arg23[%c24_186, %c0_187] : memref<64x256xf32, #tpu.memory_space<vmem>>, vector<8x128xf32>
    %701 = vector.extract_strided_slice %699 {offsets = [0, 0], sizes = [8, 128], strides = [1, 1]} : vector<8x256xf32> to vector<8x128xf32>
    %702 = arith.addf %700, %701 : vector<8x128xf32>
    %c32_188 = arith.constant 32 : index
    %c128_189 = arith.constant 128 : index
    %703 = vector.load %arg23[%c32_188, %c128_189] : memref<64x256xf32, #tpu.memory_space<vmem>>, vector<8x128xf32>
    %704 = vector.extract_strided_slice %699 {offsets = [0, 128], sizes = [8, 128], strides = [1, 1]} : vector<8x256xf32> to vector<8x128xf32>
    %705 = arith.addf %703, %704 : vector<8x128xf32>
    %706 = vector.extract_strided_slice %702 {offsets = [0, 0], sizes = [8, 32], strides = [1, 1]} : vector<8x128xf32> to vector<8x32xf32>
    %707 = arith.negf %706 : vector<8x32xf32>
    %708 = math.exp %707 : vector<8x32xf32>
    %cst_190 = arith.constant 1.000000e+00 : f32
    %709 = vector.broadcast %cst_190 : f32 to vector<8x32xf32>
    %710 = arith.addf %709, %708 : vector<8x32xf32>
    %711 = arith.divf %709, %710 : vector<8x32xf32>
    %712 = vector.extract_strided_slice %702 {offsets = [0, 32], sizes = [8, 32], strides = [1, 1]} : vector<8x128xf32> to vector<8x32xf32>
    %713 = arith.negf %712 : vector<8x32xf32>
    %714 = math.exp %713 : vector<8x32xf32>
    %cst_191 = arith.constant 1.000000e+00 : f32
    %715 = vector.broadcast %cst_191 : f32 to vector<8x32xf32>
    %716 = arith.addf %715, %714 : vector<8x32xf32>
    %717 = arith.divf %715, %716 : vector<8x32xf32>
    %718 = vector.extract_strided_slice %702 {offsets = [0, 64], sizes = [8, 32], strides = [1, 1]} : vector<8x128xf32> to vector<8x32xf32>
    %719 = math.tanh %718 : vector<8x32xf32>
    %720 = vector.extract_strided_slice %702 {offsets = [0, 96], sizes = [8, 32], strides = [1, 1]} : vector<8x128xf32> to vector<8x32xf32>
    %721 = arith.negf %720 : vector<8x32xf32>
    %722 = math.exp %721 : vector<8x32xf32>
    %cst_192 = arith.constant 1.000000e+00 : f32
    %723 = vector.broadcast %cst_192 : f32 to vector<8x32xf32>
    %724 = arith.addf %723, %722 : vector<8x32xf32>
    %725 = arith.divf %723, %724 : vector<8x32xf32>
    %726 = arith.mulf %717, %667 : vector<8x32xf32>
    %727 = arith.mulf %711, %719 : vector<8x32xf32>
    %728 = arith.addf %726, %727 : vector<8x32xf32>
    %729 = math.tanh %728 : vector<8x32xf32>
    %730 = arith.mulf %725, %729 : vector<8x32xf32>
    %731 = vector.extract_strided_slice %705 {offsets = [0, 0], sizes = [8, 32], strides = [1, 1]} : vector<8x128xf32> to vector<8x32xf32>
    %732 = arith.negf %731 : vector<8x32xf32>
    %733 = math.exp %732 : vector<8x32xf32>
    %cst_193 = arith.constant 1.000000e+00 : f32
    %734 = vector.broadcast %cst_193 : f32 to vector<8x32xf32>
    %735 = arith.addf %734, %733 : vector<8x32xf32>
    %736 = arith.divf %734, %735 : vector<8x32xf32>
    %737 = vector.extract_strided_slice %705 {offsets = [0, 32], sizes = [8, 32], strides = [1, 1]} : vector<8x128xf32> to vector<8x32xf32>
    %738 = arith.negf %737 : vector<8x32xf32>
    %739 = math.exp %738 : vector<8x32xf32>
    %cst_194 = arith.constant 1.000000e+00 : f32
    %740 = vector.broadcast %cst_194 : f32 to vector<8x32xf32>
    %741 = arith.addf %740, %739 : vector<8x32xf32>
    %742 = arith.divf %740, %741 : vector<8x32xf32>
    %743 = vector.extract_strided_slice %705 {offsets = [0, 64], sizes = [8, 32], strides = [1, 1]} : vector<8x128xf32> to vector<8x32xf32>
    %744 = math.tanh %743 : vector<8x32xf32>
    %745 = vector.extract_strided_slice %705 {offsets = [0, 96], sizes = [8, 32], strides = [1, 1]} : vector<8x128xf32> to vector<8x32xf32>
    %746 = arith.negf %745 : vector<8x32xf32>
    %747 = math.exp %746 : vector<8x32xf32>
    %cst_195 = arith.constant 1.000000e+00 : f32
    %748 = vector.broadcast %cst_195 : f32 to vector<8x32xf32>
    %749 = arith.addf %748, %747 : vector<8x32xf32>
    %750 = arith.divf %748, %749 : vector<8x32xf32>
    %751 = arith.mulf %742, %692 : vector<8x32xf32>
    %752 = arith.mulf %736, %744 : vector<8x32xf32>
    %753 = arith.addf %751, %752 : vector<8x32xf32>
    %754 = math.tanh %753 : vector<8x32xf32>
    %755 = arith.mulf %750, %754 : vector<8x32xf32>
    %c24_196 = arith.constant 24 : index
    %c0_197 = arith.constant 0 : index
    %756 = vector.load %arg22[%c24_196, %c0_197] : memref<64x64xf32, #tpu.memory_space<vmem>>, vector<8x32xf32>
    tpu.vector_store %arg22[%c24_196, %c0_197], %730 {strides = array<i32>} : memref<64x64xf32, #tpu.memory_space<vmem>>, vector<8x32xf32>,
    %c32_198 = arith.constant 32 : index
    %c32_199 = arith.constant 32 : index
    %757 = vector.load %arg22[%c32_198, %c32_199] : memref<64x64xf32, #tpu.memory_space<vmem>>, vector<8x32xf32>
    tpu.vector_store %arg22[%c32_198, %c32_199], %755 {strides = array<i32>} : memref<64x64xf32, #tpu.memory_space<vmem>>, vector<8x32xf32>,
    %758 = tpu.concatenate %730, %755 in 1 : vector<8x32xf32>, vector<8x32xf32> -> vector<8x64xf32>
    %759 = arith.truncf %758 : vector<8x64xf32> to vector<8x64xbf16>
    %cst_200 = arith.constant dense<0.000000e+00> : vector<8x256xf32>
    %760 = tpu.matmul %759, %509, %cst_200 {dimension_numbers = #tpu.dot_dimension_numbers<[1], [0], [0], [1], [0, 0, 1, 1], [], []>} : vector<8x64xbf16>, vector<64x256xbf16>, vector<8x256xf32> -> vector<8x256xf32>
    %c32_201 = arith.constant 32 : index
    %c0_202 = arith.constant 0 : index
    %761 = vector.load %arg23[%c32_201, %c0_202] : memref<64x256xf32, #tpu.memory_space<vmem>>, vector<8x128xf32>
    %762 = vector.extract_strided_slice %760 {offsets = [0, 0], sizes = [8, 128], strides = [1, 1]} : vector<8x256xf32> to vector<8x128xf32>
    %763 = arith.addf %761, %762 : vector<8x128xf32>
    %c24_203 = arith.constant 24 : index
    %c128_204 = arith.constant 128 : index
    %764 = vector.load %arg23[%c24_203, %c128_204] : memref<64x256xf32, #tpu.memory_space<vmem>>, vector<8x128xf32>
    %765 = vector.extract_strided_slice %760 {offsets = [0, 128], sizes = [8, 128], strides = [1, 1]} : vector<8x256xf32> to vector<8x128xf32>
    %766 = arith.addf %764, %765 : vector<8x128xf32>
    %767 = vector.extract_strided_slice %763 {offsets = [0, 0], sizes = [8, 32], strides = [1, 1]} : vector<8x128xf32> to vector<8x32xf32>
    %768 = arith.negf %767 : vector<8x32xf32>
    %769 = math.exp %768 : vector<8x32xf32>
    %cst_205 = arith.constant 1.000000e+00 : f32
    %770 = vector.broadcast %cst_205 : f32 to vector<8x32xf32>
    %771 = arith.addf %770, %769 : vector<8x32xf32>
    %772 = arith.divf %770, %771 : vector<8x32xf32>
    %773 = vector.extract_strided_slice %763 {offsets = [0, 32], sizes = [8, 32], strides = [1, 1]} : vector<8x128xf32> to vector<8x32xf32>
    %774 = arith.negf %773 : vector<8x32xf32>
    %775 = math.exp %774 : vector<8x32xf32>
    %cst_206 = arith.constant 1.000000e+00 : f32
    %776 = vector.broadcast %cst_206 : f32 to vector<8x32xf32>
    %777 = arith.addf %776, %775 : vector<8x32xf32>
    %778 = arith.divf %776, %777 : vector<8x32xf32>
    %779 = vector.extract_strided_slice %763 {offsets = [0, 64], sizes = [8, 32], strides = [1, 1]} : vector<8x128xf32> to vector<8x32xf32>
    %780 = math.tanh %779 : vector<8x32xf32>
    %781 = vector.extract_strided_slice %763 {offsets = [0, 96], sizes = [8, 32], strides = [1, 1]} : vector<8x128xf32> to vector<8x32xf32>
    %782 = arith.negf %781 : vector<8x32xf32>
    %783 = math.exp %782 : vector<8x32xf32>
    %cst_207 = arith.constant 1.000000e+00 : f32
    %784 = vector.broadcast %cst_207 : f32 to vector<8x32xf32>
    %785 = arith.addf %784, %783 : vector<8x32xf32>
    %786 = arith.divf %784, %785 : vector<8x32xf32>
    %787 = arith.mulf %778, %728 : vector<8x32xf32>
    %788 = arith.mulf %772, %780 : vector<8x32xf32>
    %789 = arith.addf %787, %788 : vector<8x32xf32>
    %790 = math.tanh %789 : vector<8x32xf32>
    %791 = arith.mulf %786, %790 : vector<8x32xf32>
    %792 = vector.extract_strided_slice %766 {offsets = [0, 0], sizes = [8, 32], strides = [1, 1]} : vector<8x128xf32> to vector<8x32xf32>
    %793 = arith.negf %792 : vector<8x32xf32>
    %794 = math.exp %793 : vector<8x32xf32>
    %cst_208 = arith.constant 1.000000e+00 : f32
    %795 = vector.broadcast %cst_208 : f32 to vector<8x32xf32>
    %796 = arith.addf %795, %794 : vector<8x32xf32>
    %797 = arith.divf %795, %796 : vector<8x32xf32>
    %798 = vector.extract_strided_slice %766 {offsets = [0, 32], sizes = [8, 32], strides = [1, 1]} : vector<8x128xf32> to vector<8x32xf32>
    %799 = arith.negf %798 : vector<8x32xf32>
    %800 = math.exp %799 : vector<8x32xf32>
    %cst_209 = arith.constant 1.000000e+00 : f32
    %801 = vector.broadcast %cst_209 : f32 to vector<8x32xf32>
    %802 = arith.addf %801, %800 : vector<8x32xf32>
    %803 = arith.divf %801, %802 : vector<8x32xf32>
    %804 = vector.extract_strided_slice %766 {offsets = [0, 64], sizes = [8, 32], strides = [1, 1]} : vector<8x128xf32> to vector<8x32xf32>
    %805 = math.tanh %804 : vector<8x32xf32>
    %806 = vector.extract_strided_slice %766 {offsets = [0, 96], sizes = [8, 32], strides = [1, 1]} : vector<8x128xf32> to vector<8x32xf32>
    %807 = arith.negf %806 : vector<8x32xf32>
    %808 = math.exp %807 : vector<8x32xf32>
    %cst_210 = arith.constant 1.000000e+00 : f32
    %809 = vector.broadcast %cst_210 : f32 to vector<8x32xf32>
    %810 = arith.addf %809, %808 : vector<8x32xf32>
    %811 = arith.divf %809, %810 : vector<8x32xf32>
    %812 = arith.mulf %803, %753 : vector<8x32xf32>
    %813 = arith.mulf %797, %805 : vector<8x32xf32>
    %814 = arith.addf %812, %813 : vector<8x32xf32>
    %815 = math.tanh %814 : vector<8x32xf32>
    %816 = arith.mulf %811, %815 : vector<8x32xf32>
    %c32_211 = arith.constant 32 : index
    %c0_212 = arith.constant 0 : index
    %817 = vector.load %arg22[%c32_211, %c0_212] : memref<64x64xf32, #tpu.memory_space<vmem>>, vector<8x32xf32>
    tpu.vector_store %arg22[%c32_211, %c0_212], %791 {strides = array<i32>} : memref<64x64xf32, #tpu.memory_space<vmem>>, vector<8x32xf32>,
    %c24_213 = arith.constant 24 : index
    %c32_214 = arith.constant 32 : index
    %818 = vector.load %arg22[%c24_213, %c32_214] : memref<64x64xf32, #tpu.memory_space<vmem>>, vector<8x32xf32>
    tpu.vector_store %arg22[%c24_213, %c32_214], %816 {strides = array<i32>} : memref<64x64xf32, #tpu.memory_space<vmem>>, vector<8x32xf32>,
    %819 = tpu.concatenate %791, %816 in 1 : vector<8x32xf32>, vector<8x32xf32> -> vector<8x64xf32>
    %820 = arith.truncf %819 : vector<8x64xf32> to vector<8x64xbf16>
    %cst_215 = arith.constant dense<0.000000e+00> : vector<8x256xf32>
    %821 = tpu.matmul %820, %509, %cst_215 {dimension_numbers = #tpu.dot_dimension_numbers<[1], [0], [0], [1], [0, 0, 1, 1], [], []>} : vector<8x64xbf16>, vector<64x256xbf16>, vector<8x256xf32> -> vector<8x256xf32>
    %c40_216 = arith.constant 40 : index
    %c0_217 = arith.constant 0 : index
    %822 = vector.load %arg23[%c40_216, %c0_217] : memref<64x256xf32, #tpu.memory_space<vmem>>, vector<8x128xf32>
    %823 = vector.extract_strided_slice %821 {offsets = [0, 0], sizes = [8, 128], strides = [1, 1]} : vector<8x256xf32> to vector<8x128xf32>
    %824 = arith.addf %822, %823 : vector<8x128xf32>
    %c16_218 = arith.constant 16 : index
    %c128_219 = arith.constant 128 : index
    %825 = vector.load %arg23[%c16_218, %c128_219] : memref<64x256xf32, #tpu.memory_space<vmem>>, vector<8x128xf32>
    %826 = vector.extract_strided_slice %821 {offsets = [0, 128], sizes = [8, 128], strides = [1, 1]} : vector<8x256xf32> to vector<8x128xf32>
    %827 = arith.addf %825, %826 : vector<8x128xf32>
    %828 = vector.extract_strided_slice %824 {offsets = [0, 0], sizes = [8, 32], strides = [1, 1]} : vector<8x128xf32> to vector<8x32xf32>
    %829 = arith.negf %828 : vector<8x32xf32>
    %830 = math.exp %829 : vector<8x32xf32>
    %cst_220 = arith.constant 1.000000e+00 : f32
    %831 = vector.broadcast %cst_220 : f32 to vector<8x32xf32>
    %832 = arith.addf %831, %830 : vector<8x32xf32>
    %833 = arith.divf %831, %832 : vector<8x32xf32>
    %834 = vector.extract_strided_slice %824 {offsets = [0, 32], sizes = [8, 32], strides = [1, 1]} : vector<8x128xf32> to vector<8x32xf32>
    %835 = arith.negf %834 : vector<8x32xf32>
    %836 = math.exp %835 : vector<8x32xf32>
    %cst_221 = arith.constant 1.000000e+00 : f32
    %837 = vector.broadcast %cst_221 : f32 to vector<8x32xf32>
    %838 = arith.addf %837, %836 : vector<8x32xf32>
    %839 = arith.divf %837, %838 : vector<8x32xf32>
    %840 = vector.extract_strided_slice %824 {offsets = [0, 64], sizes = [8, 32], strides = [1, 1]} : vector<8x128xf32> to vector<8x32xf32>
    %841 = math.tanh %840 : vector<8x32xf32>
    %842 = vector.extract_strided_slice %824 {offsets = [0, 96], sizes = [8, 32], strides = [1, 1]} : vector<8x128xf32> to vector<8x32xf32>
    %843 = arith.negf %842 : vector<8x32xf32>
    %844 = math.exp %843 : vector<8x32xf32>
    %cst_222 = arith.constant 1.000000e+00 : f32
    %845 = vector.broadcast %cst_222 : f32 to vector<8x32xf32>
    %846 = arith.addf %845, %844 : vector<8x32xf32>
    %847 = arith.divf %845, %846 : vector<8x32xf32>
    %848 = arith.mulf %839, %789 : vector<8x32xf32>
    %849 = arith.mulf %833, %841 : vector<8x32xf32>
    %850 = arith.addf %848, %849 : vector<8x32xf32>
    %851 = math.tanh %850 : vector<8x32xf32>
    %852 = arith.mulf %847, %851 : vector<8x32xf32>
    %853 = vector.extract_strided_slice %827 {offsets = [0, 0], sizes = [8, 32], strides = [1, 1]} : vector<8x128xf32> to vector<8x32xf32>
    %854 = arith.negf %853 : vector<8x32xf32>
    %855 = math.exp %854 : vector<8x32xf32>
    %cst_223 = arith.constant 1.000000e+00 : f32
    %856 = vector.broadcast %cst_223 : f32 to vector<8x32xf32>
    %857 = arith.addf %856, %855 : vector<8x32xf32>
    %858 = arith.divf %856, %857 : vector<8x32xf32>
    %859 = vector.extract_strided_slice %827 {offsets = [0, 32], sizes = [8, 32], strides = [1, 1]} : vector<8x128xf32> to vector<8x32xf32>
    %860 = arith.negf %859 : vector<8x32xf32>
    %861 = math.exp %860 : vector<8x32xf32>
    %cst_224 = arith.constant 1.000000e+00 : f32
    %862 = vector.broadcast %cst_224 : f32 to vector<8x32xf32>
    %863 = arith.addf %862, %861 : vector<8x32xf32>
    %864 = arith.divf %862, %863 : vector<8x32xf32>
    %865 = vector.extract_strided_slice %827 {offsets = [0, 64], sizes = [8, 32], strides = [1, 1]} : vector<8x128xf32> to vector<8x32xf32>
    %866 = math.tanh %865 : vector<8x32xf32>
    %867 = vector.extract_strided_slice %827 {offsets = [0, 96], sizes = [8, 32], strides = [1, 1]} : vector<8x128xf32> to vector<8x32xf32>
    %868 = arith.negf %867 : vector<8x32xf32>
    %869 = math.exp %868 : vector<8x32xf32>
    %cst_225 = arith.constant 1.000000e+00 : f32
    %870 = vector.broadcast %cst_225 : f32 to vector<8x32xf32>
    %871 = arith.addf %870, %869 : vector<8x32xf32>
    %872 = arith.divf %870, %871 : vector<8x32xf32>
    %873 = arith.mulf %864, %814 : vector<8x32xf32>
    %874 = arith.mulf %858, %866 : vector<8x32xf32>
    %875 = arith.addf %873, %874 : vector<8x32xf32>
    %876 = math.tanh %875 : vector<8x32xf32>
    %877 = arith.mulf %872, %876 : vector<8x32xf32>
    %c40_226 = arith.constant 40 : index
    %c0_227 = arith.constant 0 : index
    %878 = vector.load %arg22[%c40_226, %c0_227] : memref<64x64xf32, #tpu.memory_space<vmem>>, vector<8x32xf32>
    tpu.vector_store %arg22[%c40_226, %c0_227], %852 {strides = array<i32>} : memref<64x64xf32, #tpu.memory_space<vmem>>, vector<8x32xf32>,
    %c16_228 = arith.constant 16 : index
    %c32_229 = arith.constant 32 : index
    %879 = vector.load %arg22[%c16_228, %c32_229] : memref<64x64xf32, #tpu.memory_space<vmem>>, vector<8x32xf32>
    tpu.vector_store %arg22[%c16_228, %c32_229], %877 {strides = array<i32>} : memref<64x64xf32, #tpu.memory_space<vmem>>, vector<8x32xf32>,
    %880 = tpu.concatenate %852, %877 in 1 : vector<8x32xf32>, vector<8x32xf32> -> vector<8x64xf32>
    %881 = arith.truncf %880 : vector<8x64xf32> to vector<8x64xbf16>
    %cst_230 = arith.constant dense<0.000000e+00> : vector<8x256xf32>
    %882 = tpu.matmul %881, %509, %cst_230 {dimension_numbers = #tpu.dot_dimension_numbers<[1], [0], [0], [1], [0, 0, 1, 1], [], []>} : vector<8x64xbf16>, vector<64x256xbf16>, vector<8x256xf32> -> vector<8x256xf32>
    %c48_231 = arith.constant 48 : index
    %c0_232 = arith.constant 0 : index
    %883 = vector.load %arg23[%c48_231, %c0_232] : memref<64x256xf32, #tpu.memory_space<vmem>>, vector<8x128xf32>
    %884 = vector.extract_strided_slice %882 {offsets = [0, 0], sizes = [8, 128], strides = [1, 1]} : vector<8x256xf32> to vector<8x128xf32>
    %885 = arith.addf %883, %884 : vector<8x128xf32>
    %c8_233 = arith.constant 8 : index
    %c128_234 = arith.constant 128 : index
    %886 = vector.load %arg23[%c8_233, %c128_234] : memref<64x256xf32, #tpu.memory_space<vmem>>, vector<8x128xf32>
    %887 = vector.extract_strided_slice %882 {offsets = [0, 128], sizes = [8, 128], strides = [1, 1]} : vector<8x256xf32> to vector<8x128xf32>
    %888 = arith.addf %886, %887 : vector<8x128xf32>
    %889 = vector.extract_strided_slice %885 {offsets = [0, 0], sizes = [8, 32], strides = [1, 1]} : vector<8x128xf32> to vector<8x32xf32>
    %890 = arith.negf %889 : vector<8x32xf32>
    %891 = math.exp %890 : vector<8x32xf32>
    %cst_235 = arith.constant 1.000000e+00 : f32
    %892 = vector.broadcast %cst_235 : f32 to vector<8x32xf32>
    %893 = arith.addf %892, %891 : vector<8x32xf32>
    %894 = arith.divf %892, %893 : vector<8x32xf32>
    %895 = vector.extract_strided_slice %885 {offsets = [0, 32], sizes = [8, 32], strides = [1, 1]} : vector<8x128xf32> to vector<8x32xf32>
    %896 = arith.negf %895 : vector<8x32xf32>
    %897 = math.exp %896 : vector<8x32xf32>
    %cst_236 = arith.constant 1.000000e+00 : f32
    %898 = vector.broadcast %cst_236 : f32 to vector<8x32xf32>
    %899 = arith.addf %898, %897 : vector<8x32xf32>
    %900 = arith.divf %898, %899 : vector<8x32xf32>
    %901 = vector.extract_strided_slice %885 {offsets = [0, 64], sizes = [8, 32], strides = [1, 1]} : vector<8x128xf32> to vector<8x32xf32>
    %902 = math.tanh %901 : vector<8x32xf32>
    %903 = vector.extract_strided_slice %885 {offsets = [0, 96], sizes = [8, 32], strides = [1, 1]} : vector<8x128xf32> to vector<8x32xf32>
    %904 = arith.negf %903 : vector<8x32xf32>
    %905 = math.exp %904 : vector<8x32xf32>
    %cst_237 = arith.constant 1.000000e+00 : f32
    %906 = vector.broadcast %cst_237 : f32 to vector<8x32xf32>
    %907 = arith.addf %906, %905 : vector<8x32xf32>
    %908 = arith.divf %906, %907 : vector<8x32xf32>
    %909 = arith.mulf %900, %850 : vector<8x32xf32>
    %910 = arith.mulf %894, %902 : vector<8x32xf32>
    %911 = arith.addf %909, %910 : vector<8x32xf32>
    %912 = math.tanh %911 : vector<8x32xf32>
    %913 = arith.mulf %908, %912 : vector<8x32xf32>
    %914 = vector.extract_strided_slice %888 {offsets = [0, 0], sizes = [8, 32], strides = [1, 1]} : vector<8x128xf32> to vector<8x32xf32>
    %915 = arith.negf %914 : vector<8x32xf32>
    %916 = math.exp %915 : vector<8x32xf32>
    %cst_238 = arith.constant 1.000000e+00 : f32
    %917 = vector.broadcast %cst_238 : f32 to vector<8x32xf32>
    %918 = arith.addf %917, %916 : vector<8x32xf32>
    %919 = arith.divf %917, %918 : vector<8x32xf32>
    %920 = vector.extract_strided_slice %888 {offsets = [0, 32], sizes = [8, 32], strides = [1, 1]} : vector<8x128xf32> to vector<8x32xf32>
    %921 = arith.negf %920 : vector<8x32xf32>
    %922 = math.exp %921 : vector<8x32xf32>
    %cst_239 = arith.constant 1.000000e+00 : f32
    %923 = vector.broadcast %cst_239 : f32 to vector<8x32xf32>
    %924 = arith.addf %923, %922 : vector<8x32xf32>
    %925 = arith.divf %923, %924 : vector<8x32xf32>
    %926 = vector.extract_strided_slice %888 {offsets = [0, 64], sizes = [8, 32], strides = [1, 1]} : vector<8x128xf32> to vector<8x32xf32>
    %927 = math.tanh %926 : vector<8x32xf32>
    %928 = vector.extract_strided_slice %888 {offsets = [0, 96], sizes = [8, 32], strides = [1, 1]} : vector<8x128xf32> to vector<8x32xf32>
    %929 = arith.negf %928 : vector<8x32xf32>
    %930 = math.exp %929 : vector<8x32xf32>
    %cst_240 = arith.constant 1.000000e+00 : f32
    %931 = vector.broadcast %cst_240 : f32 to vector<8x32xf32>
    %932 = arith.addf %931, %930 : vector<8x32xf32>
    %933 = arith.divf %931, %932 : vector<8x32xf32>
    %934 = arith.mulf %925, %875 : vector<8x32xf32>
    %935 = arith.mulf %919, %927 : vector<8x32xf32>
    %936 = arith.addf %934, %935 : vector<8x32xf32>
    %937 = math.tanh %936 : vector<8x32xf32>
    %938 = arith.mulf %933, %937 : vector<8x32xf32>
    %c48_241 = arith.constant 48 : index
    %c0_242 = arith.constant 0 : index
    %939 = vector.load %arg22[%c48_241, %c0_242] : memref<64x64xf32, #tpu.memory_space<vmem>>, vector<8x32xf32>
    tpu.vector_store %arg22[%c48_241, %c0_242], %913 {strides = array<i32>} : memref<64x64xf32, #tpu.memory_space<vmem>>, vector<8x32xf32>,
    %c8_243 = arith.constant 8 : index
    %c32_244 = arith.constant 32 : index
    %940 = vector.load %arg22[%c8_243, %c32_244] : memref<64x64xf32, #tpu.memory_space<vmem>>, vector<8x32xf32>
    tpu.vector_store %arg22[%c8_243, %c32_244], %938 {strides = array<i32>} : memref<64x64xf32, #tpu.memory_space<vmem>>, vector<8x32xf32>,
    %941 = tpu.concatenate %913, %938 in 1 : vector<8x32xf32>, vector<8x32xf32> -> vector<8x64xf32>
    %942 = arith.truncf %941 : vector<8x64xf32> to vector<8x64xbf16>
    %cst_245 = arith.constant dense<0.000000e+00> : vector<8x256xf32>
    %943 = tpu.matmul %942, %509, %cst_245 {dimension_numbers = #tpu.dot_dimension_numbers<[1], [0], [0], [1], [0, 0, 1, 1], [], []>} : vector<8x64xbf16>, vector<64x256xbf16>, vector<8x256xf32> -> vector<8x256xf32>
    %c56_246 = arith.constant 56 : index
    %c0_247 = arith.constant 0 : index
    %944 = vector.load %arg23[%c56_246, %c0_247] : memref<64x256xf32, #tpu.memory_space<vmem>>, vector<8x128xf32>
    %945 = vector.extract_strided_slice %943 {offsets = [0, 0], sizes = [8, 128], strides = [1, 1]} : vector<8x256xf32> to vector<8x128xf32>
    %946 = arith.addf %944, %945 : vector<8x128xf32>
    %c0_248 = arith.constant 0 : index
    %c128_249 = arith.constant 128 : index
    %947 = vector.load %arg23[%c0_248, %c128_249] : memref<64x256xf32, #tpu.memory_space<vmem>>, vector<8x128xf32>
    %948 = vector.extract_strided_slice %943 {offsets = [0, 128], sizes = [8, 128], strides = [1, 1]} : vector<8x256xf32> to vector<8x128xf32>
    %949 = arith.addf %947, %948 : vector<8x128xf32>
    %950 = vector.extract_strided_slice %946 {offsets = [0, 0], sizes = [8, 32], strides = [1, 1]} : vector<8x128xf32> to vector<8x32xf32>
    %951 = arith.negf %950 : vector<8x32xf32>
    %952 = math.exp %951 : vector<8x32xf32>
    %cst_250 = arith.constant 1.000000e+00 : f32
    %953 = vector.broadcast %cst_250 : f32 to vector<8x32xf32>
    %954 = arith.addf %953, %952 : vector<8x32xf32>
    %955 = arith.divf %953, %954 : vector<8x32xf32>
    %956 = vector.extract_strided_slice %946 {offsets = [0, 32], sizes = [8, 32], strides = [1, 1]} : vector<8x128xf32> to vector<8x32xf32>
    %957 = arith.negf %956 : vector<8x32xf32>
    %958 = math.exp %957 : vector<8x32xf32>
    %cst_251 = arith.constant 1.000000e+00 : f32
    %959 = vector.broadcast %cst_251 : f32 to vector<8x32xf32>
    %960 = arith.addf %959, %958 : vector<8x32xf32>
    %961 = arith.divf %959, %960 : vector<8x32xf32>
    %962 = vector.extract_strided_slice %946 {offsets = [0, 64], sizes = [8, 32], strides = [1, 1]} : vector<8x128xf32> to vector<8x32xf32>
    %963 = math.tanh %962 : vector<8x32xf32>
    %964 = vector.extract_strided_slice %946 {offsets = [0, 96], sizes = [8, 32], strides = [1, 1]} : vector<8x128xf32> to vector<8x32xf32>
    %965 = arith.negf %964 : vector<8x32xf32>
    %966 = math.exp %965 : vector<8x32xf32>
    %cst_252 = arith.constant 1.000000e+00 : f32
    %967 = vector.broadcast %cst_252 : f32 to vector<8x32xf32>
    %968 = arith.addf %967, %966 : vector<8x32xf32>
    %969 = arith.divf %967, %968 : vector<8x32xf32>
    %970 = arith.mulf %961, %911 : vector<8x32xf32>
    %971 = arith.mulf %955, %963 : vector<8x32xf32>
    %972 = arith.addf %970, %971 : vector<8x32xf32>
    %973 = math.tanh %972 : vector<8x32xf32>
    %974 = arith.mulf %969, %973 : vector<8x32xf32>
    %975 = vector.extract_strided_slice %949 {offsets = [0, 0], sizes = [8, 32], strides = [1, 1]} : vector<8x128xf32> to vector<8x32xf32>
    %976 = arith.negf %975 : vector<8x32xf32>
    %977 = math.exp %976 : vector<8x32xf32>
    %cst_253 = arith.constant 1.000000e+00 : f32
    %978 = vector.broadcast %cst_253 : f32 to vector<8x32xf32>
    %979 = arith.addf %978, %977 : vector<8x32xf32>
    %980 = arith.divf %978, %979 : vector<8x32xf32>
    %981 = vector.extract_strided_slice %949 {offsets = [0, 32], sizes = [8, 32], strides = [1, 1]} : vector<8x128xf32> to vector<8x32xf32>
    %982 = arith.negf %981 : vector<8x32xf32>
    %983 = math.exp %982 : vector<8x32xf32>
    %cst_254 = arith.constant 1.000000e+00 : f32
    %984 = vector.broadcast %cst_254 : f32 to vector<8x32xf32>
    %985 = arith.addf %984, %983 : vector<8x32xf32>
    %986 = arith.divf %984, %985 : vector<8x32xf32>
    %987 = vector.extract_strided_slice %949 {offsets = [0, 64], sizes = [8, 32], strides = [1, 1]} : vector<8x128xf32> to vector<8x32xf32>
    %988 = math.tanh %987 : vector<8x32xf32>
    %989 = vector.extract_strided_slice %949 {offsets = [0, 96], sizes = [8, 32], strides = [1, 1]} : vector<8x128xf32> to vector<8x32xf32>
    %990 = arith.negf %989 : vector<8x32xf32>
    %991 = math.exp %990 : vector<8x32xf32>
    %cst_255 = arith.constant 1.000000e+00 : f32
    %992 = vector.broadcast %cst_255 : f32 to vector<8x32xf32>
    %993 = arith.addf %992, %991 : vector<8x32xf32>
    %994 = arith.divf %992, %993 : vector<8x32xf32>
    %995 = arith.mulf %986, %936 : vector<8x32xf32>
    %996 = arith.mulf %980, %988 : vector<8x32xf32>
    %997 = arith.addf %995, %996 : vector<8x32xf32>
    %998 = math.tanh %997 : vector<8x32xf32>
    %999 = arith.mulf %994, %998 : vector<8x32xf32>
    %c56_256 = arith.constant 56 : index
    %c0_257 = arith.constant 0 : index
    %1000 = vector.load %arg22[%c56_256, %c0_257] : memref<64x64xf32, #tpu.memory_space<vmem>>, vector<8x32xf32>
    tpu.vector_store %arg22[%c56_256, %c0_257], %974 {strides = array<i32>} : memref<64x64xf32, #tpu.memory_space<vmem>>, vector<8x32xf32>,
    %c0_258 = arith.constant 0 : index
    %c32_259 = arith.constant 32 : index
    %1001 = vector.load %arg22[%c0_258, %c32_259] : memref<64x64xf32, #tpu.memory_space<vmem>>, vector<8x32xf32>
    tpu.vector_store %arg22[%c0_258, %c32_259], %999 {strides = array<i32>} : memref<64x64xf32, #tpu.memory_space<vmem>>, vector<8x32xf32>,
    %c0_260 = arith.constant 0 : index
    %c0_261 = arith.constant 0 : index
    %1002 = vector.load %arg22[%c0_260, %c0_261] : memref<64x64xf32, #tpu.memory_space<vmem>>, vector<64x64xf32>
    %1003 = arith.truncf %1002 : vector<64x64xf32> to vector<64x64xbf16>
    %c0_262 = arith.constant 0 : index
    %c0_263 = arith.constant 0 : index
    %1004 = vector.load %arg7[%c0_262, %c0_263] : memref<64x256xbf16, #tpu.memory_space<vmem>>, vector<64x256xbf16>
    %cst_264 = arith.constant dense<0.000000e+00> : vector<64x256xf32>
    %1005 = tpu.matmul %1003, %1004, %cst_264 {dimension_numbers = #tpu.dot_dimension_numbers<[1], [0], [0], [1], [0, 0, 1, 1], [], []>} : vector<64x64xbf16>, vector<64x256xbf16>, vector<64x256xf32> -> vector<64x256xf32>
    %c0_265 = arith.constant 0 : index
    %c0_266 = arith.constant 0 : index
    %1006 = vector.load %arg9[%c0_265, %c0_266] : memref<1x256xf32, #tpu.memory_space<vmem>>, vector<1x256xf32>
    %1007 = vector.broadcast %1006 : vector<1x256xf32> to vector<64x256xf32>
    %1008 = arith.addf %1005, %1007 : vector<64x256xf32>
    %c0_267 = arith.constant 0 : index
    %c0_268 = arith.constant 0 : index
    %1009 = vector.load %arg23[%c0_267, %c0_268] : memref<64x256xf32, #tpu.memory_space<vmem>>, vector<64x256xf32>
    tpu.vector_store %arg23[%c0_267, %c0_268], %1008 {strides = array<i32>} : memref<64x256xf32, #tpu.memory_space<vmem>>, vector<64x256xf32>,
    %c0_269 = arith.constant 0 : index
    %c0_270 = arith.constant 0 : index
    %1010 = vector.load %arg8[%c0_269, %c0_270] : memref<64x256xbf16, #tpu.memory_space<vmem>>, vector<64x256xbf16>
    %cst_271 = arith.constant 0.000000e+00 : f32
    %1011 = vector.broadcast %cst_271 : f32 to vector<8x32xf32>
    %cst_272 = arith.constant 0.000000e+00 : f32
    %1012 = vector.broadcast %cst_272 : f32 to vector<8x32xf32>
    %cst_273 = arith.constant 0.000000e+00 : f32
    %1013 = vector.broadcast %cst_273 : f32 to vector<8x32xf32>
    %cst_274 = arith.constant 0.000000e+00 : f32
    %1014 = vector.broadcast %cst_274 : f32 to vector<8x32xf32>
    %1015 = tpu.concatenate %1011, %1013 in 1 : vector<8x32xf32>, vector<8x32xf32> -> vector<8x64xf32>
    %1016 = arith.truncf %1015 : vector<8x64xf32> to vector<8x64xbf16>
    %cst_275 = arith.constant dense<0.000000e+00> : vector<8x256xf32>
    %1017 = tpu.matmul %1016, %1010, %cst_275 {dimension_numbers = #tpu.dot_dimension_numbers<[1], [0], [0], [1], [0, 0, 1, 1], [], []>} : vector<8x64xbf16>, vector<64x256xbf16>, vector<8x256xf32> -> vector<8x256xf32>
    %c0_276 = arith.constant 0 : index
    %c0_277 = arith.constant 0 : index
    %1018 = vector.load %arg23[%c0_276, %c0_277] : memref<64x256xf32, #tpu.memory_space<vmem>>, vector<8x128xf32>
    %1019 = vector.extract_strided_slice %1017 {offsets = [0, 0], sizes = [8, 128], strides = [1, 1]} : vector<8x256xf32> to vector<8x128xf32>
    %1020 = arith.addf %1018, %1019 : vector<8x128xf32>
    %c56_278 = arith.constant 56 : index
    %c128_279 = arith.constant 128 : index
    %1021 = vector.load %arg23[%c56_278, %c128_279] : memref<64x256xf32, #tpu.memory_space<vmem>>, vector<8x128xf32>
    %1022 = vector.extract_strided_slice %1017 {offsets = [0, 128], sizes = [8, 128], strides = [1, 1]} : vector<8x256xf32> to vector<8x128xf32>
    %1023 = arith.addf %1021, %1022 : vector<8x128xf32>
    %1024 = vector.extract_strided_slice %1020 {offsets = [0, 0], sizes = [8, 32], strides = [1, 1]} : vector<8x128xf32> to vector<8x32xf32>
    %1025 = arith.negf %1024 : vector<8x32xf32>
    %1026 = math.exp %1025 : vector<8x32xf32>
    %cst_280 = arith.constant 1.000000e+00 : f32
    %1027 = vector.broadcast %cst_280 : f32 to vector<8x32xf32>
    %1028 = arith.addf %1027, %1026 : vector<8x32xf32>
    %1029 = arith.divf %1027, %1028 : vector<8x32xf32>
    %1030 = vector.extract_strided_slice %1020 {offsets = [0, 32], sizes = [8, 32], strides = [1, 1]} : vector<8x128xf32> to vector<8x32xf32>
    %1031 = arith.negf %1030 : vector<8x32xf32>
    %1032 = math.exp %1031 : vector<8x32xf32>
    %cst_281 = arith.constant 1.000000e+00 : f32
    %1033 = vector.broadcast %cst_281 : f32 to vector<8x32xf32>
    %1034 = arith.addf %1033, %1032 : vector<8x32xf32>
    %1035 = arith.divf %1033, %1034 : vector<8x32xf32>
    %1036 = vector.extract_strided_slice %1020 {offsets = [0, 64], sizes = [8, 32], strides = [1, 1]} : vector<8x128xf32> to vector<8x32xf32>
    %1037 = math.tanh %1036 : vector<8x32xf32>
    %1038 = vector.extract_strided_slice %1020 {offsets = [0, 96], sizes = [8, 32], strides = [1, 1]} : vector<8x128xf32> to vector<8x32xf32>
    %1039 = arith.negf %1038 : vector<8x32xf32>
    %1040 = math.exp %1039 : vector<8x32xf32>
    %cst_282 = arith.constant 1.000000e+00 : f32
    %1041 = vector.broadcast %cst_282 : f32 to vector<8x32xf32>
    %1042 = arith.addf %1041, %1040 : vector<8x32xf32>
    %1043 = arith.divf %1041, %1042 : vector<8x32xf32>
    %1044 = arith.mulf %1035, %1012 : vector<8x32xf32>
    %1045 = arith.mulf %1029, %1037 : vector<8x32xf32>
    %1046 = arith.addf %1044, %1045 : vector<8x32xf32>
    %1047 = math.tanh %1046 : vector<8x32xf32>
    %1048 = arith.mulf %1043, %1047 : vector<8x32xf32>
    %1049 = vector.extract_strided_slice %1023 {offsets = [0, 0], sizes = [8, 32], strides = [1, 1]} : vector<8x128xf32> to vector<8x32xf32>
    %1050 = arith.negf %1049 : vector<8x32xf32>
    %1051 = math.exp %1050 : vector<8x32xf32>
    %cst_283 = arith.constant 1.000000e+00 : f32
    %1052 = vector.broadcast %cst_283 : f32 to vector<8x32xf32>
    %1053 = arith.addf %1052, %1051 : vector<8x32xf32>
    %1054 = arith.divf %1052, %1053 : vector<8x32xf32>
    %1055 = vector.extract_strided_slice %1023 {offsets = [0, 32], sizes = [8, 32], strides = [1, 1]} : vector<8x128xf32> to vector<8x32xf32>
    %1056 = arith.negf %1055 : vector<8x32xf32>
    %1057 = math.exp %1056 : vector<8x32xf32>
    %cst_284 = arith.constant 1.000000e+00 : f32
    %1058 = vector.broadcast %cst_284 : f32 to vector<8x32xf32>
    %1059 = arith.addf %1058, %1057 : vector<8x32xf32>
    %1060 = arith.divf %1058, %1059 : vector<8x32xf32>
    %1061 = vector.extract_strided_slice %1023 {offsets = [0, 64], sizes = [8, 32], strides = [1, 1]} : vector<8x128xf32> to vector<8x32xf32>
    %1062 = math.tanh %1061 : vector<8x32xf32>
    %1063 = vector.extract_strided_slice %1023 {offsets = [0, 96], sizes = [8, 32], strides = [1, 1]} : vector<8x128xf32> to vector<8x32xf32>
    %1064 = arith.negf %1063 : vector<8x32xf32>
    %1065 = math.exp %1064 : vector<8x32xf32>
    %cst_285 = arith.constant 1.000000e+00 : f32
    %1066 = vector.broadcast %cst_285 : f32 to vector<8x32xf32>
    %1067 = arith.addf %1066, %1065 : vector<8x32xf32>
    %1068 = arith.divf %1066, %1067 : vector<8x32xf32>
    %1069 = arith.mulf %1060, %1014 : vector<8x32xf32>
    %1070 = arith.mulf %1054, %1062 : vector<8x32xf32>
    %1071 = arith.addf %1069, %1070 : vector<8x32xf32>
    %1072 = math.tanh %1071 : vector<8x32xf32>
    %1073 = arith.mulf %1068, %1072 : vector<8x32xf32>
    %c0_286 = arith.constant 0 : index
    %c0_287 = arith.constant 0 : index
    %1074 = vector.load %arg21[%c0_286, %c0_287] : memref<64x64xf32, #tpu.memory_space<vmem>>, vector<8x32xf32>
    tpu.vector_store %arg21[%c0_286, %c0_287], %1048 {strides = array<i32>} : memref<64x64xf32, #tpu.memory_space<vmem>>, vector<8x32xf32>,
    %c56_288 = arith.constant 56 : index
    %c32_289 = arith.constant 32 : index
    %1075 = vector.load %arg21[%c56_288, %c32_289] : memref<64x64xf32, #tpu.memory_space<vmem>>, vector<8x32xf32>
    tpu.vector_store %arg21[%c56_288, %c32_289], %1073 {strides = array<i32>} : memref<64x64xf32, #tpu.memory_space<vmem>>, vector<8x32xf32>,
    %1076 = tpu.concatenate %1048, %1073 in 1 : vector<8x32xf32>, vector<8x32xf32> -> vector<8x64xf32>
    %1077 = arith.truncf %1076 : vector<8x64xf32> to vector<8x64xbf16>
    %cst_290 = arith.constant dense<0.000000e+00> : vector<8x256xf32>
    %1078 = tpu.matmul %1077, %1010, %cst_290 {dimension_numbers = #tpu.dot_dimension_numbers<[1], [0], [0], [1], [0, 0, 1, 1], [], []>} : vector<8x64xbf16>, vector<64x256xbf16>, vector<8x256xf32> -> vector<8x256xf32>
    %c8_291 = arith.constant 8 : index
    %c0_292 = arith.constant 0 : index
    %1079 = vector.load %arg23[%c8_291, %c0_292] : memref<64x256xf32, #tpu.memory_space<vmem>>, vector<8x128xf32>
    %1080 = vector.extract_strided_slice %1078 {offsets = [0, 0], sizes = [8, 128], strides = [1, 1]} : vector<8x256xf32> to vector<8x128xf32>
    %1081 = arith.addf %1079, %1080 : vector<8x128xf32>
    %c48_293 = arith.constant 48 : index
    %c128_294 = arith.constant 128 : index
    %1082 = vector.load %arg23[%c48_293, %c128_294] : memref<64x256xf32, #tpu.memory_space<vmem>>, vector<8x128xf32>
    %1083 = vector.extract_strided_slice %1078 {offsets = [0, 128], sizes = [8, 128], strides = [1, 1]} : vector<8x256xf32> to vector<8x128xf32>
    %1084 = arith.addf %1082, %1083 : vector<8x128xf32>
    %1085 = vector.extract_strided_slice %1081 {offsets = [0, 0], sizes = [8, 32], strides = [1, 1]} : vector<8x128xf32> to vector<8x32xf32>
    %1086 = arith.negf %1085 : vector<8x32xf32>
    %1087 = math.exp %1086 : vector<8x32xf32>
    %cst_295 = arith.constant 1.000000e+00 : f32
    %1088 = vector.broadcast %cst_295 : f32 to vector<8x32xf32>
    %1089 = arith.addf %1088, %1087 : vector<8x32xf32>
    %1090 = arith.divf %1088, %1089 : vector<8x32xf32>
    %1091 = vector.extract_strided_slice %1081 {offsets = [0, 32], sizes = [8, 32], strides = [1, 1]} : vector<8x128xf32> to vector<8x32xf32>
    %1092 = arith.negf %1091 : vector<8x32xf32>
    %1093 = math.exp %1092 : vector<8x32xf32>
    %cst_296 = arith.constant 1.000000e+00 : f32
    %1094 = vector.broadcast %cst_296 : f32 to vector<8x32xf32>
    %1095 = arith.addf %1094, %1093 : vector<8x32xf32>
    %1096 = arith.divf %1094, %1095 : vector<8x32xf32>
    %1097 = vector.extract_strided_slice %1081 {offsets = [0, 64], sizes = [8, 32], strides = [1, 1]} : vector<8x128xf32> to vector<8x32xf32>
    %1098 = math.tanh %1097 : vector<8x32xf32>
    %1099 = vector.extract_strided_slice %1081 {offsets = [0, 96], sizes = [8, 32], strides = [1, 1]} : vector<8x128xf32> to vector<8x32xf32>
    %1100 = arith.negf %1099 : vector<8x32xf32>
    %1101 = math.exp %1100 : vector<8x32xf32>
    %cst_297 = arith.constant 1.000000e+00 : f32
    %1102 = vector.broadcast %cst_297 : f32 to vector<8x32xf32>
    %1103 = arith.addf %1102, %1101 : vector<8x32xf32>
    %1104 = arith.divf %1102, %1103 : vector<8x32xf32>
    %1105 = arith.mulf %1096, %1046 : vector<8x32xf32>
    %1106 = arith.mulf %1090, %1098 : vector<8x32xf32>
    %1107 = arith.addf %1105, %1106 : vector<8x32xf32>
    %1108 = math.tanh %1107 : vector<8x32xf32>
    %1109 = arith.mulf %1104, %1108 : vector<8x32xf32>
    %1110 = vector.extract_strided_slice %1084 {offsets = [0, 0], sizes = [8, 32], strides = [1, 1]} : vector<8x128xf32> to vector<8x32xf32>
    %1111 = arith.negf %1110 : vector<8x32xf32>
    %1112 = math.exp %1111 : vector<8x32xf32>
    %cst_298 = arith.constant 1.000000e+00 : f32
    %1113 = vector.broadcast %cst_298 : f32 to vector<8x32xf32>
    %1114 = arith.addf %1113, %1112 : vector<8x32xf32>
    %1115 = arith.divf %1113, %1114 : vector<8x32xf32>
    %1116 = vector.extract_strided_slice %1084 {offsets = [0, 32], sizes = [8, 32], strides = [1, 1]} : vector<8x128xf32> to vector<8x32xf32>
    %1117 = arith.negf %1116 : vector<8x32xf32>
    %1118 = math.exp %1117 : vector<8x32xf32>
    %cst_299 = arith.constant 1.000000e+00 : f32
    %1119 = vector.broadcast %cst_299 : f32 to vector<8x32xf32>
    %1120 = arith.addf %1119, %1118 : vector<8x32xf32>
    %1121 = arith.divf %1119, %1120 : vector<8x32xf32>
    %1122 = vector.extract_strided_slice %1084 {offsets = [0, 64], sizes = [8, 32], strides = [1, 1]} : vector<8x128xf32> to vector<8x32xf32>
    %1123 = math.tanh %1122 : vector<8x32xf32>
    %1124 = vector.extract_strided_slice %1084 {offsets = [0, 96], sizes = [8, 32], strides = [1, 1]} : vector<8x128xf32> to vector<8x32xf32>
    %1125 = arith.negf %1124 : vector<8x32xf32>
    %1126 = math.exp %1125 : vector<8x32xf32>
    %cst_300 = arith.constant 1.000000e+00 : f32
    %1127 = vector.broadcast %cst_300 : f32 to vector<8x32xf32>
    %1128 = arith.addf %1127, %1126 : vector<8x32xf32>
    %1129 = arith.divf %1127, %1128 : vector<8x32xf32>
    %1130 = arith.mulf %1121, %1071 : vector<8x32xf32>
    %1131 = arith.mulf %1115, %1123 : vector<8x32xf32>
    %1132 = arith.addf %1130, %1131 : vector<8x32xf32>
    %1133 = math.tanh %1132 : vector<8x32xf32>
    %1134 = arith.mulf %1129, %1133 : vector<8x32xf32>
    %c8_301 = arith.constant 8 : index
    %c0_302 = arith.constant 0 : index
    %1135 = vector.load %arg21[%c8_301, %c0_302] : memref<64x64xf32, #tpu.memory_space<vmem>>, vector<8x32xf32>
    tpu.vector_store %arg21[%c8_301, %c0_302], %1109 {strides = array<i32>} : memref<64x64xf32, #tpu.memory_space<vmem>>, vector<8x32xf32>,
    %c48_303 = arith.constant 48 : index
    %c32_304 = arith.constant 32 : index
    %1136 = vector.load %arg21[%c48_303, %c32_304] : memref<64x64xf32, #tpu.memory_space<vmem>>, vector<8x32xf32>
    tpu.vector_store %arg21[%c48_303, %c32_304], %1134 {strides = array<i32>} : memref<64x64xf32, #tpu.memory_space<vmem>>, vector<8x32xf32>,
    %1137 = tpu.concatenate %1109, %1134 in 1 : vector<8x32xf32>, vector<8x32xf32> -> vector<8x64xf32>
    %1138 = arith.truncf %1137 : vector<8x64xf32> to vector<8x64xbf16>
    %cst_305 = arith.constant dense<0.000000e+00> : vector<8x256xf32>
    %1139 = tpu.matmul %1138, %1010, %cst_305 {dimension_numbers = #tpu.dot_dimension_numbers<[1], [0], [0], [1], [0, 0, 1, 1], [], []>} : vector<8x64xbf16>, vector<64x256xbf16>, vector<8x256xf32> -> vector<8x256xf32>
    %c16_306 = arith.constant 16 : index
    %c0_307 = arith.constant 0 : index
    %1140 = vector.load %arg23[%c16_306, %c0_307] : memref<64x256xf32, #tpu.memory_space<vmem>>, vector<8x128xf32>
    %1141 = vector.extract_strided_slice %1139 {offsets = [0, 0], sizes = [8, 128], strides = [1, 1]} : vector<8x256xf32> to vector<8x128xf32>
    %1142 = arith.addf %1140, %1141 : vector<8x128xf32>
    %c40_308 = arith.constant 40 : index
    %c128_309 = arith.constant 128 : index
    %1143 = vector.load %arg23[%c40_308, %c128_309] : memref<64x256xf32, #tpu.memory_space<vmem>>, vector<8x128xf32>
    %1144 = vector.extract_strided_slice %1139 {offsets = [0, 128], sizes = [8, 128], strides = [1, 1]} : vector<8x256xf32> to vector<8x128xf32>
    %1145 = arith.addf %1143, %1144 : vector<8x128xf32>
    %1146 = vector.extract_strided_slice %1142 {offsets = [0, 0], sizes = [8, 32], strides = [1, 1]} : vector<8x128xf32> to vector<8x32xf32>
    %1147 = arith.negf %1146 : vector<8x32xf32>
    %1148 = math.exp %1147 : vector<8x32xf32>
    %cst_310 = arith.constant 1.000000e+00 : f32
    %1149 = vector.broadcast %cst_310 : f32 to vector<8x32xf32>
    %1150 = arith.addf %1149, %1148 : vector<8x32xf32>
    %1151 = arith.divf %1149, %1150 : vector<8x32xf32>
    %1152 = vector.extract_strided_slice %1142 {offsets = [0, 32], sizes = [8, 32], strides = [1, 1]} : vector<8x128xf32> to vector<8x32xf32>
    %1153 = arith.negf %1152 : vector<8x32xf32>
    %1154 = math.exp %1153 : vector<8x32xf32>
    %cst_311 = arith.constant 1.000000e+00 : f32
    %1155 = vector.broadcast %cst_311 : f32 to vector<8x32xf32>
    %1156 = arith.addf %1155, %1154 : vector<8x32xf32>
    %1157 = arith.divf %1155, %1156 : vector<8x32xf32>
    %1158 = vector.extract_strided_slice %1142 {offsets = [0, 64], sizes = [8, 32], strides = [1, 1]} : vector<8x128xf32> to vector<8x32xf32>
    %1159 = math.tanh %1158 : vector<8x32xf32>
    %1160 = vector.extract_strided_slice %1142 {offsets = [0, 96], sizes = [8, 32], strides = [1, 1]} : vector<8x128xf32> to vector<8x32xf32>
    %1161 = arith.negf %1160 : vector<8x32xf32>
    %1162 = math.exp %1161 : vector<8x32xf32>
    %cst_312 = arith.constant 1.000000e+00 : f32
    %1163 = vector.broadcast %cst_312 : f32 to vector<8x32xf32>
    %1164 = arith.addf %1163, %1162 : vector<8x32xf32>
    %1165 = arith.divf %1163, %1164 : vector<8x32xf32>
    %1166 = arith.mulf %1157, %1107 : vector<8x32xf32>
    %1167 = arith.mulf %1151, %1159 : vector<8x32xf32>
    %1168 = arith.addf %1166, %1167 : vector<8x32xf32>
    %1169 = math.tanh %1168 : vector<8x32xf32>
    %1170 = arith.mulf %1165, %1169 : vector<8x32xf32>
    %1171 = vector.extract_strided_slice %1145 {offsets = [0, 0], sizes = [8, 32], strides = [1, 1]} : vector<8x128xf32> to vector<8x32xf32>
    %1172 = arith.negf %1171 : vector<8x32xf32>
    %1173 = math.exp %1172 : vector<8x32xf32>
    %cst_313 = arith.constant 1.000000e+00 : f32
    %1174 = vector.broadcast %cst_313 : f32 to vector<8x32xf32>
    %1175 = arith.addf %1174, %1173 : vector<8x32xf32>
    %1176 = arith.divf %1174, %1175 : vector<8x32xf32>
    %1177 = vector.extract_strided_slice %1145 {offsets = [0, 32], sizes = [8, 32], strides = [1, 1]} : vector<8x128xf32> to vector<8x32xf32>
    %1178 = arith.negf %1177 : vector<8x32xf32>
    %1179 = math.exp %1178 : vector<8x32xf32>
    %cst_314 = arith.constant 1.000000e+00 : f32
    %1180 = vector.broadcast %cst_314 : f32 to vector<8x32xf32>
    %1181 = arith.addf %1180, %1179 : vector<8x32xf32>
    %1182 = arith.divf %1180, %1181 : vector<8x32xf32>
    %1183 = vector.extract_strided_slice %1145 {offsets = [0, 64], sizes = [8, 32], strides = [1, 1]} : vector<8x128xf32> to vector<8x32xf32>
    %1184 = math.tanh %1183 : vector<8x32xf32>
    %1185 = vector.extract_strided_slice %1145 {offsets = [0, 96], sizes = [8, 32], strides = [1, 1]} : vector<8x128xf32> to vector<8x32xf32>
    %1186 = arith.negf %1185 : vector<8x32xf32>
    %1187 = math.exp %1186 : vector<8x32xf32>
    %cst_315 = arith.constant 1.000000e+00 : f32
    %1188 = vector.broadcast %cst_315 : f32 to vector<8x32xf32>
    %1189 = arith.addf %1188, %1187 : vector<8x32xf32>
    %1190 = arith.divf %1188, %1189 : vector<8x32xf32>
    %1191 = arith.mulf %1182, %1132 : vector<8x32xf32>
    %1192 = arith.mulf %1176, %1184 : vector<8x32xf32>
    %1193 = arith.addf %1191, %1192 : vector<8x32xf32>
    %1194 = math.tanh %1193 : vector<8x32xf32>
    %1195 = arith.mulf %1190, %1194 : vector<8x32xf32>
    %c16_316 = arith.constant 16 : index
    %c0_317 = arith.constant 0 : index
    %1196 = vector.load %arg21[%c16_316, %c0_317] : memref<64x64xf32, #tpu.memory_space<vmem>>, vector<8x32xf32>
    tpu.vector_store %arg21[%c16_316, %c0_317], %1170 {strides = array<i32>} : memref<64x64xf32, #tpu.memory_space<vmem>>, vector<8x32xf32>,
    %c40_318 = arith.constant 40 : index
    %c32_319 = arith.constant 32 : index
    %1197 = vector.load %arg21[%c40_318, %c32_319] : memref<64x64xf32, #tpu.memory_space<vmem>>, vector<8x32xf32>
    tpu.vector_store %arg21[%c40_318, %c32_319], %1195 {strides = array<i32>} : memref<64x64xf32, #tpu.memory_space<vmem>>, vector<8x32xf32>,
    %1198 = tpu.concatenate %1170, %1195 in 1 : vector<8x32xf32>, vector<8x32xf32> -> vector<8x64xf32>
    %1199 = arith.truncf %1198 : vector<8x64xf32> to vector<8x64xbf16>
    %cst_320 = arith.constant dense<0.000000e+00> : vector<8x256xf32>
    %1200 = tpu.matmul %1199, %1010, %cst_320 {dimension_numbers = #tpu.dot_dimension_numbers<[1], [0], [0], [1], [0, 0, 1, 1], [], []>} : vector<8x64xbf16>, vector<64x256xbf16>, vector<8x256xf32> -> vector<8x256xf32>
    %c24_321 = arith.constant 24 : index
    %c0_322 = arith.constant 0 : index
    %1201 = vector.load %arg23[%c24_321, %c0_322] : memref<64x256xf32, #tpu.memory_space<vmem>>, vector<8x128xf32>
    %1202 = vector.extract_strided_slice %1200 {offsets = [0, 0], sizes = [8, 128], strides = [1, 1]} : vector<8x256xf32> to vector<8x128xf32>
    %1203 = arith.addf %1201, %1202 : vector<8x128xf32>
    %c32_323 = arith.constant 32 : index
    %c128_324 = arith.constant 128 : index
    %1204 = vector.load %arg23[%c32_323, %c128_324] : memref<64x256xf32, #tpu.memory_space<vmem>>, vector<8x128xf32>
    %1205 = vector.extract_strided_slice %1200 {offsets = [0, 128], sizes = [8, 128], strides = [1, 1]} : vector<8x256xf32> to vector<8x128xf32>
    %1206 = arith.addf %1204, %1205 : vector<8x128xf32>
    %1207 = vector.extract_strided_slice %1203 {offsets = [0, 0], sizes = [8, 32], strides = [1, 1]} : vector<8x128xf32> to vector<8x32xf32>
    %1208 = arith.negf %1207 : vector<8x32xf32>
    %1209 = math.exp %1208 : vector<8x32xf32>
    %cst_325 = arith.constant 1.000000e+00 : f32
    %1210 = vector.broadcast %cst_325 : f32 to vector<8x32xf32>
    %1211 = arith.addf %1210, %1209 : vector<8x32xf32>
    %1212 = arith.divf %1210, %1211 : vector<8x32xf32>
    %1213 = vector.extract_strided_slice %1203 {offsets = [0, 32], sizes = [8, 32], strides = [1, 1]} : vector<8x128xf32> to vector<8x32xf32>
    %1214 = arith.negf %1213 : vector<8x32xf32>
    %1215 = math.exp %1214 : vector<8x32xf32>
    %cst_326 = arith.constant 1.000000e+00 : f32
    %1216 = vector.broadcast %cst_326 : f32 to vector<8x32xf32>
    %1217 = arith.addf %1216, %1215 : vector<8x32xf32>
    %1218 = arith.divf %1216, %1217 : vector<8x32xf32>
    %1219 = vector.extract_strided_slice %1203 {offsets = [0, 64], sizes = [8, 32], strides = [1, 1]} : vector<8x128xf32> to vector<8x32xf32>
    %1220 = math.tanh %1219 : vector<8x32xf32>
    %1221 = vector.extract_strided_slice %1203 {offsets = [0, 96], sizes = [8, 32], strides = [1, 1]} : vector<8x128xf32> to vector<8x32xf32>
    %1222 = arith.negf %1221 : vector<8x32xf32>
    %1223 = math.exp %1222 : vector<8x32xf32>
    %cst_327 = arith.constant 1.000000e+00 : f32
    %1224 = vector.broadcast %cst_327 : f32 to vector<8x32xf32>
    %1225 = arith.addf %1224, %1223 : vector<8x32xf32>
    %1226 = arith.divf %1224, %1225 : vector<8x32xf32>
    %1227 = arith.mulf %1218, %1168 : vector<8x32xf32>
    %1228 = arith.mulf %1212, %1220 : vector<8x32xf32>
    %1229 = arith.addf %1227, %1228 : vector<8x32xf32>
    %1230 = math.tanh %1229 : vector<8x32xf32>
    %1231 = arith.mulf %1226, %1230 : vector<8x32xf32>
    %1232 = vector.extract_strided_slice %1206 {offsets = [0, 0], sizes = [8, 32], strides = [1, 1]} : vector<8x128xf32> to vector<8x32xf32>
    %1233 = arith.negf %1232 : vector<8x32xf32>
    %1234 = math.exp %1233 : vector<8x32xf32>
    %cst_328 = arith.constant 1.000000e+00 : f32
    %1235 = vector.broadcast %cst_328 : f32 to vector<8x32xf32>
    %1236 = arith.addf %1235, %1234 : vector<8x32xf32>
    %1237 = arith.divf %1235, %1236 : vector<8x32xf32>
    %1238 = vector.extract_strided_slice %1206 {offsets = [0, 32], sizes = [8, 32], strides = [1, 1]} : vector<8x128xf32> to vector<8x32xf32>
    %1239 = arith.negf %1238 : vector<8x32xf32>
    %1240 = math.exp %1239 : vector<8x32xf32>
    %cst_329 = arith.constant 1.000000e+00 : f32
    %1241 = vector.broadcast %cst_329 : f32 to vector<8x32xf32>
    %1242 = arith.addf %1241, %1240 : vector<8x32xf32>
    %1243 = arith.divf %1241, %1242 : vector<8x32xf32>
    %1244 = vector.extract_strided_slice %1206 {offsets = [0, 64], sizes = [8, 32], strides = [1, 1]} : vector<8x128xf32> to vector<8x32xf32>
    %1245 = math.tanh %1244 : vector<8x32xf32>
    %1246 = vector.extract_strided_slice %1206 {offsets = [0, 96], sizes = [8, 32], strides = [1, 1]} : vector<8x128xf32> to vector<8x32xf32>
    %1247 = arith.negf %1246 : vector<8x32xf32>
    %1248 = math.exp %1247 : vector<8x32xf32>
    %cst_330 = arith.constant 1.000000e+00 : f32
    %1249 = vector.broadcast %cst_330 : f32 to vector<8x32xf32>
    %1250 = arith.addf %1249, %1248 : vector<8x32xf32>
    %1251 = arith.divf %1249, %1250 : vector<8x32xf32>
    %1252 = arith.mulf %1243, %1193 : vector<8x32xf32>
    %1253 = arith.mulf %1237, %1245 : vector<8x32xf32>
    %1254 = arith.addf %1252, %1253 : vector<8x32xf32>
    %1255 = math.tanh %1254 : vector<8x32xf32>
    %1256 = arith.mulf %1251, %1255 : vector<8x32xf32>
    %c24_331 = arith.constant 24 : index
    %c0_332 = arith.constant 0 : index
    %1257 = vector.load %arg21[%c24_331, %c0_332] : memref<64x64xf32, #tpu.memory_space<vmem>>, vector<8x32xf32>
    tpu.vector_store %arg21[%c24_331, %c0_332], %1231 {strides = array<i32>} : memref<64x64xf32, #tpu.memory_space<vmem>>, vector<8x32xf32>,
    %c32_333 = arith.constant 32 : index
    %c32_334 = arith.constant 32 : index
    %1258 = vector.load %arg21[%c32_333, %c32_334] : memref<64x64xf32, #tpu.memory_space<vmem>>, vector<8x32xf32>
    tpu.vector_store %arg21[%c32_333, %c32_334], %1256 {strides = array<i32>} : memref<64x64xf32, #tpu.memory_space<vmem>>, vector<8x32xf32>,
    %1259 = tpu.concatenate %1231, %1256 in 1 : vector<8x32xf32>, vector<8x32xf32> -> vector<8x64xf32>
    %1260 = arith.truncf %1259 : vector<8x64xf32> to vector<8x64xbf16>
    %cst_335 = arith.constant dense<0.000000e+00> : vector<8x256xf32>
    %1261 = tpu.matmul %1260, %1010, %cst_335 {dimension_numbers = #tpu.dot_dimension_numbers<[1], [0], [0], [1], [0, 0, 1, 1], [], []>} : vector<8x64xbf16>, vector<64x256xbf16>, vector<8x256xf32> -> vector<8x256xf32>
    %c32_336 = arith.constant 32 : index
    %c0_337 = arith.constant 0 : index
    %1262 = vector.load %arg23[%c32_336, %c0_337] : memref<64x256xf32, #tpu.memory_space<vmem>>, vector<8x128xf32>
    %1263 = vector.extract_strided_slice %1261 {offsets = [0, 0], sizes = [8, 128], strides = [1, 1]} : vector<8x256xf32> to vector<8x128xf32>
    %1264 = arith.addf %1262, %1263 : vector<8x128xf32>
    %c24_338 = arith.constant 24 : index
    %c128_339 = arith.constant 128 : index
    %1265 = vector.load %arg23[%c24_338, %c128_339] : memref<64x256xf32, #tpu.memory_space<vmem>>, vector<8x128xf32>
    %1266 = vector.extract_strided_slice %1261 {offsets = [0, 128], sizes = [8, 128], strides = [1, 1]} : vector<8x256xf32> to vector<8x128xf32>
    %1267 = arith.addf %1265, %1266 : vector<8x128xf32>
    %1268 = vector.extract_strided_slice %1264 {offsets = [0, 0], sizes = [8, 32], strides = [1, 1]} : vector<8x128xf32> to vector<8x32xf32>
    %1269 = arith.negf %1268 : vector<8x32xf32>
    %1270 = math.exp %1269 : vector<8x32xf32>
    %cst_340 = arith.constant 1.000000e+00 : f32
    %1271 = vector.broadcast %cst_340 : f32 to vector<8x32xf32>
    %1272 = arith.addf %1271, %1270 : vector<8x32xf32>
    %1273 = arith.divf %1271, %1272 : vector<8x32xf32>
    %1274 = vector.extract_strided_slice %1264 {offsets = [0, 32], sizes = [8, 32], strides = [1, 1]} : vector<8x128xf32> to vector<8x32xf32>
    %1275 = arith.negf %1274 : vector<8x32xf32>
    %1276 = math.exp %1275 : vector<8x32xf32>
    %cst_341 = arith.constant 1.000000e+00 : f32
    %1277 = vector.broadcast %cst_341 : f32 to vector<8x32xf32>
    %1278 = arith.addf %1277, %1276 : vector<8x32xf32>
    %1279 = arith.divf %1277, %1278 : vector<8x32xf32>
    %1280 = vector.extract_strided_slice %1264 {offsets = [0, 64], sizes = [8, 32], strides = [1, 1]} : vector<8x128xf32> to vector<8x32xf32>
    %1281 = math.tanh %1280 : vector<8x32xf32>
    %1282 = vector.extract_strided_slice %1264 {offsets = [0, 96], sizes = [8, 32], strides = [1, 1]} : vector<8x128xf32> to vector<8x32xf32>
    %1283 = arith.negf %1282 : vector<8x32xf32>
    %1284 = math.exp %1283 : vector<8x32xf32>
    %cst_342 = arith.constant 1.000000e+00 : f32
    %1285 = vector.broadcast %cst_342 : f32 to vector<8x32xf32>
    %1286 = arith.addf %1285, %1284 : vector<8x32xf32>
    %1287 = arith.divf %1285, %1286 : vector<8x32xf32>
    %1288 = arith.mulf %1279, %1229 : vector<8x32xf32>
    %1289 = arith.mulf %1273, %1281 : vector<8x32xf32>
    %1290 = arith.addf %1288, %1289 : vector<8x32xf32>
    %1291 = math.tanh %1290 : vector<8x32xf32>
    %1292 = arith.mulf %1287, %1291 : vector<8x32xf32>
    %1293 = vector.extract_strided_slice %1267 {offsets = [0, 0], sizes = [8, 32], strides = [1, 1]} : vector<8x128xf32> to vector<8x32xf32>
    %1294 = arith.negf %1293 : vector<8x32xf32>
    %1295 = math.exp %1294 : vector<8x32xf32>
    %cst_343 = arith.constant 1.000000e+00 : f32
    %1296 = vector.broadcast %cst_343 : f32 to vector<8x32xf32>
    %1297 = arith.addf %1296, %1295 : vector<8x32xf32>
    %1298 = arith.divf %1296, %1297 : vector<8x32xf32>
    %1299 = vector.extract_strided_slice %1267 {offsets = [0, 32], sizes = [8, 32], strides = [1, 1]} : vector<8x128xf32> to vector<8x32xf32>
    %1300 = arith.negf %1299 : vector<8x32xf32>
    %1301 = math.exp %1300 : vector<8x32xf32>
    %cst_344 = arith.constant 1.000000e+00 : f32
    %1302 = vector.broadcast %cst_344 : f32 to vector<8x32xf32>
    %1303 = arith.addf %1302, %1301 : vector<8x32xf32>
    %1304 = arith.divf %1302, %1303 : vector<8x32xf32>
    %1305 = vector.extract_strided_slice %1267 {offsets = [0, 64], sizes = [8, 32], strides = [1, 1]} : vector<8x128xf32> to vector<8x32xf32>
    %1306 = math.tanh %1305 : vector<8x32xf32>
    %1307 = vector.extract_strided_slice %1267 {offsets = [0, 96], sizes = [8, 32], strides = [1, 1]} : vector<8x128xf32> to vector<8x32xf32>
    %1308 = arith.negf %1307 : vector<8x32xf32>
    %1309 = math.exp %1308 : vector<8x32xf32>
    %cst_345 = arith.constant 1.000000e+00 : f32
    %1310 = vector.broadcast %cst_345 : f32 to vector<8x32xf32>
    %1311 = arith.addf %1310, %1309 : vector<8x32xf32>
    %1312 = arith.divf %1310, %1311 : vector<8x32xf32>
    %1313 = arith.mulf %1304, %1254 : vector<8x32xf32>
    %1314 = arith.mulf %1298, %1306 : vector<8x32xf32>
    %1315 = arith.addf %1313, %1314 : vector<8x32xf32>
    %1316 = math.tanh %1315 : vector<8x32xf32>
    %1317 = arith.mulf %1312, %1316 : vector<8x32xf32>
    %c32_346 = arith.constant 32 : index
    %c0_347 = arith.constant 0 : index
    %1318 = vector.load %arg21[%c32_346, %c0_347] : memref<64x64xf32, #tpu.memory_space<vmem>>, vector<8x32xf32>
    tpu.vector_store %arg21[%c32_346, %c0_347], %1292 {strides = array<i32>} : memref<64x64xf32, #tpu.memory_space<vmem>>, vector<8x32xf32>,
    %c24_348 = arith.constant 24 : index
    %c32_349 = arith.constant 32 : index
    %1319 = vector.load %arg21[%c24_348, %c32_349] : memref<64x64xf32, #tpu.memory_space<vmem>>, vector<8x32xf32>
    tpu.vector_store %arg21[%c24_348, %c32_349], %1317 {strides = array<i32>} : memref<64x64xf32, #tpu.memory_space<vmem>>, vector<8x32xf32>,
    %1320 = tpu.concatenate %1292, %1317 in 1 : vector<8x32xf32>, vector<8x32xf32> -> vector<8x64xf32>
    %1321 = arith.truncf %1320 : vector<8x64xf32> to vector<8x64xbf16>
    %cst_350 = arith.constant dense<0.000000e+00> : vector<8x256xf32>
    %1322 = tpu.matmul %1321, %1010, %cst_350 {dimension_numbers = #tpu.dot_dimension_numbers<[1], [0], [0], [1], [0, 0, 1, 1], [], []>} : vector<8x64xbf16>, vector<64x256xbf16>, vector<8x256xf32> -> vector<8x256xf32>
    %c40_351 = arith.constant 40 : index
    %c0_352 = arith.constant 0 : index
    %1323 = vector.load %arg23[%c40_351, %c0_352] : memref<64x256xf32, #tpu.memory_space<vmem>>, vector<8x128xf32>
    %1324 = vector.extract_strided_slice %1322 {offsets = [0, 0], sizes = [8, 128], strides = [1, 1]} : vector<8x256xf32> to vector<8x128xf32>
    %1325 = arith.addf %1323, %1324 : vector<8x128xf32>
    %c16_353 = arith.constant 16 : index
    %c128_354 = arith.constant 128 : index
    %1326 = vector.load %arg23[%c16_353, %c128_354] : memref<64x256xf32, #tpu.memory_space<vmem>>, vector<8x128xf32>
    %1327 = vector.extract_strided_slice %1322 {offsets = [0, 128], sizes = [8, 128], strides = [1, 1]} : vector<8x256xf32> to vector<8x128xf32>
    %1328 = arith.addf %1326, %1327 : vector<8x128xf32>
    %1329 = vector.extract_strided_slice %1325 {offsets = [0, 0], sizes = [8, 32], strides = [1, 1]} : vector<8x128xf32> to vector<8x32xf32>
    %1330 = arith.negf %1329 : vector<8x32xf32>
    %1331 = math.exp %1330 : vector<8x32xf32>
    %cst_355 = arith.constant 1.000000e+00 : f32
    %1332 = vector.broadcast %cst_355 : f32 to vector<8x32xf32>
    %1333 = arith.addf %1332, %1331 : vector<8x32xf32>
    %1334 = arith.divf %1332, %1333 : vector<8x32xf32>
    %1335 = vector.extract_strided_slice %1325 {offsets = [0, 32], sizes = [8, 32], strides = [1, 1]} : vector<8x128xf32> to vector<8x32xf32>
    %1336 = arith.negf %1335 : vector<8x32xf32>
    %1337 = math.exp %1336 : vector<8x32xf32>
    %cst_356 = arith.constant 1.000000e+00 : f32
    %1338 = vector.broadcast %cst_356 : f32 to vector<8x32xf32>
    %1339 = arith.addf %1338, %1337 : vector<8x32xf32>
    %1340 = arith.divf %1338, %1339 : vector<8x32xf32>
    %1341 = vector.extract_strided_slice %1325 {offsets = [0, 64], sizes = [8, 32], strides = [1, 1]} : vector<8x128xf32> to vector<8x32xf32>
    %1342 = math.tanh %1341 : vector<8x32xf32>
    %1343 = vector.extract_strided_slice %1325 {offsets = [0, 96], sizes = [8, 32], strides = [1, 1]} : vector<8x128xf32> to vector<8x32xf32>
    %1344 = arith.negf %1343 : vector<8x32xf32>
    %1345 = math.exp %1344 : vector<8x32xf32>
    %cst_357 = arith.constant 1.000000e+00 : f32
    %1346 = vector.broadcast %cst_357 : f32 to vector<8x32xf32>
    %1347 = arith.addf %1346, %1345 : vector<8x32xf32>
    %1348 = arith.divf %1346, %1347 : vector<8x32xf32>
    %1349 = arith.mulf %1340, %1290 : vector<8x32xf32>
    %1350 = arith.mulf %1334, %1342 : vector<8x32xf32>
    %1351 = arith.addf %1349, %1350 : vector<8x32xf32>
    %1352 = math.tanh %1351 : vector<8x32xf32>
    %1353 = arith.mulf %1348, %1352 : vector<8x32xf32>
    %1354 = vector.extract_strided_slice %1328 {offsets = [0, 0], sizes = [8, 32], strides = [1, 1]} : vector<8x128xf32> to vector<8x32xf32>
    %1355 = arith.negf %1354 : vector<8x32xf32>
    %1356 = math.exp %1355 : vector<8x32xf32>
    %cst_358 = arith.constant 1.000000e+00 : f32
    %1357 = vector.broadcast %cst_358 : f32 to vector<8x32xf32>
    %1358 = arith.addf %1357, %1356 : vector<8x32xf32>
    %1359 = arith.divf %1357, %1358 : vector<8x32xf32>
    %1360 = vector.extract_strided_slice %1328 {offsets = [0, 32], sizes = [8, 32], strides = [1, 1]} : vector<8x128xf32> to vector<8x32xf32>
    %1361 = arith.negf %1360 : vector<8x32xf32>
    %1362 = math.exp %1361 : vector<8x32xf32>
    %cst_359 = arith.constant 1.000000e+00 : f32
    %1363 = vector.broadcast %cst_359 : f32 to vector<8x32xf32>
    %1364 = arith.addf %1363, %1362 : vector<8x32xf32>
    %1365 = arith.divf %1363, %1364 : vector<8x32xf32>
    %1366 = vector.extract_strided_slice %1328 {offsets = [0, 64], sizes = [8, 32], strides = [1, 1]} : vector<8x128xf32> to vector<8x32xf32>
    %1367 = math.tanh %1366 : vector<8x32xf32>
    %1368 = vector.extract_strided_slice %1328 {offsets = [0, 96], sizes = [8, 32], strides = [1, 1]} : vector<8x128xf32> to vector<8x32xf32>
    %1369 = arith.negf %1368 : vector<8x32xf32>
    %1370 = math.exp %1369 : vector<8x32xf32>
    %cst_360 = arith.constant 1.000000e+00 : f32
    %1371 = vector.broadcast %cst_360 : f32 to vector<8x32xf32>
    %1372 = arith.addf %1371, %1370 : vector<8x32xf32>
    %1373 = arith.divf %1371, %1372 : vector<8x32xf32>
    %1374 = arith.mulf %1365, %1315 : vector<8x32xf32>
    %1375 = arith.mulf %1359, %1367 : vector<8x32xf32>
    %1376 = arith.addf %1374, %1375 : vector<8x32xf32>
    %1377 = math.tanh %1376 : vector<8x32xf32>
    %1378 = arith.mulf %1373, %1377 : vector<8x32xf32>
    %c40_361 = arith.constant 40 : index
    %c0_362 = arith.constant 0 : index
    %1379 = vector.load %arg21[%c40_361, %c0_362] : memref<64x64xf32, #tpu.memory_space<vmem>>, vector<8x32xf32>
    tpu.vector_store %arg21[%c40_361, %c0_362], %1353 {strides = array<i32>} : memref<64x64xf32, #tpu.memory_space<vmem>>, vector<8x32xf32>,
    %c16_363 = arith.constant 16 : index
    %c32_364 = arith.constant 32 : index
    %1380 = vector.load %arg21[%c16_363, %c32_364] : memref<64x64xf32, #tpu.memory_space<vmem>>, vector<8x32xf32>
    tpu.vector_store %arg21[%c16_363, %c32_364], %1378 {strides = array<i32>} : memref<64x64xf32, #tpu.memory_space<vmem>>, vector<8x32xf32>,
    %1381 = tpu.concatenate %1353, %1378 in 1 : vector<8x32xf32>, vector<8x32xf32> -> vector<8x64xf32>
    %1382 = arith.truncf %1381 : vector<8x64xf32> to vector<8x64xbf16>
    %cst_365 = arith.constant dense<0.000000e+00> : vector<8x256xf32>
    %1383 = tpu.matmul %1382, %1010, %cst_365 {dimension_numbers = #tpu.dot_dimension_numbers<[1], [0], [0], [1], [0, 0, 1, 1], [], []>} : vector<8x64xbf16>, vector<64x256xbf16>, vector<8x256xf32> -> vector<8x256xf32>
    %c48_366 = arith.constant 48 : index
    %c0_367 = arith.constant 0 : index
    %1384 = vector.load %arg23[%c48_366, %c0_367] : memref<64x256xf32, #tpu.memory_space<vmem>>, vector<8x128xf32>
    %1385 = vector.extract_strided_slice %1383 {offsets = [0, 0], sizes = [8, 128], strides = [1, 1]} : vector<8x256xf32> to vector<8x128xf32>
    %1386 = arith.addf %1384, %1385 : vector<8x128xf32>
    %c8_368 = arith.constant 8 : index
    %c128_369 = arith.constant 128 : index
    %1387 = vector.load %arg23[%c8_368, %c128_369] : memref<64x256xf32, #tpu.memory_space<vmem>>, vector<8x128xf32>
    %1388 = vector.extract_strided_slice %1383 {offsets = [0, 128], sizes = [8, 128], strides = [1, 1]} : vector<8x256xf32> to vector<8x128xf32>
    %1389 = arith.addf %1387, %1388 : vector<8x128xf32>
    %1390 = vector.extract_strided_slice %1386 {offsets = [0, 0], sizes = [8, 32], strides = [1, 1]} : vector<8x128xf32> to vector<8x32xf32>
    %1391 = arith.negf %1390 : vector<8x32xf32>
    %1392 = math.exp %1391 : vector<8x32xf32>
    %cst_370 = arith.constant 1.000000e+00 : f32
    %1393 = vector.broadcast %cst_370 : f32 to vector<8x32xf32>
    %1394 = arith.addf %1393, %1392 : vector<8x32xf32>
    %1395 = arith.divf %1393, %1394 : vector<8x32xf32>
    %1396 = vector.extract_strided_slice %1386 {offsets = [0, 32], sizes = [8, 32], strides = [1, 1]} : vector<8x128xf32> to vector<8x32xf32>
    %1397 = arith.negf %1396 : vector<8x32xf32>
    %1398 = math.exp %1397 : vector<8x32xf32>
    %cst_371 = arith.constant 1.000000e+00 : f32
    %1399 = vector.broadcast %cst_371 : f32 to vector<8x32xf32>
    %1400 = arith.addf %1399, %1398 : vector<8x32xf32>
    %1401 = arith.divf %1399, %1400 : vector<8x32xf32>
    %1402 = vector.extract_strided_slice %1386 {offsets = [0, 64], sizes = [8, 32], strides = [1, 1]} : vector<8x128xf32> to vector<8x32xf32>
    %1403 = math.tanh %1402 : vector<8x32xf32>
    %1404 = vector.extract_strided_slice %1386 {offsets = [0, 96], sizes = [8, 32], strides = [1, 1]} : vector<8x128xf32> to vector<8x32xf32>
    %1405 = arith.negf %1404 : vector<8x32xf32>
    %1406 = math.exp %1405 : vector<8x32xf32>
    %cst_372 = arith.constant 1.000000e+00 : f32
    %1407 = vector.broadcast %cst_372 : f32 to vector<8x32xf32>
    %1408 = arith.addf %1407, %1406 : vector<8x32xf32>
    %1409 = arith.divf %1407, %1408 : vector<8x32xf32>
    %1410 = arith.mulf %1401, %1351 : vector<8x32xf32>
    %1411 = arith.mulf %1395, %1403 : vector<8x32xf32>
    %1412 = arith.addf %1410, %1411 : vector<8x32xf32>
    %1413 = math.tanh %1412 : vector<8x32xf32>
    %1414 = arith.mulf %1409, %1413 : vector<8x32xf32>
    %1415 = vector.extract_strided_slice %1389 {offsets = [0, 0], sizes = [8, 32], strides = [1, 1]} : vector<8x128xf32> to vector<8x32xf32>
    %1416 = arith.negf %1415 : vector<8x32xf32>
    %1417 = math.exp %1416 : vector<8x32xf32>
    %cst_373 = arith.constant 1.000000e+00 : f32
    %1418 = vector.broadcast %cst_373 : f32 to vector<8x32xf32>
    %1419 = arith.addf %1418, %1417 : vector<8x32xf32>
    %1420 = arith.divf %1418, %1419 : vector<8x32xf32>
    %1421 = vector.extract_strided_slice %1389 {offsets = [0, 32], sizes = [8, 32], strides = [1, 1]} : vector<8x128xf32> to vector<8x32xf32>
    %1422 = arith.negf %1421 : vector<8x32xf32>
    %1423 = math.exp %1422 : vector<8x32xf32>
    %cst_374 = arith.constant 1.000000e+00 : f32
    %1424 = vector.broadcast %cst_374 : f32 to vector<8x32xf32>
    %1425 = arith.addf %1424, %1423 : vector<8x32xf32>
    %1426 = arith.divf %1424, %1425 : vector<8x32xf32>
    %1427 = vector.extract_strided_slice %1389 {offsets = [0, 64], sizes = [8, 32], strides = [1, 1]} : vector<8x128xf32> to vector<8x32xf32>
    %1428 = math.tanh %1427 : vector<8x32xf32>
    %1429 = vector.extract_strided_slice %1389 {offsets = [0, 96], sizes = [8, 32], strides = [1, 1]} : vector<8x128xf32> to vector<8x32xf32>
    %1430 = arith.negf %1429 : vector<8x32xf32>
    %1431 = math.exp %1430 : vector<8x32xf32>
    %cst_375 = arith.constant 1.000000e+00 : f32
    %1432 = vector.broadcast %cst_375 : f32 to vector<8x32xf32>
    %1433 = arith.addf %1432, %1431 : vector<8x32xf32>
    %1434 = arith.divf %1432, %1433 : vector<8x32xf32>
    %1435 = arith.mulf %1426, %1376 : vector<8x32xf32>
    %1436 = arith.mulf %1420, %1428 : vector<8x32xf32>
    %1437 = arith.addf %1435, %1436 : vector<8x32xf32>
    %1438 = math.tanh %1437 : vector<8x32xf32>
    %1439 = arith.mulf %1434, %1438 : vector<8x32xf32>
    %c48_376 = arith.constant 48 : index
    %c0_377 = arith.constant 0 : index
    %1440 = vector.load %arg21[%c48_376, %c0_377] : memref<64x64xf32, #tpu.memory_space<vmem>>, vector<8x32xf32>
    tpu.vector_store %arg21[%c48_376, %c0_377], %1414 {strides = array<i32>} : memref<64x64xf32, #tpu.memory_space<vmem>>, vector<8x32xf32>,
    %c8_378 = arith.constant 8 : index
    %c32_379 = arith.constant 32 : index
    %1441 = vector.load %arg21[%c8_378, %c32_379] : memref<64x64xf32, #tpu.memory_space<vmem>>, vector<8x32xf32>
    tpu.vector_store %arg21[%c8_378, %c32_379], %1439 {strides = array<i32>} : memref<64x64xf32, #tpu.memory_space<vmem>>, vector<8x32xf32>,
    %1442 = tpu.concatenate %1414, %1439 in 1 : vector<8x32xf32>, vector<8x32xf32> -> vector<8x64xf32>
    %1443 = arith.truncf %1442 : vector<8x64xf32> to vector<8x64xbf16>
    %cst_380 = arith.constant dense<0.000000e+00> : vector<8x256xf32>
    %1444 = tpu.matmul %1443, %1010, %cst_380 {dimension_numbers = #tpu.dot_dimension_numbers<[1], [0], [0], [1], [0, 0, 1, 1], [], []>} : vector<8x64xbf16>, vector<64x256xbf16>, vector<8x256xf32> -> vector<8x256xf32>
    %c56_381 = arith.constant 56 : index
    %c0_382 = arith.constant 0 : index
    %1445 = vector.load %arg23[%c56_381, %c0_382] : memref<64x256xf32, #tpu.memory_space<vmem>>, vector<8x128xf32>
    %1446 = vector.extract_strided_slice %1444 {offsets = [0, 0], sizes = [8, 128], strides = [1, 1]} : vector<8x256xf32> to vector<8x128xf32>
    %1447 = arith.addf %1445, %1446 : vector<8x128xf32>
    %c0_383 = arith.constant 0 : index
    %c128_384 = arith.constant 128 : index
    %1448 = vector.load %arg23[%c0_383, %c128_384] : memref<64x256xf32, #tpu.memory_space<vmem>>, vector<8x128xf32>
    %1449 = vector.extract_strided_slice %1444 {offsets = [0, 128], sizes = [8, 128], strides = [1, 1]} : vector<8x256xf32> to vector<8x128xf32>
    %1450 = arith.addf %1448, %1449 : vector<8x128xf32>
    %1451 = vector.extract_strided_slice %1447 {offsets = [0, 0], sizes = [8, 32], strides = [1, 1]} : vector<8x128xf32> to vector<8x32xf32>
    %1452 = arith.negf %1451 : vector<8x32xf32>
    %1453 = math.exp %1452 : vector<8x32xf32>
    %cst_385 = arith.constant 1.000000e+00 : f32
    %1454 = vector.broadcast %cst_385 : f32 to vector<8x32xf32>
    %1455 = arith.addf %1454, %1453 : vector<8x32xf32>
    %1456 = arith.divf %1454, %1455 : vector<8x32xf32>
    %1457 = vector.extract_strided_slice %1447 {offsets = [0, 32], sizes = [8, 32], strides = [1, 1]} : vector<8x128xf32> to vector<8x32xf32>
    %1458 = arith.negf %1457 : vector<8x32xf32>
    %1459 = math.exp %1458 : vector<8x32xf32>
    %cst_386 = arith.constant 1.000000e+00 : f32
    %1460 = vector.broadcast %cst_386 : f32 to vector<8x32xf32>
    %1461 = arith.addf %1460, %1459 : vector<8x32xf32>
    %1462 = arith.divf %1460, %1461 : vector<8x32xf32>
    %1463 = vector.extract_strided_slice %1447 {offsets = [0, 64], sizes = [8, 32], strides = [1, 1]} : vector<8x128xf32> to vector<8x32xf32>
    %1464 = math.tanh %1463 : vector<8x32xf32>
    %1465 = vector.extract_strided_slice %1447 {offsets = [0, 96], sizes = [8, 32], strides = [1, 1]} : vector<8x128xf32> to vector<8x32xf32>
    %1466 = arith.negf %1465 : vector<8x32xf32>
    %1467 = math.exp %1466 : vector<8x32xf32>
    %cst_387 = arith.constant 1.000000e+00 : f32
    %1468 = vector.broadcast %cst_387 : f32 to vector<8x32xf32>
    %1469 = arith.addf %1468, %1467 : vector<8x32xf32>
    %1470 = arith.divf %1468, %1469 : vector<8x32xf32>
    %1471 = arith.mulf %1462, %1412 : vector<8x32xf32>
    %1472 = arith.mulf %1456, %1464 : vector<8x32xf32>
    %1473 = arith.addf %1471, %1472 : vector<8x32xf32>
    %1474 = math.tanh %1473 : vector<8x32xf32>
    %1475 = arith.mulf %1470, %1474 : vector<8x32xf32>
    %1476 = vector.extract_strided_slice %1450 {offsets = [0, 0], sizes = [8, 32], strides = [1, 1]} : vector<8x128xf32> to vector<8x32xf32>
    %1477 = arith.negf %1476 : vector<8x32xf32>
    %1478 = math.exp %1477 : vector<8x32xf32>
    %cst_388 = arith.constant 1.000000e+00 : f32
    %1479 = vector.broadcast %cst_388 : f32 to vector<8x32xf32>
    %1480 = arith.addf %1479, %1478 : vector<8x32xf32>
    %1481 = arith.divf %1479, %1480 : vector<8x32xf32>
    %1482 = vector.extract_strided_slice %1450 {offsets = [0, 32], sizes = [8, 32], strides = [1, 1]} : vector<8x128xf32> to vector<8x32xf32>
    %1483 = arith.negf %1482 : vector<8x32xf32>
    %1484 = math.exp %1483 : vector<8x32xf32>
    %cst_389 = arith.constant 1.000000e+00 : f32
    %1485 = vector.broadcast %cst_389 : f32 to vector<8x32xf32>
    %1486 = arith.addf %1485, %1484 : vector<8x32xf32>
    %1487 = arith.divf %1485, %1486 : vector<8x32xf32>
    %1488 = vector.extract_strided_slice %1450 {offsets = [0, 64], sizes = [8, 32], strides = [1, 1]} : vector<8x128xf32> to vector<8x32xf32>
    %1489 = math.tanh %1488 : vector<8x32xf32>
    %1490 = vector.extract_strided_slice %1450 {offsets = [0, 96], sizes = [8, 32], strides = [1, 1]} : vector<8x128xf32> to vector<8x32xf32>
    %1491 = arith.negf %1490 : vector<8x32xf32>
    %1492 = math.exp %1491 : vector<8x32xf32>
    %cst_390 = arith.constant 1.000000e+00 : f32
    %1493 = vector.broadcast %cst_390 : f32 to vector<8x32xf32>
    %1494 = arith.addf %1493, %1492 : vector<8x32xf32>
    %1495 = arith.divf %1493, %1494 : vector<8x32xf32>
    %1496 = arith.mulf %1487, %1437 : vector<8x32xf32>
    %1497 = arith.mulf %1481, %1489 : vector<8x32xf32>
    %1498 = arith.addf %1496, %1497 : vector<8x32xf32>
    %1499 = math.tanh %1498 : vector<8x32xf32>
    %1500 = arith.mulf %1495, %1499 : vector<8x32xf32>
    %c56_391 = arith.constant 56 : index
    %c0_392 = arith.constant 0 : index
    %1501 = vector.load %arg21[%c56_391, %c0_392] : memref<64x64xf32, #tpu.memory_space<vmem>>, vector<8x32xf32>
    tpu.vector_store %arg21[%c56_391, %c0_392], %1475 {strides = array<i32>} : memref<64x64xf32, #tpu.memory_space<vmem>>, vector<8x32xf32>,
    %c0_393 = arith.constant 0 : index
    %c32_394 = arith.constant 32 : index
    %1502 = vector.load %arg21[%c0_393, %c32_394] : memref<64x64xf32, #tpu.memory_space<vmem>>, vector<8x32xf32>
    tpu.vector_store %arg21[%c0_393, %c32_394], %1500 {strides = array<i32>} : memref<64x64xf32, #tpu.memory_space<vmem>>, vector<8x32xf32>,
    %c0_395 = arith.constant 0 : index
    %c0_396 = arith.constant 0 : index
    %1503 = vector.load %arg21[%c0_395, %c0_396] : memref<64x64xf32, #tpu.memory_space<vmem>>, vector<64x64xf32>
    %1504 = arith.truncf %1503 : vector<64x64xf32> to vector<64x64xbf16>
    %c0_397 = arith.constant 0 : index
    %c0_398 = arith.constant 0 : index
    %1505 = vector.load %arg10[%c0_397, %c0_398] : memref<64x256xbf16, #tpu.memory_space<vmem>>, vector<64x256xbf16>
    %cst_399 = arith.constant dense<0.000000e+00> : vector<64x256xf32>
    %1506 = tpu.matmul %1504, %1505, %cst_399 {dimension_numbers = #tpu.dot_dimension_numbers<[1], [0], [0], [1], [0, 0, 1, 1], [], []>} : vector<64x64xbf16>, vector<64x256xbf16>, vector<64x256xf32> -> vector<64x256xf32>
    %c0_400 = arith.constant 0 : index
    %c0_401 = arith.constant 0 : index
    %1507 = vector.load %arg12[%c0_400, %c0_401] : memref<1x256xf32, #tpu.memory_space<vmem>>, vector<1x256xf32>
    %1508 = vector.broadcast %1507 : vector<1x256xf32> to vector<64x256xf32>
    %1509 = arith.addf %1506, %1508 : vector<64x256xf32>
    %c0_402 = arith.constant 0 : index
    %c0_403 = arith.constant 0 : index
    %1510 = vector.load %arg23[%c0_402, %c0_403] : memref<64x256xf32, #tpu.memory_space<vmem>>, vector<64x256xf32>
    tpu.vector_store %arg23[%c0_402, %c0_403], %1509 {strides = array<i32>} : memref<64x256xf32, #tpu.memory_space<vmem>>, vector<64x256xf32>,
    %c0_404 = arith.constant 0 : index
    %c0_405 = arith.constant 0 : index
    %1511 = vector.load %arg11[%c0_404, %c0_405] : memref<64x256xbf16, #tpu.memory_space<vmem>>, vector<64x256xbf16>
    %cst_406 = arith.constant 0.000000e+00 : f32
    %1512 = vector.broadcast %cst_406 : f32 to vector<8x32xf32>
    %cst_407 = arith.constant 0.000000e+00 : f32
    %1513 = vector.broadcast %cst_407 : f32 to vector<8x32xf32>
    %cst_408 = arith.constant 0.000000e+00 : f32
    %1514 = vector.broadcast %cst_408 : f32 to vector<8x32xf32>
    %cst_409 = arith.constant 0.000000e+00 : f32
    %1515 = vector.broadcast %cst_409 : f32 to vector<8x32xf32>
    %1516 = tpu.concatenate %1512, %1514 in 1 : vector<8x32xf32>, vector<8x32xf32> -> vector<8x64xf32>
    %1517 = arith.truncf %1516 : vector<8x64xf32> to vector<8x64xbf16>
    %cst_410 = arith.constant dense<0.000000e+00> : vector<8x256xf32>
    %1518 = tpu.matmul %1517, %1511, %cst_410 {dimension_numbers = #tpu.dot_dimension_numbers<[1], [0], [0], [1], [0, 0, 1, 1], [], []>} : vector<8x64xbf16>, vector<64x256xbf16>, vector<8x256xf32> -> vector<8x256xf32>
    %c0_411 = arith.constant 0 : index
    %c0_412 = arith.constant 0 : index
    %1519 = vector.load %arg23[%c0_411, %c0_412] : memref<64x256xf32, #tpu.memory_space<vmem>>, vector<8x128xf32>
    %1520 = vector.extract_strided_slice %1518 {offsets = [0, 0], sizes = [8, 128], strides = [1, 1]} : vector<8x256xf32> to vector<8x128xf32>
    %1521 = arith.addf %1519, %1520 : vector<8x128xf32>
    %c56_413 = arith.constant 56 : index
    %c128_414 = arith.constant 128 : index
    %1522 = vector.load %arg23[%c56_413, %c128_414] : memref<64x256xf32, #tpu.memory_space<vmem>>, vector<8x128xf32>
    %1523 = vector.extract_strided_slice %1518 {offsets = [0, 128], sizes = [8, 128], strides = [1, 1]} : vector<8x256xf32> to vector<8x128xf32>
    %1524 = arith.addf %1522, %1523 : vector<8x128xf32>
    %1525 = vector.extract_strided_slice %1521 {offsets = [0, 0], sizes = [8, 32], strides = [1, 1]} : vector<8x128xf32> to vector<8x32xf32>
    %1526 = arith.negf %1525 : vector<8x32xf32>
    %1527 = math.exp %1526 : vector<8x32xf32>
    %cst_415 = arith.constant 1.000000e+00 : f32
    %1528 = vector.broadcast %cst_415 : f32 to vector<8x32xf32>
    %1529 = arith.addf %1528, %1527 : vector<8x32xf32>
    %1530 = arith.divf %1528, %1529 : vector<8x32xf32>
    %1531 = vector.extract_strided_slice %1521 {offsets = [0, 32], sizes = [8, 32], strides = [1, 1]} : vector<8x128xf32> to vector<8x32xf32>
    %1532 = arith.negf %1531 : vector<8x32xf32>
    %1533 = math.exp %1532 : vector<8x32xf32>
    %cst_416 = arith.constant 1.000000e+00 : f32
    %1534 = vector.broadcast %cst_416 : f32 to vector<8x32xf32>
    %1535 = arith.addf %1534, %1533 : vector<8x32xf32>
    %1536 = arith.divf %1534, %1535 : vector<8x32xf32>
    %1537 = vector.extract_strided_slice %1521 {offsets = [0, 64], sizes = [8, 32], strides = [1, 1]} : vector<8x128xf32> to vector<8x32xf32>
    %1538 = math.tanh %1537 : vector<8x32xf32>
    %1539 = vector.extract_strided_slice %1521 {offsets = [0, 96], sizes = [8, 32], strides = [1, 1]} : vector<8x128xf32> to vector<8x32xf32>
    %1540 = arith.negf %1539 : vector<8x32xf32>
    %1541 = math.exp %1540 : vector<8x32xf32>
    %cst_417 = arith.constant 1.000000e+00 : f32
    %1542 = vector.broadcast %cst_417 : f32 to vector<8x32xf32>
    %1543 = arith.addf %1542, %1541 : vector<8x32xf32>
    %1544 = arith.divf %1542, %1543 : vector<8x32xf32>
    %1545 = arith.mulf %1536, %1513 : vector<8x32xf32>
    %1546 = arith.mulf %1530, %1538 : vector<8x32xf32>
    %1547 = arith.addf %1545, %1546 : vector<8x32xf32>
    %1548 = math.tanh %1547 : vector<8x32xf32>
    %1549 = arith.mulf %1544, %1548 : vector<8x32xf32>
    %1550 = vector.extract_strided_slice %1524 {offsets = [0, 0], sizes = [8, 32], strides = [1, 1]} : vector<8x128xf32> to vector<8x32xf32>
    %1551 = arith.negf %1550 : vector<8x32xf32>
    %1552 = math.exp %1551 : vector<8x32xf32>
    %cst_418 = arith.constant 1.000000e+00 : f32
    %1553 = vector.broadcast %cst_418 : f32 to vector<8x32xf32>
    %1554 = arith.addf %1553, %1552 : vector<8x32xf32>
    %1555 = arith.divf %1553, %1554 : vector<8x32xf32>
    %1556 = vector.extract_strided_slice %1524 {offsets = [0, 32], sizes = [8, 32], strides = [1, 1]} : vector<8x128xf32> to vector<8x32xf32>
    %1557 = arith.negf %1556 : vector<8x32xf32>
    %1558 = math.exp %1557 : vector<8x32xf32>
    %cst_419 = arith.constant 1.000000e+00 : f32
    %1559 = vector.broadcast %cst_419 : f32 to vector<8x32xf32>
    %1560 = arith.addf %1559, %1558 : vector<8x32xf32>
    %1561 = arith.divf %1559, %1560 : vector<8x32xf32>
    %1562 = vector.extract_strided_slice %1524 {offsets = [0, 64], sizes = [8, 32], strides = [1, 1]} : vector<8x128xf32> to vector<8x32xf32>
    %1563 = math.tanh %1562 : vector<8x32xf32>
    %1564 = vector.extract_strided_slice %1524 {offsets = [0, 96], sizes = [8, 32], strides = [1, 1]} : vector<8x128xf32> to vector<8x32xf32>
    %1565 = arith.negf %1564 : vector<8x32xf32>
    %1566 = math.exp %1565 : vector<8x32xf32>
    %cst_420 = arith.constant 1.000000e+00 : f32
    %1567 = vector.broadcast %cst_420 : f32 to vector<8x32xf32>
    %1568 = arith.addf %1567, %1566 : vector<8x32xf32>
    %1569 = arith.divf %1567, %1568 : vector<8x32xf32>
    %1570 = arith.mulf %1561, %1515 : vector<8x32xf32>
    %1571 = arith.mulf %1555, %1563 : vector<8x32xf32>
    %1572 = arith.addf %1570, %1571 : vector<8x32xf32>
    %1573 = math.tanh %1572 : vector<8x32xf32>
    %1574 = arith.mulf %1569, %1573 : vector<8x32xf32>
    %c0_421 = arith.constant 0 : index
    %c0_422 = arith.constant 0 : index
    %1575 = vector.load %arg22[%c0_421, %c0_422] : memref<64x64xf32, #tpu.memory_space<vmem>>, vector<8x32xf32>
    tpu.vector_store %arg22[%c0_421, %c0_422], %1549 {strides = array<i32>} : memref<64x64xf32, #tpu.memory_space<vmem>>, vector<8x32xf32>,
    %c56_423 = arith.constant 56 : index
    %c32_424 = arith.constant 32 : index
    %1576 = vector.load %arg22[%c56_423, %c32_424] : memref<64x64xf32, #tpu.memory_space<vmem>>, vector<8x32xf32>
    tpu.vector_store %arg22[%c56_423, %c32_424], %1574 {strides = array<i32>} : memref<64x64xf32, #tpu.memory_space<vmem>>, vector<8x32xf32>,
    %1577 = tpu.concatenate %1549, %1574 in 1 : vector<8x32xf32>, vector<8x32xf32> -> vector<8x64xf32>
    %1578 = arith.truncf %1577 : vector<8x64xf32> to vector<8x64xbf16>
    %cst_425 = arith.constant dense<0.000000e+00> : vector<8x256xf32>
    %1579 = tpu.matmul %1578, %1511, %cst_425 {dimension_numbers = #tpu.dot_dimension_numbers<[1], [0], [0], [1], [0, 0, 1, 1], [], []>} : vector<8x64xbf16>, vector<64x256xbf16>, vector<8x256xf32> -> vector<8x256xf32>
    %c8_426 = arith.constant 8 : index
    %c0_427 = arith.constant 0 : index
    %1580 = vector.load %arg23[%c8_426, %c0_427] : memref<64x256xf32, #tpu.memory_space<vmem>>, vector<8x128xf32>
    %1581 = vector.extract_strided_slice %1579 {offsets = [0, 0], sizes = [8, 128], strides = [1, 1]} : vector<8x256xf32> to vector<8x128xf32>
    %1582 = arith.addf %1580, %1581 : vector<8x128xf32>
    %c48_428 = arith.constant 48 : index
    %c128_429 = arith.constant 128 : index
    %1583 = vector.load %arg23[%c48_428, %c128_429] : memref<64x256xf32, #tpu.memory_space<vmem>>, vector<8x128xf32>
    %1584 = vector.extract_strided_slice %1579 {offsets = [0, 128], sizes = [8, 128], strides = [1, 1]} : vector<8x256xf32> to vector<8x128xf32>
    %1585 = arith.addf %1583, %1584 : vector<8x128xf32>
    %1586 = vector.extract_strided_slice %1582 {offsets = [0, 0], sizes = [8, 32], strides = [1, 1]} : vector<8x128xf32> to vector<8x32xf32>
    %1587 = arith.negf %1586 : vector<8x32xf32>
    %1588 = math.exp %1587 : vector<8x32xf32>
    %cst_430 = arith.constant 1.000000e+00 : f32
    %1589 = vector.broadcast %cst_430 : f32 to vector<8x32xf32>
    %1590 = arith.addf %1589, %1588 : vector<8x32xf32>
    %1591 = arith.divf %1589, %1590 : vector<8x32xf32>
    %1592 = vector.extract_strided_slice %1582 {offsets = [0, 32], sizes = [8, 32], strides = [1, 1]} : vector<8x128xf32> to vector<8x32xf32>
    %1593 = arith.negf %1592 : vector<8x32xf32>
    %1594 = math.exp %1593 : vector<8x32xf32>
    %cst_431 = arith.constant 1.000000e+00 : f32
    %1595 = vector.broadcast %cst_431 : f32 to vector<8x32xf32>
    %1596 = arith.addf %1595, %1594 : vector<8x32xf32>
    %1597 = arith.divf %1595, %1596 : vector<8x32xf32>
    %1598 = vector.extract_strided_slice %1582 {offsets = [0, 64], sizes = [8, 32], strides = [1, 1]} : vector<8x128xf32> to vector<8x32xf32>
    %1599 = math.tanh %1598 : vector<8x32xf32>
    %1600 = vector.extract_strided_slice %1582 {offsets = [0, 96], sizes = [8, 32], strides = [1, 1]} : vector<8x128xf32> to vector<8x32xf32>
    %1601 = arith.negf %1600 : vector<8x32xf32>
    %1602 = math.exp %1601 : vector<8x32xf32>
    %cst_432 = arith.constant 1.000000e+00 : f32
    %1603 = vector.broadcast %cst_432 : f32 to vector<8x32xf32>
    %1604 = arith.addf %1603, %1602 : vector<8x32xf32>
    %1605 = arith.divf %1603, %1604 : vector<8x32xf32>
    %1606 = arith.mulf %1597, %1547 : vector<8x32xf32>
    %1607 = arith.mulf %1591, %1599 : vector<8x32xf32>
    %1608 = arith.addf %1606, %1607 : vector<8x32xf32>
    %1609 = math.tanh %1608 : vector<8x32xf32>
    %1610 = arith.mulf %1605, %1609 : vector<8x32xf32>
    %1611 = vector.extract_strided_slice %1585 {offsets = [0, 0], sizes = [8, 32], strides = [1, 1]} : vector<8x128xf32> to vector<8x32xf32>
    %1612 = arith.negf %1611 : vector<8x32xf32>
    %1613 = math.exp %1612 : vector<8x32xf32>
    %cst_433 = arith.constant 1.000000e+00 : f32
    %1614 = vector.broadcast %cst_433 : f32 to vector<8x32xf32>
    %1615 = arith.addf %1614, %1613 : vector<8x32xf32>
    %1616 = arith.divf %1614, %1615 : vector<8x32xf32>
    %1617 = vector.extract_strided_slice %1585 {offsets = [0, 32], sizes = [8, 32], strides = [1, 1]} : vector<8x128xf32> to vector<8x32xf32>
    %1618 = arith.negf %1617 : vector<8x32xf32>
    %1619 = math.exp %1618 : vector<8x32xf32>
    %cst_434 = arith.constant 1.000000e+00 : f32
    %1620 = vector.broadcast %cst_434 : f32 to vector<8x32xf32>
    %1621 = arith.addf %1620, %1619 : vector<8x32xf32>
    %1622 = arith.divf %1620, %1621 : vector<8x32xf32>
    %1623 = vector.extract_strided_slice %1585 {offsets = [0, 64], sizes = [8, 32], strides = [1, 1]} : vector<8x128xf32> to vector<8x32xf32>
    %1624 = math.tanh %1623 : vector<8x32xf32>
    %1625 = vector.extract_strided_slice %1585 {offsets = [0, 96], sizes = [8, 32], strides = [1, 1]} : vector<8x128xf32> to vector<8x32xf32>
    %1626 = arith.negf %1625 : vector<8x32xf32>
    %1627 = math.exp %1626 : vector<8x32xf32>
    %cst_435 = arith.constant 1.000000e+00 : f32
    %1628 = vector.broadcast %cst_435 : f32 to vector<8x32xf32>
    %1629 = arith.addf %1628, %1627 : vector<8x32xf32>
    %1630 = arith.divf %1628, %1629 : vector<8x32xf32>
    %1631 = arith.mulf %1622, %1572 : vector<8x32xf32>
    %1632 = arith.mulf %1616, %1624 : vector<8x32xf32>
    %1633 = arith.addf %1631, %1632 : vector<8x32xf32>
    %1634 = math.tanh %1633 : vector<8x32xf32>
    %1635 = arith.mulf %1630, %1634 : vector<8x32xf32>
    %c8_436 = arith.constant 8 : index
    %c0_437 = arith.constant 0 : index
    %1636 = vector.load %arg22[%c8_436, %c0_437] : memref<64x64xf32, #tpu.memory_space<vmem>>, vector<8x32xf32>
    tpu.vector_store %arg22[%c8_436, %c0_437], %1610 {strides = array<i32>} : memref<64x64xf32, #tpu.memory_space<vmem>>, vector<8x32xf32>,
    %c48_438 = arith.constant 48 : index
    %c32_439 = arith.constant 32 : index
    %1637 = vector.load %arg22[%c48_438, %c32_439] : memref<64x64xf32, #tpu.memory_space<vmem>>, vector<8x32xf32>
    tpu.vector_store %arg22[%c48_438, %c32_439], %1635 {strides = array<i32>} : memref<64x64xf32, #tpu.memory_space<vmem>>, vector<8x32xf32>,
    %1638 = tpu.concatenate %1610, %1635 in 1 : vector<8x32xf32>, vector<8x32xf32> -> vector<8x64xf32>
    %1639 = arith.truncf %1638 : vector<8x64xf32> to vector<8x64xbf16>
    %cst_440 = arith.constant dense<0.000000e+00> : vector<8x256xf32>
    %1640 = tpu.matmul %1639, %1511, %cst_440 {dimension_numbers = #tpu.dot_dimension_numbers<[1], [0], [0], [1], [0, 0, 1, 1], [], []>} : vector<8x64xbf16>, vector<64x256xbf16>, vector<8x256xf32> -> vector<8x256xf32>
    %c16_441 = arith.constant 16 : index
    %c0_442 = arith.constant 0 : index
    %1641 = vector.load %arg23[%c16_441, %c0_442] : memref<64x256xf32, #tpu.memory_space<vmem>>, vector<8x128xf32>
    %1642 = vector.extract_strided_slice %1640 {offsets = [0, 0], sizes = [8, 128], strides = [1, 1]} : vector<8x256xf32> to vector<8x128xf32>
    %1643 = arith.addf %1641, %1642 : vector<8x128xf32>
    %c40_443 = arith.constant 40 : index
    %c128_444 = arith.constant 128 : index
    %1644 = vector.load %arg23[%c40_443, %c128_444] : memref<64x256xf32, #tpu.memory_space<vmem>>, vector<8x128xf32>
    %1645 = vector.extract_strided_slice %1640 {offsets = [0, 128], sizes = [8, 128], strides = [1, 1]} : vector<8x256xf32> to vector<8x128xf32>
    %1646 = arith.addf %1644, %1645 : vector<8x128xf32>
    %1647 = vector.extract_strided_slice %1643 {offsets = [0, 0], sizes = [8, 32], strides = [1, 1]} : vector<8x128xf32> to vector<8x32xf32>
    %1648 = arith.negf %1647 : vector<8x32xf32>
    %1649 = math.exp %1648 : vector<8x32xf32>
    %cst_445 = arith.constant 1.000000e+00 : f32
    %1650 = vector.broadcast %cst_445 : f32 to vector<8x32xf32>
    %1651 = arith.addf %1650, %1649 : vector<8x32xf32>
    %1652 = arith.divf %1650, %1651 : vector<8x32xf32>
    %1653 = vector.extract_strided_slice %1643 {offsets = [0, 32], sizes = [8, 32], strides = [1, 1]} : vector<8x128xf32> to vector<8x32xf32>
    %1654 = arith.negf %1653 : vector<8x32xf32>
    %1655 = math.exp %1654 : vector<8x32xf32>
    %cst_446 = arith.constant 1.000000e+00 : f32
    %1656 = vector.broadcast %cst_446 : f32 to vector<8x32xf32>
    %1657 = arith.addf %1656, %1655 : vector<8x32xf32>
    %1658 = arith.divf %1656, %1657 : vector<8x32xf32>
    %1659 = vector.extract_strided_slice %1643 {offsets = [0, 64], sizes = [8, 32], strides = [1, 1]} : vector<8x128xf32> to vector<8x32xf32>
    %1660 = math.tanh %1659 : vector<8x32xf32>
    %1661 = vector.extract_strided_slice %1643 {offsets = [0, 96], sizes = [8, 32], strides = [1, 1]} : vector<8x128xf32> to vector<8x32xf32>
    %1662 = arith.negf %1661 : vector<8x32xf32>
    %1663 = math.exp %1662 : vector<8x32xf32>
    %cst_447 = arith.constant 1.000000e+00 : f32
    %1664 = vector.broadcast %cst_447 : f32 to vector<8x32xf32>
    %1665 = arith.addf %1664, %1663 : vector<8x32xf32>
    %1666 = arith.divf %1664, %1665 : vector<8x32xf32>
    %1667 = arith.mulf %1658, %1608 : vector<8x32xf32>
    %1668 = arith.mulf %1652, %1660 : vector<8x32xf32>
    %1669 = arith.addf %1667, %1668 : vector<8x32xf32>
    %1670 = math.tanh %1669 : vector<8x32xf32>
    %1671 = arith.mulf %1666, %1670 : vector<8x32xf32>
    %1672 = vector.extract_strided_slice %1646 {offsets = [0, 0], sizes = [8, 32], strides = [1, 1]} : vector<8x128xf32> to vector<8x32xf32>
    %1673 = arith.negf %1672 : vector<8x32xf32>
    %1674 = math.exp %1673 : vector<8x32xf32>
    %cst_448 = arith.constant 1.000000e+00 : f32
    %1675 = vector.broadcast %cst_448 : f32 to vector<8x32xf32>
    %1676 = arith.addf %1675, %1674 : vector<8x32xf32>
    %1677 = arith.divf %1675, %1676 : vector<8x32xf32>
    %1678 = vector.extract_strided_slice %1646 {offsets = [0, 32], sizes = [8, 32], strides = [1, 1]} : vector<8x128xf32> to vector<8x32xf32>
    %1679 = arith.negf %1678 : vector<8x32xf32>
    %1680 = math.exp %1679 : vector<8x32xf32>
    %cst_449 = arith.constant 1.000000e+00 : f32
    %1681 = vector.broadcast %cst_449 : f32 to vector<8x32xf32>
    %1682 = arith.addf %1681, %1680 : vector<8x32xf32>
    %1683 = arith.divf %1681, %1682 : vector<8x32xf32>
    %1684 = vector.extract_strided_slice %1646 {offsets = [0, 64], sizes = [8, 32], strides = [1, 1]} : vector<8x128xf32> to vector<8x32xf32>
    %1685 = math.tanh %1684 : vector<8x32xf32>
    %1686 = vector.extract_strided_slice %1646 {offsets = [0, 96], sizes = [8, 32], strides = [1, 1]} : vector<8x128xf32> to vector<8x32xf32>
    %1687 = arith.negf %1686 : vector<8x32xf32>
    %1688 = math.exp %1687 : vector<8x32xf32>
    %cst_450 = arith.constant 1.000000e+00 : f32
    %1689 = vector.broadcast %cst_450 : f32 to vector<8x32xf32>
    %1690 = arith.addf %1689, %1688 : vector<8x32xf32>
    %1691 = arith.divf %1689, %1690 : vector<8x32xf32>
    %1692 = arith.mulf %1683, %1633 : vector<8x32xf32>
    %1693 = arith.mulf %1677, %1685 : vector<8x32xf32>
    %1694 = arith.addf %1692, %1693 : vector<8x32xf32>
    %1695 = math.tanh %1694 : vector<8x32xf32>
    %1696 = arith.mulf %1691, %1695 : vector<8x32xf32>
    %c16_451 = arith.constant 16 : index
    %c0_452 = arith.constant 0 : index
    %1697 = vector.load %arg22[%c16_451, %c0_452] : memref<64x64xf32, #tpu.memory_space<vmem>>, vector<8x32xf32>
    tpu.vector_store %arg22[%c16_451, %c0_452], %1671 {strides = array<i32>} : memref<64x64xf32, #tpu.memory_space<vmem>>, vector<8x32xf32>,
    %c40_453 = arith.constant 40 : index
    %c32_454 = arith.constant 32 : index
    %1698 = vector.load %arg22[%c40_453, %c32_454] : memref<64x64xf32, #tpu.memory_space<vmem>>, vector<8x32xf32>
    tpu.vector_store %arg22[%c40_453, %c32_454], %1696 {strides = array<i32>} : memref<64x64xf32, #tpu.memory_space<vmem>>, vector<8x32xf32>,
    %1699 = tpu.concatenate %1671, %1696 in 1 : vector<8x32xf32>, vector<8x32xf32> -> vector<8x64xf32>
    %1700 = arith.truncf %1699 : vector<8x64xf32> to vector<8x64xbf16>
    %cst_455 = arith.constant dense<0.000000e+00> : vector<8x256xf32>
    %1701 = tpu.matmul %1700, %1511, %cst_455 {dimension_numbers = #tpu.dot_dimension_numbers<[1], [0], [0], [1], [0, 0, 1, 1], [], []>} : vector<8x64xbf16>, vector<64x256xbf16>, vector<8x256xf32> -> vector<8x256xf32>
    %c24_456 = arith.constant 24 : index
    %c0_457 = arith.constant 0 : index
    %1702 = vector.load %arg23[%c24_456, %c0_457] : memref<64x256xf32, #tpu.memory_space<vmem>>, vector<8x128xf32>
    %1703 = vector.extract_strided_slice %1701 {offsets = [0, 0], sizes = [8, 128], strides = [1, 1]} : vector<8x256xf32> to vector<8x128xf32>
    %1704 = arith.addf %1702, %1703 : vector<8x128xf32>
    %c32_458 = arith.constant 32 : index
    %c128_459 = arith.constant 128 : index
    %1705 = vector.load %arg23[%c32_458, %c128_459] : memref<64x256xf32, #tpu.memory_space<vmem>>, vector<8x128xf32>
    %1706 = vector.extract_strided_slice %1701 {offsets = [0, 128], sizes = [8, 128], strides = [1, 1]} : vector<8x256xf32> to vector<8x128xf32>
    %1707 = arith.addf %1705, %1706 : vector<8x128xf32>
    %1708 = vector.extract_strided_slice %1704 {offsets = [0, 0], sizes = [8, 32], strides = [1, 1]} : vector<8x128xf32> to vector<8x32xf32>
    %1709 = arith.negf %1708 : vector<8x32xf32>
    %1710 = math.exp %1709 : vector<8x32xf32>
    %cst_460 = arith.constant 1.000000e+00 : f32
    %1711 = vector.broadcast %cst_460 : f32 to vector<8x32xf32>
    %1712 = arith.addf %1711, %1710 : vector<8x32xf32>
    %1713 = arith.divf %1711, %1712 : vector<8x32xf32>
    %1714 = vector.extract_strided_slice %1704 {offsets = [0, 32], sizes = [8, 32], strides = [1, 1]} : vector<8x128xf32> to vector<8x32xf32>
    %1715 = arith.negf %1714 : vector<8x32xf32>
    %1716 = math.exp %1715 : vector<8x32xf32>
    %cst_461 = arith.constant 1.000000e+00 : f32
    %1717 = vector.broadcast %cst_461 : f32 to vector<8x32xf32>
    %1718 = arith.addf %1717, %1716 : vector<8x32xf32>
    %1719 = arith.divf %1717, %1718 : vector<8x32xf32>
    %1720 = vector.extract_strided_slice %1704 {offsets = [0, 64], sizes = [8, 32], strides = [1, 1]} : vector<8x128xf32> to vector<8x32xf32>
    %1721 = math.tanh %1720 : vector<8x32xf32>
    %1722 = vector.extract_strided_slice %1704 {offsets = [0, 96], sizes = [8, 32], strides = [1, 1]} : vector<8x128xf32> to vector<8x32xf32>
    %1723 = arith.negf %1722 : vector<8x32xf32>
    %1724 = math.exp %1723 : vector<8x32xf32>
    %cst_462 = arith.constant 1.000000e+00 : f32
    %1725 = vector.broadcast %cst_462 : f32 to vector<8x32xf32>
    %1726 = arith.addf %1725, %1724 : vector<8x32xf32>
    %1727 = arith.divf %1725, %1726 : vector<8x32xf32>
    %1728 = arith.mulf %1719, %1669 : vector<8x32xf32>
    %1729 = arith.mulf %1713, %1721 : vector<8x32xf32>
    %1730 = arith.addf %1728, %1729 : vector<8x32xf32>
    %1731 = math.tanh %1730 : vector<8x32xf32>
    %1732 = arith.mulf %1727, %1731 : vector<8x32xf32>
    %1733 = vector.extract_strided_slice %1707 {offsets = [0, 0], sizes = [8, 32], strides = [1, 1]} : vector<8x128xf32> to vector<8x32xf32>
    %1734 = arith.negf %1733 : vector<8x32xf32>
    %1735 = math.exp %1734 : vector<8x32xf32>
    %cst_463 = arith.constant 1.000000e+00 : f32
    %1736 = vector.broadcast %cst_463 : f32 to vector<8x32xf32>
    %1737 = arith.addf %1736, %1735 : vector<8x32xf32>
    %1738 = arith.divf %1736, %1737 : vector<8x32xf32>
    %1739 = vector.extract_strided_slice %1707 {offsets = [0, 32], sizes = [8, 32], strides = [1, 1]} : vector<8x128xf32> to vector<8x32xf32>
    %1740 = arith.negf %1739 : vector<8x32xf32>
    %1741 = math.exp %1740 : vector<8x32xf32>
    %cst_464 = arith.constant 1.000000e+00 : f32
    %1742 = vector.broadcast %cst_464 : f32 to vector<8x32xf32>
    %1743 = arith.addf %1742, %1741 : vector<8x32xf32>
    %1744 = arith.divf %1742, %1743 : vector<8x32xf32>
    %1745 = vector.extract_strided_slice %1707 {offsets = [0, 64], sizes = [8, 32], strides = [1, 1]} : vector<8x128xf32> to vector<8x32xf32>
    %1746 = math.tanh %1745 : vector<8x32xf32>
    %1747 = vector.extract_strided_slice %1707 {offsets = [0, 96], sizes = [8, 32], strides = [1, 1]} : vector<8x128xf32> to vector<8x32xf32>
    %1748 = arith.negf %1747 : vector<8x32xf32>
    %1749 = math.exp %1748 : vector<8x32xf32>
    %cst_465 = arith.constant 1.000000e+00 : f32
    %1750 = vector.broadcast %cst_465 : f32 to vector<8x32xf32>
    %1751 = arith.addf %1750, %1749 : vector<8x32xf32>
    %1752 = arith.divf %1750, %1751 : vector<8x32xf32>
    %1753 = arith.mulf %1744, %1694 : vector<8x32xf32>
    %1754 = arith.mulf %1738, %1746 : vector<8x32xf32>
    %1755 = arith.addf %1753, %1754 : vector<8x32xf32>
    %1756 = math.tanh %1755 : vector<8x32xf32>
    %1757 = arith.mulf %1752, %1756 : vector<8x32xf32>
    %c24_466 = arith.constant 24 : index
    %c0_467 = arith.constant 0 : index
    %1758 = vector.load %arg22[%c24_466, %c0_467] : memref<64x64xf32, #tpu.memory_space<vmem>>, vector<8x32xf32>
    tpu.vector_store %arg22[%c24_466, %c0_467], %1732 {strides = array<i32>} : memref<64x64xf32, #tpu.memory_space<vmem>>, vector<8x32xf32>,
    %c32_468 = arith.constant 32 : index
    %c32_469 = arith.constant 32 : index
    %1759 = vector.load %arg22[%c32_468, %c32_469] : memref<64x64xf32, #tpu.memory_space<vmem>>, vector<8x32xf32>
    tpu.vector_store %arg22[%c32_468, %c32_469], %1757 {strides = array<i32>} : memref<64x64xf32, #tpu.memory_space<vmem>>, vector<8x32xf32>,
    %1760 = tpu.concatenate %1732, %1757 in 1 : vector<8x32xf32>, vector<8x32xf32> -> vector<8x64xf32>
    %1761 = arith.truncf %1760 : vector<8x64xf32> to vector<8x64xbf16>
    %cst_470 = arith.constant dense<0.000000e+00> : vector<8x256xf32>
    %1762 = tpu.matmul %1761, %1511, %cst_470 {dimension_numbers = #tpu.dot_dimension_numbers<[1], [0], [0], [1], [0, 0, 1, 1], [], []>} : vector<8x64xbf16>, vector<64x256xbf16>, vector<8x256xf32> -> vector<8x256xf32>
    %c32_471 = arith.constant 32 : index
    %c0_472 = arith.constant 0 : index
    %1763 = vector.load %arg23[%c32_471, %c0_472] : memref<64x256xf32, #tpu.memory_space<vmem>>, vector<8x128xf32>
    %1764 = vector.extract_strided_slice %1762 {offsets = [0, 0], sizes = [8, 128], strides = [1, 1]} : vector<8x256xf32> to vector<8x128xf32>
    %1765 = arith.addf %1763, %1764 : vector<8x128xf32>
    %c24_473 = arith.constant 24 : index
    %c128_474 = arith.constant 128 : index
    %1766 = vector.load %arg23[%c24_473, %c128_474] : memref<64x256xf32, #tpu.memory_space<vmem>>, vector<8x128xf32>
    %1767 = vector.extract_strided_slice %1762 {offsets = [0, 128], sizes = [8, 128], strides = [1, 1]} : vector<8x256xf32> to vector<8x128xf32>
    %1768 = arith.addf %1766, %1767 : vector<8x128xf32>
    %1769 = vector.extract_strided_slice %1765 {offsets = [0, 0], sizes = [8, 32], strides = [1, 1]} : vector<8x128xf32> to vector<8x32xf32>
    %1770 = arith.negf %1769 : vector<8x32xf32>
    %1771 = math.exp %1770 : vector<8x32xf32>
    %cst_475 = arith.constant 1.000000e+00 : f32
    %1772 = vector.broadcast %cst_475 : f32 to vector<8x32xf32>
    %1773 = arith.addf %1772, %1771 : vector<8x32xf32>
    %1774 = arith.divf %1772, %1773 : vector<8x32xf32>
    %1775 = vector.extract_strided_slice %1765 {offsets = [0, 32], sizes = [8, 32], strides = [1, 1]} : vector<8x128xf32> to vector<8x32xf32>
    %1776 = arith.negf %1775 : vector<8x32xf32>
    %1777 = math.exp %1776 : vector<8x32xf32>
    %cst_476 = arith.constant 1.000000e+00 : f32
    %1778 = vector.broadcast %cst_476 : f32 to vector<8x32xf32>
    %1779 = arith.addf %1778, %1777 : vector<8x32xf32>
    %1780 = arith.divf %1778, %1779 : vector<8x32xf32>
    %1781 = vector.extract_strided_slice %1765 {offsets = [0, 64], sizes = [8, 32], strides = [1, 1]} : vector<8x128xf32> to vector<8x32xf32>
    %1782 = math.tanh %1781 : vector<8x32xf32>
    %1783 = vector.extract_strided_slice %1765 {offsets = [0, 96], sizes = [8, 32], strides = [1, 1]} : vector<8x128xf32> to vector<8x32xf32>
    %1784 = arith.negf %1783 : vector<8x32xf32>
    %1785 = math.exp %1784 : vector<8x32xf32>
    %cst_477 = arith.constant 1.000000e+00 : f32
    %1786 = vector.broadcast %cst_477 : f32 to vector<8x32xf32>
    %1787 = arith.addf %1786, %1785 : vector<8x32xf32>
    %1788 = arith.divf %1786, %1787 : vector<8x32xf32>
    %1789 = arith.mulf %1780, %1730 : vector<8x32xf32>
    %1790 = arith.mulf %1774, %1782 : vector<8x32xf32>
    %1791 = arith.addf %1789, %1790 : vector<8x32xf32>
    %1792 = math.tanh %1791 : vector<8x32xf32>
    %1793 = arith.mulf %1788, %1792 : vector<8x32xf32>
    %1794 = vector.extract_strided_slice %1768 {offsets = [0, 0], sizes = [8, 32], strides = [1, 1]} : vector<8x128xf32> to vector<8x32xf32>
    %1795 = arith.negf %1794 : vector<8x32xf32>
    %1796 = math.exp %1795 : vector<8x32xf32>
    %cst_478 = arith.constant 1.000000e+00 : f32
    %1797 = vector.broadcast %cst_478 : f32 to vector<8x32xf32>
    %1798 = arith.addf %1797, %1796 : vector<8x32xf32>
    %1799 = arith.divf %1797, %1798 : vector<8x32xf32>
    %1800 = vector.extract_strided_slice %1768 {offsets = [0, 32], sizes = [8, 32], strides = [1, 1]} : vector<8x128xf32> to vector<8x32xf32>
    %1801 = arith.negf %1800 : vector<8x32xf32>
    %1802 = math.exp %1801 : vector<8x32xf32>
    %cst_479 = arith.constant 1.000000e+00 : f32
    %1803 = vector.broadcast %cst_479 : f32 to vector<8x32xf32>
    %1804 = arith.addf %1803, %1802 : vector<8x32xf32>
    %1805 = arith.divf %1803, %1804 : vector<8x32xf32>
    %1806 = vector.extract_strided_slice %1768 {offsets = [0, 64], sizes = [8, 32], strides = [1, 1]} : vector<8x128xf32> to vector<8x32xf32>
    %1807 = math.tanh %1806 : vector<8x32xf32>
    %1808 = vector.extract_strided_slice %1768 {offsets = [0, 96], sizes = [8, 32], strides = [1, 1]} : vector<8x128xf32> to vector<8x32xf32>
    %1809 = arith.negf %1808 : vector<8x32xf32>
    %1810 = math.exp %1809 : vector<8x32xf32>
    %cst_480 = arith.constant 1.000000e+00 : f32
    %1811 = vector.broadcast %cst_480 : f32 to vector<8x32xf32>
    %1812 = arith.addf %1811, %1810 : vector<8x32xf32>
    %1813 = arith.divf %1811, %1812 : vector<8x32xf32>
    %1814 = arith.mulf %1805, %1755 : vector<8x32xf32>
    %1815 = arith.mulf %1799, %1807 : vector<8x32xf32>
    %1816 = arith.addf %1814, %1815 : vector<8x32xf32>
    %1817 = math.tanh %1816 : vector<8x32xf32>
    %1818 = arith.mulf %1813, %1817 : vector<8x32xf32>
    %c32_481 = arith.constant 32 : index
    %c0_482 = arith.constant 0 : index
    %1819 = vector.load %arg22[%c32_481, %c0_482] : memref<64x64xf32, #tpu.memory_space<vmem>>, vector<8x32xf32>
    tpu.vector_store %arg22[%c32_481, %c0_482], %1793 {strides = array<i32>} : memref<64x64xf32, #tpu.memory_space<vmem>>, vector<8x32xf32>,
    %c24_483 = arith.constant 24 : index
    %c32_484 = arith.constant 32 : index
    %1820 = vector.load %arg22[%c24_483, %c32_484] : memref<64x64xf32, #tpu.memory_space<vmem>>, vector<8x32xf32>
    tpu.vector_store %arg22[%c24_483, %c32_484], %1818 {strides = array<i32>} : memref<64x64xf32, #tpu.memory_space<vmem>>, vector<8x32xf32>,
    %1821 = tpu.concatenate %1793, %1818 in 1 : vector<8x32xf32>, vector<8x32xf32> -> vector<8x64xf32>
    %1822 = arith.truncf %1821 : vector<8x64xf32> to vector<8x64xbf16>
    %cst_485 = arith.constant dense<0.000000e+00> : vector<8x256xf32>
    %1823 = tpu.matmul %1822, %1511, %cst_485 {dimension_numbers = #tpu.dot_dimension_numbers<[1], [0], [0], [1], [0, 0, 1, 1], [], []>} : vector<8x64xbf16>, vector<64x256xbf16>, vector<8x256xf32> -> vector<8x256xf32>
    %c40_486 = arith.constant 40 : index
    %c0_487 = arith.constant 0 : index
    %1824 = vector.load %arg23[%c40_486, %c0_487] : memref<64x256xf32, #tpu.memory_space<vmem>>, vector<8x128xf32>
    %1825 = vector.extract_strided_slice %1823 {offsets = [0, 0], sizes = [8, 128], strides = [1, 1]} : vector<8x256xf32> to vector<8x128xf32>
    %1826 = arith.addf %1824, %1825 : vector<8x128xf32>
    %c16_488 = arith.constant 16 : index
    %c128_489 = arith.constant 128 : index
    %1827 = vector.load %arg23[%c16_488, %c128_489] : memref<64x256xf32, #tpu.memory_space<vmem>>, vector<8x128xf32>
    %1828 = vector.extract_strided_slice %1823 {offsets = [0, 128], sizes = [8, 128], strides = [1, 1]} : vector<8x256xf32> to vector<8x128xf32>
    %1829 = arith.addf %1827, %1828 : vector<8x128xf32>
    %1830 = vector.extract_strided_slice %1826 {offsets = [0, 0], sizes = [8, 32], strides = [1, 1]} : vector<8x128xf32> to vector<8x32xf32>
    %1831 = arith.negf %1830 : vector<8x32xf32>
    %1832 = math.exp %1831 : vector<8x32xf32>
    %cst_490 = arith.constant 1.000000e+00 : f32
    %1833 = vector.broadcast %cst_490 : f32 to vector<8x32xf32>
    %1834 = arith.addf %1833, %1832 : vector<8x32xf32>
    %1835 = arith.divf %1833, %1834 : vector<8x32xf32>
    %1836 = vector.extract_strided_slice %1826 {offsets = [0, 32], sizes = [8, 32], strides = [1, 1]} : vector<8x128xf32> to vector<8x32xf32>
    %1837 = arith.negf %1836 : vector<8x32xf32>
    %1838 = math.exp %1837 : vector<8x32xf32>
    %cst_491 = arith.constant 1.000000e+00 : f32
    %1839 = vector.broadcast %cst_491 : f32 to vector<8x32xf32>
    %1840 = arith.addf %1839, %1838 : vector<8x32xf32>
    %1841 = arith.divf %1839, %1840 : vector<8x32xf32>
    %1842 = vector.extract_strided_slice %1826 {offsets = [0, 64], sizes = [8, 32], strides = [1, 1]} : vector<8x128xf32> to vector<8x32xf32>
    %1843 = math.tanh %1842 : vector<8x32xf32>
    %1844 = vector.extract_strided_slice %1826 {offsets = [0, 96], sizes = [8, 32], strides = [1, 1]} : vector<8x128xf32> to vector<8x32xf32>
    %1845 = arith.negf %1844 : vector<8x32xf32>
    %1846 = math.exp %1845 : vector<8x32xf32>
    %cst_492 = arith.constant 1.000000e+00 : f32
    %1847 = vector.broadcast %cst_492 : f32 to vector<8x32xf32>
    %1848 = arith.addf %1847, %1846 : vector<8x32xf32>
    %1849 = arith.divf %1847, %1848 : vector<8x32xf32>
    %1850 = arith.mulf %1841, %1791 : vector<8x32xf32>
    %1851 = arith.mulf %1835, %1843 : vector<8x32xf32>
    %1852 = arith.addf %1850, %1851 : vector<8x32xf32>
    %1853 = math.tanh %1852 : vector<8x32xf32>
    %1854 = arith.mulf %1849, %1853 : vector<8x32xf32>
    %1855 = vector.extract_strided_slice %1829 {offsets = [0, 0], sizes = [8, 32], strides = [1, 1]} : vector<8x128xf32> to vector<8x32xf32>
    %1856 = arith.negf %1855 : vector<8x32xf32>
    %1857 = math.exp %1856 : vector<8x32xf32>
    %cst_493 = arith.constant 1.000000e+00 : f32
    %1858 = vector.broadcast %cst_493 : f32 to vector<8x32xf32>
    %1859 = arith.addf %1858, %1857 : vector<8x32xf32>
    %1860 = arith.divf %1858, %1859 : vector<8x32xf32>
    %1861 = vector.extract_strided_slice %1829 {offsets = [0, 32], sizes = [8, 32], strides = [1, 1]} : vector<8x128xf32> to vector<8x32xf32>
    %1862 = arith.negf %1861 : vector<8x32xf32>
    %1863 = math.exp %1862 : vector<8x32xf32>
    %cst_494 = arith.constant 1.000000e+00 : f32
    %1864 = vector.broadcast %cst_494 : f32 to vector<8x32xf32>
    %1865 = arith.addf %1864, %1863 : vector<8x32xf32>
    %1866 = arith.divf %1864, %1865 : vector<8x32xf32>
    %1867 = vector.extract_strided_slice %1829 {offsets = [0, 64], sizes = [8, 32], strides = [1, 1]} : vector<8x128xf32> to vector<8x32xf32>
    %1868 = math.tanh %1867 : vector<8x32xf32>
    %1869 = vector.extract_strided_slice %1829 {offsets = [0, 96], sizes = [8, 32], strides = [1, 1]} : vector<8x128xf32> to vector<8x32xf32>
    %1870 = arith.negf %1869 : vector<8x32xf32>
    %1871 = math.exp %1870 : vector<8x32xf32>
    %cst_495 = arith.constant 1.000000e+00 : f32
    %1872 = vector.broadcast %cst_495 : f32 to vector<8x32xf32>
    %1873 = arith.addf %1872, %1871 : vector<8x32xf32>
    %1874 = arith.divf %1872, %1873 : vector<8x32xf32>
    %1875 = arith.mulf %1866, %1816 : vector<8x32xf32>
    %1876 = arith.mulf %1860, %1868 : vector<8x32xf32>
    %1877 = arith.addf %1875, %1876 : vector<8x32xf32>
    %1878 = math.tanh %1877 : vector<8x32xf32>
    %1879 = arith.mulf %1874, %1878 : vector<8x32xf32>
    %c40_496 = arith.constant 40 : index
    %c0_497 = arith.constant 0 : index
    %1880 = vector.load %arg22[%c40_496, %c0_497] : memref<64x64xf32, #tpu.memory_space<vmem>>, vector<8x32xf32>
    tpu.vector_store %arg22[%c40_496, %c0_497], %1854 {strides = array<i32>} : memref<64x64xf32, #tpu.memory_space<vmem>>, vector<8x32xf32>,
    %c16_498 = arith.constant 16 : index
    %c32_499 = arith.constant 32 : index
    %1881 = vector.load %arg22[%c16_498, %c32_499] : memref<64x64xf32, #tpu.memory_space<vmem>>, vector<8x32xf32>
    tpu.vector_store %arg22[%c16_498, %c32_499], %1879 {strides = array<i32>} : memref<64x64xf32, #tpu.memory_space<vmem>>, vector<8x32xf32>,
    %1882 = tpu.concatenate %1854, %1879 in 1 : vector<8x32xf32>, vector<8x32xf32> -> vector<8x64xf32>
    %1883 = arith.truncf %1882 : vector<8x64xf32> to vector<8x64xbf16>
    %cst_500 = arith.constant dense<0.000000e+00> : vector<8x256xf32>
    %1884 = tpu.matmul %1883, %1511, %cst_500 {dimension_numbers = #tpu.dot_dimension_numbers<[1], [0], [0], [1], [0, 0, 1, 1], [], []>} : vector<8x64xbf16>, vector<64x256xbf16>, vector<8x256xf32> -> vector<8x256xf32>
    %c48_501 = arith.constant 48 : index
    %c0_502 = arith.constant 0 : index
    %1885 = vector.load %arg23[%c48_501, %c0_502] : memref<64x256xf32, #tpu.memory_space<vmem>>, vector<8x128xf32>
    %1886 = vector.extract_strided_slice %1884 {offsets = [0, 0], sizes = [8, 128], strides = [1, 1]} : vector<8x256xf32> to vector<8x128xf32>
    %1887 = arith.addf %1885, %1886 : vector<8x128xf32>
    %c8_503 = arith.constant 8 : index
    %c128_504 = arith.constant 128 : index
    %1888 = vector.load %arg23[%c8_503, %c128_504] : memref<64x256xf32, #tpu.memory_space<vmem>>, vector<8x128xf32>
    %1889 = vector.extract_strided_slice %1884 {offsets = [0, 128], sizes = [8, 128], strides = [1, 1]} : vector<8x256xf32> to vector<8x128xf32>
    %1890 = arith.addf %1888, %1889 : vector<8x128xf32>
    %1891 = vector.extract_strided_slice %1887 {offsets = [0, 0], sizes = [8, 32], strides = [1, 1]} : vector<8x128xf32> to vector<8x32xf32>
    %1892 = arith.negf %1891 : vector<8x32xf32>
    %1893 = math.exp %1892 : vector<8x32xf32>
    %cst_505 = arith.constant 1.000000e+00 : f32
    %1894 = vector.broadcast %cst_505 : f32 to vector<8x32xf32>
    %1895 = arith.addf %1894, %1893 : vector<8x32xf32>
    %1896 = arith.divf %1894, %1895 : vector<8x32xf32>
    %1897 = vector.extract_strided_slice %1887 {offsets = [0, 32], sizes = [8, 32], strides = [1, 1]} : vector<8x128xf32> to vector<8x32xf32>
    %1898 = arith.negf %1897 : vector<8x32xf32>
    %1899 = math.exp %1898 : vector<8x32xf32>
    %cst_506 = arith.constant 1.000000e+00 : f32
    %1900 = vector.broadcast %cst_506 : f32 to vector<8x32xf32>
    %1901 = arith.addf %1900, %1899 : vector<8x32xf32>
    %1902 = arith.divf %1900, %1901 : vector<8x32xf32>
    %1903 = vector.extract_strided_slice %1887 {offsets = [0, 64], sizes = [8, 32], strides = [1, 1]} : vector<8x128xf32> to vector<8x32xf32>
    %1904 = math.tanh %1903 : vector<8x32xf32>
    %1905 = vector.extract_strided_slice %1887 {offsets = [0, 96], sizes = [8, 32], strides = [1, 1]} : vector<8x128xf32> to vector<8x32xf32>
    %1906 = arith.negf %1905 : vector<8x32xf32>
    %1907 = math.exp %1906 : vector<8x32xf32>
    %cst_507 = arith.constant 1.000000e+00 : f32
    %1908 = vector.broadcast %cst_507 : f32 to vector<8x32xf32>
    %1909 = arith.addf %1908, %1907 : vector<8x32xf32>
    %1910 = arith.divf %1908, %1909 : vector<8x32xf32>
    %1911 = arith.mulf %1902, %1852 : vector<8x32xf32>
    %1912 = arith.mulf %1896, %1904 : vector<8x32xf32>
    %1913 = arith.addf %1911, %1912 : vector<8x32xf32>
    %1914 = math.tanh %1913 : vector<8x32xf32>
    %1915 = arith.mulf %1910, %1914 : vector<8x32xf32>
    %1916 = vector.extract_strided_slice %1890 {offsets = [0, 0], sizes = [8, 32], strides = [1, 1]} : vector<8x128xf32> to vector<8x32xf32>
    %1917 = arith.negf %1916 : vector<8x32xf32>
    %1918 = math.exp %1917 : vector<8x32xf32>
    %cst_508 = arith.constant 1.000000e+00 : f32
    %1919 = vector.broadcast %cst_508 : f32 to vector<8x32xf32>
    %1920 = arith.addf %1919, %1918 : vector<8x32xf32>
    %1921 = arith.divf %1919, %1920 : vector<8x32xf32>
    %1922 = vector.extract_strided_slice %1890 {offsets = [0, 32], sizes = [8, 32], strides = [1, 1]} : vector<8x128xf32> to vector<8x32xf32>
    %1923 = arith.negf %1922 : vector<8x32xf32>
    %1924 = math.exp %1923 : vector<8x32xf32>
    %cst_509 = arith.constant 1.000000e+00 : f32
    %1925 = vector.broadcast %cst_509 : f32 to vector<8x32xf32>
    %1926 = arith.addf %1925, %1924 : vector<8x32xf32>
    %1927 = arith.divf %1925, %1926 : vector<8x32xf32>
    %1928 = vector.extract_strided_slice %1890 {offsets = [0, 64], sizes = [8, 32], strides = [1, 1]} : vector<8x128xf32> to vector<8x32xf32>
    %1929 = math.tanh %1928 : vector<8x32xf32>
    %1930 = vector.extract_strided_slice %1890 {offsets = [0, 96], sizes = [8, 32], strides = [1, 1]} : vector<8x128xf32> to vector<8x32xf32>
    %1931 = arith.negf %1930 : vector<8x32xf32>
    %1932 = math.exp %1931 : vector<8x32xf32>
    %cst_510 = arith.constant 1.000000e+00 : f32
    %1933 = vector.broadcast %cst_510 : f32 to vector<8x32xf32>
    %1934 = arith.addf %1933, %1932 : vector<8x32xf32>
    %1935 = arith.divf %1933, %1934 : vector<8x32xf32>
    %1936 = arith.mulf %1927, %1877 : vector<8x32xf32>
    %1937 = arith.mulf %1921, %1929 : vector<8x32xf32>
    %1938 = arith.addf %1936, %1937 : vector<8x32xf32>
    %1939 = math.tanh %1938 : vector<8x32xf32>
    %1940 = arith.mulf %1935, %1939 : vector<8x32xf32>
    %c48_511 = arith.constant 48 : index
    %c0_512 = arith.constant 0 : index
    %1941 = vector.load %arg22[%c48_511, %c0_512] : memref<64x64xf32, #tpu.memory_space<vmem>>, vector<8x32xf32>
    tpu.vector_store %arg22[%c48_511, %c0_512], %1915 {strides = array<i32>} : memref<64x64xf32, #tpu.memory_space<vmem>>, vector<8x32xf32>,
    %c8_513 = arith.constant 8 : index
    %c32_514 = arith.constant 32 : index
    %1942 = vector.load %arg22[%c8_513, %c32_514] : memref<64x64xf32, #tpu.memory_space<vmem>>, vector<8x32xf32>
    tpu.vector_store %arg22[%c8_513, %c32_514], %1940 {strides = array<i32>} : memref<64x64xf32, #tpu.memory_space<vmem>>, vector<8x32xf32>,
    %1943 = tpu.concatenate %1915, %1940 in 1 : vector<8x32xf32>, vector<8x32xf32> -> vector<8x64xf32>
    %1944 = arith.truncf %1943 : vector<8x64xf32> to vector<8x64xbf16>
    %cst_515 = arith.constant dense<0.000000e+00> : vector<8x256xf32>
    %1945 = tpu.matmul %1944, %1511, %cst_515 {dimension_numbers = #tpu.dot_dimension_numbers<[1], [0], [0], [1], [0, 0, 1, 1], [], []>} : vector<8x64xbf16>, vector<64x256xbf16>, vector<8x256xf32> -> vector<8x256xf32>
    %c56_516 = arith.constant 56 : index
    %c0_517 = arith.constant 0 : index
    %1946 = vector.load %arg23[%c56_516, %c0_517] : memref<64x256xf32, #tpu.memory_space<vmem>>, vector<8x128xf32>
    %1947 = vector.extract_strided_slice %1945 {offsets = [0, 0], sizes = [8, 128], strides = [1, 1]} : vector<8x256xf32> to vector<8x128xf32>
    %1948 = arith.addf %1946, %1947 : vector<8x128xf32>
    %c0_518 = arith.constant 0 : index
    %c128_519 = arith.constant 128 : index
    %1949 = vector.load %arg23[%c0_518, %c128_519] : memref<64x256xf32, #tpu.memory_space<vmem>>, vector<8x128xf32>
    %1950 = vector.extract_strided_slice %1945 {offsets = [0, 128], sizes = [8, 128], strides = [1, 1]} : vector<8x256xf32> to vector<8x128xf32>
    %1951 = arith.addf %1949, %1950 : vector<8x128xf32>
    %1952 = vector.extract_strided_slice %1948 {offsets = [0, 0], sizes = [8, 32], strides = [1, 1]} : vector<8x128xf32> to vector<8x32xf32>
    %1953 = arith.negf %1952 : vector<8x32xf32>
    %1954 = math.exp %1953 : vector<8x32xf32>
    %cst_520 = arith.constant 1.000000e+00 : f32
    %1955 = vector.broadcast %cst_520 : f32 to vector<8x32xf32>
    %1956 = arith.addf %1955, %1954 : vector<8x32xf32>
    %1957 = arith.divf %1955, %1956 : vector<8x32xf32>
    %1958 = vector.extract_strided_slice %1948 {offsets = [0, 32], sizes = [8, 32], strides = [1, 1]} : vector<8x128xf32> to vector<8x32xf32>
    %1959 = arith.negf %1958 : vector<8x32xf32>
    %1960 = math.exp %1959 : vector<8x32xf32>
    %cst_521 = arith.constant 1.000000e+00 : f32
    %1961 = vector.broadcast %cst_521 : f32 to vector<8x32xf32>
    %1962 = arith.addf %1961, %1960 : vector<8x32xf32>
    %1963 = arith.divf %1961, %1962 : vector<8x32xf32>
    %1964 = vector.extract_strided_slice %1948 {offsets = [0, 64], sizes = [8, 32], strides = [1, 1]} : vector<8x128xf32> to vector<8x32xf32>
    %1965 = math.tanh %1964 : vector<8x32xf32>
    %1966 = vector.extract_strided_slice %1948 {offsets = [0, 96], sizes = [8, 32], strides = [1, 1]} : vector<8x128xf32> to vector<8x32xf32>
    %1967 = arith.negf %1966 : vector<8x32xf32>
    %1968 = math.exp %1967 : vector<8x32xf32>
    %cst_522 = arith.constant 1.000000e+00 : f32
    %1969 = vector.broadcast %cst_522 : f32 to vector<8x32xf32>
    %1970 = arith.addf %1969, %1968 : vector<8x32xf32>
    %1971 = arith.divf %1969, %1970 : vector<8x32xf32>
    %1972 = arith.mulf %1963, %1913 : vector<8x32xf32>
    %1973 = arith.mulf %1957, %1965 : vector<8x32xf32>
    %1974 = arith.addf %1972, %1973 : vector<8x32xf32>
    %1975 = math.tanh %1974 : vector<8x32xf32>
    %1976 = arith.mulf %1971, %1975 : vector<8x32xf32>
    %1977 = vector.extract_strided_slice %1951 {offsets = [0, 0], sizes = [8, 32], strides = [1, 1]} : vector<8x128xf32> to vector<8x32xf32>
    %1978 = arith.negf %1977 : vector<8x32xf32>
    %1979 = math.exp %1978 : vector<8x32xf32>
    %cst_523 = arith.constant 1.000000e+00 : f32
    %1980 = vector.broadcast %cst_523 : f32 to vector<8x32xf32>
    %1981 = arith.addf %1980, %1979 : vector<8x32xf32>
    %1982 = arith.divf %1980, %1981 : vector<8x32xf32>
    %1983 = vector.extract_strided_slice %1951 {offsets = [0, 32], sizes = [8, 32], strides = [1, 1]} : vector<8x128xf32> to vector<8x32xf32>
    %1984 = arith.negf %1983 : vector<8x32xf32>
    %1985 = math.exp %1984 : vector<8x32xf32>
    %cst_524 = arith.constant 1.000000e+00 : f32
    %1986 = vector.broadcast %cst_524 : f32 to vector<8x32xf32>
    %1987 = arith.addf %1986, %1985 : vector<8x32xf32>
    %1988 = arith.divf %1986, %1987 : vector<8x32xf32>
    %1989 = vector.extract_strided_slice %1951 {offsets = [0, 64], sizes = [8, 32], strides = [1, 1]} : vector<8x128xf32> to vector<8x32xf32>
    %1990 = math.tanh %1989 : vector<8x32xf32>
    %1991 = vector.extract_strided_slice %1951 {offsets = [0, 96], sizes = [8, 32], strides = [1, 1]} : vector<8x128xf32> to vector<8x32xf32>
    %1992 = arith.negf %1991 : vector<8x32xf32>
    %1993 = math.exp %1992 : vector<8x32xf32>
    %cst_525 = arith.constant 1.000000e+00 : f32
    %1994 = vector.broadcast %cst_525 : f32 to vector<8x32xf32>
    %1995 = arith.addf %1994, %1993 : vector<8x32xf32>
    %1996 = arith.divf %1994, %1995 : vector<8x32xf32>
    %1997 = arith.mulf %1988, %1938 : vector<8x32xf32>
    %1998 = arith.mulf %1982, %1990 : vector<8x32xf32>
    %1999 = arith.addf %1997, %1998 : vector<8x32xf32>
    %2000 = math.tanh %1999 : vector<8x32xf32>
    %2001 = arith.mulf %1996, %2000 : vector<8x32xf32>
    %c56_526 = arith.constant 56 : index
    %c0_527 = arith.constant 0 : index
    %2002 = vector.load %arg22[%c56_526, %c0_527] : memref<64x64xf32, #tpu.memory_space<vmem>>, vector<8x32xf32>
    tpu.vector_store %arg22[%c56_526, %c0_527], %1976 {strides = array<i32>} : memref<64x64xf32, #tpu.memory_space<vmem>>, vector<8x32xf32>,
    %c0_528 = arith.constant 0 : index
    %c32_529 = arith.constant 32 : index
    %2003 = vector.load %arg22[%c0_528, %c32_529] : memref<64x64xf32, #tpu.memory_space<vmem>>, vector<8x32xf32>
    tpu.vector_store %arg22[%c0_528, %c32_529], %2001 {strides = array<i32>} : memref<64x64xf32, #tpu.memory_space<vmem>>, vector<8x32xf32>,
    %c0_530 = arith.constant 0 : index
    %c0_531 = arith.constant 0 : index
    %2004 = vector.load %arg22[%c0_530, %c0_531] : memref<64x64xf32, #tpu.memory_space<vmem>>, vector<64x64xf32>
    %2005 = arith.truncf %2004 : vector<64x64xf32> to vector<64x64xbf16>
    %c0_532 = arith.constant 0 : index
    %c0_533 = arith.constant 0 : index
    %2006 = vector.load %arg13[%c0_532, %c0_533] : memref<64x64xbf16, #tpu.memory_space<vmem>>, vector<64x64xbf16>
    %cst_534 = arith.constant dense<0.000000e+00> : vector<64x64xf32>
    %2007 = tpu.matmul %2005, %2006, %cst_534 {dimension_numbers = #tpu.dot_dimension_numbers<[1], [0], [0], [1], [0, 0, 1, 1], [], []>} : vector<64x64xbf16>, vector<64x64xbf16>, vector<64x64xf32> -> vector<64x64xf32>
    %c0_535 = arith.constant 0 : index
    %c0_536 = arith.constant 0 : index
    %2008 = vector.load %arg15[%c0_535, %c0_536] : memref<1x64xf32, #tpu.memory_space<vmem>>, vector<1x64xf32>
    %2009 = vector.broadcast %2008 : vector<1x64xf32> to vector<64x64xf32>
    %2010 = arith.addf %2007, %2009 : vector<64x64xf32>
    %c0_537 = arith.constant 0 : index
    %c0_538 = arith.constant 0 : index
    %2011 = vector.load %arg14[%c0_537, %c0_538] : memref<64x64xbf16, #tpu.memory_space<vmem>>, vector<64x64xbf16>
    %cst_539 = arith.constant dense<0.000000e+00> : vector<64x64xf32>
    %2012 = tpu.matmul %2005, %2011, %cst_539 {dimension_numbers = #tpu.dot_dimension_numbers<[1], [0], [0], [1], [0, 0, 1, 1], [], []>} : vector<64x64xbf16>, vector<64x64xbf16>, vector<64x64xf32> -> vector<64x64xf32>
    %2013 = vector.shape_cast %2010 : vector<64x64xf32> to vector<8x8x64xf32>
    %cst_540 = arith.constant 0.000000e+00 : f32
    %2014 = vector.broadcast %cst_540 : f32 to vector<64x64xf32>
    %2015 = arith.maximumf %2010, %2014 : vector<64x64xf32>
    %2016 = arith.truncf %2015 : vector<64x64xf32> to vector<64x64xbf16>
    %c0_541 = arith.constant 0 : index
    %c0_542 = arith.constant 0 : index
    %2017 = vector.load %arg24[%c0_541, %c0_542] : memref<576x64xbf16, #tpu.memory_space<vmem>>, vector<64x64xbf16>
    tpu.vector_store %arg24[%c0_541, %c0_542], %2016 {strides = array<i32>} : memref<576x64xbf16, #tpu.memory_space<vmem>>, vector<64x64xbf16>,
    %2018 = vector.extract_strided_slice %2012 {offsets = [0, 0], sizes = [8, 64], strides = [1, 1]} : vector<64x64xf32> to vector<8x64xf32>
    %2019 = vector.shape_cast %2018 : vector<8x64xf32> to vector<1x8x64xf32>
    %2020 = vector.broadcast %2019 : vector<1x8x64xf32> to vector<8x8x64xf32>
    %2021 = arith.addf %2013, %2020 : vector<8x8x64xf32>
    %cst_543 = arith.constant 0.000000e+00 : f32
    %2022 = vector.broadcast %cst_543 : f32 to vector<8x8x64xf32>
    %2023 = arith.maximumf %2021, %2022 : vector<8x8x64xf32>
    %2024 = vector.shape_cast %2023 : vector<8x8x64xf32> to vector<64x64xf32>
    %2025 = arith.truncf %2024 : vector<64x64xf32> to vector<64x64xbf16>
    %c64 = arith.constant 64 : index
    %c0_544 = arith.constant 0 : index
    %2026 = vector.load %arg24[%c64, %c0_544] : memref<576x64xbf16, #tpu.memory_space<vmem>>, vector<64x64xbf16>
    tpu.vector_store %arg24[%c64, %c0_544], %2025 {strides = array<i32>} : memref<576x64xbf16, #tpu.memory_space<vmem>>, vector<64x64xbf16>,
    %2027 = vector.extract_strided_slice %2012 {offsets = [8, 0], sizes = [8, 64], strides = [1, 1]} : vector<64x64xf32> to vector<8x64xf32>
    %2028 = vector.shape_cast %2027 : vector<8x64xf32> to vector<1x8x64xf32>
    %2029 = vector.broadcast %2028 : vector<1x8x64xf32> to vector<8x8x64xf32>
    %2030 = arith.addf %2013, %2029 : vector<8x8x64xf32>
    %cst_545 = arith.constant 0.000000e+00 : f32
    %2031 = vector.broadcast %cst_545 : f32 to vector<8x8x64xf32>
    %2032 = arith.maximumf %2030, %2031 : vector<8x8x64xf32>
    %2033 = vector.shape_cast %2032 : vector<8x8x64xf32> to vector<64x64xf32>
    %2034 = arith.truncf %2033 : vector<64x64xf32> to vector<64x64xbf16>
    %c128_546 = arith.constant 128 : index
    %c0_547 = arith.constant 0 : index
    %2035 = vector.load %arg24[%c128_546, %c0_547] : memref<576x64xbf16, #tpu.memory_space<vmem>>, vector<64x64xbf16>
    tpu.vector_store %arg24[%c128_546, %c0_547], %2034 {strides = array<i32>} : memref<576x64xbf16, #tpu.memory_space<vmem>>, vector<64x64xbf16>,
    %2036 = vector.extract_strided_slice %2012 {offsets = [16, 0], sizes = [8, 64], strides = [1, 1]} : vector<64x64xf32> to vector<8x64xf32>
    %2037 = vector.shape_cast %2036 : vector<8x64xf32> to vector<1x8x64xf32>
    %2038 = vector.broadcast %2037 : vector<1x8x64xf32> to vector<8x8x64xf32>
    %2039 = arith.addf %2013, %2038 : vector<8x8x64xf32>
    %cst_548 = arith.constant 0.000000e+00 : f32
    %2040 = vector.broadcast %cst_548 : f32 to vector<8x8x64xf32>
    %2041 = arith.maximumf %2039, %2040 : vector<8x8x64xf32>
    %2042 = vector.shape_cast %2041 : vector<8x8x64xf32> to vector<64x64xf32>
    %2043 = arith.truncf %2042 : vector<64x64xf32> to vector<64x64xbf16>
    %c192 = arith.constant 192 : index
    %c0_549 = arith.constant 0 : index
    %2044 = vector.load %arg24[%c192, %c0_549] : memref<576x64xbf16, #tpu.memory_space<vmem>>, vector<64x64xbf16>
    tpu.vector_store %arg24[%c192, %c0_549], %2043 {strides = array<i32>} : memref<576x64xbf16, #tpu.memory_space<vmem>>, vector<64x64xbf16>,
    %2045 = vector.extract_strided_slice %2012 {offsets = [24, 0], sizes = [8, 64], strides = [1, 1]} : vector<64x64xf32> to vector<8x64xf32>
    %2046 = vector.shape_cast %2045 : vector<8x64xf32> to vector<1x8x64xf32>
    %2047 = vector.broadcast %2046 : vector<1x8x64xf32> to vector<8x8x64xf32>
    %2048 = arith.addf %2013, %2047 : vector<8x8x64xf32>
    %cst_550 = arith.constant 0.000000e+00 : f32
    %2049 = vector.broadcast %cst_550 : f32 to vector<8x8x64xf32>
    %2050 = arith.maximumf %2048, %2049 : vector<8x8x64xf32>
    %2051 = vector.shape_cast %2050 : vector<8x8x64xf32> to vector<64x64xf32>
    %2052 = arith.truncf %2051 : vector<64x64xf32> to vector<64x64xbf16>
    %c256 = arith.constant 256 : index
    %c0_551 = arith.constant 0 : index
    %2053 = vector.load %arg24[%c256, %c0_551] : memref<576x64xbf16, #tpu.memory_space<vmem>>, vector<64x64xbf16>
    tpu.vector_store %arg24[%c256, %c0_551], %2052 {strides = array<i32>} : memref<576x64xbf16, #tpu.memory_space<vmem>>, vector<64x64xbf16>,
    %2054 = vector.extract_strided_slice %2012 {offsets = [32, 0], sizes = [8, 64], strides = [1, 1]} : vector<64x64xf32> to vector<8x64xf32>
    %2055 = vector.shape_cast %2054 : vector<8x64xf32> to vector<1x8x64xf32>
    %2056 = vector.broadcast %2055 : vector<1x8x64xf32> to vector<8x8x64xf32>
    %2057 = arith.addf %2013, %2056 : vector<8x8x64xf32>
    %cst_552 = arith.constant 0.000000e+00 : f32
    %2058 = vector.broadcast %cst_552 : f32 to vector<8x8x64xf32>
    %2059 = arith.maximumf %2057, %2058 : vector<8x8x64xf32>
    %2060 = vector.shape_cast %2059 : vector<8x8x64xf32> to vector<64x64xf32>
    %2061 = arith.truncf %2060 : vector<64x64xf32> to vector<64x64xbf16>
    %c320 = arith.constant 320 : index
    %c0_553 = arith.constant 0 : index
    %2062 = vector.load %arg24[%c320, %c0_553] : memref<576x64xbf16, #tpu.memory_space<vmem>>, vector<64x64xbf16>
    tpu.vector_store %arg24[%c320, %c0_553], %2061 {strides = array<i32>} : memref<576x64xbf16, #tpu.memory_space<vmem>>, vector<64x64xbf16>,
    %2063 = vector.extract_strided_slice %2012 {offsets = [40, 0], sizes = [8, 64], strides = [1, 1]} : vector<64x64xf32> to vector<8x64xf32>
    %2064 = vector.shape_cast %2063 : vector<8x64xf32> to vector<1x8x64xf32>
    %2065 = vector.broadcast %2064 : vector<1x8x64xf32> to vector<8x8x64xf32>
    %2066 = arith.addf %2013, %2065 : vector<8x8x64xf32>
    %cst_554 = arith.constant 0.000000e+00 : f32
    %2067 = vector.broadcast %cst_554 : f32 to vector<8x8x64xf32>
    %2068 = arith.maximumf %2066, %2067 : vector<8x8x64xf32>
    %2069 = vector.shape_cast %2068 : vector<8x8x64xf32> to vector<64x64xf32>
    %2070 = arith.truncf %2069 : vector<64x64xf32> to vector<64x64xbf16>
    %c384 = arith.constant 384 : index
    %c0_555 = arith.constant 0 : index
    %2071 = vector.load %arg24[%c384, %c0_555] : memref<576x64xbf16, #tpu.memory_space<vmem>>, vector<64x64xbf16>
    tpu.vector_store %arg24[%c384, %c0_555], %2070 {strides = array<i32>} : memref<576x64xbf16, #tpu.memory_space<vmem>>, vector<64x64xbf16>,
    %2072 = vector.extract_strided_slice %2012 {offsets = [48, 0], sizes = [8, 64], strides = [1, 1]} : vector<64x64xf32> to vector<8x64xf32>
    %2073 = vector.shape_cast %2072 : vector<8x64xf32> to vector<1x8x64xf32>
    %2074 = vector.broadcast %2073 : vector<1x8x64xf32> to vector<8x8x64xf32>
    %2075 = arith.addf %2013, %2074 : vector<8x8x64xf32>
    %cst_556 = arith.constant 0.000000e+00 : f32
    %2076 = vector.broadcast %cst_556 : f32 to vector<8x8x64xf32>
    %2077 = arith.maximumf %2075, %2076 : vector<8x8x64xf32>
    %2078 = vector.shape_cast %2077 : vector<8x8x64xf32> to vector<64x64xf32>
    %2079 = arith.truncf %2078 : vector<64x64xf32> to vector<64x64xbf16>
    %c448 = arith.constant 448 : index
    %c0_557 = arith.constant 0 : index
    %2080 = vector.load %arg24[%c448, %c0_557] : memref<576x64xbf16, #tpu.memory_space<vmem>>, vector<64x64xbf16>
    tpu.vector_store %arg24[%c448, %c0_557], %2079 {strides = array<i32>} : memref<576x64xbf16, #tpu.memory_space<vmem>>, vector<64x64xbf16>,
    %2081 = vector.extract_strided_slice %2012 {offsets = [56, 0], sizes = [8, 64], strides = [1, 1]} : vector<64x64xf32> to vector<8x64xf32>
    %2082 = vector.shape_cast %2081 : vector<8x64xf32> to vector<1x8x64xf32>
    %2083 = vector.broadcast %2082 : vector<1x8x64xf32> to vector<8x8x64xf32>
    %2084 = arith.addf %2013, %2083 : vector<8x8x64xf32>
    %cst_558 = arith.constant 0.000000e+00 : f32
    %2085 = vector.broadcast %cst_558 : f32 to vector<8x8x64xf32>
    %2086 = arith.maximumf %2084, %2085 : vector<8x8x64xf32>
    %2087 = vector.shape_cast %2086 : vector<8x8x64xf32> to vector<64x64xf32>
    %2088 = arith.truncf %2087 : vector<64x64xf32> to vector<64x64xbf16>
    %c512 = arith.constant 512 : index
    %c0_559 = arith.constant 0 : index
    %2089 = vector.load %arg24[%c512, %c0_559] : memref<576x64xbf16, #tpu.memory_space<vmem>>, vector<64x64xbf16>
    tpu.vector_store %arg24[%c512, %c0_559], %2088 {strides = array<i32>} : memref<576x64xbf16, #tpu.memory_space<vmem>>, vector<64x64xbf16>,
    %c0_560 = arith.constant 0 : index
    %c0_561 = arith.constant 0 : index
    %2090 = vector.load %arg24[%c0_560, %c0_561] : memref<576x64xbf16, #tpu.memory_space<vmem>>, vector<576x64xbf16>
    %c0_562 = arith.constant 0 : index
    %c0_563 = arith.constant 0 : index
    %2091 = vector.load %arg16[%c0_562, %c0_563] : memref<64x16xbf16, #tpu.memory_space<vmem>>, vector<64x16xbf16>
    %cst_564 = arith.constant dense<0.000000e+00> : vector<576x16xf32>
    %2092 = tpu.matmul %2090, %2091, %cst_564 {dimension_numbers = #tpu.dot_dimension_numbers<[1], [0], [0], [1], [0, 0, 1, 1], [], []>} : vector<576x64xbf16>, vector<64x16xbf16>, vector<576x16xf32> -> vector<576x16xf32>
    %c0_565 = arith.constant 0 : index
    %c0_566 = arith.constant 0 : index
    %2093 = vector.load %arg17[%c0_565, %c0_566] : memref<1x16xf32, #tpu.memory_space<vmem>>, vector<1x16xf32>
    %2094 = vector.broadcast %2093 : vector<1x16xf32> to vector<576x16xf32>
    %2095 = arith.addf %2092, %2094 : vector<576x16xf32>
    %cst_567 = arith.constant 0.000000e+00 : f32
    %2096 = vector.broadcast %cst_567 : f32 to vector<576x16xf32>
    %2097 = arith.maximumf %2095, %2096 : vector<576x16xf32>
    %c0_568 = arith.constant 0 : index
    %c0_569 = arith.constant 0 : index
    %2098 = vector.load %arg18[%c0_568, %c0_569] : memref<1x16xf32, #tpu.memory_space<vmem>>, vector<1x16xf32>
    %2099 = vector.broadcast %2098 : vector<1x16xf32> to vector<576x16xf32>
    %2100 = arith.mulf %2097, %2099 : vector<576x16xf32>
    %2101 = vector.shape_cast %2100 : vector<576x16xf32> to vector<9x64x16xf32>
    %cst_570 = arith.constant dense<0.000000e+00> : vector<9x64xf32>
    %2102 = vector.multi_reduction <add>, %2101, %cst_570 [2] : vector<9x64x16xf32> to vector<9x64xf32>
    %c0_571 = arith.constant 0 : index
    %c0_572 = arith.constant 0 : index
    %2103 = vector.load %arg19[%c0_571, %c0_572] : memref<1x1xf32, #tpu.memory_space<vmem>>, vector<1x1xf32>
    %2104 = vector.broadcast %2103 : vector<1x1xf32> to vector<9x64xf32>
    %2105 = arith.addf %2102, %2104 : vector<9x64xf32>
    %c0_573 = arith.constant 0 : index
    %c0_574 = arith.constant 0 : index
    %2106 = vector.load %arg20[%c0_573, %c0_574] : memref<9x64xf32, #tpu.memory_space<vmem>>, vector<9x64xf32>
    tpu.vector_store %arg20[%c0_573, %c0_574], %2105 {strides = array<i32>} : memref<9x64xf32, #tpu.memory_space<vmem>>, vector<9x64xf32>,
    return
  }
}

</mosaic_0001>

<bundles_post_ra>
// kernel: new_dnn_pos_tagger_forward.1
= control target key start
LH: loop header
LB: loop body
LE: loop exit
PB: predicated region body
PF: predicated region fallthrough
CT: control target
= control target key end

     0   :  { %v7244_v1 = vmov 0   ;;  %vm116_vm0 = vcmask 261120   ;;  %v7245_v19 = vmov 0.0|0.0   ;;  %v86_v26 = vlaneseq  ;;  %s7246_s24 = smov 64   ;;  %s9514_s1 = inlined_call_operand.vmem [shape: bf16[32,256], index: 1, kind: input, shape index: {}]   ;;  %s9515_s2 = inlined_call_operand.vmem [shape: bf16[64,256], index: 2, kind: input, shape index: {}]   ;;  %s9516_s0 = inlined_call_operand.vmem [shape: f32[64,32], index: 0, kind: input, shape index: {}]   ;;  %s9517_s3 = inlined_call_operand.vmem [shape: f32[1,256], index: 3, kind: input, shape index: {}]   ;;  %s9518_s4 = inlined_call_operand.vmem [shape: bf16[64,256], index: 4, kind: input, shape index: {}]   ;;  %s9519_s5 = inlined_call_operand.vmem [shape: bf16[64,256], index: 5, kind: input, shape index: {}]   ;;  %s9520_s6 = inlined_call_operand.vmem [shape: f32[1,256], index: 6, kind: input, shape index: {}]   ;;  %s9521_s7 = inlined_call_operand.vmem [shape: bf16[64,256], index: 7, kind: input, shape index: {}]   ;;  %s9522_s8 = inlined_call_operand.vmem [shape: bf16[64,256], index: 8, kind: input, shape index: {}]   ;;  %s9523_s9 = inlined_call_operand.vmem [shape: f32[1,256], index: 9, kind: input, shape index: {}]   ;;  %s9524_s10 = inlined_call_operand.vmem [shape: bf16[64,256], index: 10, kind: input, shape index: {}]   ;;  %s9525_s11 = inlined_call_operand.vmem [shape: bf16[64,256], index: 11, kind: input, shape index: {}]   ;;  %s9526_s12 = inlined_call_operand.vmem [shape: f32[1,256], index: 12, kind: input, shape index: {}]   ;;  %s9527_s13 = inlined_call_operand.vmem [shape: bf16[64,64], index: 13, kind: input, shape index: {}]   ;;  %s9528_s14 = inlined_call_operand.vmem [shape: bf16[64,64], index: 14, kind: input, shape index: {}]   ;;  %s9529_s16 = inlined_call_operand.vmem [shape: bf16[64,16], index: 16, kind: input, shape index: {}]   ;;  %s9530_s19 = inlined_call_operand.<no memory space> [shape: f32[1,1], index: 19, kind: input, shape index: {}]   ;;  %s9531_s15 = inlined_call_operand.vmem [shape: f32[1,64], index: 15, kind: input, shape index: {}]   ;;  %s9532_s17 = inlined_call_operand.vmem [shape: f32[1,16], index: 17, kind: input, shape index: {}]   ;;  %s9533_s18 = inlined_call_operand.vmem [shape: f32[1,16], index: 18, kind: input, shape index: {}]   ;;  %s9534_s20 = inlined_call_operand.vmem [shape: f32[9,64], index: 20, kind: output, shape index: {}]  }
   0x1   :  { %9539 = sst [smem:[#allocation7_spill]] %s9514_s1  ;;  %161 = vmatprep.mubr.bf16.mxu0 %v7244_v1  ;;  %303 = vmatprep.mubr.bf16.mxu1 %v7244_v1  ;;  %vm373_vm1 = vcmask 523520   ;;  %vm267_vm2 = vcmask 523264   ;;  %vm5459_vm3 = vcmask 130048   ;;  %vm5841_vm4 = vcmask 130112  }
   0x2   :  { %9540 = sst [smem:[#allocation8_spill]] %s9515_s2  ;;  %s9544_s23 = sld [smem:[#allocation7_spill]]  ;;  %6628 = vset.pattern.permute.xlu1 %v7244_v1  ;;  %6629 = vset.pattern.permute.xlu0 %v7244_v1  ;;  %v7470_v27 = vshrl.u32 %v86_v26, 7  ;;  %vm5848_vm5 = vcmask 195712   ;;  %vm5855_vm6 = vcmask 261312   ;;  %vm5862_vm7 = vcmask 326912  }
   0x3   :  { %9541 = sst [smem:[#allocation9_spill]] %s9516_s0  ;;  %s9545_s25 = sld [smem:[#allocation8_spill]]  ;;  %vm5869_vm8 = vcmask 392512   ;;  %vm5876_vm9 = vcmask 458112   ;;  %vm5883_vm10 = vcmask 523712   ;;  %vm6197_vm11 = vcmask 1041409  }
   0x4   :  { %9542 = sst [smem:[#allocation10_spill]] %s9517_s3  ;;  %s9546_s26 = sld [smem:[#allocation9_spill]]  ;;  %v7473_v28 = vsub.s32 1, %v7470_v27  ;;  %v7479_v30 = vsub.s32 0, %v7470_v27  ;;  %vm6199_vm12 = vcmask 1042434   ;;  %vm6201_vm13 = vcmask 1043459  }
   0x5   :  { %9543 = sst [smem:[#allocation11_spill]] %s9518_s4  ;;  %s9547_s22 = sld [smem:[#allocation10_spill]]  ;;  %vm6203_vm14 = vcmask 1044484   ;;  %vm6205_vm15 = vcmask 1045509  }
   0x6   :  { %s7247_s0 = smov 32  }
   0x8   :  { %v6630_v0 = vld [vmem:[%s9544_s23 + $0x4] ss:$8 sps:$4 sm:$0xff]   ;;  %v6634_v3 = vld [vmem:[%s9544_s23] ss:$8 sps:$4 sm:$0xff]   ;;  %v6636_v5 = vld [vmem:[%s9544_s23 + $0x14] ss:$8 sps:$4 sm:$0xff]  }
   0x9   :  { %v7361_v2 = vld [vmem:[%s9545_s25 + $0x4] ss:$8 sps:$4 sm:$0xff]   ;;  %129 = vmatprep.subr.bf16.mxu0 %v6630_v0  ;;  %v7371_v4 = vld [vmem:[%s9545_s25] ss:$8 sps:$4 sm:$0xff]   ;;  %v7381_v6 = vld [vmem:[%s9545_s25 + $0x14] ss:$8 sps:$4 sm:$0xff]  }
   0xa   :  { %271 = vmatprep.subr.bf16.mxu1 %v7361_v2  ;;  %130 = vmatpush1.bf16.msra.mxu0 %v6634_v3  ;;  %v6640_v7 = vld [vmem:[%s9544_s23 + $0x10] ss:$8 sps:$4 sm:$0xff]   ;;  %v68_v9 = vld [vmem:[%s9546_s26] sm:$0xff]  ;;  %v69_v10 = vld [vmem:[%s9546_s26 + $0x8] sm:$0xff] }
   0xb   :  { %272 = vmatpush1.bf16.msra.mxu1 %v7371_v4  ;;  %131 = vmatprep.subr.bf16.mxu0 %v6636_v5  ;;  %v7389_v8 = vld [vmem:[%s9545_s25 + $0x10] ss:$8 sps:$4 sm:$0xff]   ;;  %v7401_v11 = vld [vmem:[%s9545_s25 + $0x24] ss:$8 sps:$4 sm:$0xff]   ;;  %v76_v12 = vpack.c.bf16 %v69_v10, %v68_v9  ;;  %v7407_v13 = vld [vmem:[%s9545_s25 + $0x20] ss:$8 sps:$4 sm:$0xff]  }
   0xc   :  { %273 = vmatprep.subr.bf16.mxu1 %v7381_v6  ;;  %v7413_v14 = vld [vmem:[%s9545_s25 + $0x34] ss:$8 sps:$4 sm:$0xff]   ;;  %v7421_v15 = vld [vmem:[%s9545_s25 + $0x30] ss:$8 sps:$4 sm:$0xff]   ;;  %v72_v20 = vld [vmem:[%s9546_s26 + $0x20] sm:$0xff]  ;;  %s9548_s25 = sld [smem:[#allocation11_spill]] }
   0xd   :  { %v70_v16 = vld [vmem:[%s9546_s26 + $0x10] sm:$0xff]  ;;  %v71_v17 = vld [vmem:[%s9546_s26 + $0x18] sm:$0xff]  ;;  %v73_v21 = vld [vmem:[%s9546_s26 + $0x28] sm:$0xff] }
   0xe   :  { %132 = vmatpush1.bf16.msra.mxu0 %v6640_v7  ;;  %v77_v18 = vpack.c.bf16 %v71_v17, %v70_v16  ;;  %v78_v22 = vpack.c.bf16 %v73_v21, %v72_v20  ;;  %v74_v23 = vld [vmem:[%s9546_s26 + $0x30] sm:$0xff]  ;;  %v75_v24 = vld [vmem:[%s9546_s26 + $0x38] sm:$0xff]  ;;  %v84_v29 = vld [vmem:[%s9547_s22] sm:$0x3] }
   0xf   :  { %274 = vmatpush1.bf16.msra.mxu1 %v7389_v8  ;;  %488 = vmatprep.subr.bf16.mxu0 %v7361_v2  ;;  %v79_v25 = vpack.c.bf16 %v75_v24, %v74_v23  ;;  %v93_v31 = vrot.slane %v84_v29, %v7473_v28  ;;  %v89_v33 = vrot.slane %v84_v29, %v7479_v30 }
  0x10   :  { %275 = vmatprep.subr.bf16.mxu1 %v7401_v11 }
  0x11   :  { %6224 = vmatmul.mubr.msk.bf16.vlgmr.msra.gmra.mrb[0].mxu0 %vm116_vm0, %v76_v12 }
  0x12   :  { %171 = vmatprep.mubr.bf16.mxu0 %v7244_v1  ;;  %489 = vmatpush1.bf16.msra.mxu0 %v7371_v4 }
  0x13   :  { %276 = vmatpush1.bf16.msra.mxu1 %v7407_v13  ;;  %490 = vmatprep.subr.bf16.mxu0 %v7381_v6 }
  0x14   :  { %277 = vmatprep.subr.bf16.mxu1 %v7413_v14 }
  0x16   :  { %491 = vmatpush1.bf16.msra.mxu0 %v7389_v8 }
  0x17   :  { %278 = vmatpush1.bf16.msra.mxu1 %v7421_v15  ;;  %492 = vmatprep.subr.bf16.mxu0 %v7401_v11 }
  0x18   :  { %380 = vmatprep.subr.bf16.mxu1 %v7361_v2 }
  0x19   :  { %6225 = vmatmul.mubr.msk.bf16.gmra.mrb[4].mxu0 %vm116_vm0, %v77_v18 }
  0x1a   :  { %304 = vmatmul.mubr.bf16.vlgmr.msra.gmra.mrb[0].mxu1 %v7245_v19  ;;  %181 = vmatprep.mubr.bf16.mxu0 %v7244_v1 }
  0x1b   :  { %381 = vmatpush1.bf16.msra.mxu1 %v7371_v4  ;;  %412 = vmatprep.mubr.bf16.mxu1 %v7244_v1 }
  0x1c   :  { %382 = vmatprep.subr.bf16.mxu1 %v7381_v6  ;;  %493 = vmatpush1.bf16.msra.mxu0 %v7407_v13 }
  0x1d   :  { %494 = vmatprep.subr.bf16.mxu0 %v7413_v14 }
  0x1f   :  { %383 = vmatpush1.bf16.msra.mxu1 %v7389_v8 }
  0x20   :  { %384 = vmatprep.subr.bf16.mxu1 %v7401_v11  ;;  %495 = vmatpush1.bf16.msra.mxu0 %v7421_v15 }
  0x21   :  { %6226 = vmatmul.mubr.msk.bf16.gmra.mrb[8].mxu0 %vm116_vm0, %v78_v22  ;;  %704 = vmatprep.subr.bf16.mxu0 %v7361_v2 }
  0x22   :  { %191 = vmatprep.mubr.bf16.mxu0 %v7244_v1 }
  0x23   :  { %385 = vmatpush1.bf16.msra.mxu1 %v7407_v13 }
  0x24   :  { %386 = vmatprep.subr.bf16.mxu1 %v7413_v14 }
  0x27   :  { %387 = vmatpush1.bf16.msra.mxu1 %v7421_v15 }
  0x28   :  { %596 = vmatprep.subr.bf16.mxu1 %v7361_v2 }
  0x29   :  { %6227 = vmatmul.mubr.msk.bf16.gmra.mrb[12].mxu0 %vm116_vm0, %v79_v25 }
  0x2a   :  { %520 = vmatprep.mubr.bf16.mxu0 %v7244_v1 }
  0xe4   :  { %v163_v32 = vpop.f32.mrb[0].mxu0 }
  0xe5   :  { %v165_v34 = vpop.f32.mrb[1].mxu0  ;;  %v164_v40 = vadd.f32 %v163_v32, %v89_v33 }
  0xe6   :  { %v7483_v35 = vadd.f32 %v165_v34, %v93_v31  ;;  %v167_v36 = vpop.f32.mrb[2].mxu0 }
  0xe7   :  { %v7485_v37 = vadd.f32 %v167_v36, %v89_v33  ;;  %v169_v38 = vpop.f32.mrb[3].mxu0 }
  0xe8   :  { %v7487_v39 = vadd.f32 %v169_v38, %v93_v31 }
  0xec   :  { %v173_v41 = vpop.f32.mrb[4].mxu0 }
  0xed   :  { %v305_v42 = vpop.f32.mrb[0].mxu1  ;;  %v7489_v43 = vadd.f32 %v173_v41, %v89_v33  ;;  %v175_v45 = vpop.f32.mrb[5].mxu0 }
  0xee   :  { %v313_v44 = vadd.f32 %v305_v42, %v164_v40  ;;  %v307_v46 = vpop.f32.mrb[1].mxu1  ;;  %v7491_v47 = vadd.f32 %v175_v45, %v93_v31  ;;  %v177_v48 = vpop.f32.mrb[6].mxu0 }
  0xef   :  { %v309_v49 = vpop.f32.mrb[2].mxu1  ;;  %v7493_v50 = vadd.f32 %v177_v48, %v89_v33  ;;  %v179_v51 = vpop.f32.mrb[7].mxu0 }
  0xf0   :  { %6732 = vtanh.f32 %v313_v44  ;;  %v310_v52 = vpop.f32.mrb[3].mxu1  ;;  %v7495_v53 = vadd.f32 %v179_v51, %v93_v31  ;;  %v6236_v18 = vmul.f32 -1.442695, %v313_v44 }
  0xf4   :  { %v183_v54 = vpop.f32.mrb[8].mxu0 }
  0xf5   :  { %v7497_v55 = vadd.f32 %v183_v54, %v89_v33  ;;  %v185_v56 = vpop.f32.mrb[9].mxu0 }
  0xf6   :  { %v7499_v57 = vadd.f32 %v185_v56, %v93_v31  ;;  %v187_v58 = vpop.f32.mrb[10].mxu0 }
  0xf7   :  { %v7501_v59 = vadd.f32 %v187_v58, %v89_v33  ;;  %v189_v60 = vpop.f32.mrb[11].mxu0 }
  0xf8   :  { %v7503_v61 = vadd.f32 %v189_v60, %v93_v31 }
  0xfa   :  { %v6733_v62 = vpop.eup %6732 }
  0xfb   :  { %325 = vrot.lane.b32.xlu0 %v6733_v62, %s7246_s24 }
  0xfc   :  { %v193_v63 = vpop.f32.mrb[12].mxu0 }
  0xfd   :  { %v7506_v0 = vadd.f32 %v193_v63, %v89_v33  ;;  %v195_v3 = vpop.f32.mrb[13].mxu0 }
  0xfe   :  { %v7508_v5 = vadd.f32 %v195_v3, %v93_v31  ;;  %v197_v7 = vpop.f32.mrb[14].mxu0 }
  0xff   :  { %v7510_v9 = vadd.f32 %v197_v7, %v89_v33  ;;  %v199_v10 = vpop.f32.mrb[15].mxu0 }
 0x100   :  { %v200_v12 = vadd.f32 %v199_v10, %v93_v31 }
 0x102   :  { %v315_v16 = vadd.f32 %v307_v46, %v200_v12 }
 0x104   :  { %6734 = vtanh.f32 %v315_v16  ;;  %v6237_v22 = vmul.f32 -1.442695, %v315_v16 }
 0x105   :  { %6736 = vpow2.f32 %v6236_v18 }
 0x10e   :  { %v6735_v17 = vpop.eup %6734 }
 0x10f   :  { %349 = vrot.lane.b32.xlu0 %v6735_v17, %s7246_s24  ;;  %v6737_v20 = vpop.eup %6736 }
 0x110   :  { %v319_v21 = vadd.f32 1.0, %v6737_v20 }
 0x112   :  { %6738 = vrcp.f32 %v319_v21 }
 0x113   :  { %6740 = vpow2.f32 %v6237_v22 }
 0x11c   :  { %v6739_v23 = vpop.eup %6738 }
 0x11d   :  { %v6741_v29 = vpop.eup %6740  ;;  %v323_v36 = vmul.f32 0.0, %v6739_v23 }
 0x11e   :  { %v343_v31 = vadd.f32 1.0, %v6741_v29 }
 0x120   :  { %6742 = vrcp.f32 %v343_v31 }
 0x12a   :  { %v6743_v32 = vpop.eup %6742 }
 0x12b   :  { %v347_v42 = vmul.f32 0.0, %v6743_v32 }
 0x16d   :  { %v326_v24 = vpop.permute.xlu0 %325 }
 0x16e   :  { %v328_v25 = vmul.f32 %v6739_v23, %v326_v24 }
 0x170   :  { %330 = vrot.lane.b32.xlu1 %v328_v25, %s7247_s0 }
 0x181   :  { %v350_v33 = vpop.permute.xlu0 %349 }
 0x182   :  { %v352_v34 = vmul.f32 %v6743_v32, %v350_v33 }
 0x184   :  { %354 = vrot.lane.b32.xlu1 %v352_v34, %s7247_s0 }
 0x1e2   :  { %v331_v38 = vpop.permute.xlu1 %330 }
 0x1e3   :  { %v7515_v40 = vadd.f32 %v331_v38, %v323_v36 }
 0x1e5   :  { %6744 = vtanh.f32 %v7515_v40 }
 0x1ef   :  { %v6745_v41 = vpop.eup %6744 }
 0x1f0   :  { %336 = vrot.lane.b32.xlu0 %v6745_v41, %s7246_s24 }
 0x1f6   :  { %v355_v44 = vpop.permute.xlu1 %354 }
 0x1f7   :  { %v357_v45 = vadd.f32 %v355_v44, %v347_v42 }
 0x1f9   :  { %6746 = vtanh.f32 %v357_v45 }
 0x203   :  { %v6747_v46 = vpop.eup %6746 }
 0x204   :  { %360 = vrot.lane.b32.xlu1 %v6747_v46, %s7246_s24 }
 0x262   :  { %v337_v48 = vpop.permute.xlu0 %336 }
 0x263   :  { %v339_v49 = vmul.f32 %v6739_v23, %v337_v48 }
 0x265   :  { %365 = vrot.lane.b32.xlu0 %v339_v49, %s7247_s0 }
 0x276   :  { %v361_v51 = vpop.permute.xlu1 %360 }
 0x277   :  { %v363_v52 = vmul.f32 %v6743_v32, %v361_v51 }
 0x279   :  { %370 = vrot.lane.b32.xlu1 %v363_v52, %s7246_s24 }
 0x2d7   :  { %v366_v54 = vpop.permute.xlu0 %365 }
 0x2d8   :  { %368 = vst.msk [vmem:[#allocation2] sm:$0xff] %vm116_vm0, %v366_v54 }
 0x2eb   :  { %v371_v56 = vpop.permute.xlu1 %370 }
 0x2ec   :  { %374 = vst.msk [vmem:[#allocation2 + $0x38] sm:$0xff] %vm373_vm1, %v371_v56  ;;  %v375_v58 = vsel %vm116_vm0, %v366_v54, %v371_v56 }
 0x2ed   :  { %v376_v60 = vpack.c.bf16 %v375_v58, %v375_v58 }
 0x2ef   :  { %6238 = vmatmul.mubr.msk.bf16.vlgmr.msra.gmra.mrb[4].mxu1 %vm267_vm2, %v376_v60 }
 0x2f0   :  { %597 = vmatpush1.bf16.msra.mxu1 %v7371_v4  ;;  %628 = vmatprep.mubr.bf16.mxu1 %v7244_v1 }
 0x2f1   :  { %598 = vmatprep.subr.bf16.mxu1 %v7381_v6 }
 0x2f4   :  { %599 = vmatpush1.bf16.msra.mxu1 %v7389_v8 }
 0x2f5   :  { %600 = vmatprep.subr.bf16.mxu1 %v7401_v11 }
 0x2f8   :  { %601 = vmatpush1.bf16.msra.mxu1 %v7407_v13 }
 0x2f9   :  { %602 = vmatprep.subr.bf16.mxu1 %v7413_v14 }
 0x2fc   :  { %603 = vmatpush1.bf16.msra.mxu1 %v7421_v15 }
 0x2fd   :  { %812 = vmatprep.subr.bf16.mxu1 %v7361_v2 }
 0x3c2   :  { %v414_v62 = vpop.f32.mrb[4].mxu1 }
 0x3c3   :  { %v422_v63 = vadd.f32 %v414_v62, %v7485_v37  ;;  %v416_v3 = vpop.f32.mrb[5].mxu1 }
 0x3c4   :  { %v424_v7 = vadd.f32 %v416_v3, %v7508_v5  ;;  %v418_v10 = vpop.f32.mrb[6].mxu1 }
 0x3c5   :  { %6748 = vtanh.f32 %v422_v63  ;;  %v419_v12 = vpop.f32.mrb[7].mxu1  ;;  %v6239_v18 = vmul.f32 -1.442695, %v422_v63 }
 0x3c6   :  { %6750 = vtanh.f32 %v424_v7  ;;  %v6240_v20 = vmul.f32 -1.442695, %v424_v7 }
 0x3c7   :  { %6752 = vpow2.f32 %v6239_v18 }
 0x3c8   :  { %6754 = vpow2.f32 %v6240_v20 }
 0x3cf   :  { %v6749_v16 = vpop.eup %6748 }
 0x3d0   :  { %v6751_v17 = vpop.eup %6750  ;;  %434 = vrot.lane.b32.xlu0 %v6749_v16, %s7246_s24 }
 0x3d1   :  { %458 = vrot.lane.b32.xlu1 %v6751_v17, %s7246_s24  ;;  %v6753_v21 = vpop.eup %6752 }
 0x3d2   :  { %v6755_v22 = vpop.eup %6754  ;;  %v428_v37 = vadd.f32 1.0, %v6753_v21 }
 0x3d3   :  { %v452_v23 = vadd.f32 1.0, %v6755_v22 }
 0x3d4   :  { %6756 = vrcp.f32 %v428_v37 }
 0x3d5   :  { %6758 = vrcp.f32 %v452_v23 }
 0x3de   :  { %v6757_v5 = vpop.eup %6756 }
 0x3df   :  { %v6759_v25 = vpop.eup %6758  ;;  %v432_v33 = vmul.f32 %v6757_v5, %v7515_v40 }
 0x3e0   :  { %v456_v36 = vmul.f32 %v6759_v25, %v357_v45 }
 0x442   :  { %v435_v24 = vpop.permute.xlu0 %434 }
 0x443   :  { %v437_v29 = vmul.f32 %v6757_v5, %v435_v24  ;;  %v459_v31 = vpop.permute.xlu1 %458 }
 0x444   :  { %v461_v32 = vmul.f32 %v6759_v25, %v459_v31 }
 0x445   :  { %439 = vrot.lane.b32.xlu0 %v437_v29, %s7247_s0 }
 0x446   :  { %463 = vrot.lane.b32.xlu1 %v461_v32, %s7247_s0 }
 0x4b7   :  { %v440_v34 = vpop.permute.xlu0 %439 }
 0x4b8   :  { %v442_v38 = vadd.f32 %v440_v34, %v432_v33  ;;  %v464_v41 = vpop.permute.xlu1 %463 }
 0x4b9   :  { %v466_v42 = vadd.f32 %v464_v41, %v456_v36 }
 0x4ba   :  { %6760 = vtanh.f32 %v442_v38 }
 0x4bb   :  { %6762 = vtanh.f32 %v466_v42 }
 0x4c4   :  { %v6761_v44 = vpop.eup %6760 }
 0x4c5   :  { %v6763_v46 = vpop.eup %6762  ;;  %445 = vrot.lane.b32.xlu0 %v6761_v44, %s7246_s24 }
 0x4c6   :  { %469 = vrot.lane.b32.xlu1 %v6763_v46, %s7246_s24 }
 0x537   :  { %v446_v48 = vpop.permute.xlu0 %445 }
 0x538   :  { %v448_v49 = vmul.f32 %v6757_v5, %v446_v48  ;;  %v470_v51 = vpop.permute.xlu1 %469 }
 0x539   :  { %v472_v52 = vmul.f32 %v6759_v25, %v470_v51 }
 0x53a   :  { %474 = vrot.lane.b32.xlu0 %v448_v49, %s7247_s0 }
 0x53b   :  { %479 = vrot.lane.b32.xlu1 %v472_v52, %s7246_s24 }
 0x5ac   :  { %v475_v40 = vpop.permute.xlu0 %474 }
 0x5ad   :  { %477 = vst.msk [vmem:[#allocation2 + $0x8] sm:$0xff] %vm116_vm0, %v475_v40  ;;  %v480_v45 = vpop.permute.xlu1 %479 }
 0x5ae   :  { %482 = vst.msk [vmem:[#allocation2 + $0x30] sm:$0xff] %vm373_vm1, %v480_v45  ;;  %v483_v54 = vsel %vm116_vm0, %v475_v40, %v480_v45 }
 0x5af   :  { %v484_v56 = vpack.c.bf16 %v483_v54, %v483_v54 }
 0x5b1   :  { %6241 = vmatmul.mubr.msk.bf16.vlgmr.msra.gmra.mrb[16].mxu0 %vm267_vm2, %v484_v56 }
 0x5b2   :  { %705 = vmatpush1.bf16.msra.mxu0 %v7371_v4  ;;  %736 = vmatprep.mubr.bf16.mxu0 %v7244_v1 }
 0x5b3   :  { %706 = vmatprep.subr.bf16.mxu0 %v7381_v6 }
 0x5b6   :  { %707 = vmatpush1.bf16.msra.mxu0 %v7389_v8 }
 0x5b7   :  { %708 = vmatprep.subr.bf16.mxu0 %v7401_v11 }
 0x5ba   :  { %709 = vmatpush1.bf16.msra.mxu0 %v7407_v13 }
 0x5bb   :  { %710 = vmatprep.subr.bf16.mxu0 %v7413_v14 }
 0x5be   :  { %711 = vmatpush1.bf16.msra.mxu0 %v7421_v15 }
 0x5bf   :  { %920 = vmatprep.subr.bf16.mxu0 %v7361_v2 }
 0x684   :  { %v522_v58 = vpop.f32.mrb[16].mxu0 }
 0x685   :  { %v530_v60 = vadd.f32 %v522_v58, %v7489_v43  ;;  %v524_v62 = vpop.f32.mrb[17].mxu0 }
 0x686   :  { %v532_v63 = vadd.f32 %v524_v62, %v7503_v61  ;;  %v526_v3 = vpop.f32.mrb[18].mxu0 }
 0x687   :  { %6764 = vtanh.f32 %v530_v60  ;;  %v527_v7 = vpop.f32.mrb[19].mxu0  ;;  %v6242_v16 = vmul.f32 -1.442695, %v530_v60 }
 0x688   :  { %6766 = vtanh.f32 %v532_v63  ;;  %v6243_v17 = vmul.f32 -1.442695, %v532_v63 }
 0x689   :  { %6768 = vpow2.f32 %v6242_v16 }
 0x68a   :  { %6770 = vpow2.f32 %v6243_v17 }
 0x691   :  { %v6765_v10 = vpop.eup %6764 }
 0x692   :  { %v6767_v12 = vpop.eup %6766  ;;  %542 = vrot.lane.b32.xlu0 %v6765_v10, %s7246_s24 }
 0x693   :  { %566 = vrot.lane.b32.xlu1 %v6767_v12, %s7246_s24  ;;  %v6769_v18 = vpop.eup %6768 }
 0x694   :  { %v6771_v20 = vpop.eup %6770  ;;  %v536_v43 = vadd.f32 1.0, %v6769_v18 }
 0x695   :  { %v560_v21 = vadd.f32 1.0, %v6771_v20 }
 0x696   :  { %6772 = vrcp.f32 %v536_v43 }
 0x697   :  { %6774 = vrcp.f32 %v560_v21 }
 0x6a0   :  { %v6773_v61 = vpop.eup %6772 }
 0x6a1   :  { %v6775_v37 = vpop.eup %6774  ;;  %v540_v25 = vmul.f32 %v6773_v61, %v442_v38 }
 0x6a2   :  { %v564_v31 = vmul.f32 %v6775_v37, %v466_v42 }
 0x704   :  { %v543_v22 = vpop.permute.xlu0 %542 }
 0x705   :  { %v545_v23 = vmul.f32 %v6773_v61, %v543_v22  ;;  %v567_v5 = vpop.permute.xlu1 %566 }
 0x706   :  { %v569_v24 = vmul.f32 %v6775_v37, %v567_v5 }
 0x707   :  { %547 = vrot.lane.b32.xlu0 %v545_v23, %s7247_s0 }
 0x708   :  { %571 = vrot.lane.b32.xlu1 %v569_v24, %s7247_s0 }
 0x779   :  { %v548_v29 = vpop.permute.xlu0 %547 }
 0x77a   :  { %v550_v32 = vadd.f32 %v548_v29, %v540_v25  ;;  %v572_v33 = vpop.permute.xlu1 %571 }
 0x77b   :  { %v574_v34 = vadd.f32 %v572_v33, %v564_v31 }
 0x77c   :  { %6776 = vtanh.f32 %v550_v32 }
 0x77d   :  { %6778 = vtanh.f32 %v574_v34 }
 0x786   :  { %v6777_v36 = vpop.eup %6776 }
 0x787   :  { %v6779_v41 = vpop.eup %6778  ;;  %553 = vrot.lane.b32.xlu0 %v6777_v36, %s7246_s24 }
 0x788   :  { %577 = vrot.lane.b32.xlu1 %v6779_v41, %s7246_s24 }
 0x7f9   :  { %v554_v44 = vpop.permute.xlu0 %553 }
 0x7fa   :  { %v556_v46 = vmul.f32 %v6773_v61, %v554_v44  ;;  %v578_v48 = vpop.permute.xlu1 %577 }
 0x7fb   :  { %v580_v49 = vmul.f32 %v6775_v37, %v578_v48 }
 0x7fc   :  { %582 = vrot.lane.b32.xlu0 %v556_v46, %s7247_s0 }
 0x7fd   :  { %587 = vrot.lane.b32.xlu1 %v580_v49, %s7246_s24 }
 0x86e   :  { %v583_v38 = vpop.permute.xlu0 %582 }
 0x86f   :  { %585 = vst.msk [vmem:[#allocation2 + $0x10] sm:$0xff] %vm116_vm0, %v583_v38  ;;  %v588_v42 = vpop.permute.xlu1 %587 }
 0x870   :  { %590 = vst.msk [vmem:[#allocation2 + $0x28] sm:$0xff] %vm373_vm1, %v588_v42  ;;  %v591_v51 = vsel %vm116_vm0, %v583_v38, %v588_v42 }
 0x871   :  { %v592_v52 = vpack.c.bf16 %v591_v51, %v591_v51 }
 0x873   :  { %6244 = vmatmul.mubr.msk.bf16.vlgmr.msra.gmra.mrb[8].mxu1 %vm267_vm2, %v592_v52 }
 0x874   :  { %813 = vmatpush1.bf16.msra.mxu1 %v7371_v4  ;;  %844 = vmatprep.mubr.bf16.mxu1 %v7244_v1 }
 0x875   :  { %814 = vmatprep.subr.bf16.mxu1 %v7381_v6 }
 0x878   :  { %815 = vmatpush1.bf16.msra.mxu1 %v7389_v8 }
 0x879   :  { %816 = vmatprep.subr.bf16.mxu1 %v7401_v11 }
 0x87c   :  { %817 = vmatpush1.bf16.msra.mxu1 %v7407_v13 }
 0x87d   :  { %818 = vmatprep.subr.bf16.mxu1 %v7413_v14 }
 0x880   :  { %819 = vmatpush1.bf16.msra.mxu1 %v7421_v15 }
 0x881   :  { %1028 = vmatprep.subr.bf16.mxu1 %v7361_v2 }
 0x946   :  { %v630_v40 = vpop.f32.mrb[8].mxu1 }
 0x947   :  { %v638_v45 = vadd.f32 %v630_v40, %v7493_v50  ;;  %v632_v54 = vpop.f32.mrb[9].mxu1 }
 0x948   :  { %v640_v56 = vadd.f32 %v632_v54, %v7499_v57  ;;  %v634_v58 = vpop.f32.mrb[10].mxu1 }
 0x949   :  { %6780 = vtanh.f32 %v638_v45  ;;  %v635_v60 = vpop.f32.mrb[11].mxu1  ;;  %v6245_v3 = vmul.f32 -1.442695, %v638_v45 }
 0x94a   :  { %6782 = vtanh.f32 %v640_v56  ;;  %v6246_v7 = vmul.f32 -1.442695, %v640_v56 }
 0x94b   :  { %6784 = vpow2.f32 %v6245_v3 }
 0x94c   :  { %6786 = vpow2.f32 %v6246_v7 }
 0x953   :  { %v6781_v62 = vpop.eup %6780 }
 0x954   :  { %v6783_v63 = vpop.eup %6782  ;;  %650 = vrot.lane.b32.xlu0 %v6781_v62, %s7246_s24 }
 0x955   :  { %674 = vrot.lane.b32.xlu1 %v6783_v63, %s7246_s24  ;;  %v6785_v2 = vpop.eup %6784 }
 0x956   :  { %v6787_v10 = vpop.eup %6786  ;;  %v644_v50 = vadd.f32 1.0, %v6785_v2 }
 0x957   :  { %v668_v12 = vadd.f32 1.0, %v6787_v10 }
 0x958   :  { %6788 = vrcp.f32 %v644_v50 }
 0x959   :  { %6790 = vrcp.f32 %v668_v12 }
 0x962   :  { %v6789_v57 = vpop.eup %6788 }
 0x963   :  { %v6791_v17 = vpop.eup %6790  ;;  %v648_v21 = vmul.f32 %v6789_v57, %v550_v32 }
 0x964   :  { %v672_v22 = vmul.f32 %v6791_v17, %v574_v34 }
 0x9c6   :  { %v651_v16 = vpop.permute.xlu0 %650 }
 0x9c7   :  { %v653_v18 = vmul.f32 %v6789_v57, %v651_v16  ;;  %v675_v20 = vpop.permute.xlu1 %674 }
 0x9c8   :  { %v677_v43 = vmul.f32 %v6791_v17, %v675_v20 }
 0x9c9   :  { %655 = vrot.lane.b32.xlu0 %v653_v18, %s7247_s0 }
 0x9ca   :  { %679 = vrot.lane.b32.xlu1 %v677_v43, %s7247_s0 }
 0xa3b   :  { %v656_v61 = vpop.permute.xlu0 %655 }
 0xa3c   :  { %v658_v37 = vadd.f32 %v656_v61, %v648_v21  ;;  %v680_v23 = vpop.permute.xlu1 %679 }
 0xa3d   :  { %v682_v5 = vadd.f32 %v680_v23, %v672_v22 }
 0xa3e   :  { %6792 = vtanh.f32 %v658_v37 }
 0xa3f   :  { %6794 = vtanh.f32 %v682_v5 }
 0xa48   :  { %v6793_v24 = vpop.eup %6792 }
 0xa49   :  { %v6795_v25 = vpop.eup %6794  ;;  %661 = vrot.lane.b32.xlu0 %v6793_v24, %s7246_s24 }
 0xa4a   :  { %685 = vrot.lane.b32.xlu1 %v6795_v25, %s7246_s24 }
 0xabb   :  { %v662_v29 = vpop.permute.xlu0 %661 }
 0xabc   :  { %v664_v31 = vmul.f32 %v6789_v57, %v662_v29  ;;  %v686_v33 = vpop.permute.xlu1 %685 }
 0xabd   :  { %v688_v36 = vmul.f32 %v6791_v17, %v686_v33 }
 0xabe   :  { %690 = vrot.lane.b32.xlu0 %v664_v31, %s7247_s0 }
 0xabf   :  { %695 = vrot.lane.b32.xlu1 %v688_v36, %s7246_s24 }
 0xb30   :  { %v691_v32 = vpop.permute.xlu0 %690 }
 0xb31   :  { %693 = vst.msk [vmem:[#allocation2 + $0x18] sm:$0xff] %vm116_vm0, %v691_v32  ;;  %v696_v34 = vpop.permute.xlu1 %695 }
 0xb32   :  { %698 = vst.msk [vmem:[#allocation2 + $0x20] sm:$0xff] %vm373_vm1, %v696_v34  ;;  %v699_v41 = vsel %vm116_vm0, %v691_v32, %v696_v34 }
 0xb33   :  { %v700_v44 = vpack.c.bf16 %v699_v41, %v699_v41 }
 0xb35   :  { %6247 = vmatmul.mubr.msk.bf16.vlgmr.msra.gmra.mrb[20].mxu0 %vm267_vm2, %v700_v44 }
 0xb36   :  { %921 = vmatpush1.bf16.msra.mxu0 %v7371_v4  ;;  %952 = vmatprep.mubr.bf16.mxu0 %v7244_v1 }
 0xb37   :  { %922 = vmatprep.subr.bf16.mxu0 %v7381_v6 }
 0xb3a   :  { %923 = vmatpush1.bf16.msra.mxu0 %v7389_v8 }
 0xb3b   :  { %924 = vmatprep.subr.bf16.mxu0 %v7401_v11 }
 0xb3e   :  { %925 = vmatpush1.bf16.msra.mxu0 %v7407_v13 }
 0xb3f   :  { %926 = vmatprep.subr.bf16.mxu0 %v7413_v14 }
 0xb42   :  { %927 = vmatpush1.bf16.msra.mxu0 %v7421_v15 }
 0xc08   :  { %v738_v46 = vpop.f32.mrb[20].mxu0 }
 0xc09   :  { %v746_v48 = vadd.f32 %v738_v46, %v7497_v55  ;;  %v740_v49 = vpop.f32.mrb[21].mxu0 }
 0xc0a   :  { %v748_v38 = vadd.f32 %v740_v49, %v7495_v53  ;;  %v742_v42 = vpop.f32.mrb[22].mxu0 }
 0xc0b   :  { %6796 = vtanh.f32 %v746_v48  ;;  %v743_v51 = vpop.f32.mrb[23].mxu0  ;;  %v6248_v45 = vmul.f32 -1.442695, %v746_v48 }
 0xc0c   :  { %6798 = vtanh.f32 %v748_v38  ;;  %v6249_v54 = vmul.f32 -1.442695, %v748_v38 }
 0xc0d   :  { %6800 = vpow2.f32 %v6248_v45 }
 0xc0e   :  { %6802 = vpow2.f32 %v6249_v54 }
 0xc15   :  { %v6797_v52 = vpop.eup %6796 }
 0xc16   :  { %v6799_v40 = vpop.eup %6798  ;;  %758 = vrot.lane.b32.xlu0 %v6797_v52, %s7246_s24 }
 0xc17   :  { %782 = vrot.lane.b32.xlu1 %v6799_v40, %s7246_s24  ;;  %v6801_v56 = vpop.eup %6800 }
 0xc18   :  { %v6803_v58 = vpop.eup %6802  ;;  %v752_v55 = vadd.f32 1.0, %v6801_v56 }
 0xc19   :  { %v776_v60 = vadd.f32 1.0, %v6803_v58 }
 0xc1a   :  { %6804 = vrcp.f32 %v752_v55 }
 0xc1b   :  { %6806 = vrcp.f32 %v776_v60 }
 0xc24   :  { %v6805_v53 = vpop.eup %6804 }
 0xc25   :  { %v6807_v63 = vpop.eup %6806  ;;  %v756_v10 = vmul.f32 %v6805_v53, %v658_v37 }
 0xc26   :  { %v780_v12 = vmul.f32 %v6807_v63, %v682_v5 }
 0xc88   :  { %v759_v62 = vpop.permute.xlu0 %758 }
 0xc89   :  { %v761_v3 = vmul.f32 %v6805_v53, %v759_v62  ;;  %v783_v7 = vpop.permute.xlu1 %782 }
 0xc8a   :  { %v785_v2 = vmul.f32 %v6807_v63, %v783_v7 }
 0xc8b   :  { %763 = vrot.lane.b32.xlu0 %v761_v3, %s7247_s0 }
 0xc8c   :  { %787 = vrot.lane.b32.xlu1 %v785_v2, %s7247_s0 }
 0xcfd   :  { %v764_v50 = vpop.permute.xlu0 %763 }
 0xcfe   :  { %v766_v57 = vadd.f32 %v764_v50, %v756_v10  ;;  %v788_v16 = vpop.permute.xlu1 %787 }
 0xcff   :  { %v790_v17 = vadd.f32 %v788_v16, %v780_v12 }
 0xd00   :  { %6808 = vtanh.f32 %v766_v57 }
 0xd01   :  { %6810 = vtanh.f32 %v790_v17 }
 0xd0a   :  { %v6809_v18 = vpop.eup %6808 }
 0xd0b   :  { %v6811_v20 = vpop.eup %6810  ;;  %769 = vrot.lane.b32.xlu0 %v6809_v18, %s7246_s24 }
 0xd0c   :  { %793 = vrot.lane.b32.xlu1 %v6811_v20, %s7246_s24 }
 0xd7d   :  { %v770_v43 = vpop.permute.xlu0 %769 }
 0xd7e   :  { %v772_v21 = vmul.f32 %v6805_v53, %v770_v43  ;;  %v794_v61 = vpop.permute.xlu1 %793 }
 0xd7f   :  { %v796_v22 = vmul.f32 %v6807_v63, %v794_v61 }
 0xd80   :  { %798 = vrot.lane.b32.xlu0 %v772_v21, %s7247_s0 }
 0xd81   :  { %803 = vrot.lane.b32.xlu1 %v796_v22, %s7246_s24 }
 0xdf2   :  { %v799_v37 = vpop.permute.xlu0 %798 }
 0xdf3   :  { %801 = vst.msk [vmem:[#allocation2 + $0x20] sm:$0xff] %vm116_vm0, %v799_v37  ;;  %v804_v23 = vpop.permute.xlu1 %803 }
 0xdf4   :  { %806 = vst.msk [vmem:[#allocation2 + $0x18] sm:$0xff] %vm373_vm1, %v804_v23  ;;  %v807_v5 = vsel %vm116_vm0, %v799_v37, %v804_v23 }
 0xdf5   :  { %v808_v24 = vpack.c.bf16 %v807_v5, %v807_v5 }
 0xdf7   :  { %6250 = vmatmul.mubr.msk.bf16.vlgmr.msra.gmra.mrb[12].mxu1 %vm267_vm2, %v808_v24 }
 0xdf8   :  { %1029 = vmatpush1.bf16.msra.mxu1 %v7371_v4  ;;  %1060 = vmatprep.mubr.bf16.mxu1 %v7244_v1 }
 0xdf9   :  { %1030 = vmatprep.subr.bf16.mxu1 %v7381_v6 }
 0xdfc   :  { %1031 = vmatpush1.bf16.msra.mxu1 %v7389_v8 }
 0xdfd   :  { %1032 = vmatprep.subr.bf16.mxu1 %v7401_v11 }
 0xe00   :  { %1033 = vmatpush1.bf16.msra.mxu1 %v7407_v13 }
 0xe01   :  { %1034 = vmatprep.subr.bf16.mxu1 %v7413_v14 }
 0xe04   :  { %1035 = vmatpush1.bf16.msra.mxu1 %v7421_v15 }
 0xeca   :  { %v846_v25 = vpop.f32.mrb[12].mxu1 }
 0xecb   :  { %v854_v29 = vadd.f32 %v846_v25, %v7501_v59  ;;  %v848_v31 = vpop.f32.mrb[13].mxu1 }
 0xecc   :  { %v856_v4 = vadd.f32 %v848_v31, %v7491_v47  ;;  %v850_v33 = vpop.f32.mrb[14].mxu1 }
 0xecd   :  { %6812 = vtanh.f32 %v854_v29  ;;  %v851_v36 = vpop.f32.mrb[15].mxu1  ;;  %v6251_v11 = vmul.f32 -1.442695, %v854_v29 }
 0xece   :  { %6814 = vtanh.f32 %v856_v4  ;;  %v6252_v13 = vmul.f32 -1.442695, %v856_v4 }
 0xecf   :  { %6816 = vpow2.f32 %v6251_v11 }
 0xed0   :  { %6818 = vpow2.f32 %v6252_v13 }
 0xed7   :  { %v6813_v6 = vpop.eup %6812 }
 0xed8   :  { %v6815_v8 = vpop.eup %6814  ;;  %866 = vrot.lane.b32.xlu0 %v6813_v6, %s7246_s24 }
 0xed9   :  { %890 = vrot.lane.b32.xlu1 %v6815_v8, %s7246_s24  ;;  %v6817_v14 = vpop.eup %6816 }
 0xeda   :  { %v6819_v15 = vpop.eup %6818  ;;  %v860_v59 = vadd.f32 1.0, %v6817_v14 }
 0xedb   :  { %v884_v32 = vadd.f32 1.0, %v6819_v15 }
 0xedc   :  { %6820 = vrcp.f32 %v860_v59 }
 0xedd   :  { %6822 = vrcp.f32 %v884_v32 }
 0xee6   :  { %v6821_v47 = vpop.eup %6820 }
 0xee7   :  { %v6823_v41 = vpop.eup %6822  ;;  %v864_v49 = vmul.f32 %v6821_v47, %v766_v57 }
 0xee8   :  { %v888_v42 = vmul.f32 %v6823_v41, %v790_v17 }
 0xf4a   :  { %v867_v34 = vpop.permute.xlu0 %866 }
 0xf4b   :  { %v869_v44 = vmul.f32 %v6821_v47, %v867_v34  ;;  %v891_v46 = vpop.permute.xlu1 %890 }
 0xf4c   :  { %v893_v48 = vmul.f32 %v6823_v41, %v891_v46 }
 0xf4d   :  { %871 = vrot.lane.b32.xlu0 %v869_v44, %s7247_s0 }
 0xf4e   :  { %895 = vrot.lane.b32.xlu1 %v893_v48, %s7247_s0 }
 0xfbf   :  { %v872_v38 = vpop.permute.xlu0 %871 }
 0xfc0   :  { %v874_v51 = vadd.f32 %v872_v38, %v864_v49  ;;  %v896_v52 = vpop.permute.xlu1 %895 }
 0xfc1   :  { %v898_v40 = vadd.f32 %v896_v52, %v888_v42 }
 0xfc2   :  { %6824 = vtanh.f32 %v874_v51 }
 0xfc3   :  { %6826 = vtanh.f32 %v898_v40 }
 0xfcc   :  { %v6825_v45 = vpop.eup %6824 }
 0xfcd   :  { %v6827_v54 = vpop.eup %6826  ;;  %877 = vrot.lane.b32.xlu0 %v6825_v45, %s7246_s24 }
 0xfce   :  { %901 = vrot.lane.b32.xlu1 %v6827_v54, %s7246_s24 }
0x103f   :  { %v878_v56 = vpop.permute.xlu0 %877 }
0x1040   :  { %v880_v58 = vmul.f32 %v6821_v47, %v878_v56  ;;  %v902_v55 = vpop.permute.xlu1 %901 }
0x1041   :  { %v904_v60 = vmul.f32 %v6823_v41, %v902_v55 }
0x1042   :  { %906 = vrot.lane.b32.xlu0 %v880_v58, %s7247_s0 }
0x1043   :  { %911 = vrot.lane.b32.xlu1 %v904_v60, %s7246_s24 }
0x10b4   :  { %v907_v53 = vpop.permute.xlu0 %906 }
0x10b5   :  { %909 = vst.msk [vmem:[#allocation2 + $0x28] sm:$0xff] %vm116_vm0, %v907_v53  ;;  %v912_v62 = vpop.permute.xlu1 %911 }
0x10b6   :  { %914 = vst.msk [vmem:[#allocation2 + $0x10] sm:$0xff] %vm373_vm1, %v912_v62  ;;  %v915_v63 = vsel %vm116_vm0, %v907_v53, %v912_v62 }
0x10b7   :  { %v916_v3 = vpack.c.bf16 %v915_v63, %v915_v63 }
0x10b9   :  { %6253 = vmatmul.mubr.msk.bf16.vlgmr.msra.gmra.mrb[24].mxu0 %vm267_vm2, %v916_v3 }
0x10ba   :  { %1247 = vmatprep.mubr.bf16.mxu0 %v7244_v1 }
0x118c   :  { %v954_v7 = vpop.f32.mrb[24].mxu0 }
0x118d   :  { %v962_v2 = vadd.f32 %v954_v7, %v7506_v0  ;;  %v956_v10 = vpop.f32.mrb[25].mxu0 }
0x118e   :  { %v964_v50 = vadd.f32 %v956_v10, %v7487_v39  ;;  %v958_v12 = vpop.f32.mrb[26].mxu0 }
0x118f   :  { %6828 = vtanh.f32 %v962_v2  ;;  %v959_v57 = vpop.f32.mrb[27].mxu0  ;;  %v6254_v18 = vmul.f32 -1.442695, %v962_v2  ;;  %v6648_v12 = vld [vmem:[%s9548_s25] ss:$8 sps:$4 sm:$0xff]  }
0x1190   :  { %6830 = vtanh.f32 %v964_v50  ;;  %v6255_v20 = vmul.f32 -1.442695, %v964_v50  ;;  %v6650_v57 = vld [vmem:[%s9548_s25 + $0x4] ss:$8 sps:$4 sm:$0xff]  }
0x1191   :  { %6832 = vpow2.f32 %v6254_v18  ;;  %1215 = vmatprep.subr.bf16.mxu0 %v6650_v57  ;;  %v6654_v18 = vld [vmem:[%s9548_s25 + $0x10] ss:$8 sps:$4 sm:$0xff]  }
0x1192   :  { %6834 = vpow2.f32 %v6255_v20  ;;  %v6656_v20 = vld [vmem:[%s9548_s25 + $0x14] ss:$8 sps:$4 sm:$0xff]   ;;  %1216 = vmatpush1.bf16.msra.mxu0 %v6648_v12 }
0x1193   :  { %1217 = vmatprep.subr.bf16.mxu0 %v6656_v20 }
0x1196   :  { %1218 = vmatpush1.bf16.msra.mxu0 %v6654_v18 }
0x1199   :  { %v6829_v16 = vpop.eup %6828 }
0x119a   :  { %v6831_v17 = vpop.eup %6830  ;;  %974 = vrot.lane.b32.xlu0 %v6829_v16, %s7246_s24  ;;  %v7671_v16 = vld [vmem:[%s9519_s5 + $0x4] ss:$8 sps:$4 sm:$0xff]  }
0x119b   :  { %998 = vrot.lane.b32.xlu1 %v6831_v17, %s7246_s24  ;;  %v6833_v43 = vpop.eup %6832  ;;  %v7676_v17 = vld [vmem:[%s9519_s5] ss:$8 sps:$4 sm:$0xff]   ;;  %1352 = vmatprep.subr.bf16.mxu1 %v7671_v16 }
0x119c   :  { %v6835_v21 = vpop.eup %6834  ;;  %v968_v0 = vadd.f32 1.0, %v6833_v43 }
0x119d   :  { %v992_v61 = vadd.f32 1.0, %v6835_v21 }
0x119e   :  { %6836 = vrcp.f32 %v968_v0  ;;  %v7691_v0 = vld [vmem:[%s9519_s5 + $0x14] ss:$8 sps:$4 sm:$0xff]  }
0x119f   :  { %6838 = vrcp.f32 %v992_v61  ;;  %v7696_v61 = vld [vmem:[%s9519_s5 + $0x10] ss:$8 sps:$4 sm:$0xff]  }
0x11a8   :  { %v6837_v39 = vpop.eup %6836 }
0x11a9   :  { %v6839_v37 = vpop.eup %6838  ;;  %v972_v25 = vmul.f32 %v6837_v39, %v874_v51 }
0x11aa   :  { %v996_v31 = vmul.f32 %v6839_v37, %v898_v40 }
0x120c   :  { %v975_v22 = vpop.permute.xlu0 %974 }
0x120d   :  { %v977_v23 = vmul.f32 %v6837_v39, %v975_v22  ;;  %v999_v5 = vpop.permute.xlu1 %998  ;;  %v6662_v22 = vld [vmem:[%s9548_s25 + $0x24] ss:$8 sps:$4 sm:$0xff]  }
0x120e   :  { %v1001_v24 = vmul.f32 %v6839_v37, %v999_v5  ;;  %v6668_v5 = vld [vmem:[%s9548_s25 + $0x34] ss:$8 sps:$4 sm:$0xff]   ;;  %1219 = vmatprep.subr.bf16.mxu0 %v6662_v22 }
0x120f   :  { %979 = vrot.lane.b32.xlu0 %v977_v23, %s7247_s0  ;;  %v7714_v23 = vld [vmem:[%s9519_s5 + $0x20] ss:$8 sps:$4 sm:$0xff]  }
0x1210   :  { %1003 = vrot.lane.b32.xlu1 %v1001_v24, %s7247_s0  ;;  %v7723_v24 = vld [vmem:[%s9519_s5 + $0x34] ss:$8 sps:$4 sm:$0xff]  }
0x1281   :  { %v980_v29 = vpop.permute.xlu0 %979 }
0x1282   :  { %v982_v4 = vadd.f32 %v980_v29, %v972_v25  ;;  %v1004_v33 = vpop.permute.xlu1 %1003  ;;  %v6666_v25 = vld [vmem:[%s9548_s25 + $0x30] ss:$8 sps:$4 sm:$0xff]  }
0x1283   :  { %v1006_v36 = vadd.f32 %v1004_v33, %v996_v31  ;;  %v7732_v29 = vld [vmem:[%s9519_s5 + $0x30] ss:$8 sps:$4 sm:$0xff]  }
0x1284   :  { %6840 = vtanh.f32 %v982_v4 }
0x1285   :  { %6842 = vtanh.f32 %v1006_v36 }
0x128e   :  { %v6841_v6 = vpop.eup %6840 }
0x128f   :  { %v6843_v8 = vpop.eup %6842  ;;  %985 = vrot.lane.b32.xlu0 %v6841_v6, %s7246_s24 }
0x1290   :  { %1009 = vrot.lane.b32.xlu1 %v6843_v8, %s7246_s24 }
0x1301   :  { %v986_v11 = vpop.permute.xlu0 %985 }
0x1302   :  { %v988_v13 = vmul.f32 %v6837_v39, %v986_v11  ;;  %v1010_v14 = vpop.permute.xlu1 %1009  ;;  %v6660_v39 = vld [vmem:[%s9548_s25 + $0x20] ss:$8 sps:$4 sm:$0xff]  }
0x1303   :  { %v1012_v15 = vmul.f32 %v6839_v37, %v1010_v14  ;;  %v7708_v37 = vld [vmem:[%s9519_s5 + $0x24] ss:$8 sps:$4 sm:$0xff]   ;;  %1220 = vmatpush1.bf16.msra.mxu0 %v6660_v39 }
0x1304   :  { %1014 = vrot.lane.b32.xlu0 %v988_v13, %s7247_s0  ;;  %1221 = vmatprep.subr.bf16.mxu0 %v6668_v5 }
0x1305   :  { %1019 = vrot.lane.b32.xlu1 %v1012_v15, %s7246_s24  ;;  %v1133_v15 = vld [vmem:[#allocation2 + $0x10] sm:$0xff] }
0x1307   :  { %1222 = vmatpush1.bf16.msra.mxu0 %v6666_v25 }
0x1308   :  { %1568 = vmatprep.subr.bf16.mxu0 %v7671_v16 }
0x1376   :  { %v1015_v59 = vpop.permute.xlu0 %1014 }
0x1377   :  { %1017 = vst.msk [vmem:[#allocation2 + $0x30] sm:$0xff] %vm116_vm0, %v1015_v59  ;;  %v1020_v32 = vpop.permute.xlu1 %1019 }
0x1378   :  { %1022 = vst.msk [vmem:[#allocation2 + $0x8] sm:$0xff] %vm373_vm1, %v1020_v32  ;;  %v1023_v47 = vsel %vm116_vm0, %v1015_v59, %v1020_v32  ;;  %v1134_v59 = vld [vmem:[#allocation2 + $0x18] sm:$0xff] }
0x1379   :  { %v1024_v34 = vpack.c.bf16 %v1023_v47, %v1023_v47  ;;  %v1140_v32 = vpack.c.bf16 %v1134_v59, %v1133_v15  ;;  %v1136_v47 = vld [vmem:[#allocation2 + $0x28] sm:$0xff] }
0x137b   :  { %6256 = vmatmul.mubr.msk.bf16.vlgmr.msra.gmra.mrb[16].mxu1 %vm267_vm2, %v1024_v34  ;;  %v1135_v34 = vld [vmem:[#allocation2 + $0x20] sm:$0xff] }
0x137c   :  { %1384 = vmatprep.mubr.bf16.mxu1 %v7244_v1  ;;  %1353 = vmatpush1.bf16.msra.mxu1 %v7676_v17 }
0x137d   :  { %1354 = vmatprep.subr.bf16.mxu1 %v7691_v0 }
0x137f   :  { %v1132_v13 = vld [vmem:[#allocation2 + $0x8] sm:$0xff] }
0x1380   :  { %1355 = vmatpush1.bf16.msra.mxu1 %v7696_v61 }
0x1381   :  { %1356 = vmatprep.subr.bf16.mxu1 %v7708_v37 }
0x1384   :  { %1357 = vmatpush1.bf16.msra.mxu1 %v7714_v23 }
0x1385   :  { %1358 = vmatprep.subr.bf16.mxu1 %v7723_v24 }
0x1388   :  { %1359 = vmatpush1.bf16.msra.mxu1 %v7732_v29 }
0x1389   :  { %1460 = vmatprep.subr.bf16.mxu1 %v7671_v16 }
0x138b   :  { %1385 = vmatmul.mubr.bf16.vlgmr.msra.gmra.mrb[20].mxu1 %v7245_v19 }
0x138c   :  { %1461 = vmatpush1.bf16.msra.mxu1 %v7676_v17  ;;  %1492 = vmatprep.mubr.bf16.mxu1 %v7244_v1 }
0x138d   :  { %1462 = vmatprep.subr.bf16.mxu1 %v7691_v0 }
0x1390   :  { %1463 = vmatpush1.bf16.msra.mxu1 %v7696_v61 }
0x1391   :  { %1464 = vmatprep.subr.bf16.mxu1 %v7708_v37 }
0x1394   :  { %1465 = vmatpush1.bf16.msra.mxu1 %v7714_v23 }
0x1395   :  { %1466 = vmatprep.subr.bf16.mxu1 %v7723_v24 }
0x1398   :  { %1467 = vmatpush1.bf16.msra.mxu1 %v7732_v29 }
0x1399   :  { %1676 = vmatprep.subr.bf16.mxu1 %v7671_v16 }
0x144e   :  { %v1062_v41 = vpop.f32.mrb[16].mxu1 }
0x144f   :  { %v1070_v44 = vadd.f32 %v1062_v41, %v7510_v9  ;;  %v1064_v46 = vpop.f32.mrb[17].mxu1  ;;  %v1141_v41 = vpack.c.bf16 %v1136_v47, %v1135_v34 }
0x1450   :  { %v1072_v48 = vadd.f32 %v1064_v46, %v7483_v35  ;;  %v1066_v49 = vpop.f32.mrb[18].mxu1  ;;  %v1137_v46 = vld [vmem:[#allocation2 + $0x30] sm:$0xff] }
0x1451   :  { %6844 = vtanh.f32 %v1070_v44  ;;  %v1067_v38 = vpop.f32.mrb[19].mxu1  ;;  %v6257_v52 = vmul.f32 -1.442695, %v1070_v44 }
0x1452   :  { %6846 = vtanh.f32 %v1072_v48  ;;  %v6258_v40 = vmul.f32 -1.442695, %v1072_v48 }
0x1453   :  { %6848 = vpow2.f32 %v6257_v52  ;;  %v1151_v52 = vld [vmem:[%s9520_s6] sm:$0x3] }
0x1454   :  { %6850 = vpow2.f32 %v6258_v40  ;;  %v1156_v40 = vrot.slane %v1151_v52, %v7479_v30 }
0x145b   :  { %v6845_v42 = vpop.eup %6844 }
0x145c   :  { %v6847_v51 = vpop.eup %6846  ;;  %1082 = vrot.lane.b32.xlu1 %v6845_v42, %s7246_s24 }
0x145d   :  { %1106 = vrot.lane.b32.xlu0 %v6847_v51, %s7246_s24  ;;  %v6849_v45 = vpop.eup %6848 }
0x145e   :  { %v6851_v54 = vpop.eup %6850  ;;  %v1076_v9 = vadd.f32 1.0, %v6849_v45  ;;  %v1386_v49 = vpop.f32.mrb[20].mxu1  ;;  %v1160_v45 = vrot.slane %v1151_v52, %v7473_v28 }
0x145f   :  { %v1100_v56 = vadd.f32 1.0, %v6851_v54  ;;  %v1388_v38 = vpop.f32.mrb[21].mxu1 }
0x1460   :  { %6852 = vrcp.f32 %v1076_v9  ;;  %v1390_v42 = vpop.f32.mrb[22].mxu1 }
0x1461   :  { %6854 = vrcp.f32 %v1100_v56  ;;  %v1391_v51 = vpop.f32.mrb[23].mxu1 }
0x146a   :  { %v6853_v35 = vpop.eup %6852 }
0x146b   :  { %v6855_v55 = vpop.eup %6854  ;;  %v1080_v63 = vmul.f32 %v6853_v35, %v982_v4 }
0x146c   :  { %v1104_v7 = vmul.f32 %v6855_v55, %v1006_v36 }
0x14ce   :  { %v1083_v58 = vpop.permute.xlu1 %1082 }
0x14cf   :  { %v1085_v60 = vmul.f32 %v6853_v35, %v1083_v58  ;;  %v1107_v53 = vpop.permute.xlu0 %1106 }
0x14d0   :  { %v1109_v62 = vmul.f32 %v6855_v55, %v1107_v53 }
0x14d1   :  { %1087 = vrot.lane.b32.xlu1 %v1085_v60, %s7247_s0 }
0x14d2   :  { %1111 = vrot.lane.b32.xlu0 %v1109_v62, %s7247_s0 }
0x1543   :  { %v1088_v3 = vpop.permute.xlu1 %1087 }
0x1544   :  { %v1090_v2 = vadd.f32 %v1088_v3, %v1080_v63  ;;  %v1112_v10 = vpop.permute.xlu0 %1111 }
0x1545   :  { %v1114_v50 = vadd.f32 %v1112_v10, %v1104_v7 }
0x1546   :  { %6856 = vtanh.f32 %v1090_v2 }
0x1547   :  { %6858 = vtanh.f32 %v1114_v50 }
0x1550   :  { %v6857_v43 = vpop.eup %6856 }
0x1551   :  { %v6859_v21 = vpop.eup %6858  ;;  %1093 = vrot.lane.b32.xlu1 %v6857_v43, %s7246_s24 }
0x1552   :  { %1117 = vrot.lane.b32.xlu0 %v6859_v21, %s7246_s24 }
0x15c3   :  { %v1094_v31 = vpop.permute.xlu1 %1093 }
0x15c4   :  { %v1096_v4 = vmul.f32 %v6853_v35, %v1094_v31  ;;  %v1118_v33 = vpop.permute.xlu0 %1117 }
0x15c5   :  { %v1120_v36 = vmul.f32 %v6855_v55, %v1118_v33 }
0x15c6   :  { %1122 = vrot.lane.b32.xlu1 %v1096_v4, %s7247_s0 }
0x15c7   :  { %1127 = vrot.lane.b32.xlu0 %v1120_v36, %s7246_s24 }
0x1638   :  { %v1123_v6 = vpop.permute.xlu1 %1122 }
0x1639   :  { %1125 = vst.msk [vmem:[#allocation2 + $0x38] sm:$0xff] %vm116_vm0, %v1123_v6  ;;  %v1128_v8 = vpop.permute.xlu0 %1127 }
0x163a   :  { %1130 = vst.msk [vmem:[#allocation2] sm:$0xff] %vm373_vm1, %v1128_v8 }
0x1640   :  { %v1138_v44 = vld [vmem:[#allocation2 + $0x38] sm:$0xff] }
0x1641   :  { %v1131_v11 = vld [vmem:[#allocation2] sm:$0xff]  ;;  %v1142_v48 = vpack.c.bf16 %v1138_v44, %v1137_v46 }
0x1642   :  { %v1139_v14 = vpack.c.bf16 %v1132_v13, %v1131_v11 }
0x1644   :  { %6267 = vmatmul.mubr.msk.bf16.vlgmr.msra.gmra.mrb[28].mxu0 %vm267_vm2, %v1139_v14 }
0x1645   :  { %1257 = vmatprep.mubr.bf16.mxu0 %v7244_v1  ;;  %1569 = vmatpush1.bf16.msra.mxu0 %v7676_v17 }
0x1646   :  { %1570 = vmatprep.subr.bf16.mxu0 %v7691_v0 }
0x1649   :  { %1571 = vmatpush1.bf16.msra.mxu0 %v7696_v61 }
0x164a   :  { %1572 = vmatprep.subr.bf16.mxu0 %v7708_v37 }
0x164c   :  { %6268 = vmatmul.mubr.msk.bf16.gmra.mrb[32].mxu0 %vm267_vm2, %v1140_v32 }
0x164d   :  { %1267 = vmatprep.mubr.bf16.mxu0 %v7244_v1  ;;  %1573 = vmatpush1.bf16.msra.mxu0 %v7714_v23 }
0x164e   :  { %1574 = vmatprep.subr.bf16.mxu0 %v7723_v24 }
0x1651   :  { %1575 = vmatpush1.bf16.msra.mxu0 %v7732_v29 }
0x1652   :  { %1784 = vmatprep.subr.bf16.mxu0 %v7671_v16 }
0x1654   :  { %6269 = vmatmul.mubr.msk.bf16.gmra.mrb[36].mxu0 %vm267_vm2, %v1141_v41 }
0x1655   :  { %1277 = vmatprep.mubr.bf16.mxu0 %v7244_v1 }
0x165c   :  { %6270 = vmatmul.mubr.msk.bf16.gmra.mrb[40].mxu0 %vm267_vm2, %v1142_v48 }
0x165d   :  { %1600 = vmatprep.mubr.bf16.mxu0 %v7244_v1 }
0x1717   :  { %v1249_v54 = vpop.f32.mrb[28].mxu0 }
0x1718   :  { %v1250_v9 = vadd.f32 %v1249_v54, %v1156_v40  ;;  %v1251_v56 = vpop.f32.mrb[29].mxu0 }
0x1719   :  { %v7773_v35 = vadd.f32 %v1251_v56, %v1160_v45  ;;  %v1253_v58 = vpop.f32.mrb[30].mxu0 }
0x171a   :  { %v7775_v55 = vadd.f32 %v1253_v58, %v1156_v40  ;;  %v1394_v60 = vadd.f32 %v1386_v49, %v1250_v9  ;;  %v1255_v53 = vpop.f32.mrb[31].mxu0 }
0x171b   :  { %v7777_v62 = vadd.f32 %v1255_v53, %v1160_v45 }
0x171c   :  { %6860 = vtanh.f32 %v1394_v60  ;;  %v6279_v32 = vmul.f32 -1.442695, %v1394_v60 }
0x171f   :  { %v1259_v63 = vpop.f32.mrb[32].mxu0 }
0x1720   :  { %v7779_v3 = vadd.f32 %v1259_v63, %v1156_v40  ;;  %v1261_v7 = vpop.f32.mrb[33].mxu0 }
0x1721   :  { %v7781_v2 = vadd.f32 %v1261_v7, %v1160_v45  ;;  %v1263_v10 = vpop.f32.mrb[34].mxu0 }
0x1722   :  { %v7783_v50 = vadd.f32 %v1263_v10, %v1156_v40  ;;  %v1265_v12 = vpop.f32.mrb[35].mxu0 }
0x1723   :  { %v7785_v57 = vadd.f32 %v1265_v12, %v1160_v45 }
0x1726   :  { %v6861_v18 = vpop.eup %6860 }
0x1727   :  { %v1269_v20 = vpop.f32.mrb[36].mxu0  ;;  %1406 = vrot.lane.b32.xlu0 %v6861_v18, %s7246_s24 }
0x1728   :  { %v7788_v43 = vadd.f32 %v1269_v20, %v1156_v40  ;;  %v1271_v21 = vpop.f32.mrb[37].mxu0 }
0x1729   :  { %v7790_v39 = vadd.f32 %v1271_v21, %v1160_v45  ;;  %v1273_v22 = vpop.f32.mrb[38].mxu0 }
0x172a   :  { %v7792_v5 = vadd.f32 %v1273_v22, %v1156_v40  ;;  %v1275_v25 = vpop.f32.mrb[39].mxu0 }
0x172b   :  { %v7794_v31 = vadd.f32 %v1275_v25, %v1160_v45 }
0x172f   :  { %v1279_v4 = vpop.f32.mrb[40].mxu0 }
0x1730   :  { %v7796_v33 = vadd.f32 %v1279_v4, %v1156_v40  ;;  %v1281_v36 = vpop.f32.mrb[41].mxu0 }
0x1731   :  { %v7798_v6 = vadd.f32 %v1281_v36, %v1160_v45  ;;  %v1283_v8 = vpop.f32.mrb[42].mxu0 }
0x1732   :  { %v7800_v11 = vadd.f32 %v1283_v8, %v1156_v40  ;;  %v1285_v13 = vpop.f32.mrb[43].mxu0 }
0x1733   :  { %v1286_v14 = vadd.f32 %v1285_v13, %v1160_v45 }
0x1735   :  { %v1396_v15 = vadd.f32 %v1388_v38, %v1286_v14 }
0x1737   :  { %6862 = vtanh.f32 %v1396_v15  ;;  %v6280_v41 = vmul.f32 -1.442695, %v1396_v15 }
0x1738   :  { %6864 = vpow2.f32 %v6279_v32 }
0x1741   :  { %v6863_v59 = vpop.eup %6862 }
0x1742   :  { %1430 = vrot.lane.b32.xlu1 %v6863_v59, %s7246_s24  ;;  %v6865_v47 = vpop.eup %6864 }
0x1743   :  { %v1400_v34 = vadd.f32 1.0, %v6865_v47 }
0x1745   :  { %6866 = vrcp.f32 %v1400_v34 }
0x1746   :  { %6868 = vpow2.f32 %v6280_v41 }
0x174f   :  { %v6867_v44 = vpop.eup %6866 }
0x1750   :  { %v6869_v49 = vpop.eup %6868  ;;  %v1404_v40 = vmul.f32 0.0, %v6867_v44 }
0x1751   :  { %v1424_v42 = vadd.f32 1.0, %v6869_v49 }
0x1753   :  { %6870 = vrcp.f32 %v1424_v42 }
0x175d   :  { %v6871_v38 = vpop.eup %6870 }
0x175e   :  { %v1428_v56 = vmul.f32 0.0, %v6871_v38 }
0x1799   :  { %v1407_v46 = vpop.permute.xlu0 %1406 }
0x179a   :  { %v1409_v48 = vmul.f32 %v6867_v44, %v1407_v46 }
0x179c   :  { %1411 = vrot.lane.b32.xlu0 %v1409_v48, %s7247_s0 }
0x17b4   :  { %v1431_v51 = vpop.permute.xlu1 %1430 }
0x17b5   :  { %v1433_v52 = vmul.f32 %v6871_v38, %v1431_v51 }
0x17b7   :  { %1435 = vrot.lane.b32.xlu1 %v1433_v52, %s7247_s0 }
0x180e   :  { %v1412_v45 = vpop.permute.xlu0 %1411 }
0x180f   :  { %v1414_v54 = vadd.f32 %v1412_v45, %v1404_v40 }
0x1811   :  { %6872 = vtanh.f32 %v1414_v54 }
0x181b   :  { %v6873_v9 = vpop.eup %6872 }
0x181c   :  { %1417 = vrot.lane.b32.xlu0 %v6873_v9, %s7246_s24 }
0x1829   :  { %v1436_v58 = vpop.permute.xlu1 %1435 }
0x182a   :  { %v1438_v60 = vadd.f32 %v1436_v58, %v1428_v56 }
0x182c   :  { %6874 = vtanh.f32 %v1438_v60 }
0x1836   :  { %v6875_v53 = vpop.eup %6874 }
0x1837   :  { %1441 = vrot.lane.b32.xlu1 %v6875_v53, %s7246_s24 }
0x188e   :  { %v1418_v63 = vpop.permute.xlu0 %1417 }
0x188f   :  { %v1420_v7 = vmul.f32 %v6867_v44, %v1418_v63 }
0x1891   :  { %1446 = vrot.lane.b32.xlu0 %v1420_v7, %s7247_s0 }
0x18a9   :  { %v1442_v10 = vpop.permute.xlu1 %1441 }
0x18aa   :  { %v1444_v12 = vmul.f32 %v6871_v38, %v1442_v10 }
0x18ac   :  { %1451 = vrot.lane.b32.xlu1 %v1444_v12, %s7246_s24 }
0x1903   :  { %v1447_v18 = vpop.permute.xlu0 %1446 }
0x1904   :  { %1449 = vst.msk [vmem:[#allocation3] sm:$0xff] %vm116_vm0, %v1447_v18 }
0x191e   :  { %v1452_v20 = vpop.permute.xlu1 %1451 }
0x191f   :  { %1454 = vst.msk [vmem:[#allocation3 + $0x38] sm:$0xff] %vm373_vm1, %v1452_v20  ;;  %v1455_v21 = vsel %vm116_vm0, %v1447_v18, %v1452_v20 }
0x1920   :  { %v1456_v22 = vpack.c.bf16 %v1455_v21, %v1455_v21 }
0x1922   :  { %6281 = vmatmul.mubr.msk.bf16.vlgmr.msra.gmra.mrb[24].mxu1 %vm267_vm2, %v1456_v22 }
0x1923   :  { %1677 = vmatpush1.bf16.msra.mxu1 %v7676_v17  ;;  %1708 = vmatprep.mubr.bf16.mxu1 %v7244_v1 }
0x1924   :  { %1678 = vmatprep.subr.bf16.mxu1 %v7691_v0 }
0x1927   :  { %1679 = vmatpush1.bf16.msra.mxu1 %v7696_v61 }
0x1928   :  { %1680 = vmatprep.subr.bf16.mxu1 %v7708_v37 }
0x192b   :  { %1681 = vmatpush1.bf16.msra.mxu1 %v7714_v23 }
0x192c   :  { %1682 = vmatprep.subr.bf16.mxu1 %v7723_v24 }
0x192f   :  { %1683 = vmatpush1.bf16.msra.mxu1 %v7732_v29 }
0x1930   :  { %1892 = vmatprep.subr.bf16.mxu1 %v7671_v16 }
0x19f5   :  { %v1494_v25 = vpop.f32.mrb[24].mxu1 }
0x19f6   :  { %v1502_v4 = vadd.f32 %v1494_v25, %v7775_v55  ;;  %v1496_v36 = vpop.f32.mrb[25].mxu1 }
0x19f7   :  { %v1504_v8 = vadd.f32 %v1496_v36, %v7798_v6  ;;  %v1498_v13 = vpop.f32.mrb[26].mxu1 }
0x19f8   :  { %6876 = vtanh.f32 %v1502_v4  ;;  %v1499_v14 = vpop.f32.mrb[27].mxu1  ;;  %v6282_v32 = vmul.f32 -1.442695, %v1502_v4 }
0x19f9   :  { %6878 = vtanh.f32 %v1504_v8  ;;  %v6283_v47 = vmul.f32 -1.442695, %v1504_v8 }
0x19fa   :  { %6880 = vpow2.f32 %v6282_v32 }
0x19fb   :  { %6882 = vpow2.f32 %v6283_v47 }
0x1a02   :  { %v6877_v15 = vpop.eup %6876 }
0x1a03   :  { %v6879_v59 = vpop.eup %6878  ;;  %1514 = vrot.lane.b32.xlu0 %v6877_v15, %s7246_s24 }
0x1a04   :  { %1538 = vrot.lane.b32.xlu1 %v6879_v59, %s7246_s24  ;;  %v6881_v34 = vpop.eup %6880 }
0x1a05   :  { %v6883_v41 = vpop.eup %6882  ;;  %v1508_v55 = vadd.f32 1.0, %v6881_v34 }
0x1a06   :  { %v1532_v44 = vadd.f32 1.0, %v6883_v41 }
0x1a07   :  { %6884 = vrcp.f32 %v1508_v55 }
0x1a08   :  { %6886 = vrcp.f32 %v1532_v44 }
0x1a11   :  { %v6885_v6 = vpop.eup %6884 }
0x1a12   :  { %v6887_v48 = vpop.eup %6886  ;;  %v1512_v51 = vmul.f32 %v6885_v6, %v1414_v54 }
0x1a13   :  { %v1536_v40 = vmul.f32 %v6887_v48, %v1438_v60 }
0x1a75   :  { %v1515_v46 = vpop.permute.xlu0 %1514 }
0x1a76   :  { %v1517_v49 = vmul.f32 %v6885_v6, %v1515_v46  ;;  %v1539_v42 = vpop.permute.xlu1 %1538 }
0x1a77   :  { %v1541_v38 = vmul.f32 %v6887_v48, %v1539_v42 }
0x1a78   :  { %1519 = vrot.lane.b32.xlu0 %v1517_v49, %s7247_s0 }
0x1a79   :  { %1543 = vrot.lane.b32.xlu1 %v1541_v38, %s7247_s0 }
0x1aea   :  { %v1520_v52 = vpop.permute.xlu0 %1519 }
0x1aeb   :  { %v1522_v45 = vadd.f32 %v1520_v52, %v1512_v51  ;;  %v1544_v9 = vpop.permute.xlu1 %1543 }
0x1aec   :  { %v1546_v56 = vadd.f32 %v1544_v9, %v1536_v40 }
0x1aed   :  { %6888 = vtanh.f32 %v1522_v45 }
0x1aee   :  { %6890 = vtanh.f32 %v1546_v56 }
0x1af7   :  { %v6889_v58 = vpop.eup %6888 }
0x1af8   :  { %v6891_v53 = vpop.eup %6890  ;;  %1525 = vrot.lane.b32.xlu0 %v6889_v58, %s7246_s24 }
0x1af9   :  { %1549 = vrot.lane.b32.xlu1 %v6891_v53, %s7246_s24 }
0x1b6a   :  { %v1526_v63 = vpop.permute.xlu0 %1525 }
0x1b6b   :  { %v1528_v7 = vmul.f32 %v6885_v6, %v1526_v63  ;;  %v1550_v10 = vpop.permute.xlu1 %1549 }
0x1b6c   :  { %v1552_v12 = vmul.f32 %v6887_v48, %v1550_v10 }
0x1b6d   :  { %1554 = vrot.lane.b32.xlu0 %v1528_v7, %s7247_s0 }
0x1b6e   :  { %1559 = vrot.lane.b32.xlu1 %v1552_v12, %s7246_s24 }
0x1bdf   :  { %v1555_v54 = vpop.permute.xlu0 %1554 }
0x1be0   :  { %1557 = vst.msk [vmem:[#allocation3 + $0x8] sm:$0xff] %vm116_vm0, %v1555_v54  ;;  %v1560_v60 = vpop.permute.xlu1 %1559 }
0x1be1   :  { %1562 = vst.msk [vmem:[#allocation3 + $0x30] sm:$0xff] %vm373_vm1, %v1560_v60  ;;  %v1563_v18 = vsel %vm116_vm0, %v1555_v54, %v1560_v60 }
0x1be2   :  { %v1564_v20 = vpack.c.bf16 %v1563_v18, %v1563_v18 }
0x1be4   :  { %6284 = vmatmul.mubr.msk.bf16.vlgmr.msra.gmra.mrb[44].mxu0 %vm267_vm2, %v1564_v20 }
0x1be5   :  { %1785 = vmatpush1.bf16.msra.mxu0 %v7676_v17  ;;  %1816 = vmatprep.mubr.bf16.mxu0 %v7244_v1 }
0x1be6   :  { %1786 = vmatprep.subr.bf16.mxu0 %v7691_v0 }
0x1be9   :  { %1787 = vmatpush1.bf16.msra.mxu0 %v7696_v61 }
0x1bea   :  { %1788 = vmatprep.subr.bf16.mxu0 %v7708_v37 }
0x1bed   :  { %1789 = vmatpush1.bf16.msra.mxu0 %v7714_v23 }
0x1bee   :  { %1790 = vmatprep.subr.bf16.mxu0 %v7723_v24 }
0x1bf1   :  { %1791 = vmatpush1.bf16.msra.mxu0 %v7732_v29 }
0x1bf2   :  { %2000 = vmatprep.subr.bf16.mxu0 %v7671_v16 }
0x1cb7   :  { %v1602_v21 = vpop.f32.mrb[44].mxu0 }
0x1cb8   :  { %v1610_v22 = vadd.f32 %v1602_v21, %v7779_v3  ;;  %v1604_v25 = vpop.f32.mrb[45].mxu0 }
0x1cb9   :  { %v1612_v4 = vadd.f32 %v1604_v25, %v7794_v31  ;;  %v1606_v36 = vpop.f32.mrb[46].mxu0 }
0x1cba   :  { %6892 = vtanh.f32 %v1610_v22  ;;  %v1607_v8 = vpop.f32.mrb[47].mxu0  ;;  %v6285_v15 = vmul.f32 -1.442695, %v1610_v22 }
0x1cbb   :  { %6894 = vtanh.f32 %v1612_v4  ;;  %v6286_v59 = vmul.f32 -1.442695, %v1612_v4 }
0x1cbc   :  { %6896 = vpow2.f32 %v6285_v15 }
0x1cbd   :  { %6898 = vpow2.f32 %v6286_v59 }
0x1cc4   :  { %v6893_v13 = vpop.eup %6892 }
0x1cc5   :  { %v6895_v14 = vpop.eup %6894  ;;  %1622 = vrot.lane.b32.xlu0 %v6893_v13, %s7246_s24 }
0x1cc6   :  { %1646 = vrot.lane.b32.xlu1 %v6895_v14, %s7246_s24  ;;  %v6897_v32 = vpop.eup %6896 }
0x1cc7   :  { %v6899_v47 = vpop.eup %6898  ;;  %v1616_v3 = vadd.f32 1.0, %v6897_v32 }
0x1cc8   :  { %v1640_v34 = vadd.f32 1.0, %v6899_v47 }
0x1cc9   :  { %6900 = vrcp.f32 %v1616_v3 }
0x1cca   :  { %6902 = vrcp.f32 %v1640_v34 }
0x1cd3   :  { %v6901_v31 = vpop.eup %6900 }
0x1cd4   :  { %v6903_v55 = vpop.eup %6902  ;;  %v1620_v48 = vmul.f32 %v6901_v31, %v1522_v45 }
0x1cd5   :  { %v1644_v42 = vmul.f32 %v6903_v55, %v1546_v56 }
0x1d37   :  { %v1623_v41 = vpop.permute.xlu0 %1622 }
0x1d38   :  { %v1625_v44 = vmul.f32 %v6901_v31, %v1623_v41  ;;  %v1647_v6 = vpop.permute.xlu1 %1646 }
0x1d39   :  { %v1649_v46 = vmul.f32 %v6903_v55, %v1647_v6 }
0x1d3a   :  { %1627 = vrot.lane.b32.xlu0 %v1625_v44, %s7247_s0 }
0x1d3b   :  { %1651 = vrot.lane.b32.xlu1 %v1649_v46, %s7247_s0 }
0x1dac   :  { %v1628_v49 = vpop.permute.xlu0 %1627 }
0x1dad   :  { %v1630_v38 = vadd.f32 %v1628_v49, %v1620_v48  ;;  %v1652_v51 = vpop.permute.xlu1 %1651 }
0x1dae   :  { %v1654_v52 = vadd.f32 %v1652_v51, %v1644_v42 }
0x1daf   :  { %6904 = vtanh.f32 %v1630_v38 }
0x1db0   :  { %6906 = vtanh.f32 %v1654_v52 }
0x1db9   :  { %v6905_v40 = vpop.eup %6904 }
0x1dba   :  { %v6907_v9 = vpop.eup %6906  ;;  %1633 = vrot.lane.b32.xlu0 %v6905_v40, %s7246_s24 }
0x1dbb   :  { %1657 = vrot.lane.b32.xlu1 %v6907_v9, %s7246_s24 }
0x1e2c   :  { %v1634_v58 = vpop.permute.xlu0 %1633 }
0x1e2d   :  { %v1636_v53 = vmul.f32 %v6901_v31, %v1634_v58  ;;  %v1658_v63 = vpop.permute.xlu1 %1657 }
0x1e2e   :  { %v1660_v7 = vmul.f32 %v6903_v55, %v1658_v63 }
0x1e2f   :  { %1662 = vrot.lane.b32.xlu0 %v1636_v53, %s7247_s0 }
0x1e30   :  { %1667 = vrot.lane.b32.xlu1 %v1660_v7, %s7246_s24 }
0x1ea1   :  { %v1663_v45 = vpop.permute.xlu0 %1662 }
0x1ea2   :  { %1665 = vst.msk [vmem:[#allocation3 + $0x10] sm:$0xff] %vm116_vm0, %v1663_v45  ;;  %v1668_v56 = vpop.permute.xlu1 %1667 }
0x1ea3   :  { %1670 = vst.msk [vmem:[#allocation3 + $0x28] sm:$0xff] %vm373_vm1, %v1668_v56  ;;  %v1671_v10 = vsel %vm116_vm0, %v1663_v45, %v1668_v56 }
0x1ea4   :  { %v1672_v12 = vpack.c.bf16 %v1671_v10, %v1671_v10 }
0x1ea6   :  { %6287 = vmatmul.mubr.msk.bf16.vlgmr.msra.gmra.mrb[28].mxu1 %vm267_vm2, %v1672_v12 }
0x1ea7   :  { %1893 = vmatpush1.bf16.msra.mxu1 %v7676_v17  ;;  %1924 = vmatprep.mubr.bf16.mxu1 %v7244_v1 }
0x1ea8   :  { %1894 = vmatprep.subr.bf16.mxu1 %v7691_v0 }
0x1eab   :  { %1895 = vmatpush1.bf16.msra.mxu1 %v7696_v61 }
0x1eac   :  { %1896 = vmatprep.subr.bf16.mxu1 %v7708_v37 }
0x1eaf   :  { %1897 = vmatpush1.bf16.msra.mxu1 %v7714_v23 }
0x1eb0   :  { %1898 = vmatprep.subr.bf16.mxu1 %v7723_v24 }
0x1eb3   :  { %1899 = vmatpush1.bf16.msra.mxu1 %v7732_v29 }
0x1eb4   :  { %2108 = vmatprep.subr.bf16.mxu1 %v7671_v16 }
0x1f79   :  { %v1710_v54 = vpop.f32.mrb[28].mxu1 }
0x1f7a   :  { %v1718_v60 = vadd.f32 %v1710_v54, %v7783_v50  ;;  %v1712_v18 = vpop.f32.mrb[29].mxu1 }
0x1f7b   :  { %v1720_v20 = vadd.f32 %v1712_v18, %v7790_v39  ;;  %v1714_v21 = vpop.f32.mrb[30].mxu1 }
0x1f7c   :  { %6908 = vtanh.f32 %v1718_v60  ;;  %v1715_v22 = vpop.f32.mrb[31].mxu1  ;;  %v6288_v36 = vmul.f32 -1.442695, %v1718_v60 }
0x1f7d   :  { %6910 = vtanh.f32 %v1720_v20  ;;  %v6289_v8 = vmul.f32 -1.442695, %v1720_v20 }
0x1f7e   :  { %6912 = vpow2.f32 %v6288_v36 }
0x1f7f   :  { %6914 = vpow2.f32 %v6289_v8 }
0x1f86   :  { %v6909_v25 = vpop.eup %6908 }
0x1f87   :  { %v6911_v4 = vpop.eup %6910  ;;  %1730 = vrot.lane.b32.xlu0 %v6909_v25, %s7246_s24 }
0x1f88   :  { %1754 = vrot.lane.b32.xlu1 %v6911_v4, %s7246_s24  ;;  %v6913_v16 = vpop.eup %6912 }
0x1f89   :  { %v6915_v13 = vpop.eup %6914  ;;  %v1724_v50 = vadd.f32 1.0, %v6913_v16 }
0x1f8a   :  { %v1748_v14 = vadd.f32 1.0, %v6915_v13 }
0x1f8b   :  { %6916 = vrcp.f32 %v1724_v50 }
0x1f8c   :  { %6918 = vrcp.f32 %v1748_v14 }
0x1f95   :  { %v6917_v39 = vpop.eup %6916 }
0x1f96   :  { %v6919_v59 = vpop.eup %6918  ;;  %v1728_v34 = vmul.f32 %v6917_v39, %v1630_v38 }
0x1f97   :  { %v1752_v41 = vmul.f32 %v6919_v59, %v1654_v52 }
0x1ff9   :  { %v1731_v15 = vpop.permute.xlu0 %1730 }
0x1ffa   :  { %v1733_v32 = vmul.f32 %v6917_v39, %v1731_v15  ;;  %v1755_v47 = vpop.permute.xlu1 %1754 }
0x1ffb   :  { %v1757_v3 = vmul.f32 %v6919_v59, %v1755_v47 }
0x1ffc   :  { %1735 = vrot.lane.b32.xlu0 %v1733_v32, %s7247_s0 }
0x1ffd   :  { %1759 = vrot.lane.b32.xlu1 %v1757_v3, %s7247_s0 }
0x206e   :  { %v1736_v31 = vpop.permute.xlu0 %1735 }
0x206f   :  { %v1738_v55 = vadd.f32 %v1736_v31, %v1728_v34  ;;  %v1760_v44 = vpop.permute.xlu1 %1759 }
0x2070   :  { %v1762_v6 = vadd.f32 %v1760_v44, %v1752_v41 }
0x2071   :  { %6920 = vtanh.f32 %v1738_v55 }
0x2072   :  { %6922 = vtanh.f32 %v1762_v6 }
0x207b   :  { %v6921_v46 = vpop.eup %6920 }
0x207c   :  { %v6923_v48 = vpop.eup %6922  ;;  %1741 = vrot.lane.b32.xlu0 %v6921_v46, %s7246_s24 }
0x207d   :  { %1765 = vrot.lane.b32.xlu1 %v6923_v48, %s7246_s24 }
0x20ee   :  { %v1742_v49 = vpop.permute.xlu0 %1741 }
0x20ef   :  { %v1744_v42 = vmul.f32 %v6917_v39, %v1742_v49  ;;  %v1766_v51 = vpop.permute.xlu1 %1765 }
0x20f0   :  { %v1768_v40 = vmul.f32 %v6919_v59, %v1766_v51 }
0x20f1   :  { %1770 = vrot.lane.b32.xlu0 %v1744_v42, %s7247_s0 }
0x20f2   :  { %1775 = vrot.lane.b32.xlu1 %v1768_v40, %s7246_s24 }
0x2163   :  { %v1771_v38 = vpop.permute.xlu0 %1770 }
0x2164   :  { %1773 = vst.msk [vmem:[#allocation3 + $0x18] sm:$0xff] %vm116_vm0, %v1771_v38  ;;  %v1776_v52 = vpop.permute.xlu1 %1775 }
0x2165   :  { %1778 = vst.msk [vmem:[#allocation3 + $0x20] sm:$0xff] %vm373_vm1, %v1776_v52  ;;  %v1779_v9 = vsel %vm116_vm0, %v1771_v38, %v1776_v52 }
0x2166   :  { %v1780_v58 = vpack.c.bf16 %v1779_v9, %v1779_v9 }
0x2168   :  { %6290 = vmatmul.mubr.msk.bf16.vlgmr.msra.gmra.mrb[48].mxu0 %vm267_vm2, %v1780_v58 }
0x2169   :  { %2001 = vmatpush1.bf16.msra.mxu0 %v7676_v17  ;;  %2032 = vmatprep.mubr.bf16.mxu0 %v7244_v1 }
0x216a   :  { %2002 = vmatprep.subr.bf16.mxu0 %v7691_v0 }
0x216d   :  { %2003 = vmatpush1.bf16.msra.mxu0 %v7696_v61 }
0x216e   :  { %2004 = vmatprep.subr.bf16.mxu0 %v7708_v37 }
0x2171   :  { %2005 = vmatpush1.bf16.msra.mxu0 %v7714_v23 }
0x2172   :  { %2006 = vmatprep.subr.bf16.mxu0 %v7723_v24 }
0x2175   :  { %2007 = vmatpush1.bf16.msra.mxu0 %v7732_v29 }
0x223b   :  { %v1818_v53 = vpop.f32.mrb[48].mxu0 }
0x223c   :  { %v1826_v63 = vadd.f32 %v1818_v53, %v7788_v43  ;;  %v1820_v7 = vpop.f32.mrb[49].mxu0 }
0x223d   :  { %v1828_v45 = vadd.f32 %v1820_v7, %v7785_v57  ;;  %v1822_v56 = vpop.f32.mrb[50].mxu0 }
0x223e   :  { %6924 = vtanh.f32 %v1826_v63  ;;  %v1823_v10 = vpop.f32.mrb[51].mxu0  ;;  %v6291_v60 = vmul.f32 -1.442695, %v1826_v63 }
0x223f   :  { %6926 = vtanh.f32 %v1828_v45  ;;  %v6292_v18 = vmul.f32 -1.442695, %v1828_v45 }
0x2240   :  { %6928 = vpow2.f32 %v6291_v60 }
0x2241   :  { %6930 = vpow2.f32 %v6292_v18 }
0x2248   :  { %v6925_v12 = vpop.eup %6924 }
0x2249   :  { %v6927_v54 = vpop.eup %6926  ;;  %1838 = vrot.lane.b32.xlu0 %v6925_v12, %s7246_s24 }
0x224a   :  { %1862 = vrot.lane.b32.xlu1 %v6927_v54, %s7246_s24  ;;  %v6929_v20 = vpop.eup %6928 }
0x224b   :  { %v6931_v21 = vpop.eup %6930  ;;  %v1832_v43 = vadd.f32 1.0, %v6929_v20 }
0x224c   :  { %v1856_v22 = vadd.f32 1.0, %v6931_v21 }
0x224d   :  { %6932 = vrcp.f32 %v1832_v43 }
0x224e   :  { %6934 = vrcp.f32 %v1856_v22 }
0x2257   :  { %v6933_v57 = vpop.eup %6932 }
0x2258   :  { %v6935_v4 = vpop.eup %6934  ;;  %v1836_v13 = vmul.f32 %v6933_v57, %v1738_v55 }
0x2259   :  { %v1860_v14 = vmul.f32 %v6935_v4, %v1762_v6 }
0x22bb   :  { %v1839_v25 = vpop.permute.xlu0 %1838 }
0x22bc   :  { %v1841_v36 = vmul.f32 %v6933_v57, %v1839_v25  ;;  %v1863_v8 = vpop.permute.xlu1 %1862 }
0x22bd   :  { %v1865_v16 = vmul.f32 %v6935_v4, %v1863_v8 }
0x22be   :  { %1843 = vrot.lane.b32.xlu0 %v1841_v36, %s7247_s0 }
0x22bf   :  { %1867 = vrot.lane.b32.xlu1 %v1865_v16, %s7247_s0 }
0x2330   :  { %v1844_v50 = vpop.permute.xlu0 %1843 }
0x2331   :  { %v1846_v39 = vadd.f32 %v1844_v50, %v1836_v13  ;;  %v1868_v15 = vpop.permute.xlu1 %1867 }
0x2332   :  { %v1870_v59 = vadd.f32 %v1868_v15, %v1860_v14 }
0x2333   :  { %6936 = vtanh.f32 %v1846_v39 }
0x2334   :  { %6938 = vtanh.f32 %v1870_v59 }
0x233d   :  { %v6937_v32 = vpop.eup %6936 }
0x233e   :  { %v6939_v47 = vpop.eup %6938  ;;  %1849 = vrot.lane.b32.xlu0 %v6937_v32, %s7246_s24 }
0x233f   :  { %1873 = vrot.lane.b32.xlu1 %v6939_v47, %s7246_s24 }
0x23b0   :  { %v1850_v3 = vpop.permute.xlu0 %1849 }
0x23b1   :  { %v1852_v34 = vmul.f32 %v6933_v57, %v1850_v3  ;;  %v1874_v31 = vpop.permute.xlu1 %1873 }
0x23b2   :  { %v1876_v41 = vmul.f32 %v6935_v4, %v1874_v31 }
0x23b3   :  { %1878 = vrot.lane.b32.xlu0 %v1852_v34, %s7247_s0 }
0x23b4   :  { %1883 = vrot.lane.b32.xlu1 %v1876_v41, %s7246_s24 }
0x2425   :  { %v1879_v55 = vpop.permute.xlu0 %1878 }
0x2426   :  { %1881 = vst.msk [vmem:[#allocation3 + $0x20] sm:$0xff] %vm116_vm0, %v1879_v55  ;;  %v1884_v44 = vpop.permute.xlu1 %1883 }
0x2427   :  { %1886 = vst.msk [vmem:[#allocation3 + $0x18] sm:$0xff] %vm373_vm1, %v1884_v44  ;;  %v1887_v6 = vsel %vm116_vm0, %v1879_v55, %v1884_v44 }
0x2428   :  { %v1888_v46 = vpack.c.bf16 %v1887_v6, %v1887_v6 }
0x242a   :  { %6293 = vmatmul.mubr.msk.bf16.vlgmr.msra.gmra.mrb[32].mxu1 %vm267_vm2, %v1888_v46 }
0x242b   :  { %2109 = vmatpush1.bf16.msra.mxu1 %v7676_v17  ;;  %2140 = vmatprep.mubr.bf16.mxu1 %v7244_v1 }
0x242c   :  { %2110 = vmatprep.subr.bf16.mxu1 %v7691_v0 }
0x242f   :  { %2111 = vmatpush1.bf16.msra.mxu1 %v7696_v61 }
0x2430   :  { %2112 = vmatprep.subr.bf16.mxu1 %v7708_v37 }
0x2433   :  { %2113 = vmatpush1.bf16.msra.mxu1 %v7714_v23 }
0x2434   :  { %2114 = vmatprep.subr.bf16.mxu1 %v7723_v24 }
0x2437   :  { %2115 = vmatpush1.bf16.msra.mxu1 %v7732_v29 }
0x24fd   :  { %v1926_v48 = vpop.f32.mrb[32].mxu1 }
0x24fe   :  { %v1934_v49 = vadd.f32 %v1926_v48, %v7792_v5  ;;  %v1928_v42 = vpop.f32.mrb[33].mxu1 }
0x24ff   :  { %v1936_v17 = vadd.f32 %v1928_v42, %v7781_v2  ;;  %v1930_v51 = vpop.f32.mrb[34].mxu1 }
0x2500   :  { %6940 = vtanh.f32 %v1934_v49  ;;  %v1931_v40 = vpop.f32.mrb[35].mxu1  ;;  %v6294_v37 = vmul.f32 -1.442695, %v1934_v49 }
0x2501   :  { %6942 = vtanh.f32 %v1936_v17  ;;  %v6295_v23 = vmul.f32 -1.442695, %v1936_v17 }
0x2502   :  { %6944 = vpow2.f32 %v6294_v37 }
0x2503   :  { %6946 = vpow2.f32 %v6295_v23 }
0x250a   :  { %v6941_v0 = vpop.eup %6940 }
0x250b   :  { %v6943_v61 = vpop.eup %6942  ;;  %1946 = vrot.lane.b32.xlu0 %v6941_v0, %s7246_s24 }
0x250c   :  { %1970 = vrot.lane.b32.xlu1 %v6943_v61, %s7246_s24  ;;  %v6945_v24 = vpop.eup %6944 }
0x250d   :  { %v6947_v29 = vpop.eup %6946  ;;  %v1940_v5 = vadd.f32 1.0, %v6945_v24 }
0x250e   :  { %v1964_v38 = vadd.f32 1.0, %v6947_v29 }
0x250f   :  { %6948 = vrcp.f32 %v1940_v5 }
0x2510   :  { %6950 = vrcp.f32 %v1964_v38 }
0x2519   :  { %v6949_v2 = vpop.eup %6948 }
0x251a   :  { %v6951_v9 = vpop.eup %6950  ;;  %v1944_v7 = vmul.f32 %v6949_v2, %v1846_v39 }
0x251b   :  { %v1968_v56 = vmul.f32 %v6951_v9, %v1870_v59 }
0x257d   :  { %v1947_v52 = vpop.permute.xlu0 %1946 }
0x257e   :  { %v1949_v58 = vmul.f32 %v6949_v2, %v1947_v52  ;;  %v1971_v53 = vpop.permute.xlu1 %1970 }
0x257f   :  { %v1973_v63 = vmul.f32 %v6951_v9, %v1971_v53 }
0x2580   :  { %1951 = vrot.lane.b32.xlu0 %v1949_v58, %s7247_s0 }
0x2581   :  { %1975 = vrot.lane.b32.xlu1 %v1973_v63, %s7247_s0 }
0x25f2   :  { %v1952_v45 = vpop.permute.xlu0 %1951 }
0x25f3   :  { %v1954_v10 = vadd.f32 %v1952_v45, %v1944_v7  ;;  %v1976_v12 = vpop.permute.xlu1 %1975 }
0x25f4   :  { %v1978_v54 = vadd.f32 %v1976_v12, %v1968_v56 }
0x25f5   :  { %6952 = vtanh.f32 %v1954_v10 }
0x25f6   :  { %6954 = vtanh.f32 %v1978_v54 }
0x25ff   :  { %v6953_v60 = vpop.eup %6952 }
0x2600   :  { %v6955_v18 = vpop.eup %6954  ;;  %1957 = vrot.lane.b32.xlu0 %v6953_v60, %s7246_s24 }
0x2601   :  { %1981 = vrot.lane.b32.xlu1 %v6955_v18, %s7246_s24 }
0x2672   :  { %v1958_v20 = vpop.permute.xlu0 %1957 }
0x2673   :  { %v1960_v21 = vmul.f32 %v6949_v2, %v1958_v20  ;;  %v1982_v43 = vpop.permute.xlu1 %1981 }
0x2674   :  { %v1984_v22 = vmul.f32 %v6951_v9, %v1982_v43 }
0x2675   :  { %1986 = vrot.lane.b32.xlu0 %v1960_v21, %s7247_s0 }
0x2676   :  { %1991 = vrot.lane.b32.xlu1 %v1984_v22, %s7246_s24 }
0x26e7   :  { %v1987_v57 = vpop.permute.xlu0 %1986 }
0x26e8   :  { %1989 = vst.msk [vmem:[#allocation3 + $0x28] sm:$0xff] %vm116_vm0, %v1987_v57  ;;  %v1992_v25 = vpop.permute.xlu1 %1991 }
0x26e9   :  { %1994 = vst.msk [vmem:[#allocation3 + $0x10] sm:$0xff] %vm373_vm1, %v1992_v25  ;;  %v1995_v4 = vsel %vm116_vm0, %v1987_v57, %v1992_v25 }
0x26ea   :  { %v1996_v36 = vpack.c.bf16 %v1995_v4, %v1995_v4 }
0x26ec   :  { %6296 = vmatmul.mubr.msk.bf16.vlgmr.msra.gmra.mrb[52].mxu0 %vm267_vm2, %v1996_v36 }
0x26ed   :  { %2327 = vmatprep.mubr.bf16.mxu0 %v7244_v1 }
0x27bf   :  { %v2034_v8 = vpop.f32.mrb[52].mxu0 }
0x27c0   :  { %v2042_v16 = vadd.f32 %v2034_v8, %v7796_v33  ;;  %v2036_v13 = vpop.f32.mrb[53].mxu0 }
0x27c1   :  { %v2044_v50 = vadd.f32 %v2036_v13, %v7777_v62  ;;  %v2038_v14 = vpop.f32.mrb[54].mxu0 }
0x27c2   :  { %6956 = vtanh.f32 %v2042_v16  ;;  %v2039_v39 = vpop.f32.mrb[55].mxu0  ;;  %v6297_v32 = vmul.f32 -1.442695, %v2042_v16  ;;  %v6672_v14 = vld [vmem:[%s9521_s7] ss:$8 sps:$4 sm:$0xff]  }
0x27c3   :  { %6958 = vtanh.f32 %v2044_v50  ;;  %v6298_v47 = vmul.f32 -1.442695, %v2044_v50  ;;  %v6674_v39 = vld [vmem:[%s9521_s7 + $0x4] ss:$8 sps:$4 sm:$0xff]  }
0x27c4   :  { %6960 = vpow2.f32 %v6297_v32  ;;  %2295 = vmatprep.subr.bf16.mxu0 %v6674_v39  ;;  %v6678_v32 = vld [vmem:[%s9521_s7 + $0x10] ss:$8 sps:$4 sm:$0xff]  }
0x27c5   :  { %6962 = vpow2.f32 %v6298_v47  ;;  %v6680_v47 = vld [vmem:[%s9521_s7 + $0x14] ss:$8 sps:$4 sm:$0xff]   ;;  %2296 = vmatpush1.bf16.msra.mxu0 %v6672_v14 }
0x27c6   :  { %2297 = vmatprep.subr.bf16.mxu0 %v6680_v47 }
0x27c9   :  { %2298 = vmatpush1.bf16.msra.mxu0 %v6678_v32 }
0x27cc   :  { %v6957_v15 = vpop.eup %6956 }
0x27cd   :  { %v6959_v59 = vpop.eup %6958  ;;  %2054 = vrot.lane.b32.xlu0 %v6957_v15, %s7246_s24  ;;  %v7957_v15 = vld [vmem:[%s9522_s8 + $0x4] ss:$8 sps:$4 sm:$0xff]  }
0x27ce   :  { %2078 = vrot.lane.b32.xlu1 %v6959_v59, %s7246_s24  ;;  %v6961_v3 = vpop.eup %6960  ;;  %v7962_v59 = vld [vmem:[%s9522_s8] ss:$8 sps:$4 sm:$0xff]   ;;  %2432 = vmatprep.subr.bf16.mxu1 %v7957_v15 }
0x27cf   :  { %v6963_v34 = vpop.eup %6962  ;;  %v2048_v33 = vadd.f32 1.0, %v6961_v3 }
0x27d0   :  { %v2072_v31 = vadd.f32 1.0, %v6963_v34 }
0x27d1   :  { %6964 = vrcp.f32 %v2048_v33  ;;  %v7977_v33 = vld [vmem:[%s9522_s8 + $0x14] ss:$8 sps:$4 sm:$0xff]  }
0x27d2   :  { %6966 = vrcp.f32 %v2072_v31  ;;  %v7982_v31 = vld [vmem:[%s9522_s8 + $0x10] ss:$8 sps:$4 sm:$0xff]  }
0x27db   :  { %v6965_v62 = vpop.eup %6964 }
0x27dc   :  { %v6967_v55 = vpop.eup %6966  ;;  %v2052_v48 = vmul.f32 %v6965_v62, %v1954_v10 }
0x27dd   :  { %v2076_v42 = vmul.f32 %v6967_v55, %v1978_v54 }
0x283f   :  { %v2055_v41 = vpop.permute.xlu0 %2054 }
0x2840   :  { %v2057_v44 = vmul.f32 %v6965_v62, %v2055_v41  ;;  %v2079_v6 = vpop.permute.xlu1 %2078  ;;  %v6686_v41 = vld [vmem:[%s9521_s7 + $0x24] ss:$8 sps:$4 sm:$0xff]  }
0x2841   :  { %v2081_v46 = vmul.f32 %v6967_v55, %v2079_v6  ;;  %v6692_v6 = vld [vmem:[%s9521_s7 + $0x34] ss:$8 sps:$4 sm:$0xff]   ;;  %2299 = vmatprep.subr.bf16.mxu0 %v6686_v41 }
0x2842   :  { %2059 = vrot.lane.b32.xlu0 %v2057_v44, %s7247_s0  ;;  %v8000_v44 = vld [vmem:[%s9522_s8 + $0x20] ss:$8 sps:$4 sm:$0xff]  }
0x2843   :  { %2083 = vrot.lane.b32.xlu1 %v2081_v46, %s7247_s0  ;;  %v8009_v46 = vld [vmem:[%s9522_s8 + $0x34] ss:$8 sps:$4 sm:$0xff]  }
0x28b4   :  { %v2060_v49 = vpop.permute.xlu0 %2059 }
0x28b5   :  { %v2062_v17 = vadd.f32 %v2060_v49, %v2052_v48  ;;  %v2084_v51 = vpop.permute.xlu1 %2083  ;;  %v6690_v48 = vld [vmem:[%s9521_s7 + $0x30] ss:$8 sps:$4 sm:$0xff]  }
0x28b6   :  { %v2086_v40 = vadd.f32 %v2084_v51, %v2076_v42  ;;  %v8018_v49 = vld [vmem:[%s9522_s8 + $0x30] ss:$8 sps:$4 sm:$0xff]  }
0x28b7   :  { %6968 = vtanh.f32 %v2062_v17 }
0x28b8   :  { %6970 = vtanh.f32 %v2086_v40 }
0x28c1   :  { %v6969_v0 = vpop.eup %6968 }
0x28c2   :  { %v6971_v61 = vpop.eup %6970  ;;  %2065 = vrot.lane.b32.xlu0 %v6969_v0, %s7246_s24 }
0x28c3   :  { %2089 = vrot.lane.b32.xlu1 %v6971_v61, %s7246_s24 }
0x2934   :  { %v2066_v37 = vpop.permute.xlu0 %2065 }
0x2935   :  { %v2068_v23 = vmul.f32 %v6965_v62, %v2066_v37  ;;  %v2090_v24 = vpop.permute.xlu1 %2089  ;;  %v6684_v62 = vld [vmem:[%s9521_s7 + $0x20] ss:$8 sps:$4 sm:$0xff]  }
0x2936   :  { %v2092_v29 = vmul.f32 %v6967_v55, %v2090_v24  ;;  %v7994_v55 = vld [vmem:[%s9522_s8 + $0x24] ss:$8 sps:$4 sm:$0xff]   ;;  %2300 = vmatpush1.bf16.msra.mxu0 %v6684_v62 }
0x2937   :  { %2094 = vrot.lane.b32.xlu0 %v2068_v23, %s7247_s0  ;;  %2301 = vmatprep.subr.bf16.mxu0 %v6692_v6 }
0x2938   :  { %2099 = vrot.lane.b32.xlu1 %v2092_v29, %s7246_s24  ;;  %v2213_v29 = vld [vmem:[#allocation3 + $0x10] sm:$0xff] }
0x293a   :  { %2302 = vmatpush1.bf16.msra.mxu0 %v6690_v48 }
0x293b   :  { %2648 = vmatprep.subr.bf16.mxu0 %v7957_v15 }
0x29a9   :  { %v2095_v5 = vpop.permute.xlu0 %2094 }
0x29aa   :  { %2097 = vst.msk [vmem:[#allocation3 + $0x30] sm:$0xff] %vm116_vm0, %v2095_v5  ;;  %v2100_v38 = vpop.permute.xlu1 %2099 }
0x29ab   :  { %2102 = vst.msk [vmem:[#allocation3 + $0x8] sm:$0xff] %vm373_vm1, %v2100_v38  ;;  %v2103_v2 = vsel %vm116_vm0, %v2095_v5, %v2100_v38  ;;  %v2214_v5 = vld [vmem:[#allocation3 + $0x18] sm:$0xff] }
0x29ac   :  { %v2104_v52 = vpack.c.bf16 %v2103_v2, %v2103_v2  ;;  %v2220_v38 = vpack.c.bf16 %v2214_v5, %v2213_v29  ;;  %v2216_v2 = vld [vmem:[#allocation3 + $0x28] sm:$0xff] }
0x29ae   :  { %6299 = vmatmul.mubr.msk.bf16.vlgmr.msra.gmra.mrb[36].mxu1 %vm267_vm2, %v2104_v52  ;;  %v2215_v52 = vld [vmem:[#allocation3 + $0x20] sm:$0xff] }
0x29af   :  { %2464 = vmatprep.mubr.bf16.mxu1 %v7244_v1  ;;  %2433 = vmatpush1.bf16.msra.mxu1 %v7962_v59 }
0x29b0   :  { %2434 = vmatprep.subr.bf16.mxu1 %v7977_v33 }
0x29b2   :  { %v2212_v23 = vld [vmem:[#allocation3 + $0x8] sm:$0xff] }
0x29b3   :  { %2435 = vmatpush1.bf16.msra.mxu1 %v7982_v31 }
0x29b4   :  { %2436 = vmatprep.subr.bf16.mxu1 %v7994_v55 }
0x29b7   :  { %2437 = vmatpush1.bf16.msra.mxu1 %v8000_v44 }
0x29b8   :  { %2438 = vmatprep.subr.bf16.mxu1 %v8009_v46 }
0x29bb   :  { %2439 = vmatpush1.bf16.msra.mxu1 %v8018_v49 }
0x29bc   :  { %2540 = vmatprep.subr.bf16.mxu1 %v7957_v15 }
0x29be   :  { %2465 = vmatmul.mubr.bf16.vlgmr.msra.gmra.mrb[40].mxu1 %v7245_v19 }
0x29bf   :  { %2541 = vmatpush1.bf16.msra.mxu1 %v7962_v59  ;;  %2572 = vmatprep.mubr.bf16.mxu1 %v7244_v1 }
0x29c0   :  { %2542 = vmatprep.subr.bf16.mxu1 %v7977_v33 }
0x29c3   :  { %2543 = vmatpush1.bf16.msra.mxu1 %v7982_v31 }
0x29c4   :  { %2544 = vmatprep.subr.bf16.mxu1 %v7994_v55 }
0x29c7   :  { %2545 = vmatpush1.bf16.msra.mxu1 %v8000_v44 }
0x29c8   :  { %2546 = vmatprep.subr.bf16.mxu1 %v8009_v46 }
0x29cb   :  { %2547 = vmatpush1.bf16.msra.mxu1 %v8018_v49 }
0x29cc   :  { %2756 = vmatprep.subr.bf16.mxu1 %v7957_v15 }
0x2a81   :  { %v2142_v9 = vpop.f32.mrb[36].mxu1 }
0x2a82   :  { %v2150_v58 = vadd.f32 %v2142_v9, %v7800_v11  ;;  %v2144_v53 = vpop.f32.mrb[37].mxu1  ;;  %v2221_v9 = vpack.c.bf16 %v2216_v2, %v2215_v52 }
0x2a83   :  { %v2152_v63 = vadd.f32 %v2144_v53, %v7773_v35  ;;  %v2146_v7 = vpop.f32.mrb[38].mxu1  ;;  %v2217_v53 = vld [vmem:[#allocation3 + $0x30] sm:$0xff] }
0x2a84   :  { %6972 = vtanh.f32 %v2150_v58  ;;  %v2147_v45 = vpop.f32.mrb[39].mxu1  ;;  %v6300_v12 = vmul.f32 -1.442695, %v2150_v58 }
0x2a85   :  { %6974 = vtanh.f32 %v2152_v63  ;;  %v6301_v54 = vmul.f32 -1.442695, %v2152_v63 }
0x2a86   :  { %6976 = vpow2.f32 %v6300_v12  ;;  %v2231_v12 = vld [vmem:[%s9523_s9] sm:$0x3] }
0x2a87   :  { %6978 = vpow2.f32 %v6301_v54  ;;  %v2236_v54 = vrot.slane %v2231_v12, %v7479_v30 }
0x2a8e   :  { %v6973_v56 = vpop.eup %6972 }
0x2a8f   :  { %v6975_v10 = vpop.eup %6974  ;;  %2162 = vrot.lane.b32.xlu1 %v6973_v56, %s7246_s24 }
0x2a90   :  { %2186 = vrot.lane.b32.xlu0 %v6975_v10, %s7246_s24  ;;  %v6977_v60 = vpop.eup %6976 }
0x2a91   :  { %v6979_v18 = vpop.eup %6978  ;;  %v2156_v11 = vadd.f32 1.0, %v6977_v60  ;;  %v2466_v7 = vpop.f32.mrb[40].mxu1  ;;  %v2240_v60 = vrot.slane %v2231_v12, %v7473_v28 }
0x2a92   :  { %v2180_v20 = vadd.f32 1.0, %v6979_v18  ;;  %v2468_v45 = vpop.f32.mrb[41].mxu1 }
0x2a93   :  { %6980 = vrcp.f32 %v2156_v11  ;;  %v2470_v56 = vpop.f32.mrb[42].mxu1 }
0x2a94   :  { %6982 = vrcp.f32 %v2180_v20  ;;  %v2471_v10 = vpop.f32.mrb[43].mxu1 }
0x2a9d   :  { %v6981_v35 = vpop.eup %6980 }
0x2a9e   :  { %v6983_v43 = vpop.eup %6982  ;;  %v2160_v4 = vmul.f32 %v6981_v35, %v2062_v17 }
0x2a9f   :  { %v2184_v8 = vmul.f32 %v6983_v43, %v2086_v40 }
0x2b01   :  { %v2163_v21 = vpop.permute.xlu1 %2162 }
0x2b02   :  { %v2165_v22 = vmul.f32 %v6981_v35, %v2163_v21  ;;  %v2187_v57 = vpop.permute.xlu0 %2186 }
0x2b03   :  { %v2189_v25 = vmul.f32 %v6983_v43, %v2187_v57 }
0x2b04   :  { %2167 = vrot.lane.b32.xlu1 %v2165_v22, %s7247_s0 }
0x2b05   :  { %2191 = vrot.lane.b32.xlu0 %v2189_v25, %s7247_s0 }
0x2b76   :  { %v2168_v36 = vpop.permute.xlu1 %2167 }
0x2b77   :  { %v2170_v16 = vadd.f32 %v2168_v36, %v2160_v4  ;;  %v2192_v13 = vpop.permute.xlu0 %2191 }
0x2b78   :  { %v2194_v50 = vadd.f32 %v2192_v13, %v2184_v8 }
0x2b79   :  { %6984 = vtanh.f32 %v2170_v16 }
0x2b7a   :  { %6986 = vtanh.f32 %v2194_v50 }
0x2b83   :  { %v6985_v3 = vpop.eup %6984 }
0x2b84   :  { %v6987_v34 = vpop.eup %6986  ;;  %2173 = vrot.lane.b32.xlu1 %v6985_v3, %s7246_s24 }
0x2b85   :  { %2197 = vrot.lane.b32.xlu0 %v6987_v34, %s7246_s24 }
0x2bf6   :  { %v2174_v42 = vpop.permute.xlu1 %2173 }
0x2bf7   :  { %v2176_v17 = vmul.f32 %v6981_v35, %v2174_v42  ;;  %v2198_v51 = vpop.permute.xlu0 %2197 }
0x2bf8   :  { %v2200_v40 = vmul.f32 %v6983_v43, %v2198_v51 }
0x2bf9   :  { %2202 = vrot.lane.b32.xlu1 %v2176_v17, %s7247_s0 }
0x2bfa   :  { %2207 = vrot.lane.b32.xlu0 %v2200_v40, %s7246_s24 }
0x2c6b   :  { %v2203_v0 = vpop.permute.xlu1 %2202 }
0x2c6c   :  { %2205 = vst.msk [vmem:[#allocation3 + $0x38] sm:$0xff] %vm116_vm0, %v2203_v0  ;;  %v2208_v61 = vpop.permute.xlu0 %2207 }
0x2c6d   :  { %2210 = vst.msk [vmem:[#allocation3] sm:$0xff] %vm373_vm1, %v2208_v61 }
0x2c73   :  { %v2218_v58 = vld [vmem:[#allocation3 + $0x38] sm:$0xff] }
0x2c74   :  { %v2211_v37 = vld [vmem:[#allocation3] sm:$0xff]  ;;  %v2222_v63 = vpack.c.bf16 %v2218_v58, %v2217_v53 }
0x2c75   :  { %v2219_v24 = vpack.c.bf16 %v2212_v23, %v2211_v37 }
0x2c77   :  { %6310 = vmatmul.mubr.msk.bf16.vlgmr.msra.gmra.mrb[56].mxu0 %vm267_vm2, %v2219_v24 }
0x2c78   :  { %2337 = vmatprep.mubr.bf16.mxu0 %v7244_v1  ;;  %2649 = vmatpush1.bf16.msra.mxu0 %v7962_v59 }
0x2c79   :  { %2650 = vmatprep.subr.bf16.mxu0 %v7977_v33 }
0x2c7c   :  { %2651 = vmatpush1.bf16.msra.mxu0 %v7982_v31 }
0x2c7d   :  { %2652 = vmatprep.subr.bf16.mxu0 %v7994_v55 }
0x2c7f   :  { %6311 = vmatmul.mubr.msk.bf16.gmra.mrb[60].mxu0 %vm267_vm2, %v2220_v38 }
0x2c80   :  { %2347 = vmatprep.mubr.bf16.mxu0 %v7244_v1  ;;  %2653 = vmatpush1.bf16.msra.mxu0 %v8000_v44 }
0x2c81   :  { %2654 = vmatprep.subr.bf16.mxu0 %v8009_v46 }
0x2c84   :  { %2655 = vmatpush1.bf16.msra.mxu0 %v8018_v49 }
0x2c85   :  { %2864 = vmatprep.subr.bf16.mxu0 %v7957_v15 }
0x2c87   :  { %6312 = vmatmul.mubr.msk.bf16.gmra.mrb[64].mxu0 %vm267_vm2, %v2221_v9 }
0x2c88   :  { %2357 = vmatprep.mubr.bf16.mxu0 %v7244_v1 }
0x2c8f   :  { %6313 = vmatmul.mubr.msk.bf16.gmra.mrb[68].mxu0 %vm267_vm2, %v2222_v63 }
0x2c90   :  { %2680 = vmatprep.mubr.bf16.mxu0 %v7244_v1 }
0x2d4a   :  { %v2329_v18 = vpop.f32.mrb[56].mxu0 }
0x2d4b   :  { %v2330_v11 = vadd.f32 %v2329_v18, %v2236_v54  ;;  %v2331_v20 = vpop.f32.mrb[57].mxu0 }
0x2d4c   :  { %v8059_v35 = vadd.f32 %v2331_v20, %v2240_v60  ;;  %v2333_v21 = vpop.f32.mrb[58].mxu0 }
0x2d4d   :  { %v8061_v43 = vadd.f32 %v2333_v21, %v2236_v54  ;;  %v2474_v22 = vadd.f32 %v2466_v7, %v2330_v11  ;;  %v2335_v57 = vpop.f32.mrb[59].mxu0 }
0x2d4e   :  { %v8063_v25 = vadd.f32 %v2335_v57, %v2240_v60 }
0x2d4f   :  { %6988 = vtanh.f32 %v2474_v22  ;;  %v6322_v38 = vmul.f32 -1.442695, %v2474_v22 }
0x2d52   :  { %v2339_v4 = vpop.f32.mrb[60].mxu0 }
0x2d53   :  { %v8065_v36 = vadd.f32 %v2339_v4, %v2236_v54  ;;  %v2341_v8 = vpop.f32.mrb[61].mxu0 }
0x2d54   :  { %v8067_v16 = vadd.f32 %v2341_v8, %v2240_v60  ;;  %v2343_v13 = vpop.f32.mrb[62].mxu0 }
0x2d55   :  { %v8069_v50 = vadd.f32 %v2343_v13, %v2236_v54  ;;  %v2345_v14 = vpop.f32.mrb[63].mxu0 }
0x2d56   :  { %v8071_v39 = vadd.f32 %v2345_v14, %v2240_v60 }
0x2d59   :  { %v6989_v32 = vpop.eup %6988 }
0x2d5a   :  { %v2349_v47 = vpop.f32.mrb[64].mxu0  ;;  %2486 = vrot.lane.b32.xlu0 %v6989_v32, %s7246_s24 }
0x2d5b   :  { %v8074_v3 = vadd.f32 %v2349_v47, %v2236_v54  ;;  %v2351_v34 = vpop.f32.mrb[65].mxu0 }
0x2d5c   :  { %v8076_v62 = vadd.f32 %v2351_v34, %v2240_v60  ;;  %v2353_v41 = vpop.f32.mrb[66].mxu0 }
0x2d5d   :  { %v8078_v6 = vadd.f32 %v2353_v41, %v2236_v54  ;;  %v2355_v48 = vpop.f32.mrb[67].mxu0 }
0x2d5e   :  { %v8080_v42 = vadd.f32 %v2355_v48, %v2240_v60 }
0x2d62   :  { %v2359_v17 = vpop.f32.mrb[68].mxu0 }
0x2d63   :  { %v8082_v51 = vadd.f32 %v2359_v17, %v2236_v54  ;;  %v2361_v40 = vpop.f32.mrb[69].mxu0 }
0x2d64   :  { %v8084_v0 = vadd.f32 %v2361_v40, %v2240_v60  ;;  %v2363_v61 = vpop.f32.mrb[70].mxu0 }
0x2d65   :  { %v8086_v37 = vadd.f32 %v2363_v61, %v2236_v54  ;;  %v2365_v23 = vpop.f32.mrb[71].mxu0 }
0x2d66   :  { %v2366_v24 = vadd.f32 %v2365_v23, %v2240_v60 }
0x2d68   :  { %v2476_v29 = vadd.f32 %v2468_v45, %v2366_v24 }
0x2d6a   :  { %6990 = vtanh.f32 %v2476_v29  ;;  %v6323_v9 = vmul.f32 -1.442695, %v2476_v29 }
0x2d6b   :  { %6992 = vpow2.f32 %v6322_v38 }
0x2d74   :  { %v6991_v5 = vpop.eup %6990 }
0x2d75   :  { %2510 = vrot.lane.b32.xlu1 %v6991_v5, %s7246_s24  ;;  %v6993_v2 = vpop.eup %6992 }
0x2d76   :  { %v2480_v52 = vadd.f32 1.0, %v6993_v2 }
0x2d78   :  { %6994 = vrcp.f32 %v2480_v52 }
0x2d79   :  { %6996 = vpow2.f32 %v6323_v9 }
0x2d82   :  { %v6995_v58 = vpop.eup %6994 }
0x2d83   :  { %v6997_v7 = vpop.eup %6996  ;;  %v2484_v54 = vmul.f32 0.0, %v6995_v58 }
0x2d84   :  { %v2504_v56 = vadd.f32 1.0, %v6997_v7 }
0x2d86   :  { %6998 = vrcp.f32 %v2504_v56 }
0x2d90   :  { %v6999_v45 = vpop.eup %6998 }
0x2d91   :  { %v2508_v20 = vmul.f32 0.0, %v6999_v45 }
0x2dcc   :  { %v2487_v53 = vpop.permute.xlu0 %2486 }
0x2dcd   :  { %v2489_v63 = vmul.f32 %v6995_v58, %v2487_v53 }
0x2dcf   :  { %2491 = vrot.lane.b32.xlu0 %v2489_v63, %s7247_s0 }
0x2de7   :  { %v2511_v10 = vpop.permute.xlu1 %2510 }
0x2de8   :  { %v2513_v12 = vmul.f32 %v6999_v45, %v2511_v10 }
0x2dea   :  { %2515 = vrot.lane.b32.xlu1 %v2513_v12, %s7247_s0 }
0x2e41   :  { %v2492_v60 = vpop.permute.xlu0 %2491 }
0x2e42   :  { %v2494_v18 = vadd.f32 %v2492_v60, %v2484_v54 }
0x2e44   :  { %7000 = vtanh.f32 %v2494_v18 }
0x2e4e   :  { %v7001_v11 = vpop.eup %7000 }
0x2e4f   :  { %2497 = vrot.lane.b32.xlu0 %v7001_v11, %s7246_s24 }
0x2e5c   :  { %v2516_v21 = vpop.permute.xlu1 %2515 }
0x2e5d   :  { %v2518_v22 = vadd.f32 %v2516_v21, %v2508_v20 }
0x2e5f   :  { %7002 = vtanh.f32 %v2518_v22 }
0x2e69   :  { %v7003_v57 = vpop.eup %7002 }
0x2e6a   :  { %2521 = vrot.lane.b32.xlu1 %v7003_v57, %s7246_s24 }
0x2ec1   :  { %v2498_v4 = vpop.permute.xlu0 %2497 }
0x2ec2   :  { %v2500_v8 = vmul.f32 %v6995_v58, %v2498_v4 }
0x2ec4   :  { %2526 = vrot.lane.b32.xlu0 %v2500_v8, %s7247_s0 }
0x2edc   :  { %v2522_v13 = vpop.permute.xlu1 %2521 }
0x2edd   :  { %v2524_v14 = vmul.f32 %v6999_v45, %v2522_v13 }
0x2edf   :  { %2531 = vrot.lane.b32.xlu1 %v2524_v14, %s7246_s24 }
0x2f36   :  { %v2527_v32 = vpop.permute.xlu0 %2526 }
0x2f37   :  { %2529 = vst.msk [vmem:[#allocation2] sm:$0xff] %vm116_vm0, %v2527_v32 }
0x2f51   :  { %v2532_v47 = vpop.permute.xlu1 %2531 }
0x2f52   :  { %2534 = vst.msk [vmem:[#allocation2 + $0x38] sm:$0xff] %vm373_vm1, %v2532_v47  ;;  %v2535_v34 = vsel %vm116_vm0, %v2527_v32, %v2532_v47 }
0x2f53   :  { %v2536_v41 = vpack.c.bf16 %v2535_v34, %v2535_v34 }
0x2f55   :  { %6324 = vmatmul.mubr.msk.bf16.vlgmr.msra.gmra.mrb[44].mxu1 %vm267_vm2, %v2536_v41 }
0x2f56   :  { %2757 = vmatpush1.bf16.msra.mxu1 %v7962_v59  ;;  %2788 = vmatprep.mubr.bf16.mxu1 %v7244_v1 }
0x2f57   :  { %2758 = vmatprep.subr.bf16.mxu1 %v7977_v33 }
0x2f5a   :  { %2759 = vmatpush1.bf16.msra.mxu1 %v7982_v31 }
0x2f5b   :  { %2760 = vmatprep.subr.bf16.mxu1 %v7994_v55 }
0x2f5e   :  { %2761 = vmatpush1.bf16.msra.mxu1 %v8000_v44 }
0x2f5f   :  { %2762 = vmatprep.subr.bf16.mxu1 %v8009_v46 }
0x2f62   :  { %2763 = vmatpush1.bf16.msra.mxu1 %v8018_v49 }
0x2f63   :  { %2972 = vmatprep.subr.bf16.mxu1 %v7957_v15 }
0x3028   :  { %v2574_v48 = vpop.f32.mrb[44].mxu1 }
0x3029   :  { %v2582_v17 = vadd.f32 %v2574_v48, %v8061_v43  ;;  %v2576_v40 = vpop.f32.mrb[45].mxu1 }
0x302a   :  { %v2584_v61 = vadd.f32 %v2576_v40, %v8084_v0  ;;  %v2578_v23 = vpop.f32.mrb[46].mxu1 }
0x302b   :  { %7004 = vtanh.f32 %v2582_v17  ;;  %v2579_v24 = vpop.f32.mrb[47].mxu1  ;;  %v6325_v38 = vmul.f32 -1.442695, %v2582_v17 }
0x302c   :  { %7006 = vtanh.f32 %v2584_v61  ;;  %v6326_v2 = vmul.f32 -1.442695, %v2584_v61 }
0x302d   :  { %7008 = vpow2.f32 %v6325_v38 }
0x302e   :  { %7010 = vpow2.f32 %v6326_v2 }
0x3035   :  { %v7005_v29 = vpop.eup %7004 }
0x3036   :  { %v7007_v5 = vpop.eup %7006  ;;  %2594 = vrot.lane.b32.xlu0 %v7005_v29, %s7246_s24 }
0x3037   :  { %2618 = vrot.lane.b32.xlu1 %v7007_v5, %s7246_s24  ;;  %v7009_v52 = vpop.eup %7008 }
0x3038   :  { %v7011_v9 = vpop.eup %7010  ;;  %v2588_v43 = vadd.f32 1.0, %v7009_v52 }
0x3039   :  { %v2612_v58 = vadd.f32 1.0, %v7011_v9 }
0x303a   :  { %7012 = vrcp.f32 %v2588_v43 }
0x303b   :  { %7014 = vrcp.f32 %v2612_v58 }
0x3044   :  { %v7013_v0 = vpop.eup %7012 }
0x3045   :  { %v7015_v63 = vpop.eup %7014  ;;  %v2592_v10 = vmul.f32 %v7013_v0, %v2494_v18 }
0x3046   :  { %v2616_v54 = vmul.f32 %v7015_v63, %v2518_v22 }
0x30a8   :  { %v2595_v53 = vpop.permute.xlu0 %2594 }
0x30a9   :  { %v2597_v7 = vmul.f32 %v7013_v0, %v2595_v53  ;;  %v2619_v56 = vpop.permute.xlu1 %2618 }
0x30aa   :  { %v2621_v45 = vmul.f32 %v7015_v63, %v2619_v56 }
0x30ab   :  { %2599 = vrot.lane.b32.xlu0 %v2597_v7, %s7247_s0 }
0x30ac   :  { %2623 = vrot.lane.b32.xlu1 %v2621_v45, %s7247_s0 }
0x311d   :  { %v2600_v12 = vpop.permute.xlu0 %2599 }
0x311e   :  { %v2602_v60 = vadd.f32 %v2600_v12, %v2592_v10  ;;  %v2624_v11 = vpop.permute.xlu1 %2623 }
0x311f   :  { %v2626_v20 = vadd.f32 %v2624_v11, %v2616_v54 }
0x3120   :  { %7016 = vtanh.f32 %v2602_v60 }
0x3121   :  { %7018 = vtanh.f32 %v2626_v20 }
0x312a   :  { %v7017_v21 = vpop.eup %7016 }
0x312b   :  { %v7019_v57 = vpop.eup %7018  ;;  %2605 = vrot.lane.b32.xlu0 %v7017_v21, %s7246_s24 }
0x312c   :  { %2629 = vrot.lane.b32.xlu1 %v7019_v57, %s7246_s24 }
0x319d   :  { %v2606_v4 = vpop.permute.xlu0 %2605 }
0x319e   :  { %v2608_v8 = vmul.f32 %v7013_v0, %v2606_v4  ;;  %v2630_v13 = vpop.permute.xlu1 %2629 }
0x319f   :  { %v2632_v14 = vmul.f32 %v7015_v63, %v2630_v13 }
0x31a0   :  { %2634 = vrot.lane.b32.xlu0 %v2608_v8, %s7247_s0 }
0x31a1   :  { %2639 = vrot.lane.b32.xlu1 %v2632_v14, %s7246_s24 }
0x3212   :  { %v2635_v18 = vpop.permute.xlu0 %2634 }
0x3213   :  { %2637 = vst.msk [vmem:[#allocation2 + $0x8] sm:$0xff] %vm116_vm0, %v2635_v18  ;;  %v2640_v22 = vpop.permute.xlu1 %2639 }
0x3214   :  { %2642 = vst.msk [vmem:[#allocation2 + $0x30] sm:$0xff] %vm373_vm1, %v2640_v22  ;;  %v2643_v32 = vsel %vm116_vm0, %v2635_v18, %v2640_v22 }
0x3215   :  { %v2644_v47 = vpack.c.bf16 %v2643_v32, %v2643_v32 }
0x3217   :  { %6327 = vmatmul.mubr.msk.bf16.vlgmr.msra.gmra.mrb[72].mxu0 %vm267_vm2, %v2644_v47 }
0x3218   :  { %2865 = vmatpush1.bf16.msra.mxu0 %v7962_v59  ;;  %2896 = vmatprep.mubr.bf16.mxu0 %v7244_v1 }
0x3219   :  { %2866 = vmatprep.subr.bf16.mxu0 %v7977_v33 }
0x321c   :  { %2867 = vmatpush1.bf16.msra.mxu0 %v7982_v31 }
0x321d   :  { %2868 = vmatprep.subr.bf16.mxu0 %v7994_v55 }
0x3220   :  { %2869 = vmatpush1.bf16.msra.mxu0 %v8000_v44 }
0x3221   :  { %2870 = vmatprep.subr.bf16.mxu0 %v8009_v46 }
0x3224   :  { %2871 = vmatpush1.bf16.msra.mxu0 %v8018_v49 }
0x3225   :  { %3080 = vmatprep.subr.bf16.mxu0 %v7957_v15 }
0x32ea   :  { %v2682_v34 = vpop.f32.mrb[72].mxu0 }
0x32eb   :  { %v2690_v41 = vadd.f32 %v2682_v34, %v8065_v36  ;;  %v2684_v48 = vpop.f32.mrb[73].mxu0 }
0x32ec   :  { %v2692_v17 = vadd.f32 %v2684_v48, %v8080_v42  ;;  %v2686_v40 = vpop.f32.mrb[74].mxu0 }
0x32ed   :  { %7020 = vtanh.f32 %v2690_v41  ;;  %v2687_v61 = vpop.f32.mrb[75].mxu0  ;;  %v6328_v29 = vmul.f32 -1.442695, %v2690_v41 }
0x32ee   :  { %7022 = vtanh.f32 %v2692_v17  ;;  %v6329_v5 = vmul.f32 -1.442695, %v2692_v17 }
0x32ef   :  { %7024 = vpow2.f32 %v6328_v29 }
0x32f0   :  { %7026 = vpow2.f32 %v6329_v5 }
0x32f7   :  { %v7021_v23 = vpop.eup %7020 }
0x32f8   :  { %v7023_v24 = vpop.eup %7022  ;;  %2702 = vrot.lane.b32.xlu0 %v7021_v23, %s7246_s24 }
0x32f9   :  { %2726 = vrot.lane.b32.xlu1 %v7023_v24, %s7246_s24  ;;  %v7025_v38 = vpop.eup %7024 }
0x32fa   :  { %v7027_v2 = vpop.eup %7026  ;;  %v2696_v36 = vadd.f32 1.0, %v7025_v38 }
0x32fb   :  { %v2720_v52 = vadd.f32 1.0, %v7027_v2 }
0x32fc   :  { %7028 = vrcp.f32 %v2696_v36 }
0x32fd   :  { %7030 = vrcp.f32 %v2720_v52 }
0x3306   :  { %v7029_v42 = vpop.eup %7028 }
0x3307   :  { %v7031_v43 = vpop.eup %7030  ;;  %v2700_v63 = vmul.f32 %v7029_v42, %v2602_v60 }
0x3308   :  { %v2724_v56 = vmul.f32 %v7031_v43, %v2626_v20 }
0x336a   :  { %v2703_v9 = vpop.permute.xlu0 %2702 }
0x336b   :  { %v2705_v58 = vmul.f32 %v7029_v42, %v2703_v9  ;;  %v2727_v0 = vpop.permute.xlu1 %2726 }
0x336c   :  { %v2729_v53 = vmul.f32 %v7031_v43, %v2727_v0 }
0x336d   :  { %2707 = vrot.lane.b32.xlu0 %v2705_v58, %s7247_s0 }
0x336e   :  { %2731 = vrot.lane.b32.xlu1 %v2729_v53, %s7247_s0 }
0x33df   :  { %v2708_v7 = vpop.permute.xlu0 %2707 }
0x33e0   :  { %v2710_v45 = vadd.f32 %v2708_v7, %v2700_v63  ;;  %v2732_v10 = vpop.permute.xlu1 %2731 }
0x33e1   :  { %v2734_v12 = vadd.f32 %v2732_v10, %v2724_v56 }
0x33e2   :  { %7032 = vtanh.f32 %v2710_v45 }
0x33e3   :  { %7034 = vtanh.f32 %v2734_v12 }
0x33ec   :  { %v7033_v54 = vpop.eup %7032 }
0x33ed   :  { %v7035_v11 = vpop.eup %7034  ;;  %2713 = vrot.lane.b32.xlu0 %v7033_v54, %s7246_s24 }
0x33ee   :  { %2737 = vrot.lane.b32.xlu1 %v7035_v11, %s7246_s24 }
0x345f   :  { %v2714_v21 = vpop.permute.xlu0 %2713 }
0x3460   :  { %v2716_v57 = vmul.f32 %v7029_v42, %v2714_v21  ;;  %v2738_v4 = vpop.permute.xlu1 %2737 }
0x3461   :  { %v2740_v8 = vmul.f32 %v7031_v43, %v2738_v4 }
0x3462   :  { %2742 = vrot.lane.b32.xlu0 %v2716_v57, %s7247_s0 }
0x3463   :  { %2747 = vrot.lane.b32.xlu1 %v2740_v8, %s7246_s24 }
0x34d4   :  { %v2743_v60 = vpop.permute.xlu0 %2742 }
0x34d5   :  { %2745 = vst.msk [vmem:[#allocation2 + $0x10] sm:$0xff] %vm116_vm0, %v2743_v60  ;;  %v2748_v20 = vpop.permute.xlu1 %2747 }
0x34d6   :  { %2750 = vst.msk [vmem:[#allocation2 + $0x28] sm:$0xff] %vm373_vm1, %v2748_v20  ;;  %v2751_v13 = vsel %vm116_vm0, %v2743_v60, %v2748_v20 }
0x34d7   :  { %v2752_v14 = vpack.c.bf16 %v2751_v13, %v2751_v13 }
0x34d9   :  { %6330 = vmatmul.mubr.msk.bf16.vlgmr.msra.gmra.mrb[48].mxu1 %vm267_vm2, %v2752_v14 }
0x34da   :  { %2973 = vmatpush1.bf16.msra.mxu1 %v7962_v59  ;;  %3004 = vmatprep.mubr.bf16.mxu1 %v7244_v1 }
0x34db   :  { %2974 = vmatprep.subr.bf16.mxu1 %v7977_v33 }
0x34de   :  { %2975 = vmatpush1.bf16.msra.mxu1 %v7982_v31 }
0x34df   :  { %2976 = vmatprep.subr.bf16.mxu1 %v7994_v55 }
0x34e2   :  { %2977 = vmatpush1.bf16.msra.mxu1 %v8000_v44 }
0x34e3   :  { %2978 = vmatprep.subr.bf16.mxu1 %v8009_v46 }
0x34e6   :  { %2979 = vmatpush1.bf16.msra.mxu1 %v8018_v49 }
0x34e7   :  { %3188 = vmatprep.subr.bf16.mxu1 %v7957_v15 }
0x35ac   :  { %v2790_v18 = vpop.f32.mrb[48].mxu1 }
0x35ad   :  { %v2798_v22 = vadd.f32 %v2790_v18, %v8069_v50  ;;  %v2792_v32 = vpop.f32.mrb[49].mxu1 }
0x35ae   :  { %v2800_v47 = vadd.f32 %v2792_v32, %v8076_v62  ;;  %v2794_v34 = vpop.f32.mrb[50].mxu1 }
0x35af   :  { %7036 = vtanh.f32 %v2798_v22  ;;  %v2795_v41 = vpop.f32.mrb[51].mxu1  ;;  %v6331_v40 = vmul.f32 -1.442695, %v2798_v22 }
0x35b0   :  { %7038 = vtanh.f32 %v2800_v47  ;;  %v6332_v61 = vmul.f32 -1.442695, %v2800_v47 }
0x35b1   :  { %7040 = vpow2.f32 %v6331_v40 }
0x35b2   :  { %7042 = vpow2.f32 %v6332_v61 }
0x35b9   :  { %v7037_v48 = vpop.eup %7036 }
0x35ba   :  { %v7039_v17 = vpop.eup %7038  ;;  %2810 = vrot.lane.b32.xlu0 %v7037_v48, %s7246_s24 }
0x35bb   :  { %2834 = vrot.lane.b32.xlu1 %v7039_v17, %s7246_s24  ;;  %v7041_v15 = vpop.eup %7040 }
0x35bc   :  { %v7043_v23 = vpop.eup %7042  ;;  %v2804_v50 = vadd.f32 1.0, %v7041_v15 }
0x35bd   :  { %v2828_v24 = vadd.f32 1.0, %v7043_v23 }
0x35be   :  { %7044 = vrcp.f32 %v2804_v50 }
0x35bf   :  { %7046 = vrcp.f32 %v2828_v24 }
0x35c8   :  { %v7045_v62 = vpop.eup %7044 }
0x35c9   :  { %v7047_v5 = vpop.eup %7046  ;;  %v2808_v52 = vmul.f32 %v7045_v62, %v2710_v45 }
0x35ca   :  { %v2832_v9 = vmul.f32 %v7047_v5, %v2734_v12 }
0x362c   :  { %v2811_v29 = vpop.permute.xlu0 %2810 }
0x362d   :  { %v2813_v38 = vmul.f32 %v7045_v62, %v2811_v29  ;;  %v2835_v2 = vpop.permute.xlu1 %2834 }
0x362e   :  { %v2837_v36 = vmul.f32 %v7047_v5, %v2835_v2 }
0x362f   :  { %2815 = vrot.lane.b32.xlu0 %v2813_v38, %s7247_s0 }
0x3630   :  { %2839 = vrot.lane.b32.xlu1 %v2837_v36, %s7247_s0 }
0x36a1   :  { %v2816_v42 = vpop.permute.xlu0 %2815 }
0x36a2   :  { %v2818_v43 = vadd.f32 %v2816_v42, %v2808_v52  ;;  %v2840_v58 = vpop.permute.xlu1 %2839 }
0x36a3   :  { %v2842_v0 = vadd.f32 %v2840_v58, %v2832_v9 }
0x36a4   :  { %7048 = vtanh.f32 %v2818_v43 }
0x36a5   :  { %7050 = vtanh.f32 %v2842_v0 }
0x36ae   :  { %v7049_v53 = vpop.eup %7048 }
0x36af   :  { %v7051_v63 = vpop.eup %7050  ;;  %2821 = vrot.lane.b32.xlu0 %v7049_v53, %s7246_s24 }
0x36b0   :  { %2845 = vrot.lane.b32.xlu1 %v7051_v63, %s7246_s24 }
0x3721   :  { %v2822_v7 = vpop.permute.xlu0 %2821 }
0x3722   :  { %v2824_v56 = vmul.f32 %v7045_v62, %v2822_v7  ;;  %v2846_v10 = vpop.permute.xlu1 %2845 }
0x3723   :  { %v2848_v54 = vmul.f32 %v7047_v5, %v2846_v10 }
0x3724   :  { %2850 = vrot.lane.b32.xlu0 %v2824_v56, %s7247_s0 }
0x3725   :  { %2855 = vrot.lane.b32.xlu1 %v2848_v54, %s7246_s24 }
0x3796   :  { %v2851_v45 = vpop.permute.xlu0 %2850 }
0x3797   :  { %2853 = vst.msk [vmem:[#allocation2 + $0x18] sm:$0xff] %vm116_vm0, %v2851_v45  ;;  %v2856_v12 = vpop.permute.xlu1 %2855 }
0x3798   :  { %2858 = vst.msk [vmem:[#allocation2 + $0x20] sm:$0xff] %vm373_vm1, %v2856_v12  ;;  %v2859_v11 = vsel %vm116_vm0, %v2851_v45, %v2856_v12 }
0x3799   :  { %v2860_v21 = vpack.c.bf16 %v2859_v11, %v2859_v11 }
0x379b   :  { %6333 = vmatmul.mubr.msk.bf16.vlgmr.msra.gmra.mrb[76].mxu0 %vm267_vm2, %v2860_v21 }
0x379c   :  { %3081 = vmatpush1.bf16.msra.mxu0 %v7962_v59  ;;  %3112 = vmatprep.mubr.bf16.mxu0 %v7244_v1 }
0x379d   :  { %3082 = vmatprep.subr.bf16.mxu0 %v7977_v33 }
0x37a0   :  { %3083 = vmatpush1.bf16.msra.mxu0 %v7982_v31 }
0x37a1   :  { %3084 = vmatprep.subr.bf16.mxu0 %v7994_v55 }
0x37a4   :  { %3085 = vmatpush1.bf16.msra.mxu0 %v8000_v44 }
0x37a5   :  { %3086 = vmatprep.subr.bf16.mxu0 %v8009_v46 }
0x37a8   :  { %3087 = vmatpush1.bf16.msra.mxu0 %v8018_v49 }
0x386e   :  { %v2898_v57 = vpop.f32.mrb[76].mxu0 }
0x386f   :  { %v2906_v4 = vadd.f32 %v2898_v57, %v8074_v3  ;;  %v2900_v8 = vpop.f32.mrb[77].mxu0 }
0x3870   :  { %v2908_v60 = vadd.f32 %v2900_v8, %v8071_v39  ;;  %v2902_v20 = vpop.f32.mrb[78].mxu0 }
0x3871   :  { %7052 = vtanh.f32 %v2906_v4  ;;  %v2903_v13 = vpop.f32.mrb[79].mxu0  ;;  %v6334_v22 = vmul.f32 -1.442695, %v2906_v4 }
0x3872   :  { %7054 = vtanh.f32 %v2908_v60  ;;  %v6335_v32 = vmul.f32 -1.442695, %v2908_v60 }
0x3873   :  { %7056 = vpow2.f32 %v6334_v22 }
0x3874   :  { %7058 = vpow2.f32 %v6335_v32 }
0x387b   :  { %v7053_v14 = vpop.eup %7052 }
0x387c   :  { %v7055_v18 = vpop.eup %7054  ;;  %2918 = vrot.lane.b32.xlu0 %v7053_v14, %s7246_s24 }
0x387d   :  { %2942 = vrot.lane.b32.xlu1 %v7055_v18, %s7246_s24  ;;  %v7057_v47 = vpop.eup %7056 }
0x387e   :  { %v7059_v34 = vpop.eup %7058  ;;  %v2912_v3 = vadd.f32 1.0, %v7057_v47 }
0x387f   :  { %v2936_v41 = vadd.f32 1.0, %v7059_v34 }
0x3880   :  { %7060 = vrcp.f32 %v2912_v3 }
0x3881   :  { %7062 = vrcp.f32 %v2936_v41 }
0x388a   :  { %v7061_v39 = vpop.eup %7060 }
0x388b   :  { %v7063_v17 = vpop.eup %7062  ;;  %v2916_v23 = vmul.f32 %v7061_v39, %v2818_v43 }
0x388c   :  { %v2940_v24 = vmul.f32 %v7063_v17, %v2842_v0 }
0x38ee   :  { %v2919_v48 = vpop.permute.xlu0 %2918 }
0x38ef   :  { %v2921_v40 = vmul.f32 %v7061_v39, %v2919_v48  ;;  %v2943_v61 = vpop.permute.xlu1 %2942 }
0x38f0   :  { %v2945_v15 = vmul.f32 %v7063_v17, %v2943_v61 }
0x38f1   :  { %2923 = vrot.lane.b32.xlu0 %v2921_v40, %s7247_s0 }
0x38f2   :  { %2947 = vrot.lane.b32.xlu1 %v2945_v15, %s7247_s0 }
0x3963   :  { %v2924_v50 = vpop.permute.xlu0 %2923 }
0x3964   :  { %v2926_v62 = vadd.f32 %v2924_v50, %v2916_v23  ;;  %v2948_v29 = vpop.permute.xlu1 %2947 }
0x3965   :  { %v2950_v5 = vadd.f32 %v2948_v29, %v2940_v24 }
0x3966   :  { %7064 = vtanh.f32 %v2926_v62 }
0x3967   :  { %7066 = vtanh.f32 %v2950_v5 }
0x3970   :  { %v7065_v38 = vpop.eup %7064 }
0x3971   :  { %v7067_v2 = vpop.eup %7066  ;;  %2929 = vrot.lane.b32.xlu0 %v7065_v38, %s7246_s24 }
0x3972   :  { %2953 = vrot.lane.b32.xlu1 %v7067_v2, %s7246_s24 }
0x39e3   :  { %v2930_v36 = vpop.permute.xlu0 %2929 }
0x39e4   :  { %v2932_v52 = vmul.f32 %v7061_v39, %v2930_v36  ;;  %v2954_v42 = vpop.permute.xlu1 %2953 }
0x39e5   :  { %v2956_v9 = vmul.f32 %v7063_v17, %v2954_v42 }
0x39e6   :  { %2958 = vrot.lane.b32.xlu0 %v2932_v52, %s7247_s0 }
0x39e7   :  { %2963 = vrot.lane.b32.xlu1 %v2956_v9, %s7246_s24 }
0x3a58   :  { %v2959_v43 = vpop.permute.xlu0 %2958 }
0x3a59   :  { %2961 = vst.msk [vmem:[#allocation2 + $0x20] sm:$0xff] %vm116_vm0, %v2959_v43  ;;  %v2964_v58 = vpop.permute.xlu1 %2963 }
0x3a5a   :  { %2966 = vst.msk [vmem:[#allocation2 + $0x18] sm:$0xff] %vm373_vm1, %v2964_v58  ;;  %v2967_v0 = vsel %vm116_vm0, %v2959_v43, %v2964_v58 }
0x3a5b   :  { %v2968_v53 = vpack.c.bf16 %v2967_v0, %v2967_v0 }
0x3a5d   :  { %6336 = vmatmul.mubr.msk.bf16.vlgmr.msra.gmra.mrb[52].mxu1 %vm267_vm2, %v2968_v53 }
0x3a5e   :  { %3189 = vmatpush1.bf16.msra.mxu1 %v7962_v59  ;;  %3220 = vmatprep.mubr.bf16.mxu1 %v7244_v1 }
0x3a5f   :  { %3190 = vmatprep.subr.bf16.mxu1 %v7977_v33 }
0x3a62   :  { %3191 = vmatpush1.bf16.msra.mxu1 %v7982_v31 }
0x3a63   :  { %3192 = vmatprep.subr.bf16.mxu1 %v7994_v55 }
0x3a66   :  { %3193 = vmatpush1.bf16.msra.mxu1 %v8000_v44 }
0x3a67   :  { %3194 = vmatprep.subr.bf16.mxu1 %v8009_v46 }
0x3a6a   :  { %3195 = vmatpush1.bf16.msra.mxu1 %v8018_v49 }
0x3b30   :  { %v3006_v63 = vpop.f32.mrb[52].mxu1 }
0x3b31   :  { %v3014_v7 = vadd.f32 %v3006_v63, %v8078_v6  ;;  %v3008_v56 = vpop.f32.mrb[53].mxu1 }
0x3b32   :  { %v3016_v59 = vadd.f32 %v3008_v56, %v8067_v16  ;;  %v3010_v10 = vpop.f32.mrb[54].mxu1 }
0x3b33   :  { %7068 = vtanh.f32 %v3014_v7  ;;  %v3011_v54 = vpop.f32.mrb[55].mxu1  ;;  %v6337_v55 = vmul.f32 -1.442695, %v3014_v7 }
0x3b34   :  { %7070 = vtanh.f32 %v3016_v59  ;;  %v6338_v44 = vmul.f32 -1.442695, %v3016_v59 }
0x3b35   :  { %7072 = vpow2.f32 %v6337_v55 }
0x3b36   :  { %7074 = vpow2.f32 %v6338_v44 }
0x3b3d   :  { %v7069_v33 = vpop.eup %7068 }
0x3b3e   :  { %v7071_v31 = vpop.eup %7070  ;;  %3026 = vrot.lane.b32.xlu0 %v7069_v33, %s7246_s24 }
0x3b3f   :  { %3050 = vrot.lane.b32.xlu1 %v7071_v31, %s7246_s24  ;;  %v7073_v46 = vpop.eup %7072 }
0x3b40   :  { %v7075_v49 = vpop.eup %7074  ;;  %v3020_v6 = vadd.f32 1.0, %v7073_v46 }
0x3b41   :  { %v3044_v45 = vadd.f32 1.0, %v7075_v49 }
0x3b42   :  { %7076 = vrcp.f32 %v3020_v6 }
0x3b43   :  { %7078 = vrcp.f32 %v3044_v45 }
0x3b4c   :  { %v7077_v16 = vpop.eup %7076 }
0x3b4d   :  { %v7079_v11 = vpop.eup %7078  ;;  %v3024_v8 = vmul.f32 %v7077_v16, %v2926_v62 }
0x3b4e   :  { %v3048_v20 = vmul.f32 %v7079_v11, %v2950_v5 }
0x3bb0   :  { %v3027_v12 = vpop.permute.xlu0 %3026 }
0x3bb1   :  { %v3029_v21 = vmul.f32 %v7077_v16, %v3027_v12  ;;  %v3051_v57 = vpop.permute.xlu1 %3050 }
0x3bb2   :  { %v3053_v4 = vmul.f32 %v7079_v11, %v3051_v57 }
0x3bb3   :  { %3031 = vrot.lane.b32.xlu0 %v3029_v21, %s7247_s0 }
0x3bb4   :  { %3055 = vrot.lane.b32.xlu1 %v3053_v4, %s7247_s0 }
0x3c25   :  { %v3032_v60 = vpop.permute.xlu0 %3031 }
0x3c26   :  { %v3034_v13 = vadd.f32 %v3032_v60, %v3024_v8  ;;  %v3056_v14 = vpop.permute.xlu1 %3055 }
0x3c27   :  { %v3058_v18 = vadd.f32 %v3056_v14, %v3048_v20 }
0x3c28   :  { %7080 = vtanh.f32 %v3034_v13 }
0x3c29   :  { %7082 = vtanh.f32 %v3058_v18 }
0x3c32   :  { %v7081_v22 = vpop.eup %7080 }
0x3c33   :  { %v7083_v32 = vpop.eup %7082  ;;  %3037 = vrot.lane.b32.xlu0 %v7081_v22, %s7246_s24 }
0x3c34   :  { %3061 = vrot.lane.b32.xlu1 %v7083_v32, %s7246_s24 }
0x3ca5   :  { %v3038_v47 = vpop.permute.xlu0 %3037 }
0x3ca6   :  { %v3040_v34 = vmul.f32 %v7077_v16, %v3038_v47  ;;  %v3062_v3 = vpop.permute.xlu1 %3061 }
0x3ca7   :  { %v3064_v41 = vmul.f32 %v7079_v11, %v3062_v3 }
0x3ca8   :  { %3066 = vrot.lane.b32.xlu0 %v3040_v34, %s7247_s0 }
0x3ca9   :  { %3071 = vrot.lane.b32.xlu1 %v3064_v41, %s7246_s24 }
0x3d1a   :  { %v3067_v39 = vpop.permute.xlu0 %3066 }
0x3d1b   :  { %3069 = vst.msk [vmem:[#allocation2 + $0x28] sm:$0xff] %vm116_vm0, %v3067_v39  ;;  %v3072_v48 = vpop.permute.xlu1 %3071 }
0x3d1c   :  { %3074 = vst.msk [vmem:[#allocation2 + $0x10] sm:$0xff] %vm373_vm1, %v3072_v48  ;;  %v3075_v17 = vsel %vm116_vm0, %v3067_v39, %v3072_v48 }
0x3d1d   :  { %v3076_v40 = vpack.c.bf16 %v3075_v17, %v3075_v17 }
0x3d1f   :  { %6339 = vmatmul.mubr.msk.bf16.vlgmr.msra.gmra.mrb[80].mxu0 %vm267_vm2, %v3076_v40 }
0x3d20   :  { %3407 = vmatprep.mubr.bf16.mxu0 %v7244_v1 }
0x3df2   :  { %v3114_v61 = vpop.f32.mrb[80].mxu0 }
0x3df3   :  { %v3122_v15 = vadd.f32 %v3114_v61, %v8082_v51  ;;  %v3116_v23 = vpop.f32.mrb[81].mxu0 }
0x3df4   :  { %v3124_v50 = vadd.f32 %v3116_v23, %v8063_v25  ;;  %v3118_v24 = vpop.f32.mrb[82].mxu0 }
0x3df5   :  { %7084 = vtanh.f32 %v3122_v15  ;;  %v3119_v62 = vpop.f32.mrb[83].mxu0  ;;  %v6340_v38 = vmul.f32 -1.442695, %v3122_v15  ;;  %v6696_v24 = vld [vmem:[%s9524_s10] ss:$8 sps:$4 sm:$0xff]  }
0x3df6   :  { %7086 = vtanh.f32 %v3124_v50  ;;  %v6341_v2 = vmul.f32 -1.442695, %v3124_v50  ;;  %v6698_v62 = vld [vmem:[%s9524_s10 + $0x4] ss:$8 sps:$4 sm:$0xff]  }
0x3df7   :  { %7088 = vpow2.f32 %v6340_v38  ;;  %3375 = vmatprep.subr.bf16.mxu0 %v6698_v62  ;;  %v6702_v38 = vld [vmem:[%s9524_s10 + $0x10] ss:$8 sps:$4 sm:$0xff]  }
0x3df8   :  { %7090 = vpow2.f32 %v6341_v2  ;;  %v6704_v2 = vld [vmem:[%s9524_s10 + $0x14] ss:$8 sps:$4 sm:$0xff]   ;;  %3376 = vmatpush1.bf16.msra.mxu0 %v6696_v24 }
0x3df9   :  { %3377 = vmatprep.subr.bf16.mxu0 %v6704_v2 }
0x3dfc   :  { %3378 = vmatpush1.bf16.msra.mxu0 %v6702_v38 }
0x3dff   :  { %v7085_v29 = vpop.eup %7084 }
0x3e00   :  { %v7087_v5 = vpop.eup %7086  ;;  %3134 = vrot.lane.b32.xlu0 %v7085_v29, %s7246_s24  ;;  %v8243_v29 = vld [vmem:[%s9525_s11 + $0x4] ss:$8 sps:$4 sm:$0xff]  }
0x3e01   :  { %3158 = vrot.lane.b32.xlu1 %v7087_v5, %s7246_s24  ;;  %v7089_v36 = vpop.eup %7088  ;;  %v8248_v5 = vld [vmem:[%s9525_s11] ss:$8 sps:$4 sm:$0xff]   ;;  %3512 = vmatprep.subr.bf16.mxu1 %v8243_v29 }
0x3e02   :  { %v7091_v52 = vpop.eup %7090  ;;  %v3128_v51 = vadd.f32 1.0, %v7089_v36 }
0x3e03   :  { %v3152_v42 = vadd.f32 1.0, %v7091_v52 }
0x3e04   :  { %7092 = vrcp.f32 %v3128_v51  ;;  %v8263_v51 = vld [vmem:[%s9525_s11 + $0x14] ss:$8 sps:$4 sm:$0xff]  }
0x3e05   :  { %7094 = vrcp.f32 %v3152_v42  ;;  %v8268_v42 = vld [vmem:[%s9525_s11 + $0x10] ss:$8 sps:$4 sm:$0xff]  }
0x3e0e   :  { %v7093_v25 = vpop.eup %7092 }
0x3e0f   :  { %v7095_v43 = vpop.eup %7094  ;;  %v3132_v63 = vmul.f32 %v7093_v25, %v3034_v13 }
0x3e10   :  { %v3156_v56 = vmul.f32 %v7095_v43, %v3058_v18 }
0x3e72   :  { %v3135_v9 = vpop.permute.xlu0 %3134 }
0x3e73   :  { %v3137_v58 = vmul.f32 %v7093_v25, %v3135_v9  ;;  %v3159_v0 = vpop.permute.xlu1 %3158  ;;  %v6710_v9 = vld [vmem:[%s9524_s10 + $0x24] ss:$8 sps:$4 sm:$0xff]  }
0x3e74   :  { %v3161_v53 = vmul.f32 %v7095_v43, %v3159_v0  ;;  %v6716_v0 = vld [vmem:[%s9524_s10 + $0x34] ss:$8 sps:$4 sm:$0xff]   ;;  %3379 = vmatprep.subr.bf16.mxu0 %v6710_v9 }
0x3e75   :  { %3139 = vrot.lane.b32.xlu0 %v3137_v58, %s7247_s0  ;;  %v8286_v58 = vld [vmem:[%s9525_s11 + $0x20] ss:$8 sps:$4 sm:$0xff]  }
0x3e76   :  { %3163 = vrot.lane.b32.xlu1 %v3161_v53, %s7247_s0  ;;  %v8295_v53 = vld [vmem:[%s9525_s11 + $0x34] ss:$8 sps:$4 sm:$0xff]  }
0x3ee7   :  { %v3140_v7 = vpop.permute.xlu0 %3139 }
0x3ee8   :  { %v3142_v59 = vadd.f32 %v3140_v7, %v3132_v63  ;;  %v3164_v10 = vpop.permute.xlu1 %3163  ;;  %v6714_v63 = vld [vmem:[%s9524_s10 + $0x30] ss:$8 sps:$4 sm:$0xff]  }
0x3ee9   :  { %v3166_v54 = vadd.f32 %v3164_v10, %v3156_v56  ;;  %v8304_v7 = vld [vmem:[%s9525_s11 + $0x30] ss:$8 sps:$4 sm:$0xff]  }
0x3eea   :  { %7096 = vtanh.f32 %v3142_v59 }
0x3eeb   :  { %7098 = vtanh.f32 %v3166_v54 }
0x3ef4   :  { %v7097_v33 = vpop.eup %7096 }
0x3ef5   :  { %v7099_v31 = vpop.eup %7098  ;;  %3145 = vrot.lane.b32.xlu0 %v7097_v33, %s7246_s24 }
0x3ef6   :  { %3169 = vrot.lane.b32.xlu1 %v7099_v31, %s7246_s24 }
0x3f67   :  { %v3146_v55 = vpop.permute.xlu0 %3145 }
0x3f68   :  { %v3148_v44 = vmul.f32 %v7093_v25, %v3146_v55  ;;  %v3170_v46 = vpop.permute.xlu1 %3169  ;;  %v6708_v25 = vld [vmem:[%s9524_s10 + $0x20] ss:$8 sps:$4 sm:$0xff]  }
0x3f69   :  { %v3172_v49 = vmul.f32 %v7095_v43, %v3170_v46  ;;  %v8280_v43 = vld [vmem:[%s9525_s11 + $0x24] ss:$8 sps:$4 sm:$0xff]   ;;  %3380 = vmatpush1.bf16.msra.mxu0 %v6708_v25  ;;  %v3293_v46 = vld [vmem:[#allocation2 + $0x10] sm:$0xff] }
0x3f6a   :  { %3174 = vrot.lane.b32.xlu0 %v3148_v44, %s7247_s0  ;;  %3381 = vmatprep.subr.bf16.mxu0 %v6716_v0 }
0x3f6b   :  { %3179 = vrot.lane.b32.xlu1 %v3172_v49, %s7246_s24  ;;  %v3294_v49 = vld [vmem:[#allocation2 + $0x18] sm:$0xff] }
0x3f6d   :  { %3382 = vmatpush1.bf16.msra.mxu0 %v6714_v63 }
0x3f6e   :  { %3728 = vmatprep.subr.bf16.mxu0 %v8243_v29 }
0x3fdc   :  { %v3175_v6 = vpop.permute.xlu0 %3174 }
0x3fdd   :  { %3177 = vst.msk [vmem:[#allocation2 + $0x30] sm:$0xff] %vm116_vm0, %v3175_v6  ;;  %v3180_v45 = vpop.permute.xlu1 %3179 }
0x3fde   :  { %3182 = vst.msk [vmem:[#allocation2 + $0x8] sm:$0xff] %vm373_vm1, %v3180_v45  ;;  %v3183_v16 = vsel %vm116_vm0, %v3175_v6, %v3180_v45  ;;  %v3300_v6 = vpack.c.bf16 %v3294_v49, %v3293_v46  ;;  %v3296_v45 = vld [vmem:[#allocation2 + $0x28] sm:$0xff] }
0x3fdf   :  { %v3184_v12 = vpack.c.bf16 %v3183_v16, %v3183_v16  ;;  %v3295_v16 = vld [vmem:[#allocation2 + $0x20] sm:$0xff] }
0x3fe1   :  { %6342 = vmatmul.mubr.msk.bf16.vlgmr.msra.gmra.mrb[56].mxu1 %vm267_vm2, %v3184_v12  ;;  %v3301_v12 = vpack.c.bf16 %v3296_v45, %v3295_v16 }
0x3fe2   :  { %3544 = vmatprep.mubr.bf16.mxu1 %v7244_v1  ;;  %3513 = vmatpush1.bf16.msra.mxu1 %v8248_v5 }
0x3fe3   :  { %3514 = vmatprep.subr.bf16.mxu1 %v8263_v51 }
0x3fe5   :  { %v3292_v55 = vld [vmem:[#allocation2 + $0x8] sm:$0xff] }
0x3fe6   :  { %3515 = vmatpush1.bf16.msra.mxu1 %v8268_v42 }
0x3fe7   :  { %3516 = vmatprep.subr.bf16.mxu1 %v8280_v43 }
0x3fea   :  { %3517 = vmatpush1.bf16.msra.mxu1 %v8286_v58 }
0x3feb   :  { %3518 = vmatprep.subr.bf16.mxu1 %v8295_v53 }
0x3fee   :  { %3519 = vmatpush1.bf16.msra.mxu1 %v8304_v7 }
0x3fef   :  { %3620 = vmatprep.subr.bf16.mxu1 %v8243_v29 }
0x3ff1   :  { %3545 = vmatmul.mubr.bf16.vlgmr.msra.gmra.mrb[60].mxu1 %v7245_v19 }
0x3ff2   :  { %3621 = vmatpush1.bf16.msra.mxu1 %v8248_v5  ;;  %3652 = vmatprep.mubr.bf16.mxu1 %v7244_v1 }
0x3ff3   :  { %3622 = vmatprep.subr.bf16.mxu1 %v8263_v51 }
0x3ff6   :  { %3623 = vmatpush1.bf16.msra.mxu1 %v8268_v42 }
0x3ff7   :  { %3624 = vmatprep.subr.bf16.mxu1 %v8280_v43 }
0x3ffa   :  { %3625 = vmatpush1.bf16.msra.mxu1 %v8286_v58 }
0x3ffb   :  { %3626 = vmatprep.subr.bf16.mxu1 %v8295_v53 }
0x3ffe   :  { %3627 = vmatpush1.bf16.msra.mxu1 %v8304_v7 }
0x3fff   :  { %3836 = vmatprep.subr.bf16.mxu1 %v8243_v29 }
0x40b4   :  { %v3222_v11 = vpop.f32.mrb[56].mxu1 }
0x40b5   :  { %v3230_v21 = vadd.f32 %v3222_v11, %v8086_v37  ;;  %v3224_v57 = vpop.f32.mrb[57].mxu1 }
0x40b6   :  { %v3232_v4 = vadd.f32 %v3224_v57, %v8059_v35  ;;  %v3226_v8 = vpop.f32.mrb[58].mxu1 }
0x40b7   :  { %7100 = vtanh.f32 %v3230_v21  ;;  %v3227_v60 = vpop.f32.mrb[59].mxu1  ;;  %v6343_v14 = vmul.f32 -1.442695, %v3230_v21  ;;  %v3297_v21 = vld [vmem:[#allocation2 + $0x30] sm:$0xff] }
0x40b8   :  { %7102 = vtanh.f32 %v3232_v4  ;;  %v6344_v18 = vmul.f32 -1.442695, %v3232_v4 }
0x40b9   :  { %7104 = vpow2.f32 %v6343_v14 }
0x40ba   :  { %7106 = vpow2.f32 %v6344_v18 }
0x40c1   :  { %v7101_v20 = vpop.eup %7100 }
0x40c2   :  { %v7103_v13 = vpop.eup %7102  ;;  %3242 = vrot.lane.b32.xlu1 %v7101_v20, %s7246_s24 }
0x40c3   :  { %3266 = vrot.lane.b32.xlu0 %v7103_v13, %s7246_s24  ;;  %v7105_v22 = vpop.eup %7104  ;;  %v3311_v13 = vld [vmem:[%s9526_s12] sm:$0x3] }
0x40c4   :  { %v7107_v32 = vpop.eup %7106  ;;  %v3236_v37 = vadd.f32 1.0, %v7105_v22  ;;  %v3546_v4 = vpop.f32.mrb[60].mxu1  ;;  %v3316_v14 = vrot.slane %v3311_v13, %v7479_v30  ;;  %v3320_v18 = vrot.slane %v3311_v13, %v7473_v28 }
0x40c5   :  { %v3260_v47 = vadd.f32 1.0, %v7107_v32  ;;  %v3548_v8 = vpop.f32.mrb[61].mxu1 }
0x40c6   :  { %7108 = vrcp.f32 %v3236_v37  ;;  %v3550_v60 = vpop.f32.mrb[62].mxu1 }
0x40c7   :  { %7110 = vrcp.f32 %v3260_v47  ;;  %v3551_v20 = vpop.f32.mrb[63].mxu1 }
0x40d0   :  { %v7109_v35 = vpop.eup %7108 }
0x40d1   :  { %v7111_v3 = vpop.eup %7110  ;;  %v3240_v17 = vmul.f32 %v7109_v35, %v3142_v59 }
0x40d2   :  { %v3264_v61 = vmul.f32 %v7111_v3, %v3166_v54 }
0x4134   :  { %v3243_v34 = vpop.permute.xlu1 %3242 }
0x4135   :  { %v3245_v41 = vmul.f32 %v7109_v35, %v3243_v34  ;;  %v3267_v39 = vpop.permute.xlu0 %3266 }
0x4136   :  { %v3269_v48 = vmul.f32 %v7111_v3, %v3267_v39 }
0x4137   :  { %3247 = vrot.lane.b32.xlu1 %v3245_v41, %s7247_s0 }
0x4138   :  { %3271 = vrot.lane.b32.xlu0 %v3269_v48, %s7247_s0 }
0x41a9   :  { %v3248_v40 = vpop.permute.xlu1 %3247 }
0x41aa   :  { %v3250_v15 = vadd.f32 %v3248_v40, %v3240_v17  ;;  %v3272_v23 = vpop.permute.xlu0 %3271 }
0x41ab   :  { %v3274_v50 = vadd.f32 %v3272_v23, %v3264_v61 }
0x41ac   :  { %7112 = vtanh.f32 %v3250_v15 }
0x41ad   :  { %7114 = vtanh.f32 %v3274_v50 }
0x41b6   :  { %v7113_v36 = vpop.eup %7112 }
0x41b7   :  { %v7115_v52 = vpop.eup %7114  ;;  %3253 = vrot.lane.b32.xlu1 %v7113_v36, %s7246_s24 }
0x41b8   :  { %3277 = vrot.lane.b32.xlu0 %v7115_v52, %s7246_s24 }
0x4229   :  { %v3254_v56 = vpop.permute.xlu1 %3253 }
0x422a   :  { %v3256_v59 = vmul.f32 %v7109_v35, %v3254_v56  ;;  %v3278_v10 = vpop.permute.xlu0 %3277 }
0x422b   :  { %v3280_v54 = vmul.f32 %v7111_v3, %v3278_v10 }
0x422c   :  { %3282 = vrot.lane.b32.xlu1 %v3256_v59, %s7247_s0 }
0x422d   :  { %3287 = vrot.lane.b32.xlu0 %v3280_v54, %s7246_s24 }
0x429e   :  { %v3283_v19 = vpop.permute.xlu1 %3282 }
0x429f   :  { %3285 = vst.msk [vmem:[#allocation2 + $0x38] sm:$0xff] %vm116_vm0, %v3283_v19  ;;  %v3288_v33 = vpop.permute.xlu0 %3287 }
0x42a0   :  { %3290 = vst.msk [vmem:[#allocation2] sm:$0xff] %vm373_vm1, %v3288_v33 }
0x42a6   :  { %v3298_v11 = vld [vmem:[#allocation2 + $0x38] sm:$0xff] }
0x42a7   :  { %v3291_v31 = vld [vmem:[#allocation2] sm:$0xff]  ;;  %v3302_v57 = vpack.c.bf16 %v3298_v11, %v3297_v21 }
0x42a8   :  { %v3299_v44 = vpack.c.bf16 %v3292_v55, %v3291_v31 }
0x42aa   :  { %6353 = vmatmul.mubr.msk.bf16.vlgmr.msra.gmra.mrb[84].mxu0 %vm267_vm2, %v3299_v44 }
0x42ab   :  { %3417 = vmatprep.mubr.bf16.mxu0 %v7244_v1  ;;  %3729 = vmatpush1.bf16.msra.mxu0 %v8248_v5 }
0x42ac   :  { %3730 = vmatprep.subr.bf16.mxu0 %v8263_v51 }
0x42af   :  { %3731 = vmatpush1.bf16.msra.mxu0 %v8268_v42 }
0x42b0   :  { %3732 = vmatprep.subr.bf16.mxu0 %v8280_v43 }
0x42b2   :  { %6354 = vmatmul.mubr.msk.bf16.gmra.mrb[88].mxu0 %vm267_vm2, %v3300_v6 }
0x42b3   :  { %3427 = vmatprep.mubr.bf16.mxu0 %v7244_v1  ;;  %3733 = vmatpush1.bf16.msra.mxu0 %v8286_v58 }
0x42b4   :  { %3734 = vmatprep.subr.bf16.mxu0 %v8295_v53 }
0x42b7   :  { %3735 = vmatpush1.bf16.msra.mxu0 %v8304_v7 }
0x42b8   :  { %3944 = vmatprep.subr.bf16.mxu0 %v8243_v29 }
0x42ba   :  { %6355 = vmatmul.mubr.msk.bf16.gmra.mrb[92].mxu0 %vm267_vm2, %v3301_v12 }
0x42bb   :  { %3437 = vmatprep.mubr.bf16.mxu0 %v7244_v1 }
0x42c2   :  { %6356 = vmatmul.mubr.msk.bf16.gmra.mrb[96].mxu0 %vm267_vm2, %v3302_v57 }
0x42c3   :  { %3760 = vmatprep.mubr.bf16.mxu0 %v7244_v1 }
0x437d   :  { %v3409_v22 = vpop.f32.mrb[84].mxu0 }
0x437e   :  { %v3410_v32 = vadd.f32 %v3409_v22, %v3316_v14  ;;  %v3411_v37 = vpop.f32.mrb[85].mxu0 }
0x437f   :  { %v8345_v47 = vadd.f32 %v3411_v37, %v3320_v18  ;;  %v3413_v35 = vpop.f32.mrb[86].mxu0 }
0x4380   :  { %v8347_v34 = vadd.f32 %v3413_v35, %v3316_v14  ;;  %v3554_v3 = vadd.f32 %v3546_v4, %v3410_v32  ;;  %v3415_v41 = vpop.f32.mrb[87].mxu0 }
0x4381   :  { %v8349_v39 = vadd.f32 %v3415_v41, %v3320_v18 }
0x4382   :  { %7116 = vtanh.f32 %v3554_v3  ;;  %v6365_v44 = vmul.f32 -1.442695, %v3554_v3 }
0x4385   :  { %v3419_v48 = vpop.f32.mrb[88].mxu0 }
0x4386   :  { %v8351_v17 = vadd.f32 %v3419_v48, %v3316_v14  ;;  %v3421_v40 = vpop.f32.mrb[89].mxu0 }
0x4387   :  { %v8353_v30 = vadd.f32 %v3421_v40, %v3320_v18  ;;  %v3423_v28 = vpop.f32.mrb[90].mxu0 }
0x4388   :  { %v8355_v61 = vadd.f32 %v3423_v28, %v3316_v14  ;;  %v3425_v15 = vpop.f32.mrb[91].mxu0 }
0x4389   :  { %v8357_v23 = vadd.f32 %v3425_v15, %v3320_v18 }
0x438c   :  { %v7117_v50 = vpop.eup %7116 }
0x438d   :  { %v3429_v24 = vpop.f32.mrb[92].mxu0  ;;  %3566 = vrot.lane.b32.xlu0 %v7117_v50, %s7246_s24 }
0x438e   :  { %v8360_v62 = vadd.f32 %v3429_v24, %v3316_v14  ;;  %v3431_v38 = vpop.f32.mrb[93].mxu0 }
0x438f   :  { %v8362_v2 = vadd.f32 %v3431_v38, %v3320_v18  ;;  %v3433_v36 = vpop.f32.mrb[94].mxu0 }
0x4390   :  { %v8364_v52 = vadd.f32 %v3433_v36, %v3316_v14  ;;  %v3435_v25 = vpop.f32.mrb[95].mxu0 }
0x4391   :  { %v8366_v9 = vadd.f32 %v3435_v25, %v3320_v18 }
0x4395   :  { %v3439_v0 = vpop.f32.mrb[96].mxu0 }
0x4396   :  { %v8368_v63 = vadd.f32 %v3439_v0, %v3316_v14  ;;  %v3441_v56 = vpop.f32.mrb[97].mxu0 }
0x4397   :  { %v8370_v59 = vadd.f32 %v3441_v56, %v3320_v18  ;;  %v3443_v10 = vpop.f32.mrb[98].mxu0 }
0x4398   :  { %v8372_v54 = vadd.f32 %v3443_v10, %v3316_v14  ;;  %v3445_v19 = vpop.f32.mrb[99].mxu0 }
0x4399   :  { %v3446_v33 = vadd.f32 %v3445_v19, %v3320_v18 }
0x439b   :  { %v3556_v31 = vadd.f32 %v3548_v8, %v3446_v33 }
0x439d   :  { %7118 = vtanh.f32 %v3556_v31  ;;  %v6366_v6 = vmul.f32 -1.442695, %v3556_v31 }
0x439e   :  { %7120 = vpow2.f32 %v6365_v44 }
0x43a7   :  { %v7119_v55 = vpop.eup %7118 }
0x43a8   :  { %3590 = vrot.lane.b32.xlu1 %v7119_v55, %s7246_s24  ;;  %v7121_v46 = vpop.eup %7120 }
0x43a9   :  { %v3560_v49 = vadd.f32 1.0, %v7121_v46 }
0x43ab   :  { %7122 = vrcp.f32 %v3560_v49 }
0x43ac   :  { %7124 = vpow2.f32 %v6366_v6 }
0x43b5   :  { %v7123_v45 = vpop.eup %7122 }
0x43b6   :  { %v7125_v11 = vpop.eup %7124  ;;  %v3564_v60 = vmul.f32 0.0, %v7123_v45 }
0x43b7   :  { %v3584_v21 = vadd.f32 1.0, %v7125_v11 }
0x43b9   :  { %7126 = vrcp.f32 %v3584_v21 }
0x43c3   :  { %v7127_v57 = vpop.eup %7126 }
0x43c4   :  { %v3588_v18 = vmul.f32 0.0, %v7127_v57 }
0x43ff   :  { %v3567_v16 = vpop.permute.xlu0 %3566 }
0x4400   :  { %v3569_v12 = vmul.f32 %v7123_v45, %v3567_v16 }
0x4402   :  { %3571 = vrot.lane.b32.xlu0 %v3569_v12, %s7247_s0 }
0x441a   :  { %v3591_v4 = vpop.permute.xlu1 %3590 }
0x441b   :  { %v3593_v8 = vmul.f32 %v7127_v57, %v3591_v4 }
0x441d   :  { %3595 = vrot.lane.b32.xlu1 %v3593_v8, %s7247_s0 }
0x4474   :  { %v3572_v20 = vpop.permute.xlu0 %3571 }
0x4475   :  { %v3574_v13 = vadd.f32 %v3572_v20, %v3564_v60 }
0x4477   :  { %7128 = vtanh.f32 %v3574_v13 }
0x4481   :  { %v7129_v14 = vpop.eup %7128 }
0x4482   :  { %3577 = vrot.lane.b32.xlu0 %v7129_v14, %s7246_s24 }
0x448f   :  { %v3596_v22 = vpop.permute.xlu1 %3595 }
0x4490   :  { %v3598_v32 = vadd.f32 %v3596_v22, %v3588_v18 }
0x4492   :  { %7130 = vtanh.f32 %v3598_v32 }
0x449c   :  { %v7131_v37 = vpop.eup %7130 }
0x449d   :  { %3601 = vrot.lane.b32.xlu1 %v7131_v37, %s7246_s24 }
0x44f4   :  { %v3578_v35 = vpop.permute.xlu0 %3577 }
0x44f5   :  { %v3580_v3 = vmul.f32 %v7123_v45, %v3578_v35 }
0x44f7   :  { %3606 = vrot.lane.b32.xlu0 %v3580_v3, %s7247_s0 }
0x450f   :  { %v3602_v41 = vpop.permute.xlu1 %3601 }
0x4510   :  { %v3604_v48 = vmul.f32 %v7127_v57, %v3602_v41 }
0x4512   :  { %3611 = vrot.lane.b32.xlu1 %v3604_v48, %s7246_s24 }
0x4569   :  { %v3607_v40 = vpop.permute.xlu0 %3606 }
0x456a   :  { %3609 = vst.msk [vmem:[#allocation3] sm:$0xff] %vm116_vm0, %v3607_v40 }
0x4584   :  { %v3612_v28 = vpop.permute.xlu1 %3611 }
0x4585   :  { %3614 = vst.msk [vmem:[#allocation3 + $0x38] sm:$0xff] %vm373_vm1, %v3612_v28  ;;  %v3615_v15 = vsel %vm116_vm0, %v3607_v40, %v3612_v28 }
0x4586   :  { %v3616_v50 = vpack.c.bf16 %v3615_v15, %v3615_v15 }
0x4588   :  { %6367 = vmatmul.mubr.msk.bf16.vlgmr.msra.gmra.mrb[64].mxu1 %vm267_vm2, %v3616_v50 }
0x4589   :  { %3837 = vmatpush1.bf16.msra.mxu1 %v8248_v5  ;;  %3868 = vmatprep.mubr.bf16.mxu1 %v7244_v1 }
0x458a   :  { %3838 = vmatprep.subr.bf16.mxu1 %v8263_v51 }
0x458d   :  { %3839 = vmatpush1.bf16.msra.mxu1 %v8268_v42 }
0x458e   :  { %3840 = vmatprep.subr.bf16.mxu1 %v8280_v43 }
0x4591   :  { %3841 = vmatpush1.bf16.msra.mxu1 %v8286_v58 }
0x4592   :  { %3842 = vmatprep.subr.bf16.mxu1 %v8295_v53 }
0x4595   :  { %3843 = vmatpush1.bf16.msra.mxu1 %v8304_v7 }
0x4596   :  { %4052 = vmatprep.subr.bf16.mxu1 %v8243_v29 }
0x465b   :  { %v3654_v24 = vpop.f32.mrb[64].mxu1 }
0x465c   :  { %v3662_v38 = vadd.f32 %v3654_v24, %v8347_v34  ;;  %v3656_v36 = vpop.f32.mrb[65].mxu1 }
0x465d   :  { %v3664_v25 = vadd.f32 %v3656_v36, %v8370_v59  ;;  %v3658_v0 = vpop.f32.mrb[66].mxu1 }
0x465e   :  { %7132 = vtanh.f32 %v3662_v38  ;;  %v3659_v56 = vpop.f32.mrb[67].mxu1  ;;  %v6368_v33 = vmul.f32 -1.442695, %v3662_v38 }
0x465f   :  { %7134 = vtanh.f32 %v3664_v25  ;;  %v6369_v31 = vmul.f32 -1.442695, %v3664_v25 }
0x4660   :  { %7136 = vpow2.f32 %v6368_v33 }
0x4661   :  { %7138 = vpow2.f32 %v6369_v31 }
0x4668   :  { %v7133_v10 = vpop.eup %7132 }
0x4669   :  { %v7135_v19 = vpop.eup %7134  ;;  %3674 = vrot.lane.b32.xlu0 %v7133_v10, %s7246_s24 }
0x466a   :  { %3698 = vrot.lane.b32.xlu1 %v7135_v19, %s7246_s24  ;;  %v7137_v55 = vpop.eup %7136 }
0x466b   :  { %v7139_v44 = vpop.eup %7138  ;;  %v3668_v34 = vadd.f32 1.0, %v7137_v55 }
0x466c   :  { %v3692_v46 = vadd.f32 1.0, %v7139_v44 }
0x466d   :  { %7140 = vrcp.f32 %v3668_v34 }
0x466e   :  { %7142 = vrcp.f32 %v3692_v46 }
0x4677   :  { %v7141_v59 = vpop.eup %7140 }
0x4678   :  { %v7143_v6 = vpop.eup %7142  ;;  %v3672_v11 = vmul.f32 %v7141_v59, %v3574_v13 }
0x4679   :  { %v3696_v57 = vmul.f32 %v7143_v6, %v3598_v32 }
0x46db   :  { %v3675_v49 = vpop.permute.xlu0 %3674 }
0x46dc   :  { %v3677_v45 = vmul.f32 %v7141_v59, %v3675_v49  ;;  %v3699_v16 = vpop.permute.xlu1 %3698 }
0x46dd   :  { %v3701_v12 = vmul.f32 %v7143_v6, %v3699_v16 }
0x46de   :  { %3679 = vrot.lane.b32.xlu0 %v3677_v45, %s7247_s0 }
0x46df   :  { %3703 = vrot.lane.b32.xlu1 %v3701_v12, %s7247_s0 }
0x4750   :  { %v3680_v21 = vpop.permute.xlu0 %3679 }
0x4751   :  { %v3682_v4 = vadd.f32 %v3680_v21, %v3672_v11  ;;  %v3704_v8 = vpop.permute.xlu1 %3703 }
0x4752   :  { %v3706_v60 = vadd.f32 %v3704_v8, %v3696_v57 }
0x4753   :  { %7144 = vtanh.f32 %v3682_v4 }
0x4754   :  { %7146 = vtanh.f32 %v3706_v60 }
0x475d   :  { %v7145_v20 = vpop.eup %7144 }
0x475e   :  { %v7147_v14 = vpop.eup %7146  ;;  %3685 = vrot.lane.b32.xlu0 %v7145_v20, %s7246_s24 }
0x475f   :  { %3709 = vrot.lane.b32.xlu1 %v7147_v14, %s7246_s24 }
0x47d0   :  { %v3686_v18 = vpop.permute.xlu0 %3685 }
0x47d1   :  { %v3688_v22 = vmul.f32 %v7141_v59, %v3686_v18  ;;  %v3710_v37 = vpop.permute.xlu1 %3709 }
0x47d2   :  { %v3712_v35 = vmul.f32 %v7143_v6, %v3710_v37 }
0x47d3   :  { %3714 = vrot.lane.b32.xlu0 %v3688_v22, %s7247_s0 }
0x47d4   :  { %3719 = vrot.lane.b32.xlu1 %v3712_v35, %s7246_s24 }
0x4845   :  { %v3715_v13 = vpop.permute.xlu0 %3714 }
0x4846   :  { %3717 = vst.msk [vmem:[#allocation3 + $0x8] sm:$0xff] %vm116_vm0, %v3715_v13  ;;  %v3720_v32 = vpop.permute.xlu1 %3719 }
0x4847   :  { %3722 = vst.msk [vmem:[#allocation3 + $0x30] sm:$0xff] %vm373_vm1, %v3720_v32  ;;  %v3723_v3 = vsel %vm116_vm0, %v3715_v13, %v3720_v32 }
0x4848   :  { %v3724_v41 = vpack.c.bf16 %v3723_v3, %v3723_v3 }
0x484a   :  { %6370 = vmatmul.mubr.msk.bf16.vlgmr.msra.gmra.mrb[100].mxu0 %vm267_vm2, %v3724_v41 }
0x484b   :  { %3945 = vmatpush1.bf16.msra.mxu0 %v8248_v5  ;;  %3976 = vmatprep.mubr.bf16.mxu0 %v7244_v1 }
0x484c   :  { %3946 = vmatprep.subr.bf16.mxu0 %v8263_v51 }
0x484f   :  { %3947 = vmatpush1.bf16.msra.mxu0 %v8268_v42 }
0x4850   :  { %3948 = vmatprep.subr.bf16.mxu0 %v8280_v43 }
0x4853   :  { %3949 = vmatpush1.bf16.msra.mxu0 %v8286_v58 }
0x4854   :  { %3950 = vmatprep.subr.bf16.mxu0 %v8295_v53 }
0x4857   :  { %3951 = vmatpush1.bf16.msra.mxu0 %v8304_v7 }
0x4858   :  { %4160 = vmatprep.subr.bf16.mxu0 %v8243_v29 }
0x491d   :  { %v3762_v48 = vpop.f32.mrb[100].mxu0 }
0x491e   :  { %v3770_v40 = vadd.f32 %v3762_v48, %v8351_v17  ;;  %v3764_v28 = vpop.f32.mrb[101].mxu0 }
0x491f   :  { %v3772_v15 = vadd.f32 %v3764_v28, %v8366_v9  ;;  %v3766_v50 = vpop.f32.mrb[102].mxu0 }
0x4920   :  { %7148 = vtanh.f32 %v3770_v40  ;;  %v3767_v24 = vpop.f32.mrb[103].mxu0  ;;  %v6371_v25 = vmul.f32 -1.442695, %v3770_v40 }
0x4921   :  { %7150 = vtanh.f32 %v3772_v15  ;;  %v6372_v0 = vmul.f32 -1.442695, %v3772_v15 }
0x4922   :  { %7152 = vpow2.f32 %v6371_v25 }
0x4923   :  { %7154 = vpow2.f32 %v6372_v0 }
0x492a   :  { %v7149_v38 = vpop.eup %7148 }
0x492b   :  { %v7151_v36 = vpop.eup %7150  ;;  %3782 = vrot.lane.b32.xlu0 %v7149_v38, %s7246_s24 }
0x492c   :  { %3806 = vrot.lane.b32.xlu1 %v7151_v36, %s7246_s24  ;;  %v7153_v56 = vpop.eup %7152 }
0x492d   :  { %v7155_v10 = vpop.eup %7154  ;;  %v3776_v17 = vadd.f32 1.0, %v7153_v56 }
0x492e   :  { %v3800_v19 = vadd.f32 1.0, %v7155_v10 }
0x492f   :  { %7156 = vrcp.f32 %v3776_v17 }
0x4930   :  { %7158 = vrcp.f32 %v3800_v19 }
0x4939   :  { %v7157_v9 = vpop.eup %7156 }
0x493a   :  { %v7159_v31 = vpop.eup %7158  ;;  %v3780_v46 = vmul.f32 %v7157_v9, %v3682_v4 }
0x493b   :  { %v3804_v49 = vmul.f32 %v7159_v31, %v3706_v60 }
0x499d   :  { %v3783_v33 = vpop.permute.xlu0 %3782 }
0x499e   :  { %v3785_v55 = vmul.f32 %v7157_v9, %v3783_v33  ;;  %v3807_v44 = vpop.permute.xlu1 %3806 }
0x499f   :  { %v3809_v34 = vmul.f32 %v7159_v31, %v3807_v44 }
0x49a0   :  { %3787 = vrot.lane.b32.xlu0 %v3785_v55, %s7247_s0 }
0x49a1   :  { %3811 = vrot.lane.b32.xlu1 %v3809_v34, %s7247_s0 }
0x4a12   :  { %v3788_v59 = vpop.permute.xlu0 %3787 }
0x4a13   :  { %v3790_v6 = vadd.f32 %v3788_v59, %v3780_v46  ;;  %v3812_v45 = vpop.permute.xlu1 %3811 }
0x4a14   :  { %v3814_v16 = vadd.f32 %v3812_v45, %v3804_v49 }
0x4a15   :  { %7160 = vtanh.f32 %v3790_v6 }
0x4a16   :  { %7162 = vtanh.f32 %v3814_v16 }
0x4a1f   :  { %v7161_v12 = vpop.eup %7160 }
0x4a20   :  { %v7163_v11 = vpop.eup %7162  ;;  %3793 = vrot.lane.b32.xlu0 %v7161_v12, %s7246_s24 }
0x4a21   :  { %3817 = vrot.lane.b32.xlu1 %v7163_v11, %s7246_s24 }
0x4a92   :  { %v3794_v21 = vpop.permute.xlu0 %3793 }
0x4a93   :  { %v3796_v57 = vmul.f32 %v7157_v9, %v3794_v21  ;;  %v3818_v8 = vpop.permute.xlu1 %3817 }
0x4a94   :  { %v3820_v20 = vmul.f32 %v7159_v31, %v3818_v8 }
0x4a95   :  { %3822 = vrot.lane.b32.xlu0 %v3796_v57, %s7247_s0 }
0x4a96   :  { %3827 = vrot.lane.b32.xlu1 %v3820_v20, %s7246_s24 }
0x4b07   :  { %v3823_v4 = vpop.permute.xlu0 %3822 }
0x4b08   :  { %3825 = vst.msk [vmem:[#allocation3 + $0x10] sm:$0xff] %vm116_vm0, %v3823_v4  ;;  %v3828_v60 = vpop.permute.xlu1 %3827 }
0x4b09   :  { %3830 = vst.msk [vmem:[#allocation3 + $0x28] sm:$0xff] %vm373_vm1, %v3828_v60  ;;  %v3831_v14 = vsel %vm116_vm0, %v3823_v4, %v3828_v60 }
0x4b0a   :  { %v3832_v18 = vpack.c.bf16 %v3831_v14, %v3831_v14 }
0x4b0c   :  { %6373 = vmatmul.mubr.msk.bf16.vlgmr.msra.gmra.mrb[68].mxu1 %vm267_vm2, %v3832_v18 }
0x4b0d   :  { %4053 = vmatpush1.bf16.msra.mxu1 %v8248_v5  ;;  %4084 = vmatprep.mubr.bf16.mxu1 %v7244_v1 }
0x4b0e   :  { %4054 = vmatprep.subr.bf16.mxu1 %v8263_v51 }
0x4b11   :  { %4055 = vmatpush1.bf16.msra.mxu1 %v8268_v42 }
0x4b12   :  { %4056 = vmatprep.subr.bf16.mxu1 %v8280_v43 }
0x4b15   :  { %4057 = vmatpush1.bf16.msra.mxu1 %v8286_v58 }
0x4b16   :  { %4058 = vmatprep.subr.bf16.mxu1 %v8295_v53 }
0x4b19   :  { %4059 = vmatpush1.bf16.msra.mxu1 %v8304_v7 }
0x4b1a   :  { %4268 = vmatprep.subr.bf16.mxu1 %v8243_v29 }
0x4bdf   :  { %v3870_v22 = vpop.f32.mrb[68].mxu1 }
0x4be0   :  { %v3878_v37 = vadd.f32 %v3870_v22, %v8355_v61  ;;  %v3872_v35 = vpop.f32.mrb[69].mxu1 }
0x4be1   :  { %v3880_v13 = vadd.f32 %v3872_v35, %v8362_v2  ;;  %v3874_v32 = vpop.f32.mrb[70].mxu1 }
0x4be2   :  { %7164 = vtanh.f32 %v3878_v37  ;;  %v3875_v3 = vpop.f32.mrb[71].mxu1  ;;  %v6374_v40 = vmul.f32 -1.442695, %v3878_v37 }
0x4be3   :  { %7166 = vtanh.f32 %v3880_v13  ;;  %v6375_v28 = vmul.f32 -1.442695, %v3880_v13 }
0x4be4   :  { %7168 = vpow2.f32 %v6374_v40 }
0x4be5   :  { %7170 = vpow2.f32 %v6375_v28 }
0x4bec   :  { %v7165_v41 = vpop.eup %7164 }
0x4bed   :  { %v7167_v48 = vpop.eup %7166  ;;  %3890 = vrot.lane.b32.xlu0 %v7165_v41, %s7246_s24 }
0x4bee   :  { %3914 = vrot.lane.b32.xlu1 %v7167_v48, %s7246_s24  ;;  %v7169_v29 = vpop.eup %7168 }
0x4bef   :  { %v7171_v15 = vpop.eup %7170  ;;  %v3884_v61 = vadd.f32 1.0, %v7169_v29 }
0x4bf0   :  { %v3908_v50 = vadd.f32 1.0, %v7171_v15 }
0x4bf1   :  { %7172 = vrcp.f32 %v3884_v61 }
0x4bf2   :  { %7174 = vrcp.f32 %v3908_v50 }
0x4bfb   :  { %v7173_v2 = vpop.eup %7172 }
0x4bfc   :  { %v7175_v38 = vpop.eup %7174  ;;  %v3888_v56 = vmul.f32 %v7173_v2, %v3790_v6 }
0x4bfd   :  { %v3912_v17 = vmul.f32 %v7175_v38, %v3814_v16 }
0x4c5f   :  { %v3891_v24 = vpop.permute.xlu0 %3890 }
0x4c60   :  { %v3893_v36 = vmul.f32 %v7173_v2, %v3891_v24  ;;  %v3915_v25 = vpop.permute.xlu1 %3914 }
0x4c61   :  { %v3917_v0 = vmul.f32 %v7175_v38, %v3915_v25 }
0x4c62   :  { %3895 = vrot.lane.b32.xlu0 %v3893_v36, %s7247_s0 }
0x4c63   :  { %3919 = vrot.lane.b32.xlu1 %v3917_v0, %s7247_s0 }
0x4cd4   :  { %v3896_v10 = vpop.permute.xlu0 %3895 }
0x4cd5   :  { %v3898_v19 = vadd.f32 %v3896_v10, %v3888_v56  ;;  %v3920_v9 = vpop.permute.xlu1 %3919 }
0x4cd6   :  { %v3922_v33 = vadd.f32 %v3920_v9, %v3912_v17 }
0x4cd7   :  { %7176 = vtanh.f32 %v3898_v19 }
0x4cd8   :  { %7178 = vtanh.f32 %v3922_v33 }
0x4ce1   :  { %v7177_v31 = vpop.eup %7176 }
0x4ce2   :  { %v7179_v55 = vpop.eup %7178  ;;  %3901 = vrot.lane.b32.xlu0 %v7177_v31, %s7246_s24 }
0x4ce3   :  { %3925 = vrot.lane.b32.xlu1 %v7179_v55, %s7246_s24 }
0x4d54   :  { %v3902_v44 = vpop.permute.xlu0 %3901 }
0x4d55   :  { %v3904_v34 = vmul.f32 %v7173_v2, %v3902_v44  ;;  %v3926_v46 = vpop.permute.xlu1 %3925 }
0x4d56   :  { %v3928_v59 = vmul.f32 %v7175_v38, %v3926_v46 }
0x4d57   :  { %3930 = vrot.lane.b32.xlu0 %v3904_v34, %s7247_s0 }
0x4d58   :  { %3935 = vrot.lane.b32.xlu1 %v3928_v59, %s7246_s24 }
0x4dc9   :  { %v3931_v49 = vpop.permute.xlu0 %3930 }
0x4dca   :  { %3933 = vst.msk [vmem:[#allocation3 + $0x18] sm:$0xff] %vm116_vm0, %v3931_v49  ;;  %v3936_v6 = vpop.permute.xlu1 %3935 }
0x4dcb   :  { %3938 = vst.msk [vmem:[#allocation3 + $0x20] sm:$0xff] %vm373_vm1, %v3936_v6  ;;  %v3939_v45 = vsel %vm116_vm0, %v3931_v49, %v3936_v6 }
0x4dcc   :  { %v3940_v16 = vpack.c.bf16 %v3939_v45, %v3939_v45 }
0x4dce   :  { %6376 = vmatmul.mubr.msk.bf16.vlgmr.msra.gmra.mrb[104].mxu0 %vm267_vm2, %v3940_v16 }
0x4dcf   :  { %4161 = vmatpush1.bf16.msra.mxu0 %v8248_v5  ;;  %4192 = vmatprep.mubr.bf16.mxu0 %v7244_v1 }
0x4dd0   :  { %4162 = vmatprep.subr.bf16.mxu0 %v8263_v51 }
0x4dd3   :  { %4163 = vmatpush1.bf16.msra.mxu0 %v8268_v42 }
0x4dd4   :  { %4164 = vmatprep.subr.bf16.mxu0 %v8280_v43 }
0x4dd7   :  { %4165 = vmatpush1.bf16.msra.mxu0 %v8286_v58 }
0x4dd8   :  { %4166 = vmatprep.subr.bf16.mxu0 %v8295_v53 }
0x4ddb   :  { %4167 = vmatpush1.bf16.msra.mxu0 %v8304_v7 }
0x4ea1   :  { %v3978_v12 = vpop.f32.mrb[104].mxu0 }
0x4ea2   :  { %v3986_v11 = vadd.f32 %v3978_v12, %v8360_v62  ;;  %v3980_v21 = vpop.f32.mrb[105].mxu0 }
0x4ea3   :  { %v3988_v57 = vadd.f32 %v3980_v21, %v8357_v23  ;;  %v3982_v8 = vpop.f32.mrb[106].mxu0 }
0x4ea4   :  { %7180 = vtanh.f32 %v3986_v11  ;;  %v3983_v20 = vpop.f32.mrb[107].mxu0  ;;  %v6377_v14 = vmul.f32 -1.442695, %v3986_v11 }
0x4ea5   :  { %7182 = vtanh.f32 %v3988_v57  ;;  %v6378_v18 = vmul.f32 -1.442695, %v3988_v57 }
0x4ea6   :  { %7184 = vpow2.f32 %v6377_v14 }
0x4ea7   :  { %7186 = vpow2.f32 %v6378_v18 }
0x4eae   :  { %v7181_v4 = vpop.eup %7180 }
0x4eaf   :  { %v7183_v60 = vpop.eup %7182  ;;  %3998 = vrot.lane.b32.xlu0 %v7181_v4, %s7246_s24 }
0x4eb0   :  { %4022 = vrot.lane.b32.xlu1 %v7183_v60, %s7246_s24  ;;  %v7185_v22 = vpop.eup %7184 }
0x4eb1   :  { %v7187_v37 = vpop.eup %7186  ;;  %v3992_v62 = vadd.f32 1.0, %v7185_v22 }
0x4eb2   :  { %v4016_v35 = vadd.f32 1.0, %v7187_v37 }
0x4eb3   :  { %7188 = vrcp.f32 %v3992_v62 }
0x4eb4   :  { %7190 = vrcp.f32 %v4016_v35 }
0x4ebd   :  { %v7189_v23 = vpop.eup %7188 }
0x4ebe   :  { %v7191_v32 = vpop.eup %7190  ;;  %v3996_v40 = vmul.f32 %v7189_v23, %v3898_v19 }
0x4ebf   :  { %v4020_v29 = vmul.f32 %v7191_v32, %v3922_v33 }
0x4f21   :  { %v3999_v13 = vpop.permute.xlu0 %3998 }
0x4f22   :  { %v4001_v3 = vmul.f32 %v7189_v23, %v3999_v13  ;;  %v4023_v41 = vpop.permute.xlu1 %4022 }
0x4f23   :  { %v4025_v48 = vmul.f32 %v7191_v32, %v4023_v41 }
0x4f24   :  { %4003 = vrot.lane.b32.xlu0 %v4001_v3, %s7247_s0 }
0x4f25   :  { %4027 = vrot.lane.b32.xlu1 %v4025_v48, %s7247_s0 }
0x4f96   :  { %v4004_v28 = vpop.permute.xlu0 %4003 }
0x4f97   :  { %v4006_v15 = vadd.f32 %v4004_v28, %v3996_v40  ;;  %v4028_v61 = vpop.permute.xlu1 %4027 }
0x4f98   :  { %v4030_v50 = vadd.f32 %v4028_v61, %v4020_v29 }
0x4f99   :  { %7192 = vtanh.f32 %v4006_v15 }
0x4f9a   :  { %7194 = vtanh.f32 %v4030_v50 }
0x4fa3   :  { %v7193_v2 = vpop.eup %7192 }
0x4fa4   :  { %v7195_v24 = vpop.eup %7194  ;;  %4009 = vrot.lane.b32.xlu0 %v7193_v2, %s7246_s24 }
0x4fa5   :  { %4033 = vrot.lane.b32.xlu1 %v7195_v24, %s7246_s24 }
0x5016   :  { %v4010_v38 = vpop.permute.xlu0 %4009 }
0x5017   :  { %v4012_v36 = vmul.f32 %v7189_v23, %v4010_v38  ;;  %v4034_v25 = vpop.permute.xlu1 %4033 }
0x5018   :  { %v4036_v0 = vmul.f32 %v7191_v32, %v4034_v25 }
0x5019   :  { %4038 = vrot.lane.b32.xlu0 %v4012_v36, %s7247_s0 }
0x501a   :  { %4043 = vrot.lane.b32.xlu1 %v4036_v0, %s7246_s24 }
0x508b   :  { %v4039_v56 = vpop.permute.xlu0 %4038 }
0x508c   :  { %4041 = vst.msk [vmem:[#allocation3 + $0x20] sm:$0xff] %vm116_vm0, %v4039_v56  ;;  %v4044_v10 = vpop.permute.xlu1 %4043 }
0x508d   :  { %4046 = vst.msk [vmem:[#allocation3 + $0x18] sm:$0xff] %vm373_vm1, %v4044_v10  ;;  %v4047_v17 = vsel %vm116_vm0, %v4039_v56, %v4044_v10 }
0x508e   :  { %v4048_v19 = vpack.c.bf16 %v4047_v17, %v4047_v17 }
0x5090   :  { %6379 = vmatmul.mubr.msk.bf16.vlgmr.msra.gmra.mrb[72].mxu1 %vm267_vm2, %v4048_v19 }
0x5091   :  { %4269 = vmatpush1.bf16.msra.mxu1 %v8248_v5  ;;  %4300 = vmatprep.mubr.bf16.mxu1 %v7244_v1 }
0x5092   :  { %4270 = vmatprep.subr.bf16.mxu1 %v8263_v51 }
0x5095   :  { %4271 = vmatpush1.bf16.msra.mxu1 %v8268_v42 }
0x5096   :  { %4272 = vmatprep.subr.bf16.mxu1 %v8280_v43 }
0x5099   :  { %4273 = vmatpush1.bf16.msra.mxu1 %v8286_v58 }
0x509a   :  { %4274 = vmatprep.subr.bf16.mxu1 %v8295_v53 }
0x509d   :  { %4275 = vmatpush1.bf16.msra.mxu1 %v8304_v7 }
0x5163   :  { %v4086_v9 = vpop.f32.mrb[72].mxu1 }
0x5164   :  { %v4094_v33 = vadd.f32 %v4086_v9, %v8364_v52  ;;  %v4088_v31 = vpop.f32.mrb[73].mxu1 }
0x5165   :  { %v4096_v5 = vadd.f32 %v4088_v31, %v8353_v30  ;;  %v4090_v55 = vpop.f32.mrb[74].mxu1 }
0x5166   :  { %7196 = vtanh.f32 %v4094_v33  ;;  %v4091_v1 = vpop.f32.mrb[75].mxu1  ;;  %v6380_v43 = vmul.f32 -1.442695, %v4094_v33 }
0x5167   :  { %7198 = vtanh.f32 %v4096_v5  ;;  %v6381_v58 = vmul.f32 -1.442695, %v4096_v5 }
0x5168   :  { %7200 = vpow2.f32 %v6380_v43 }
0x5169   :  { %7202 = vpow2.f32 %v6381_v58 }
0x5170   :  { %v7197_v51 = vpop.eup %7196 }
0x5171   :  { %v7199_v42 = vpop.eup %7198  ;;  %4106 = vrot.lane.b32.xlu0 %v7197_v51, %s7246_s24 }
0x5172   :  { %4130 = vrot.lane.b32.xlu1 %v7199_v42, %s7246_s24  ;;  %v7201_v53 = vpop.eup %7200 }
0x5173   :  { %v7203_v7 = vpop.eup %7202  ;;  %v4100_v52 = vadd.f32 1.0, %v7201_v53 }
0x5174   :  { %v4124_v44 = vadd.f32 1.0, %v7203_v7 }
0x5175   :  { %7204 = vrcp.f32 %v4100_v52 }
0x5176   :  { %7206 = vrcp.f32 %v4124_v44 }
0x517f   :  { %v7205_v30 = vpop.eup %7204 }
0x5180   :  { %v7207_v46 = vpop.eup %7206  ;;  %v4104_v45 = vmul.f32 %v7205_v30, %v4006_v15 }
0x5181   :  { %v4128_v12 = vmul.f32 %v7207_v46, %v4030_v50 }
0x51e3   :  { %v4107_v34 = vpop.permute.xlu0 %4106 }
0x51e4   :  { %v4109_v59 = vmul.f32 %v7205_v30, %v4107_v34  ;;  %v4131_v49 = vpop.permute.xlu1 %4130 }
0x51e5   :  { %v4133_v6 = vmul.f32 %v7207_v46, %v4131_v49 }
0x51e6   :  { %4111 = vrot.lane.b32.xlu0 %v4109_v59, %s7247_s0 }
0x51e7   :  { %4135 = vrot.lane.b32.xlu1 %v4133_v6, %s7247_s0 }
0x5258   :  { %v4112_v16 = vpop.permute.xlu0 %4111 }
0x5259   :  { %v4114_v11 = vadd.f32 %v4112_v16, %v4104_v45  ;;  %v4136_v21 = vpop.permute.xlu1 %4135 }
0x525a   :  { %v4138_v57 = vadd.f32 %v4136_v21, %v4128_v12 }
0x525b   :  { %7208 = vtanh.f32 %v4114_v11 }
0x525c   :  { %7210 = vtanh.f32 %v4138_v57 }
0x5265   :  { %v7209_v8 = vpop.eup %7208 }
0x5266   :  { %v7211_v20 = vpop.eup %7210  ;;  %4117 = vrot.lane.b32.xlu0 %v7209_v8, %s7246_s24 }
0x5267   :  { %4141 = vrot.lane.b32.xlu1 %v7211_v20, %s7246_s24 }
0x52d8   :  { %v4118_v4 = vpop.permute.xlu0 %4117 }
0x52d9   :  { %v4120_v60 = vmul.f32 %v7205_v30, %v4118_v4  ;;  %v4142_v14 = vpop.permute.xlu1 %4141 }
0x52da   :  { %v4144_v18 = vmul.f32 %v7207_v46, %v4142_v14 }
0x52db   :  { %4146 = vrot.lane.b32.xlu0 %v4120_v60, %s7247_s0 }
0x52dc   :  { %4151 = vrot.lane.b32.xlu1 %v4144_v18, %s7246_s24 }
0x534d   :  { %v4147_v22 = vpop.permute.xlu0 %4146 }
0x534e   :  { %4149 = vst.msk [vmem:[#allocation3 + $0x28] sm:$0xff] %vm116_vm0, %v4147_v22  ;;  %v4152_v37 = vpop.permute.xlu1 %4151 }
0x534f   :  { %4154 = vst.msk [vmem:[#allocation3 + $0x10] sm:$0xff] %vm373_vm1, %v4152_v37  ;;  %v4155_v62 = vsel %vm116_vm0, %v4147_v22, %v4152_v37 }
0x5350   :  { %v4156_v35 = vpack.c.bf16 %v4155_v62, %v4155_v62 }
0x5352   :  { %6382 = vmatmul.mubr.msk.bf16.vlgmr.msra.gmra.mrb[108].mxu0 %vm267_vm2, %v4156_v35 }
0x5425   :  { %v4194_v23 = vpop.f32.mrb[108].mxu0 }
0x5426   :  { %v4202_v13 = vadd.f32 %v4194_v23, %v8368_v63  ;;  %v4196_v32 = vpop.f32.mrb[109].mxu0  ;;  %v6720_v23 = vld [vmem:[%s9527_s13] sm:$0xff]  }
0x5427   :  { %v4204_v3 = vadd.f32 %v4196_v32, %v8349_v39  ;;  %v4198_v41 = vpop.f32.mrb[110].mxu0  ;;  %6504 = vmatprep.subr.bf16.mxu0 %v6720_v23 }
0x5428   :  { %7212 = vtanh.f32 %v4202_v13  ;;  %v4199_v48 = vpop.f32.mrb[111].mxu0  ;;  %v6383_v29 = vmul.f32 -1.442695, %v4202_v13  ;;  %v6721_v13 = vld [vmem:[%s9528_s14] sm:$0xff]   ;;  %6505 = vmatpush3.bf16.msra.mxu0 %v6720_v23  ;;  %v6722_v41 = vld [vmem:[%s9527_s13 + $0x8] sm:$0xff]  }
0x5429   :  { %7214 = vtanh.f32 %v4204_v3  ;;  %v6384_v15 = vmul.f32 -1.442695, %v4204_v3  ;;  %6520 = vmatprep.subr.bf16.mxu1 %v6721_v13  ;;  %v6723_v48 = vld [vmem:[%s9528_s14 + $0x8] sm:$0xff]   ;;  %6506 = vmatprep.subr.bf16.mxu0 %v6722_v41 }
0x542a   :  { %7216 = vpow2.f32 %v6383_v29  ;;  %v6726_v29 = vld [vmem:[%s9527_s13 + $0x18] sm:$0xff]  }
0x542b   :  { %7218 = vpow2.f32 %v6384_v15  ;;  %v6727_v15 = vld [vmem:[%s9528_s14 + $0x18] sm:$0xff]  }
0x542c   :  { %6507 = vmatpush3.bf16.msra.mxu0 %v6722_v41 }
0x5432   :  { %v7213_v40 = vpop.eup %7212 }
0x5433   :  { %v7215_v28 = vpop.eup %7214  ;;  %4214 = vrot.lane.b32.xlu0 %v7213_v40, %s7246_s24  ;;  %v6724_v40 = vld [vmem:[%s9527_s13 + $0x10] sm:$0xff]  }
0x5434   :  { %4238 = vrot.lane.b32.xlu1 %v7215_v28, %s7246_s24  ;;  %v7217_v61 = vpop.eup %7216  ;;  %v6725_v28 = vld [vmem:[%s9528_s14 + $0x10] sm:$0xff]   ;;  %6508 = vmatprep.subr.bf16.mxu0 %v6724_v40 }
0x5435   :  { %v7219_v50 = vpop.eup %7218  ;;  %v4208_v63 = vadd.f32 1.0, %v7217_v61  ;;  %6509 = vmatpush3.bf16.msra.mxu0 %v6724_v40 }
0x5436   :  { %v4232_v2 = vadd.f32 1.0, %v7219_v50  ;;  %6510 = vmatprep.subr.bf16.mxu0 %v6726_v29 }
0x5437   :  { %7220 = vrcp.f32 %v4208_v63 }
0x5438   :  { %7222 = vrcp.f32 %v4232_v2 }
0x5439   :  { %6511 = vmatpush3.bf16.msra.mxu0 %v6726_v29 }
0x5441   :  { %v7221_v39 = vpop.eup %7220 }
0x5442   :  { %v7223_v38 = vpop.eup %7222  ;;  %v4212_v56 = vmul.f32 %v7221_v39, %v4114_v11 }
0x5443   :  { %v4236_v17 = vmul.f32 %v7223_v38, %v4138_v57 }
0x54a5   :  { %v4215_v24 = vpop.permute.xlu0 %4214 }
0x54a6   :  { %v4217_v36 = vmul.f32 %v7221_v39, %v4215_v24  ;;  %v4239_v25 = vpop.permute.xlu1 %4238 }
0x54a7   :  { %v4241_v0 = vmul.f32 %v7223_v38, %v4239_v25 }
0x54a8   :  { %4219 = vrot.lane.b32.xlu0 %v4217_v36, %s7247_s0 }
0x54a9   :  { %4243 = vrot.lane.b32.xlu1 %v4241_v0, %s7247_s0  ;;  %v4376_v0 = vld [vmem:[#allocation3 + $0x28] sm:$0xff] }
0x551a   :  { %v4220_v10 = vpop.permute.xlu0 %4219 }
0x551b   :  { %v4222_v19 = vadd.f32 %v4220_v10, %v4212_v56  ;;  %v4244_v9 = vpop.permute.xlu1 %4243  ;;  %v4374_v10 = vld [vmem:[#allocation3 + $0x18] sm:$0xff] }
0x551c   :  { %v4246_v33 = vadd.f32 %v4244_v9, %v4236_v17 }
0x551d   :  { %7224 = vtanh.f32 %v4222_v19 }
0x551e   :  { %7226 = vtanh.f32 %v4246_v33 }
0x5527   :  { %v7225_v31 = vpop.eup %7224 }
0x5528   :  { %v7227_v5 = vpop.eup %7226  ;;  %4225 = vrot.lane.b32.xlu0 %v7225_v31, %s7246_s24 }
0x5529   :  { %4249 = vrot.lane.b32.xlu1 %v7227_v5, %s7246_s24 }
0x559a   :  { %v4226_v55 = vpop.permute.xlu0 %4225 }
0x559b   :  { %v4228_v1 = vmul.f32 %v7221_v39, %v4226_v55  ;;  %v4250_v51 = vpop.permute.xlu1 %4249  ;;  %v6728_v55 = vld [vmem:[%s9529_s16] sm:$0xff]  }
0x559c   :  { %v4252_v42 = vmul.f32 %v7223_v38, %v4250_v51  ;;  %v4373_v38 = vld [vmem:[#allocation3 + $0x10] sm:$0xff]  ;;  %6536 = vmatprep.subr.bf16.mxu0 %v6728_v55 }
0x559d   :  { %4254 = vrot.lane.b32.xlu0 %v4228_v1, %s7247_s0  ;;  %v4380_v17 = vpack.c.bf16 %v4374_v10, %v4373_v38  ;;  %v6729_v1 = vld [vmem:[%s9529_s16 + $0x8] sm:$0xff]   ;;  %v6730_v51 = vld [vmem:[%s9529_s16 + $0x10] sm:$0xff]  }
0x559e   :  { %4259 = vrot.lane.b32.xlu1 %v4252_v42, %s7246_s24  ;;  %v6731_v42 = vld [vmem:[%s9529_s16 + $0x18] sm:$0xff]  }
0x560f   :  { %v4255_v43 = vpop.permute.xlu0 %4254 }
0x5610   :  { %4257 = vst.msk [vmem:[#allocation3 + $0x30] sm:$0xff] %vm116_vm0, %v4255_v43  ;;  %v4260_v58 = vpop.permute.xlu1 %4259 }
0x5611   :  { %4262 = vst.msk [vmem:[#allocation3 + $0x8] sm:$0xff] %vm373_vm1, %v4260_v58  ;;  %v4263_v53 = vsel %vm116_vm0, %v4255_v43, %v4260_v58  ;;  %v25_v43 = vstv %s9530_s19 }
0x5612   :  { %v4264_v7 = vpack.c.bf16 %v4263_v53, %v4263_v53  ;;  %26 = vst [vmem:[#allocation6] sm:$0x1] %v25_v43  ;;  %v8574_v53 = vld [vmem:[%s9531_s15] ss:$0 sm:$0xff] }
0x5614   :  { %6385 = vmatmul.mubr.msk.bf16.vlgmr.msra.gmra.mrb[76].mxu1 %vm267_vm2, %v4264_v7 }
0x5615   :  { %6521 = vmatpush3.bf16.msra.mxu1 %v6721_v13 }
0x5616   :  { %6522 = vmatprep.subr.bf16.mxu1 %v6723_v48 }
0x5617   :  { %v4377_v31 = vld [vmem:[#allocation3 + $0x30] sm:$0xff] }
0x5618   :  { %v4372_v25 = vld [vmem:[#allocation3 + $0x8] sm:$0xff] }
0x5619   :  { %6523 = vmatpush3.bf16.msra.mxu1 %v6723_v48  ;;  %v6447_v58 = vld [vmem:[#allocation6] ss:$0 sm:$0xff] }
0x561a   :  { %6524 = vmatprep.subr.bf16.mxu1 %v6725_v28 }
0x561d   :  { %6525 = vmatpush3.bf16.msra.mxu1 %v6725_v28 }
0x561e   :  { %6526 = vmatprep.subr.bf16.mxu1 %v6727_v15 }
0x5621   :  { %6527 = vmatpush3.bf16.msra.mxu1 %v6727_v15 }
0x5622   :  { %6616 = vmatprep.subr.bf16.mxu1 %v6728_v55 }
0x56e7   :  { %v4302_v52 = vpop.f32.mrb[76].mxu1 }
0x56e8   :  { %v4310_v44 = vadd.f32 %v4302_v52, %v8372_v54  ;;  %v4304_v30 = vpop.f32.mrb[77].mxu1 }
0x56e9   :  { %v4312_v34 = vadd.f32 %v4304_v30, %v8345_v47  ;;  %v4306_v46 = vpop.f32.mrb[78].mxu1 }
0x56ea   :  { %7228 = vtanh.f32 %v4310_v44  ;;  %v4307_v59 = vpop.f32.mrb[79].mxu1  ;;  %v6386_v45 = vmul.f32 -1.442695, %v4310_v44 }
0x56eb   :  { %7230 = vtanh.f32 %v4312_v34  ;;  %v6387_v16 = vmul.f32 -1.442695, %v4312_v34 }
0x56ec   :  { %7232 = vpow2.f32 %v6386_v45 }
0x56ed   :  { %7234 = vpow2.f32 %v6387_v16 }
0x56f4   :  { %v7229_v49 = vpop.eup %7228 }
0x56f5   :  { %v7231_v6 = vpop.eup %7230  ;;  %4322 = vrot.lane.b32.xlu1 %v7229_v49, %s7246_s24 }
0x56f6   :  { %4346 = vrot.lane.b32.xlu0 %v7231_v6, %s7246_s24  ;;  %v7233_v12 = vpop.eup %7232 }
0x56f7   :  { %v7235_v11 = vpop.eup %7234  ;;  %v4316_v54 = vadd.f32 1.0, %v7233_v12 }
0x56f8   :  { %v4340_v21 = vadd.f32 1.0, %v7235_v11 }
0x56f9   :  { %7236 = vrcp.f32 %v4316_v54 }
0x56fa   :  { %7238 = vrcp.f32 %v4340_v21 }
0x5703   :  { %v7237_v47 = vpop.eup %7236 }
0x5704   :  { %v7239_v8 = vpop.eup %7238  ;;  %v4320_v14 = vmul.f32 %v7237_v47, %v4222_v19  ;;  %v4375_v19 = vld [vmem:[#allocation3 + $0x20] sm:$0xff] }
0x5705   :  { %v4344_v22 = vmul.f32 %v7239_v8, %v4246_v33  ;;  %v4381_v9 = vpack.c.bf16 %v4376_v0, %v4375_v19 }
0x5767   :  { %v4323_v57 = vpop.permute.xlu1 %4322 }
0x5768   :  { %v4325_v20 = vmul.f32 %v7237_v47, %v4323_v57  ;;  %v4347_v4 = vpop.permute.xlu0 %4346 }
0x5769   :  { %v4349_v60 = vmul.f32 %v7239_v8, %v4347_v4 }
0x576a   :  { %4327 = vrot.lane.b32.xlu1 %v4325_v20, %s7247_s0 }
0x576b   :  { %4351 = vrot.lane.b32.xlu0 %v4349_v60, %s7247_s0 }
0x57dc   :  { %v4328_v18 = vpop.permute.xlu1 %4327 }
0x57dd   :  { %v4330_v37 = vadd.f32 %v4328_v18, %v4320_v14  ;;  %v4352_v62 = vpop.permute.xlu0 %4351 }
0x57de   :  { %v4354_v35 = vadd.f32 %v4352_v62, %v4344_v22 }
0x57df   :  { %7240 = vtanh.f32 %v4330_v37 }
0x57e0   :  { %7242 = vtanh.f32 %v4354_v35 }
0x57e9   :  { %v7241_v32 = vpop.eup %7240 }
0x57ea   :  { %v7243_v3 = vpop.eup %7242  ;;  %4333 = vrot.lane.b32.xlu1 %v7241_v32, %s7246_s24 }
0x57eb   :  { %4357 = vrot.lane.b32.xlu0 %v7243_v3, %s7246_s24 }
0x585c   :  { %v4334_v61 = vpop.permute.xlu1 %4333 }
0x585d   :  { %v4336_v50 = vmul.f32 %v7237_v47, %v4334_v61  ;;  %v4358_v63 = vpop.permute.xlu0 %4357 }
0x585e   :  { %v4360_v2 = vmul.f32 %v7239_v8, %v4358_v63 }
0x585f   :  { %4362 = vrot.lane.b32.xlu1 %v4336_v50, %s7247_s0 }
0x5860   :  { %4367 = vrot.lane.b32.xlu0 %v4360_v2, %s7246_s24 }
0x5863   :  { %5683 = vperm.xlu1 %6628, %v6447_v58  }
0x58d1   :  { %v4363_v39 = vpop.permute.xlu1 %4362 }
0x58d2   :  { %4365 = vst.msk [vmem:[#allocation3 + $0x38] sm:$0xff] %vm116_vm0, %v4363_v39  ;;  %v4368_v24 = vpop.permute.xlu0 %4367  ;;  %vm6207_vm0 = vcmask 1046534  }
0x58d3   :  { %4370 = vst.msk [vmem:[#allocation3] sm:$0xff] %vm373_vm1, %v4368_v24  ;;  %vm6209_vm1 = vcmask 1047559  }
0x58d9   :  { %v4378_v33 = vld [vmem:[#allocation3 + $0x38] sm:$0xff] }
0x58da   :  { %v4371_v36 = vld [vmem:[#allocation3] sm:$0xff]  ;;  %v4382_v5 = vpack.c.bf16 %v4378_v33, %v4377_v31 }
0x58db   :  { %v4379_v56 = vpack.c.bf16 %v4372_v25, %v4371_v36 }
0x58dd   :  { %6512 = vmatprep.mubr.msk.bf16.mxu0 %vm267_vm2, %v4379_v56  ;;  %6528 = vmatprep.mubr.msk.bf16.mxu1 %vm267_vm2, %v4379_v56 }
0x58de   :  { %6513 = vmatmul.mubr.msk.bf16.vlgmr.msra.gmra.mrb[112].mxu0 %vm267_vm2, %v4380_v17  ;;  %6529 = vmatmul.mubr.msk.bf16.vlgmr.msra.gmra.mrb[80].mxu1 %vm267_vm2, %v4380_v17 }
0x58df   :  { %6516 = vmatprep.mubr.msk.bf16.mxu0 %vm267_vm2, %v4381_v9  ;;  %6532 = vmatprep.mubr.msk.bf16.mxu1 %vm267_vm2, %v4381_v9 }
0x58e0   :  { %6537 = vmatpush3.bf16.msra.mxu0 %v6728_v55  ;;  %6620 = vmatpush3.bf16.msra.mxu1 %v6728_v55 }
0x58e1   :  { %6538 = vmatprep.subr.bf16.mxu0 %v6729_v1  ;;  %6617 = vmatprep.subr.bf16.mxu1 %v6729_v1 }
0x58e4   :  { %6539 = vmatpush3.bf16.msra.mxu0 %v6729_v1  ;;  %6621 = vmatpush3.bf16.msra.mxu1 %v6729_v1 }
0x58e5   :  { %6540 = vmatprep.subr.bf16.mxu0 %v6730_v51  ;;  %6618 = vmatprep.subr.bf16.mxu1 %v6730_v51 }
0x58e6   :  { %6517 = vmatmul.mubr.msk.bf16.gmra.mrb[116].mxu0 %vm267_vm2, %v4382_v5  ;;  %6533 = vmatmul.mubr.msk.bf16.gmra.mrb[84].mxu1 %vm267_vm2, %v4382_v5 }
0x58e8   :  { %6541 = vmatpush3.bf16.msra.mxu0 %v6730_v51  ;;  %6622 = vmatpush3.bf16.msra.mxu1 %v6730_v51 }
0x58e9   :  { %6542 = vmatprep.subr.bf16.mxu0 %v6731_v42  ;;  %6619 = vmatprep.subr.bf16.mxu1 %v6731_v42 }
0x58ec   :  { %6543 = vmatpush3.bf16.msra.mxu0 %v6731_v42  ;;  %6623 = vmatpush3.bf16.msra.mxu1 %v6731_v42 }
0x59b1   :  { %v6514_v7 = vpop.f32.mrb[112].mxu0  ;;  %v8576_v52 = vpop.f32.mrb[80].mxu1 }
0x59b2   :  { %v8579_v44 = vadd.f32 %v6514_v7, %v8574_v53  ;;  %v4468_v30 = vpop.f32.mrb[113].mxu0  ;;  %v8581_v34 = vpop.f32.mrb[81].mxu1 }
0x59b3   :  { %v8584_v46 = vadd.f32 %v8574_v53, %v4468_v30  ;;  %v6515_v59 = vpop.f32.mrb[114].mxu0  ;;  %v8586_v49 = vpop.f32.mrb[82].mxu1 }
0x59b4   :  { %v8590_v6 = vadd.f32 %v8576_v52, %v8579_v44  ;;  %v8594_v45 = vadd.f32 %v8581_v34, %v8579_v44  ;;  %v8597_v16 = vadd.f32 %v6515_v59, %v8574_v53  ;;  %v4471_v12 = vpop.f32.mrb[115].mxu0  ;;  %v8599_v11 = vpop.f32.mrb[83].mxu1  ;;  %v4686_v47 = vadd.f32 %v8586_v49, %v8579_v44 }
0x59b5   :  { %v8603_v54 = vadd.f32 %v8581_v34, %v8584_v46  ;;  %v8607_v21 = vadd.f32 %v8586_v49, %v8584_v46  ;;  %v8612_v57 = vadd.f32 %v8574_v53, %v4471_v12  ;;  %v4598_v8 = vmax.f32 %v8579_v44, 0.0 }
0x59b6   :  { %v4670_v20 = vmax.f32 %v8590_v6, 0.0  ;;  %v4599_v4 = vmax.f32 %v8597_v16, 0.0  ;;  %v4687_v60 = vadd.f32 %v8586_v49, %v8597_v16  ;;  %v4622_v18 = vmax.f32 %v8594_v45, 0.0 }
0x59b7   :  { %v4620_v14 = vmax.f32 %v8603_v54, 0.0  ;;  %v4694_v22 = vmax.f32 %v4686_v47, 0.0  ;;  %v4636_v37 = vadd.f32 %v8599_v11, %v8584_v46  ;;  %v4637_v35 = vadd.f32 %v8599_v11, %v8612_v57 }
0x59b8   :  { %v4695_v62 = vmax.f32 %v4687_v60, 0.0  ;;  %v4638_v23 = vadd.f32 %v8599_v11, %v8579_v44  ;;  %v4639_v13 = vadd.f32 %v8599_v11, %v8597_v16  ;;  %v4596_v48 = vmax.f32 %v8584_v46, 0.0 }
0x59b9   :  { %v4644_v32 = vmax.f32 %v4636_v37, 0.0  ;;  %v6518_v3 = vpop.f32.mrb[116].mxu0  ;;  %v8629_v41 = vpop.f32.mrb[84].mxu1  ;;  %v4597_v40 = vmax.f32 %v8612_v57, 0.0  ;;  %v4605_v28 = vpack.c.bf16 %v4599_v4, %v4598_v8  ;;  %v4645_v15 = vmax.f32 %v4637_v35, 0.0 }
0x59ba   :  { %v4701_v29 = vpack.c.bf16 %v4695_v62, %v4694_v22  ;;  %v4646_v61 = vmax.f32 %v4638_v23, 0.0  ;;  %v4647_v50 = vmax.f32 %v4639_v13, 0.0  ;;  %v4484_v63 = vpop.f32.mrb[117].mxu0  ;;  %v8633_v2 = vpop.f32.mrb[85].mxu1  ;;  %v8636_v39 = vadd.f32 %v6518_v3, %v8574_v53 }
0x59bb   :  { %v4756_v24 = vadd.f32 %v8629_v41, %v8584_v46  ;;  %v4757_v38 = vadd.f32 %v8629_v41, %v8612_v57  ;;  %v4758_v36 = vadd.f32 %v8629_v41, %v8579_v44  ;;  %v6519_v25 = vpop.f32.mrb[118].mxu0  ;;  %v8644_v0 = vpop.f32.mrb[86].mxu1  ;;  %4609 = vst.msk [vmem:[#allocation5 + $0x8] sm:$0xff] %vm267_vm2, %v4605_v28  ;;  %v4652_v56 = vpack.c.bf16 %v4645_v15, %v4644_v32 }
0x59bc   :  { %4705 = vst.msk [vmem:[#allocation5 + $0x88] sm:$0xff] %vm267_vm2, %v4701_v29  ;;  %v4653_v10 = vpack.c.bf16 %v4647_v50, %v4646_v61  ;;  %v4759_v17 = vadd.f32 %v8629_v41, %v8597_v16  ;;  %v8651_v19 = vadd.f32 %v8574_v53, %v4484_v63  ;;  %v4487_v9 = vpop.f32.mrb[119].mxu0  ;;  %v4584_v33 = vpop.f32.mrb[87].mxu1  ;;  %v8655_v31 = vadd.f32 %v8629_v41, %v8636_v39 }
0x59bd   :  { %v4764_v5 = vmax.f32 %v4756_v24, 0.0  ;;  %v4765_v55 = vmax.f32 %v4757_v38, 0.0  ;;  %v4766_v1 = vmax.f32 %v4758_v36, 0.0  ;;  %4656 = vst.msk [vmem:[#allocation5 + $0x40] sm:$0xff] %vm267_vm2, %v4652_v56  ;;  %v4708_v42 = vadd.f32 %v8633_v2, %v8584_v46 }
0x59be   :  { %4657 = vst.msk [vmem:[#allocation5 + $0x48] sm:$0xff] %vm267_vm2, %v4653_v10  ;;  %v4767_v51 = vmax.f32 %v4759_v17, 0.0  ;;  %v4709_v43 = vadd.f32 %v8633_v2, %v8612_v57  ;;  %v4710_v58 = vadd.f32 %v8633_v2, %v8579_v44  ;;  %v4770_v7 = vmax.f32 %v8655_v31, 0.0 }
0x59bf   :  { %v4772_v30 = vpack.c.bf16 %v4765_v55, %v4764_v5  ;;  %v4711_v59 = vadd.f32 %v8633_v2, %v8597_v16  ;;  %v8670_v12 = vadd.f32 %v8633_v2, %v8651_v19  ;;  %v8674_v8 = vadd.f32 %v8633_v2, %v8636_v39 }
0x59c0   :  { %v4773_v47 = vpack.c.bf16 %v4767_v51, %v4766_v1  ;;  %v4716_v4 = vmax.f32 %v4708_v42, 0.0  ;;  %v4717_v60 = vmax.f32 %v4709_v43, 0.0  ;;  %v4718_v22 = vmax.f32 %v4710_v58, 0.0 }
0x59c1   :  { %4776 = vst.msk [vmem:[#allocation5 + $0xe0] sm:$0xff] %vm267_vm2, %v4772_v30  ;;  %v4719_v37 = vmax.f32 %v4711_v59, 0.0  ;;  %v4720_v62 = vmax.f32 %v8670_v12, 0.0  ;;  %v8679_v35 = vadd.f32 %v6519_v25, %v8574_v53  ;;  %v4722_v23 = vmax.f32 %v8674_v8, 0.0 }
0x59c2   :  { %4777 = vst.msk [vmem:[#allocation5 + $0xe8] sm:$0xff] %vm267_vm2, %v4773_v47  ;;  %v4724_v13 = vpack.c.bf16 %v4717_v60, %v4716_v4  ;;  %v4780_v32 = vadd.f32 %v8644_v0, %v8584_v46  ;;  %v4781_v3 = vadd.f32 %v8644_v0, %v8612_v57  ;;  %v4782_v29 = vadd.f32 %v8644_v0, %v8579_v44 }
0x59c3   :  { %v4725_v28 = vpack.c.bf16 %v4719_v37, %v4718_v22  ;;  %v4783_v15 = vadd.f32 %v8644_v0, %v8597_v16  ;;  %v8693_v61 = vadd.f32 %v8644_v0, %v8651_v19  ;;  %v4786_v50 = vadd.f32 %v8644_v0, %v8636_v39 }
0x59c4   :  { %4728 = vst.msk [vmem:[#allocation5 + $0xa0] sm:$0xff] %vm267_vm2, %v4724_v13  ;;  %v4787_v63 = vadd.f32 %v8644_v0, %v8679_v35  ;;  %v4788_v24 = vmax.f32 %v4780_v32, 0.0  ;;  %v4789_v38 = vmax.f32 %v4781_v3, 0.0  ;;  %v4790_v36 = vmax.f32 %v4782_v29, 0.0 }
0x59c5   :  { %4729 = vst.msk [vmem:[#allocation5 + $0xa8] sm:$0xff] %vm267_vm2, %v4725_v28  ;;  %v4791_v25 = vmax.f32 %v4783_v15, 0.0  ;;  %v4792_v56 = vmax.f32 %v8693_v61, 0.0  ;;  %v8703_v10 = vadd.f32 %v8574_v53, %v4487_v9  ;;  %v4794_v17 = vmax.f32 %v4786_v50, 0.0 }
0x59c6   :  { %v4795_v5 = vmax.f32 %v4787_v63, 0.0  ;;  %v4796_v55 = vpack.c.bf16 %v4789_v38, %v4788_v24  ;;  %v4732_v1 = vadd.f32 %v4584_v33, %v8584_v46  ;;  %v4733_v42 = vadd.f32 %v4584_v33, %v8612_v57 }
0x59c7   :  { %v4797_v51 = vpack.c.bf16 %v4791_v25, %v4790_v36  ;;  %v4734_v43 = vadd.f32 %v4584_v33, %v8579_v44  ;;  %v4735_v58 = vadd.f32 %v4584_v33, %v8597_v16  ;;  %v4736_v59 = vadd.f32 %v4584_v33, %v8651_v19 }
0x59c8   :  { %v4799_v30 = vpack.c.bf16 %v4795_v5, %v4794_v17  ;;  %4800 = vst.msk [vmem:[#allocation5 + $0x100] sm:$0xff] %vm267_vm2, %v4796_v55  ;;  %v4737_v53 = vadd.f32 %v4584_v33, %v8703_v10  ;;  %v4738_v9 = vadd.f32 %v4584_v33, %v8636_v39  ;;  %v4739_v47 = vadd.f32 %v4584_v33, %v8679_v35 }
0x59c9   :  { %4801 = vst.msk [vmem:[#allocation5 + $0x108] sm:$0xff] %vm267_vm2, %v4797_v51  ;;  %v4740_v4 = vmax.f32 %v4732_v1, 0.0  ;;  %v4741_v60 = vmax.f32 %v4733_v42, 0.0  ;;  %v4742_v22 = vmax.f32 %v4734_v43, 0.0  ;;  %v4743_v44 = vmax.f32 %v4735_v58, 0.0 }
0x59ca   :  { %4803 = vst.msk [vmem:[#allocation5 + $0x118] sm:$0xff] %vm267_vm2, %v4799_v30  ;;  %v4744_v37 = vmax.f32 %v4736_v59, 0.0  ;;  %v4745_v13 = vmax.f32 %v4737_v53, 0.0  ;;  %v4746_v32 = vmax.f32 %v4738_v9, 0.0  ;;  %v4747_v3 = vmax.f32 %v4739_v47, 0.0 }
0x59cb   :  { %v4748_v28 = vpack.c.bf16 %v4741_v60, %v4740_v4  ;;  %v4604_v29 = vpack.c.bf16 %v4597_v40, %v4596_v48  ;;  %v4824_v15 = vld [vmem:[#allocation5 + $0xa0] sm:$0xff]  ;;  %v4600_v50 = vmax.f32 %v8651_v19, 0.0  ;;  %v4749_v33 = vpack.c.bf16 %v4743_v44, %v4742_v22 }
0x59cc   :  { %v4750_v63 = vpack.c.bf16 %v4745_v13, %v4744_v37  ;;  %6584 = vmatprep.mubr.msk.bf16.mxu1 %vm267_vm2, %v4824_v15  ;;  %v4825_v24 = vld [vmem:[#allocation5 + $0xa8] sm:$0xff]  ;;  %v4601_v38 = vmax.f32 %v8703_v10, 0.0  ;;  %v4602_v36 = vmax.f32 %v8636_v39, 0.0  ;;  %v4751_v25 = vpack.c.bf16 %v4747_v3, %v4746_v32 }
0x59cd   :  { %4752 = vst.msk [vmem:[#allocation5 + $0xc0] sm:$0xff] %vm267_vm2, %v4748_v28  ;;  %4608 = vst.msk [vmem:[#allocation5] sm:$0xff] %vm267_vm2, %v4604_v29  ;;  %6585 = vmatmul.mubr.msk.bf16.vlgmr.msra.gmra.mrb[88].mxu1 %vm267_vm2, %v4825_v24  ;;  %v4603_v48 = vmax.f32 %v8679_v35, 0.0  ;;  %v4613_v40 = vadd.f32 %v8581_v34, %v8612_v57  ;;  %v4713_v17 = vadd.f32 %v8633_v2, %v8703_v10  ;;  %v4805_v3 = vld [vmem:[#allocation5 + $0x8] sm:$0xff] }
0x59ce   :  { %4753 = vst.msk [vmem:[#allocation5 + $0xc8] sm:$0xff] %vm267_vm2, %v4749_v33  ;;  %4754 = vst.msk [vmem:[#allocation5 + $0xd0] sm:$0xff] %vm267_vm2, %v4750_v63  ;;  %v4606_v5 = vpack.c.bf16 %v4601_v38, %v4600_v50  ;;  %v4715_v55 = vadd.f32 %v8633_v2, %v8679_v35  ;;  %v4615_v1 = vadd.f32 %v8581_v34, %v8597_v16 }
0x59cf   :  { %v4616_v51 = vadd.f32 %v8581_v34, %v8651_v19  ;;  %4755 = vst.msk [vmem:[#allocation5 + $0xd8] sm:$0xff] %vm267_vm2, %v4751_v25  ;;  %v4607_v42 = vpack.c.bf16 %v4603_v48, %v4602_v36  ;;  %v4621_v43 = vmax.f32 %v4613_v40, 0.0  ;;  %v4721_v58 = vmax.f32 %v4713_v17, 0.0 }
0x59d0   :  { %v4617_v30 = vadd.f32 %v8581_v34, %v8703_v10  ;;  %4610 = vst.msk [vmem:[#allocation5 + $0x10] sm:$0xff] %vm267_vm2, %v4606_v5  ;;  %v4723_v59 = vmax.f32 %v4715_v55, 0.0  ;;  %v4623_v53 = vmax.f32 %v4615_v1, 0.0  ;;  %v4618_v2 = vadd.f32 %v8581_v34, %v8636_v39 }
0x59d1   :  { %v4624_v9 = vmax.f32 %v4616_v51, 0.0  ;;  %4611 = vst.msk [vmem:[#allocation5 + $0x18] sm:$0xff] %vm267_vm2, %v4607_v42  ;;  %v4628_v47 = vpack.c.bf16 %v4621_v43, %v4620_v14  ;;  %v4726_v4 = vpack.c.bf16 %v4721_v58, %v4720_v62  ;;  %v4619_v22 = vadd.f32 %v8581_v34, %v8679_v35 }
0x59d2   :  { %v4625_v60 = vmax.f32 %v4617_v30, 0.0  ;;  %v4727_v44 = vpack.c.bf16 %v4723_v59, %v4722_v23  ;;  %v4629_v37 = vpack.c.bf16 %v4623_v53, %v4622_v18  ;;  %v4626_v13 = vmax.f32 %v4618_v2, 0.0 }
0x59d3   :  { %v4640_v32 = vadd.f32 %v8599_v11, %v8651_v19  ;;  %4632 = vst.msk [vmem:[#allocation5 + $0x20] sm:$0xff] %vm267_vm2, %v4628_v47  ;;  %4730 = vst.msk [vmem:[#allocation5 + $0xb0] sm:$0xff] %vm267_vm2, %v4726_v4  ;;  %v4627_v14 = vmax.f32 %v4619_v22, 0.0  ;;  %v4641_v12 = vadd.f32 %v8599_v11, %v8703_v10  ;;  %v4760_v34 = vadd.f32 %v8629_v41, %v8651_v19 }
0x59d4   :  { %v4630_v54 = vpack.c.bf16 %v4625_v60, %v4624_v9  ;;  %v4804_v8 = vld [vmem:[#allocation5] sm:$0xff]  ;;  %4731 = vst.msk [vmem:[#allocation5 + $0xb8] sm:$0xff] %vm267_vm2, %v4727_v44  ;;  %4633 = vst.msk [vmem:[#allocation5 + $0x28] sm:$0xff] %vm267_vm2, %v4629_v37  ;;  %v4761_v18 = vadd.f32 %v8629_v41, %v8703_v10  ;;  %v4642_v62 = vadd.f32 %v8599_v11, %v8636_v39  ;;  %v4692_v37 = vmax.f32 %v8607_v21, 0.0 }
0x59d5   :  { %v4648_v45 = vmax.f32 %v4640_v32, 0.0  ;;  %v4643_v23 = vadd.f32 %v8599_v11, %v8679_v35  ;;  %6544 = vmatprep.mubr.msk.bf16.mxu0 %vm267_vm2, %v4804_v8  ;;  %v4631_v28 = vpack.c.bf16 %v4627_v14, %v4626_v13  ;;  %v4649_v29 = vmax.f32 %v4641_v12, 0.0  ;;  %v4828_v4 = vld [vmem:[#allocation5 + $0xc0] sm:$0xff] }
0x59d6   :  { %4634 = vst.msk [vmem:[#allocation5 + $0x30] sm:$0xff] %vm267_vm2, %v4630_v54  ;;  %v4768_v15 = vmax.f32 %v4760_v34, 0.0  ;;  %v4660_v50 = vadd.f32 %v8576_v52, %v8584_v46  ;;  %6545 = vmatmul.mubr.msk.bf16.vlgmr.msra.gmra.mrb[120].mxu0 %vm267_vm2, %v4805_v3  ;;  %v4769_v33 = vmax.f32 %v4761_v18, 0.0  ;;  %v4650_v63 = vmax.f32 %v4642_v62, 0.0  ;;  %v4829_v34 = vld [vmem:[#allocation5 + $0xc8] sm:$0xff]  ;;  %v4832_v18 = vld [vmem:[#allocation5 + $0xe0] sm:$0xff] }
0x59d7   :  { %v4651_v24 = vmax.f32 %v4643_v23, 0.0  ;;  %v4661_v38 = vadd.f32 %v8576_v52, %v8612_v57  ;;  %v4806_v11 = vld [vmem:[#allocation5 + $0x10] sm:$0xff]  ;;  %4635 = vst.msk [vmem:[#allocation5 + $0x38] sm:$0xff] %vm267_vm2, %v4631_v28  ;;  %v4654_v36 = vpack.c.bf16 %v4649_v29, %v4648_v45  ;;  %v4763_v48 = vadd.f32 %v8629_v41, %v8679_v35  ;;  %v4831_v45 = vld [vmem:[#allocation5 + $0xd8] sm:$0xff]  ;;  %v4812_v23 = vld [vmem:[#allocation5 + $0x40] sm:$0xff] }
0x59d8   :  { %v4668_v25 = vmax.f32 %v4660_v50, 0.0  ;;  %v4663_v40 = vadd.f32 %v8576_v52, %v8597_v16  ;;  %6548 = vmatprep.mubr.msk.bf16.mxu0 %vm267_vm2, %v4806_v11  ;;  %v4774_v46 = vpack.c.bf16 %v4769_v33, %v4768_v15  ;;  %v4664_v55 = vadd.f32 %v8576_v52, %v8651_v19  ;;  %v4807_v31 = vld [vmem:[#allocation5 + $0x18] sm:$0xff]  ;;  %v4833_v3 = vld [vmem:[#allocation5 + $0xe8] sm:$0xff]  ;;  %v4836_v33 = vld [vmem:[#allocation5 + $0x100] sm:$0xff] }
0x59d9   :  { %v4655_v17 = vpack.c.bf16 %v4651_v24, %v4650_v63  ;;  %v4669_v5 = vmax.f32 %v4661_v38, 0.0  ;;  %4658 = vst.msk [vmem:[#allocation5 + $0x50] sm:$0xff] %vm267_vm2, %v4654_v36  ;;  %v4771_v1 = vmax.f32 %v4763_v48, 0.0  ;;  %v4665_v42 = vadd.f32 %v8576_v52, %v8703_v10  ;;  %v4813_v29 = vld [vmem:[#allocation5 + $0x48] sm:$0xff]  ;;  %v4839_v48 = vld [vmem:[#allocation5 + $0x118] sm:$0xff] }
0x59da   :  { %v4671_v51 = vmax.f32 %v4663_v40, 0.0  ;;  %v4785_v41 = vadd.f32 %v8644_v0, %v8703_v10  ;;  %v4826_v43 = vld [vmem:[#allocation5 + $0xb0] sm:$0xff]  ;;  %4778 = vst.msk [vmem:[#allocation5 + $0xf0] sm:$0xff] %vm267_vm2, %v4774_v46  ;;  %v4672_v58 = vmax.f32 %v4664_v55, 0.0  ;;  %v4666_v30 = vadd.f32 %v8576_v52, %v8636_v39  ;;  %v4837_v38 = vld [vmem:[#allocation5 + $0x108] sm:$0xff] }
0x59db   :  { %4659 = vst.msk [vmem:[#allocation5 + $0x58] sm:$0xff] %vm267_vm2, %v4655_v17  ;;  %v4676_v16 = vpack.c.bf16 %v4669_v5, %v4668_v25  ;;  %v4667_v59 = vadd.f32 %v8576_v52, %v8679_v35  ;;  %6588 = vmatprep.mubr.msk.bf16.mxu1 %vm267_vm2, %v4826_v43  ;;  %v4827_v53 = vld [vmem:[#allocation5 + $0xb8] sm:$0xff]  ;;  %v4775_v9 = vpack.c.bf16 %v4771_v1, %v4770_v7  ;;  %v4673_v2 = vmax.f32 %v4665_v42, 0.0  ;;  %v4821_v17 = vld [vmem:[#allocation5 + $0x88] sm:$0xff]  ;;  %v8859_v43 = vld [vmem:[%s9532_s17] ss:$0 sm:$0xff] }
0x59dc   :  { %v4677_v0 = vpack.c.bf16 %v4671_v51, %v4670_v20  ;;  %v4793_v47 = vmax.f32 %v4785_v41, 0.0  ;;  %6589 = vmatmul.mubr.msk.bf16.gmra.mrb[92].mxu1 %vm267_vm2, %v4827_v53  ;;  %v4674_v60 = vmax.f32 %v4666_v30, 0.0  ;;  %v4685_v52 = vadd.f32 %v8586_v49, %v8612_v57  ;;  %v8866_v53 = vld [vmem:[%s9533_s18] ss:$0 sm:$0xff] }
0x59dd   :  { %4680 = vst.msk [vmem:[#allocation5 + $0x60] sm:$0xff] %vm267_vm2, %v4676_v16  ;;  %v4675_v22 = vmax.f32 %v4667_v59, 0.0  ;;  %v4688_v44 = vadd.f32 %v8586_v49, %v8651_v19  ;;  %6592 = vmatprep.mubr.msk.bf16.mxu1 %vm267_vm2, %v4828_v4  ;;  %4779 = vst.msk [vmem:[#allocation5 + $0xf8] sm:$0xff] %vm267_vm2, %v4775_v9  ;;  %v4678_v6 = vpack.c.bf16 %v4673_v2, %v4672_v58  ;;  %v4808_v19 = vld [vmem:[#allocation5 + $0x20] sm:$0xff]  ;;  %v4810_v8 = vld [vmem:[#allocation5 + $0x30] sm:$0xff] }
0x59de   :  { %4681 = vst.msk [vmem:[#allocation5 + $0x68] sm:$0xff] %vm267_vm2, %v4677_v0  ;;  %v4798_v20 = vpack.c.bf16 %v4793_v47, %v4792_v56  ;;  %v4689_v7 = vadd.f32 %v8586_v49, %v8703_v10  ;;  %v4690_v57 = vadd.f32 %v8586_v49, %v8636_v39  ;;  %6549 = vmatmul.mubr.msk.bf16.gmra.mrb[124].mxu0 %vm267_vm2, %v4807_v31  ;;  %v4693_v32 = vmax.f32 %v4685_v52, 0.0  ;;  %v4811_v62 = vld [vmem:[#allocation5 + $0x38] sm:$0xff] }
0x59df   :  { %v4679_v13 = vpack.c.bf16 %v4675_v22, %v4674_v60  ;;  %v4691_v54 = vadd.f32 %v8586_v49, %v8679_v35  ;;  %6552 = vmatprep.mubr.msk.bf16.mxu0 %vm267_vm2, %v4808_v19  ;;  %4682 = vst.msk [vmem:[#allocation5 + $0x70] sm:$0xff] %vm267_vm2, %v4678_v6  ;;  %v4696_v61 = vmax.f32 %v4688_v44, 0.0  ;;  %v4830_v49 = vld [vmem:[#allocation5 + $0xd0] sm:$0xff]  ;;  %v4809_v35 = vld [vmem:[#allocation5 + $0x28] sm:$0xff] }
0x59e0   :  { %4802 = vst.msk [vmem:[#allocation5 + $0x110] sm:$0xff] %vm267_vm2, %v4798_v20  ;;  %v4697_v56 = vmax.f32 %v4689_v7, 0.0  ;;  %v4700_v39 = vpack.c.bf16 %v4693_v32, %v4692_v37  ;;  %v4698_v21 = vmax.f32 %v4690_v57, 0.0  ;;  %v4814_v15 = vld [vmem:[#allocation5 + $0x50] sm:$0xff] }
0x59e1   :  { %4683 = vst.msk [vmem:[#allocation5 + $0x78] sm:$0xff] %vm267_vm2, %v4679_v13  ;;  %v4699_v10 = vmax.f32 %v4691_v54, 0.0  ;;  %v4834_v28 = vld [vmem:[#allocation5 + $0xf0] sm:$0xff] }
0x59e2   :  { %v4702_v14 = vpack.c.bf16 %v4697_v56, %v4696_v61  ;;  %4704 = vst.msk [vmem:[#allocation5 + $0x80] sm:$0xff] %vm267_vm2, %v4700_v39  ;;  %v4815_v63 = vld [vmem:[#allocation5 + $0x58] sm:$0xff] }
0x59e3   :  { %v4703_v12 = vpack.c.bf16 %v4699_v10, %v4698_v21 }
0x59e4   :  { %4706 = vst.msk [vmem:[#allocation5 + $0x90] sm:$0xff] %vm267_vm2, %v4702_v14  ;;  %6593 = vmatmul.mubr.msk.bf16.gmra.mrb[96].mxu1 %vm267_vm2, %v4829_v34  ;;  %v4835_v50 = vld [vmem:[#allocation5 + $0xf8] sm:$0xff]  ;;  %v4816_v24 = vld [vmem:[#allocation5 + $0x60] sm:$0xff] }
0x59e5   :  { %4707 = vst.msk [vmem:[#allocation5 + $0x98] sm:$0xff] %vm267_vm2, %v4703_v12  ;;  %6596 = vmatprep.mubr.msk.bf16.mxu1 %vm267_vm2, %v4830_v49  ;;  %v4817_v36 = vld [vmem:[#allocation5 + $0x68] sm:$0xff] }
0x59e6   :  { %6553 = vmatmul.mubr.msk.bf16.gmra.mrb[128].mxu0 %vm267_vm2, %v4809_v35  ;;  %v4818_v25 = vld [vmem:[#allocation5 + $0x70] sm:$0xff] }
0x59e7   :  { %6556 = vmatprep.mubr.msk.bf16.mxu0 %vm267_vm2, %v4810_v8  ;;  %v4838_v11 = vld [vmem:[#allocation5 + $0x110] sm:$0xff] }
0x59e8   :  { %v4819_v40 = vld [vmem:[#allocation5 + $0x78] sm:$0xff] }
0x59e9   :  { %v4820_v46 = vld [vmem:[#allocation5 + $0x80] sm:$0xff] }
0x59eb   :  { %v4822_v5 = vld [vmem:[#allocation5 + $0x90] sm:$0xff] }
0x59ec   :  { %6597 = vmatmul.mubr.msk.bf16.gmra.mrb[100].mxu1 %vm267_vm2, %v4831_v45  ;;  %v4823_v55 = vld [vmem:[#allocation5 + $0x98] sm:$0xff] }
0x59ed   :  { %6600 = vmatprep.mubr.msk.bf16.mxu1 %vm267_vm2, %v4832_v18 }
0x59ee   :  { %6557 = vmatmul.mubr.msk.bf16.gmra.mrb[132].mxu0 %vm267_vm2, %v4811_v62 }
0x59ef   :  { %6560 = vmatprep.mubr.msk.bf16.mxu0 %vm267_vm2, %v4812_v23 }
0x59f4   :  { %6601 = vmatmul.mubr.msk.bf16.gmra.mrb[104].mxu1 %vm267_vm2, %v4833_v3 }
0x59f5   :  { %6604 = vmatprep.mubr.msk.bf16.mxu1 %vm267_vm2, %v4834_v28 }
0x59f6   :  { %6561 = vmatmul.mubr.msk.bf16.gmra.mrb[136].mxu0 %vm267_vm2, %v4813_v29 }
0x59f7   :  { %6564 = vmatprep.mubr.msk.bf16.mxu0 %vm267_vm2, %v4814_v15 }
0x59fc   :  { %6605 = vmatmul.mubr.msk.bf16.gmra.mrb[108].mxu1 %vm267_vm2, %v4835_v50 }
0x59fd   :  { %6608 = vmatprep.mubr.msk.bf16.mxu1 %vm267_vm2, %v4836_v33 }
0x59fe   :  { %6565 = vmatmul.mubr.msk.bf16.gmra.mrb[140].mxu0 %vm267_vm2, %v4815_v63 }
0x59ff   :  { %6568 = vmatprep.mubr.msk.bf16.mxu0 %vm267_vm2, %v4816_v24 }
0x5a04   :  { %6609 = vmatmul.mubr.msk.bf16.gmra.mrb[112].mxu1 %vm267_vm2, %v4837_v38 }
0x5a05   :  { %6612 = vmatprep.mubr.msk.bf16.mxu1 %vm267_vm2, %v4838_v11 }
0x5a06   :  { %6569 = vmatmul.mubr.msk.bf16.gmra.mrb[144].mxu0 %vm267_vm2, %v4817_v36 }
0x5a07   :  { %6572 = vmatprep.mubr.msk.bf16.mxu0 %vm267_vm2, %v4818_v25 }
0x5a0c   :  { %6613 = vmatmul.mubr.msk.bf16.gmra.mrb[116].mxu1 %vm267_vm2, %v4839_v48 }
0x5a0e   :  { %6573 = vmatmul.mubr.msk.bf16.gmra.mrb[148].mxu0 %vm267_vm2, %v4819_v40 }
0x5a0f   :  { %6576 = vmatprep.mubr.msk.bf16.mxu0 %vm267_vm2, %v4820_v46 }
0x5a16   :  { %6577 = vmatmul.mubr.msk.bf16.gmra.mrb[152].mxu0 %vm267_vm2, %v4821_v17 }
0x5a17   :  { %6580 = vmatprep.mubr.msk.bf16.mxu0 %vm267_vm2, %v4822_v5 }
0x5a1e   :  { %6581 = vmatmul.mubr.msk.bf16.gmra.mrb[156].mxu0 %vm267_vm2, %v4823_v55 }
0x5aa0   :  { %v6586_v1 = vpop.f32.mrb[88].mxu1 }
0x5aa1   :  { %v5181_v51 = vpop.f32.mrb[89].mxu1  ;;  %v5190_v58 = vadd.f32 %v6586_v1, %v8859_v43 }
0x5aa2   :  { %v6587_v42 = vpop.f32.mrb[90].mxu1  ;;  %v5182_v6 = vadd.f32 %v8859_v43, %v5181_v51 }
0x5aa3   :  { %v5184_v41 = vpop.f32.mrb[91].mxu1  ;;  %v5350_v52 = vmax.f32 %v5190_v58, 0.0  ;;  %v5193_v37 = vadd.f32 %v6587_v42, %v8859_v43 }
0x5aa4   :  { %v5348_v10 = vmax.f32 %v5182_v6, 0.0  ;;  %v5185_v8 = vadd.f32 %v8859_v43, %v5184_v41 }
0x5aa5   :  { %v5429_v54 = vmul.f32 %v8866_v53, %v5350_v52  ;;  %v5351_v35 = vmax.f32 %v5193_v37, 0.0 }
0x5aa6   :  { %v5427_v23 = vmul.f32 %v8866_v53, %v5348_v10  ;;  %v5349_v50 = vmax.f32 %v5185_v8, 0.0 }
0x5aa7   :  { %v5586_v62 = vsel %vm5459_vm3, %v5429_v54, 0.0  ;;  %v5430_v15 = vmul.f32 %v8866_v53, %v5351_v35 }
0x5aa8   :  { %v5580_v5 = vsel %vm5459_vm3, %v5427_v23, 0.0  ;;  %v5428_v55 = vmul.f32 %v8866_v53, %v5349_v50 }
0x5aa9   :  { %v6546_v16 = vpop.f32.mrb[120].mxu0  ;;  %v5589_v41 = vsel %vm5459_vm3, %v5430_v15, 0.0 }
0x5aaa   :  { %v5030_v30 = vadd.f32 %v6546_v16, %v8859_v43  ;;  %v5021_v59 = vpop.f32.mrb[121].mxu0 }
0x5aab   :  { %v5022_v9 = vadd.f32 %v8859_v43, %v5021_v59  ;;  %v6547_v0 = vpop.f32.mrb[122].mxu0 }
0x5aac   :  { %v5310_v2 = vmax.f32 %v5030_v30, 0.0  ;;  %v5033_v47 = vadd.f32 %v6547_v0, %v8859_v43  ;;  %v5024_v4 = vpop.f32.mrb[123].mxu0 }
0x5aad   :  { %v5308_v60 = vmax.f32 %v5022_v9, 0.0  ;;  %v5025_v22 = vadd.f32 %v8859_v43, %v5024_v4  ;;  %v5583_v4 = vsel %vm5459_vm3, %v5428_v55, 0.0 }
0x5aae   :  { %v5389_v44 = vmul.f32 %v8866_v53, %v5310_v2  ;;  %v5311_v57 = vmax.f32 %v5033_v47, 0.0 }
0x5aaf   :  { %v5309_v31 = vmax.f32 %v5025_v22, 0.0  ;;  %v6590_v20 = vpop.f32.mrb[92].mxu1  ;;  %v5387_v7 = vmul.f32 %v8866_v53, %v5308_v60 }
0x5ab0   :  { %v5466_v19 = vsel %vm5459_vm3, %v5389_v44, 0.0  ;;  %v5197_v13 = vpop.f32.mrb[93].mxu1  ;;  %v5390_v49 = vmul.f32 %v8866_v53, %v5311_v57  ;;  %v5206_v46 = vadd.f32 %v6590_v20, %v8859_v43 }
0x5ab1   :  { %v5388_v32 = vmul.f32 %v8866_v53, %v5309_v31  ;;  %5467 = vadd.xlane.f32.xlu0 %v5466_v19  ;;  %v6550_v61 = vpop.f32.mrb[124].mxu0  ;;  %v8878_v56 = vpop.f32.mrb[94].mxu1  ;;  %v5460_v18 = vsel %vm5459_vm3, %v5387_v7, 0.0  ;;  %v5198_v47 = vadd.f32 %v8859_v43, %v5197_v13 }
0x5ab2   :  { %v5037_v39 = vpop.f32.mrb[125].mxu0  ;;  %v8880_v21 = vpop.f32.mrb[95].mxu1  ;;  %v5046_v14 = vadd.f32 %v6550_v61, %v8859_v43  ;;  %v5469_v63 = vsel %vm5459_vm3, %v5390_v49, 0.0  ;;  %v5354_v58 = vmax.f32 %v5206_v46, 0.0 }
0x5ab3   :  { %v6551_v12 = vpop.f32.mrb[126].mxu0  ;;  %v5463_v34 = vsel %vm5459_vm3, %v5388_v32, 0.0  ;;  %v5038_v28 = vadd.f32 %v8859_v43, %v5037_v39  ;;  %v5352_v13 = vmax.f32 %v5198_v47, 0.0  ;;  %v5209_v32 = vadd.f32 %v8878_v56, %v8859_v43 }
0x5ab4   :  { %v5040_v45 = vpop.f32.mrb[127].mxu0  ;;  %5464 = vadd.xlane.f32.xlu1 %v5463_v34  ;;  %v5314_v3 = vmax.f32 %v5046_v14, 0.0  ;;  %v5049_v33 = vadd.f32 %v6551_v12, %v8859_v43  ;;  %v5433_v6 = vmul.f32 %v8866_v53, %v5354_v58  ;;  %v5201_v56 = vadd.f32 %v8859_v43, %v8880_v21 }
0x5ab5   :  { %5461 = vadd.xlane.f32.xlu0 %v5460_v18  ;;  %v5312_v40 = vmax.f32 %v5038_v28, 0.0  ;;  %v5041_v51 = vadd.f32 %v8859_v43, %v5040_v45  ;;  %v5431_v49 = vmul.f32 %v8866_v53, %v5352_v13  ;;  %v5355_v35 = vmax.f32 %v5209_v32, 0.0 }
0x5ab6   :  { %v5393_v48 = vmul.f32 %v8866_v53, %v5314_v3  ;;  %v5315_v1 = vmax.f32 %v5049_v33, 0.0  ;;  %v5598_v12 = vsel %vm5459_vm3, %v5433_v6, 0.0 }
0x5ab7   :  { %v6594_v29 = vpop.f32.mrb[96].mxu1  ;;  %v5391_v16 = vmul.f32 %v8866_v53, %v5312_v40  ;;  %v5313_v2 = vmax.f32 %v5041_v51, 0.0  ;;  %v5434_v33 = vmul.f32 %v8866_v53, %v5355_v35 }
0x5ab8   :  { %5587 = vadd.xlane.f32.xlu1 %v5586_v62  ;;  %v8893_v24 = vpop.f32.mrb[97].mxu1  ;;  %v5478_v59 = vsel %vm5459_vm3, %v5393_v48, 0.0  ;;  %v5394_v0 = vmul.f32 %v8866_v53, %v5315_v1  ;;  %v5222_v14 = vadd.f32 %v6594_v29, %v8859_v43  ;;  %v5592_v48 = vsel %vm5459_vm3, %v5431_v49, 0.0 }
0x5ab9   :  { %v6554_v38 = vpop.f32.mrb[128].mxu0  ;;  %5470 = vadd.xlane.f32.xlu0 %v5469_v63  ;;  %v8895_v11 = vpop.f32.mrb[98].mxu1  ;;  %v5472_v37 = vsel %vm5459_vm3, %v5391_v16, 0.0  ;;  %v5392_v19 = vmul.f32 %v8866_v53, %v5313_v2  ;;  %v5353_v63 = vmax.f32 %v5201_v56, 0.0  ;;  %v5601_v16 = vsel %vm5459_vm3, %v5434_v33, 0.0 }
0x5aba   :  { %v5053_v36 = vpop.f32.mrb[129].mxu0  ;;  %v8897_v25 = vpop.f32.mrb[99].mxu1  ;;  %v5062_v30 = vadd.f32 %v6554_v38, %v8859_v43  ;;  %v5481_v61 = vsel %vm5459_vm3, %v5394_v0, 0.0  ;;  %v5358_v29 = vmax.f32 %v5222_v14, 0.0 }
0x5abb   :  { %v6555_v17 = vpop.f32.mrb[130].mxu0  ;;  %v5054_v7 = vadd.f32 %v8859_v43, %v5053_v36  ;;  %v5475_v8 = vsel %vm5459_vm3, %v5392_v19, 0.0  ;;  %v5432_v51 = vmul.f32 %v8866_v53, %v5353_v63 }
0x5abc   :  { %v8904_v42 = vpop.f32.mrb[131].mxu0  ;;  %5581 = vadd.xlane.f32.xlu1 %v5580_v5  ;;  %v5318_v20 = vmax.f32 %v5062_v30, 0.0  ;;  %v5065_v38 = vadd.f32 %v6555_v17, %v8859_v43  ;;  %v5437_v40 = vmul.f32 %v8866_v53, %v5358_v29  ;;  %v5225_v5 = vadd.f32 %v8895_v11, %v8859_v43 }
0x5abd   :  { %5590 = vadd.xlane.f32.xlu0 %v5589_v41  ;;  %v5316_v10 = vmax.f32 %v5054_v7, 0.0  ;;  %v5057_v17 = vadd.f32 %v8859_v43, %v8904_v42  ;;  %v5214_v7 = vadd.f32 %v8859_v43, %v8893_v24  ;;  %v5595_v19 = vsel %vm5459_vm3, %v5432_v51, 0.0 }
0x5abe   :  { %v5397_v39 = vmul.f32 %v8866_v53, %v5318_v20  ;;  %v5319_v41 = vmax.f32 %v5065_v38, 0.0  ;;  %v5359_v47 = vmax.f32 %v5225_v5, 0.0 }
0x5abf   :  { %v8910_v9 = vpop.f32.mrb[100].mxu1  ;;  %v5395_v28 = vmul.f32 %v8866_v53, %v5316_v10  ;;  %v5317_v20 = vmax.f32 %v5057_v17, 0.0  ;;  %v5356_v14 = vmax.f32 %v5214_v7, 0.0 }
0x5ac0   :  { %5479 = vadd.xlane.f32.xlu1 %v5478_v59  ;;  %v8915_v60 = vpop.f32.mrb[101].mxu1  ;;  %v5490_v50 = vsel %vm5459_vm3, %v5397_v39, 0.0  ;;  %v5398_v6 = vmul.f32 %v8866_v53, %v5319_v41  ;;  %v5438_v13 = vmul.f32 %v8866_v53, %v5359_v47 }
0x5ac1   :  { %v6558_v22 = vpop.f32.mrb[132].mxu0  ;;  %5584 = vadd.xlane.f32.xlu0 %v5583_v4  ;;  %v8917_v52 = vpop.f32.mrb[102].mxu1  ;;  %v5484_v55 = vsel %vm5459_vm3, %v5395_v28, 0.0  ;;  %v5396_v10 = vmul.f32 %v8866_v53, %v5317_v20  ;;  %v5435_v33 = vmul.f32 %v8866_v53, %v5356_v14 }
0x5ac2   :  { %v5069_v44 = vpop.f32.mrb[133].mxu0  ;;  %v8919_v31 = vpop.f32.mrb[103].mxu1  ;;  %v5078_v15 = vadd.f32 %v6558_v22, %v8859_v43  ;;  %v5610_v22 = vsel %vm5459_vm3, %v5437_v40, 0.0 }
0x5ac3   :  { %v8923_v57 = vpop.f32.mrb[134].mxu0  ;;  %v5070_v4 = vadd.f32 %v8859_v43, %v5069_v44  ;;  %v5217_v44 = vadd.f32 %v8859_v43, %v8897_v25  ;;  %v5487_v40 = vsel %vm5459_vm3, %v5396_v10, 0.0 }
0x5ac4   :  { %v8929_v54 = vpop.f32.mrb[135].mxu0  ;;  %5473 = vadd.xlane.f32.xlu1 %v5472_v37  ;;  %v5322_v46 = vmax.f32 %v5078_v15, 0.0  ;;  %v5081_v24 = vadd.f32 %v8923_v57, %v8859_v43 }
0x5ac5   :  { %5482 = vadd.xlane.f32.xlu0 %v5481_v61  ;;  %v5320_v32 = vmax.f32 %v5070_v4, 0.0  ;;  %v5357_v29 = vmax.f32 %v5217_v44, 0.0  ;;  %v5073_v38 = vadd.f32 %v8859_v43, %v8929_v54  ;;  %v5238_v54 = vadd.f32 %v8910_v9, %v8859_v43 }
0x5ac6   :  { %v5401_v2 = vmul.f32 %v8866_v53, %v5322_v46  ;;  %v5323_v63 = vmax.f32 %v5081_v24, 0.0  ;;  %v5230_v44 = vadd.f32 %v8859_v43, %v8915_v60  ;;  %v5241_v60 = vadd.f32 %v8917_v52, %v8859_v43 }
0x5ac7   :  { %v8935_v34 = vpop.f32.mrb[104].mxu1  ;;  %v5399_v28 = vmul.f32 %v8866_v53, %v5320_v32  ;;  %v5436_v46 = vmul.f32 %v8866_v53, %v5357_v29  ;;  %v5321_v17 = vmax.f32 %v5073_v38, 0.0  ;;  %v5362_v32 = vmax.f32 %v5238_v54, 0.0 }
0x5ac8   :  { %5599 = vadd.xlane.f32.xlu1 %v5598_v12  ;;  %v8941_v45 = vpop.f32.mrb[105].mxu1  ;;  %v5502_v61 = vsel %vm5459_vm3, %v5401_v2, 0.0  ;;  %v5493_v12 = vsel %vm5459_vm3, %v5398_v6, 0.0  ;;  %v5402_v41 = vmul.f32 %v8866_v53, %v5323_v63  ;;  %v5360_v29 = vmax.f32 %v5230_v44, 0.0 }
0x5ac9   :  { %v8943_v18 = vpop.f32.mrb[136].mxu0  ;;  %5476 = vadd.xlane.f32.xlu0 %v5475_v8  ;;  %v8945_v62 = vpop.f32.mrb[106].mxu1 }
0x5aca   :  { %v8947_v23 = vpop.f32.mrb[137].mxu0  ;;  %v8949_v3 = vpop.f32.mrb[107].mxu1  ;;  %v5094_v57 = vadd.f32 %v8943_v18, %v8859_v43  ;;  %v5505_v10 = vsel %vm5459_vm3, %v5402_v41, 0.0  ;;  %v5439_v52 = vmul.f32 %v8866_v53, %v5360_v29 }
0x5acb   :  { %v8953_v21 = vpop.f32.mrb[138].mxu0  ;;  %v5086_v18 = vadd.f32 %v8859_v43, %v8947_v23 }
0x5acc   :  { %v8958_v36 = vpop.f32.mrb[139].mxu0  ;;  %5491 = vadd.xlane.f32.xlu1 %v5490_v50  ;;  %v5613_v50 = vsel %vm5459_vm3, %v5438_v13, 0.0  ;;  %v5326_v5 = vmax.f32 %v5094_v57, 0.0  ;;  %v5400_v13 = vmul.f32 %v8866_v53, %v5321_v17 }
0x5acd   :  { %5593 = vadd.xlane.f32.xlu0 %v5592_v48  ;;  %v5324_v20 = vmax.f32 %v5086_v18, 0.0  ;;  %v5233_v18 = vadd.f32 %v8859_v43, %v8919_v31  ;;  %v5097_v31 = vadd.f32 %v8953_v21, %v8859_v43 }
0x5ace   :  { %v5405_v6 = vmul.f32 %v8866_v53, %v5326_v5  ;;  %v5499_v57 = vsel %vm5459_vm3, %v5400_v13, 0.0  ;;  %v5363_v5 = vmax.f32 %v5241_v60, 0.0 }
0x5acf   :  { %v8965_v1 = vpop.f32.mrb[108].mxu1  ;;  %v5403_v14 = vmul.f32 %v8866_v53, %v5324_v20  ;;  %v5361_v20 = vmax.f32 %v5233_v18, 0.0 }
0x5ad0   :  { %5485 = vadd.xlane.f32.xlu1 %v5484_v55  ;;  %v8971_v58 = vpop.f32.mrb[109].mxu1  ;;  %v5496_v55 = vsel %vm5459_vm3, %v5399_v28, 0.0  ;;  %v5441_v28 = vmul.f32 %v8866_v53, %v5362_v32 }
0x5ad1   :  { %v8973_v30 = vpop.f32.mrb[140].mxu0  ;;  %5602 = vadd.xlane.f32.xlu0 %v5601_v16  ;;  %v8975_v59 = vpop.f32.mrb[110].mxu1  ;;  %v5604_v16 = vsel %vm5459_vm3, %v5435_v33, 0.0  ;;  %v5440_v21 = vmul.f32 %v8866_v53, %v5361_v20 }
0x5ad2   :  { %v8977_v11 = vpop.f32.mrb[141].mxu0  ;;  %v8979_v0 = vpop.f32.mrb[111].mxu1  ;;  %v5110_v9 = vadd.f32 %v8973_v30, %v8859_v43  ;;  %v5622_v41 = vsel %vm5459_vm3, %v5441_v28, 0.0 }
0x5ad3   :  { %v8983_v42 = vpop.f32.mrb[142].mxu0  ;;  %v5102_v30 = vadd.f32 %v8859_v43, %v8977_v11  ;;  %v5249_v11 = vadd.f32 %v8859_v43, %v8949_v3 }
0x5ad4   :  { %v8989_v37 = vpop.f32.mrb[143].mxu0  ;;  %5611 = vadd.xlane.f32.xlu1 %v5610_v22  ;;  %v5330_v24 = vmax.f32 %v5110_v9, 0.0  ;;  %v5616_v9 = vsel %vm5459_vm3, %v5439_v52, 0.0 }
0x5ad5   :  { %5596 = vadd.xlane.f32.xlu0 %v5595_v19  ;;  %v5607_v19 = vsel %vm5459_vm3, %v5436_v46, 0.0  ;;  %v5328_v38 = vmax.f32 %v5102_v30, 0.0  ;;  %v5508_v46 = vsel %vm5459_vm3, %v5403_v14, 0.0  ;;  %v5365_v54 = vmax.f32 %v5249_v11, 0.0 }
0x5ad6   :  { %v5409_v63 = vmul.f32 %v8866_v53, %v5330_v24  ;;  %v5327_v24 = vmax.f32 %v5097_v31, 0.0  ;;  %v5089_v30 = vadd.f32 %v8859_v43, %v8958_v36  ;;  %v5254_v36 = vadd.f32 %v8935_v34, %v8859_v43 }
0x5ad7   :  { %v8996_v39 = vpop.f32.mrb[112].mxu1  ;;  %v5407_v17 = vmul.f32 %v8866_v53, %v5328_v38  ;;  %v5444_v32 = vmul.f32 %v8866_v53, %v5365_v54  ;;  %v5619_v11 = vsel %vm5459_vm3, %v5440_v21, 0.0  ;;  %v5257_v31 = vadd.f32 %v8945_v62, %v8859_v43 }
0x5ad8   :  { %5503 = vadd.xlane.f32.xlu1 %v5502_v61  ;;  %v9002_v49 = vpop.f32.mrb[113].mxu1  ;;  %v5325_v38 = vmax.f32 %v5089_v30, 0.0  ;;  %v5113_v21 = vadd.f32 %v8983_v42, %v8859_v43 }
0x5ad9   :  { %v9004_v35 = vpop.f32.mrb[144].mxu0  ;;  %5494 = vadd.xlane.f32.xlu0 %v5493_v12  ;;  %v9006_v56 = vpop.f32.mrb[114].mxu1  ;;  %v5514_v12 = vsel %vm5459_vm3, %v5405_v6, 0.0  ;;  %v5442_v6 = vmul.f32 %v8866_v53, %v5363_v5  ;;  %v5520_v14 = vsel %vm5459_vm3, %v5407_v17, 0.0  ;;  %v5246_v17 = vadd.f32 %v8859_v43, %v8941_v45 }
0x5ada   :  { %v9008_v25 = vpop.f32.mrb[145].mxu0  ;;  %v9010_v8 = vpop.f32.mrb[115].mxu1  ;;  %v5126_v3 = vadd.f32 %v9004_v35, %v8859_v43  ;;  %v5404_v18 = vmul.f32 %v8866_v53, %v5325_v38 }
0x5adb   :  { %v9015_v15 = vpop.f32.mrb[146].mxu0  ;;  %v5118_v35 = vadd.f32 %v8859_v43, %v9008_v25  ;;  %v5625_v28 = vsel %vm5459_vm3, %v5442_v6, 0.0  ;;  %v5278_v25 = vadd.f32 %v8859_v43, %v9002_v49  ;;  %v5364_v20 = vmax.f32 %v5246_v17, 0.0 }
0x5adc   :  { %v9021_v48 = vpop.f32.mrb[147].mxu0  ;;  %5614 = vadd.xlane.f32.xlu1 %v5613_v50  ;;  %v5334_v44 = vmax.f32 %v5126_v3, 0.0  ;;  %v5511_v45 = vsel %vm5459_vm3, %v5404_v18, 0.0  ;;  %v5262_v17 = vadd.f32 %v8859_v43, %v8971_v58 }
0x5add   :  { %5488 = vadd.xlane.f32.xlu0 %v5487_v40  ;;  %v5332_v60 = vmax.f32 %v5118_v35, 0.0  ;;  %v5372_v52 = vmax.f32 %v5278_v25, 0.0  ;;  %v5443_v35 = vmul.f32 %v8866_v53, %v5364_v20  ;;  %v5105_v25 = vadd.f32 %v8859_v43, %v8989_v37 }
0x5ade   :  { %v5413_v29 = vmul.f32 %v8866_v53, %v5334_v44 }
0x5adf   :  { %v9028_v51 = vpop.f32.mrb[116].mxu1  ;;  %v5451_v54 = vmul.f32 %v8866_v53, %v5372_v52  ;;  %v5628_v42 = vsel %vm5459_vm3, %v5443_v35, 0.0 }
0x5ae0   :  { %5497 = vadd.xlane.f32.xlu1 %v5496_v55  ;;  %v9034_v2 = vpop.f32.mrb[117].mxu1  ;;  %v5538_v49 = vsel %vm5459_vm3, %v5413_v29, 0.0  ;;  %v5302_v20 = vadd.f32 %v9028_v51, %v8859_v43 }
0x5ae1   :  { %v9036_v47 = vpop.f32.mrb[148].mxu0  ;;  %5605 = vadd.xlane.f32.xlu0 %v5604_v16  ;;  %v9038_v4 = vpop.f32.mrb[118].mxu1  ;;  %v5526_v16 = vsel %vm5459_vm3, %v5409_v63, 0.0  ;;  %v5406_v63 = vmul.f32 %v8866_v53, %v5327_v24 }
0x5ae2   :  { %v9040_v23 = vpop.f32.mrb[149].mxu0  ;;  %v9042_v22 = vpop.f32.mrb[119].mxu1  ;;  %v5142_v5 = vadd.f32 %v9036_v47, %v8859_v43 }
0x5ae3   :  { %v9047_v7 = vpop.f32.mrb[150].mxu0  ;;  %v5517_v34 = vsel %vm5459_vm3, %v5406_v63, 0.0 }
0x5ae4   :  { %v9053_v61 = vpop.f32.mrb[151].mxu0  ;;  %5608 = vadd.xlane.f32.xlu1 %v5607_v19  ;;  %v5338_v3 = vmax.f32 %v5142_v5, 0.0 }
0x5ae5   :  { %5506 = vadd.xlane.f32.xlu0 %v5505_v10 }
0x5ae8   :  { %5515 = vadd.xlane.f32.xlu1 %v5514_v12 }
0x5ae9   :  { %v9064_v50 = vpop.f32.mrb[152].mxu0  ;;  %5500 = vadd.xlane.f32.xlu0 %v5499_v57  ;;  %v5631_v57 = vsel %vm5459_vm3, %v5444_v32, 0.0 }
0x5aea   :  { %v9066_v33 = vpop.f32.mrb[153].mxu0  ;;  %v5158_v44 = vadd.f32 %v9064_v50, %v8859_v43 }
0x5aeb   :  { %v9071_v40 = vpop.f32.mrb[154].mxu0 }
0x5aec   :  { %v9077_v55 = vpop.f32.mrb[155].mxu0  ;;  %5509 = vadd.xlane.f32.xlu1 %v5508_v46  ;;  %v5411_v46 = vmul.f32 %v8866_v53, %v5332_v60  ;;  %v5342_v30 = vmax.f32 %v5158_v44, 0.0  ;;  %v5331_v60 = vmax.f32 %v5113_v21, 0.0  ;;  %v5129_v44 = vadd.f32 %v9015_v15, %v8859_v43 }
0x5aed   :  { %5623 = vadd.xlane.f32.xlu0 %v5622_v41  ;;  %v5366_v41 = vmax.f32 %v5254_v36, 0.0 }
0x5aee   :  { %v5532_v47 = vsel %vm5459_vm3, %v5411_v46, 0.0  ;;  %v5410_v36 = vmul.f32 %v8866_v53, %v5331_v60  ;;  %v5270_v46 = vadd.f32 %v8965_v1, %v8859_v43  ;;  %v5335_v21 = vmax.f32 %v5129_v44, 0.0 }
0x5aef   :  { %v5445_v6 = vmul.f32 %v8866_v53, %v5366_v41 }
0x5af0   :  { %5527 = vadd.xlane.f32.xlu1 %v5526_v16  ;;  %v5134_v16 = vadd.f32 %v8859_v43, %v9040_v23  ;;  %v5652_v23 = vsel %vm5459_vm3, %v5451_v54, 0.0  ;;  %v5370_v41 = vmax.f32 %v5270_v46, 0.0  ;;  %v5529_v1 = vsel %vm5459_vm3, %v5410_v36, 0.0 }
0x5af1   :  { %v9088_v19 = vpop.f32.mrb[156].mxu0  ;;  %5617 = vadd.xlane.f32.xlu0 %v5616_v9  ;;  %v5417_v9 = vmul.f32 %v8866_v53, %v5338_v3  ;;  %v5634_v62 = vsel %vm5459_vm3, %v5445_v6, 0.0  ;;  %v5265_v6 = vadd.f32 %v8859_v43, %v8979_v0 }
0x5af2   :  { %v9090_v13 = vpop.f32.mrb[157].mxu0  ;;  %v5336_v32 = vmax.f32 %v5134_v16, 0.0  ;;  %v5174_v38 = vadd.f32 %v9088_v19, %v8859_v43  ;;  %v5449_v16 = vmul.f32 %v8866_v53, %v5370_v41  ;;  %v5294_v41 = vadd.f32 %v8859_v43, %v9034_v2 }
0x5af3   :  { %v9095_v10 = vpop.f32.mrb[158].mxu0  ;;  %v5550_v50 = vsel %vm5459_vm3, %v5417_v9, 0.0 }
0x5af4   :  { %v9101_v12 = vpop.f32.mrb[159].mxu0  ;;  %5521 = vadd.xlane.f32.xlu1 %v5520_v14  ;;  %v5367_v14 = vmax.f32 %v5257_v31, 0.0  ;;  %v5415_v24 = vmul.f32 %v8866_v53, %v5336_v32  ;;  %v5346_v5 = vmax.f32 %v5174_v38, 0.0  ;;  %v5369_v32 = vmax.f32 %v5265_v6, 0.0 }
0x5af5   :  { %5626 = vadd.xlane.f32.xlu0 %v5625_v28  ;;  %v5150_v28 = vadd.f32 %v8859_v43, %v9066_v33  ;;  %v5646_v0 = vsel %vm5459_vm3, %v5449_v16, 0.0 }
0x5af6   :  { %v5446_v29 = vmul.f32 %v8866_v53, %v5367_v14  ;;  %v5544_v33 = vsel %vm5459_vm3, %v5415_v24, 0.0  ;;  %v5425_v54 = vmul.f32 %v8866_v53, %v5346_v5  ;;  %v5448_v14 = vmul.f32 %v8866_v53, %v5369_v32 }
0x5af7   :  { %v5340_v63 = vmax.f32 %v5150_v28, 0.0  ;;  %v5414_v28 = vmul.f32 %v8866_v53, %v5335_v21  ;;  %v5169_v21 = vadd.f32 %v8859_v43, %v9101_v12 }
0x5af8   :  { %5632 = vadd.xlane.f32.xlu1 %v5631_v57  ;;  %v5421_v57 = vmul.f32 %v8866_v53, %v5342_v30  ;;  %v5637_v37 = vsel %vm5459_vm3, %v5446_v29, 0.0  ;;  %v5286_v29 = vadd.f32 %v8996_v39, %v8859_v43  ;;  %v5643_v60 = vsel %vm5459_vm3, %v5448_v14, 0.0 }
0x5af9   :  { %5620 = vadd.xlane.f32.xlu0 %v5619_v11  ;;  %v5329_v11 = vmax.f32 %v5105_v25, 0.0  ;;  %v5419_v52 = vmul.f32 %v8866_v53, %v5340_v63  ;;  %v5541_v63 = vsel %vm5459_vm3, %v5414_v28, 0.0  ;;  %v5281_v39 = vadd.f32 %v8859_v43, %v9010_v8 }
0x5afa   :  { %v5562_v19 = vsel %vm5459_vm3, %v5421_v57, 0.0  ;;  %v5289_v57 = vadd.f32 %v9006_v56, %v8859_v43 }
0x5afb   :  { %v5408_v18 = vmul.f32 %v8866_v53, %v5329_v11  ;;  %v5373_v46 = vmax.f32 %v5281_v39, 0.0 }
0x5afc   :  { %5539 = vadd.xlane.f32.xlu1 %v5538_v49  ;;  %v5166_v49 = vadd.f32 %v8859_v43, %v9090_v13  ;;  %v5556_v13 = vsel %vm5459_vm3, %v5419_v52, 0.0 }
0x5afd   :  { %5518 = vadd.xlane.f32.xlu0 %v5517_v34  ;;  %v5297_v34 = vadd.f32 %v8859_v43, %v9042_v22  ;;  %v5523_v58 = vsel %vm5459_vm3, %v5408_v18, 0.0  ;;  %v5452_v52 = vmul.f32 %v8866_v53, %v5373_v46 }
0x5afe   :  { %v5344_v3 = vmax.f32 %v5166_v49, 0.0  ;;  %v5137_v49 = vadd.f32 %v8859_v43, %v9053_v61 }
0x5aff   :  { %v5377_v31 = vmax.f32 %v5297_v34, 0.0  ;;  %v5161_v34 = vadd.f32 %v9071_v40, %v8859_v43 }
0x5b00   :  { %5533 = vadd.xlane.f32.xlu1 %v5532_v47  ;;  %v5368_v47 = vmax.f32 %v5262_v17, 0.0  ;;  %v5423_v22 = vmul.f32 %v8866_v53, %v5344_v3  ;;  %v5337_v18 = vmax.f32 %v5137_v49, 0.0  ;;  %v5153_v3 = vadd.f32 %v8859_v43, %v9077_v55 }
0x5b01   :  { %5512 = vadd.xlane.f32.xlu0 %v5511_v45  ;;  %v5574_v45 = vsel %vm5459_vm3, %v5425_v54, 0.0  ;;  %v5456_v35 = vmul.f32 %v8866_v53, %v5377_v31  ;;  %v9214_v54 = vand.u32 127, %v86_v26  ;;  %v5343_v16 = vmax.f32 %v5161_v34, 0.0 }
0x5b02   :  { %v5447_v9 = vmul.f32 %v8866_v53, %v5368_v47  ;;  %v5568_v51 = vsel %vm5459_vm3, %v5423_v22, 0.0  ;;  %v5416_v17 = vmul.f32 %v8866_v53, %v5337_v18  ;;  %v5177_v31 = vadd.f32 %v9095_v10, %v8859_v43 }
0x5b03   :  { %v5667_v30 = vsel %vm5459_vm3, %v5456_v35, 0.0  ;;  %v5836_v6 = vadd.s32 4294967288, %v9214_v54  ;;  %v5843_v40 = vadd.s32 4294967280, %v9214_v54  ;;  %v5422_v26 = vmul.f32 %v8866_v53, %v5343_v16 }
0x5b04   :  { %5653 = vadd.xlane.f32.xlu1 %v5652_v23  ;;  %v5378_v23 = vmax.f32 %v5302_v20, 0.0  ;;  %v5640_v24 = vsel %vm5459_vm3, %v5447_v9, 0.0  ;;  %v5547_v47 = vsel %vm5459_vm3, %v5416_v17, 0.0  ;;  %v5341_v20 = vmax.f32 %v5153_v3, 0.0 }
0x5b05   :  { %5635 = vadd.xlane.f32.xlu0 %v5634_v62  ;;  %v5121_v62 = vadd.f32 %v8859_v43, %v9021_v48  ;;  %v9228_v55 = vsub.s32 %v5836_v6, %v7470_v27  ;;  %v9233_v9 = vsub.s32 %v9214_v54, %v7470_v27  ;;  %v5850_v32 = vadd.s32 4294967272, %v9214_v54 }
0x5b06   :  { %v5457_v15 = vmul.f32 %v8866_v53, %v5378_v23  ;;  %v9237_v44 = vsub.s32 %v5843_v40, %v7470_v27  ;;  %v5420_v35 = vmul.f32 %v8866_v53, %v5341_v20  ;;  %v5347_v14 = vmax.f32 %v5177_v31, 0.0 }
0x5b07   :  { %v9249_v28 = vsub.s32 %v5850_v32, %v7470_v27 }
0x5b08   :  { %5551 = vadd.xlane.f32.xlu1 %v5550_v50  ;;  %v5333_v50 = vmax.f32 %v5121_v62, 0.0  ;;  %v5670_v48 = vsel %vm5459_vm3, %v5457_v15, 0.0 }
0x5b09   :  { %5629 = vadd.xlane.f32.xlu0 %v5628_v42  ;;  %v5374_v42 = vmax.f32 %v5286_v29, 0.0 }
0x5b0a   :  { %v5412_v25 = vmul.f32 %v8866_v53, %v5333_v50 }
0x5b0b   :  { %v5453_v38 = vmul.f32 %v8866_v53, %v5374_v42  ;;  %v5345_v42 = vmax.f32 %v5169_v21, 0.0 }
0x5b0c   :  { %5545 = vadd.xlane.f32.xlu1 %v5544_v33  ;;  %v5375_v33 = vmax.f32 %v5289_v57, 0.0  ;;  %v5535_v36 = vsel %vm5459_vm3, %v5412_v25, 0.0  ;;  %v5426_v25 = vmul.f32 %v8866_v53, %v5347_v14 }
0x5b0d   :  { %5638 = vadd.xlane.f32.xlu0 %v5637_v37  ;;  %v5145_v37 = vadd.f32 %v9047_v7, %v8859_v43  ;;  %v5658_v56 = vsel %vm5459_vm3, %v5453_v38, 0.0  ;;  %v5655_v7 = vsel %vm5459_vm3, %v5452_v52, 0.0  ;;  %v5424_v46 = vmul.f32 %v8866_v53, %v5345_v42 }
0x5b0e   :  { %v5454_v11 = vmul.f32 %v8866_v53, %v5375_v33 }
0x5b0f   :  { %v5339_v5 = vmax.f32 %v5145_v37, 0.0  ;;  %v5577_v37 = vsel %vm5459_vm3, %v5426_v25, 0.0 }
0x5b10   :  { %5563 = vadd.xlane.f32.xlu1 %v5562_v19  ;;  %v5661_v8 = vsel %vm5459_vm3, %v5454_v11, 0.0  ;;  %v5305_v11 = vadd.f32 %v9038_v4, %v8859_v43 }
0x5b11   :  { %5530 = vadd.xlane.f32.xlu0 %v5529_v1  ;;  %v5418_v19 = vmul.f32 %v8866_v53, %v5339_v5  ;;  %v5376_v1 = vmax.f32 %v5294_v41, 0.0 }
0x5b13   :  { %v5553_v61 = vsel %vm5459_vm3, %v5418_v19, 0.0  ;;  %v5455_v2 = vmul.f32 %v8866_v53, %v5376_v1 }
0x5b14   :  { %5557 = vadd.xlane.f32.xlu1 %v5556_v13  ;;  %v9218_v13 = vpop.permute.xlu1 %5683 }
0x5b15   :  { %5524 = vadd.xlane.f32.xlu0 %v5523_v58  ;;  %v5664_v22 = vsel %vm5459_vm3, %v5455_v2, 0.0  ;;  %v5871_v2 = vadd.s32 4294967248, %v9214_v54 }
0x5b18   :  { %5575 = vadd.xlane.f32.xlu1 %v5574_v45 }
0x5b19   :  { %5647 = vadd.xlane.f32.xlu0 %v5646_v0 }
0x5b1c   :  { %5569 = vadd.xlane.f32.xlu1 %v5568_v51 }
0x5b1d   :  { %5641 = vadd.xlane.f32.xlu0 %v5640_v24  ;;  %v5565_v24 = vsel %vm5459_vm3, %v5422_v26, 0.0 }
0x5b20   :  { %5668 = vadd.xlane.f32.xlu1 %v5667_v30 }
0x5b21   :  { %5644 = vadd.xlane.f32.xlu0 %v5643_v60  ;;  %v5273_v60 = vadd.f32 %v8975_v59, %v8859_v43  ;;  %v5379_v43 = vmax.f32 %v5305_v11, 0.0 }
0x5b23   :  { %v5458_v20 = vmul.f32 %v8866_v53, %v5379_v43 }
0x5b24   :  { %5671 = vadd.xlane.f32.xlu1 %v5670_v48 }
0x5b25   :  { %5542 = vadd.xlane.f32.xlu0 %v5541_v63  ;;  %v5559_v63 = vsel %vm5459_vm3, %v5420_v35, 0.0  ;;  %v5673_v21 = vsel %vm5459_vm3, %v5458_v20, 0.0 }
0x5b29   :  { %5536 = vadd.xlane.f32.xlu0 %v5535_v36  ;;  %v5371_v36 = vmax.f32 %v5273_v60, 0.0 }
0x5b2b   :  { %v5450_v41 = vmul.f32 %v8866_v53, %v5371_v36 }
0x5b2d   :  { %5659 = vadd.xlane.f32.xlu0 %v5658_v56  ;;  %v5857_v56 = vadd.s32 4294967264, %v9214_v54 }
0x5b2f   :  { %v9272_v4 = vsub.s32 %v5857_v56, %v7470_v27 }
0x5b31   :  { %5662 = vadd.xlane.f32.xlu0 %v5661_v8 }
0x5b35   :  { %5656 = vadd.xlane.f32.xlu0 %v5655_v7  ;;  %v5571_v7 = vsel %vm5459_vm3, %v5424_v46, 0.0 }
0x5b39   :  { %5554 = vadd.xlane.f32.xlu0 %v5553_v61  ;;  %v5864_v61 = vadd.s32 4294967256, %v9214_v54 }
0x5b3b   :  { %v9289_v32 = vsub.s32 %v5864_v61, %v7470_v27 }
0x5b3d   :  { %5548 = vadd.xlane.f32.xlu0 %v5547_v47 }
0x5b3e   :  { %v5468_v58 = vpop.xlane.xlu0 %5467 }
0x5b3f   :  { %v5688_v0 = vadd.f32 %v9218_v13, %v5468_v58  ;;  %v5878_v58 = vadd.s32 4294967240, %v9214_v54 }
0x5b41   :  { %v5465_v45 = vpop.xlane.xlu1 %5464  ;;  %5665 = vadd.xlane.f32.xlu0 %v5664_v22  ;;  %v5847_v50 = vrot.slane %v5688_v0, %v9237_v44  ;;  %v5649_v22 = vsel %vm5459_vm3, %v5450_v41, 0.0  ;;  %v9298_v35 = vsub.s32 %v5878_v58, %v7470_v27  ;;  %vm6214_vm3 = vcmask 516096  }
0x5b42   :  { %v5687_v10 = vadd.f32 %v9218_v13, %v5465_v45  ;;  %v5462_v23 = vpop.xlane.xlu0 %5461 }
0x5b43   :  { %v5686_v51 = vadd.f32 %v9218_v13, %v5462_v23 }
0x5b44   :  { %v5840_v62 = vrot.slane %v5687_v10, %v9228_v55  ;;  %v9293_v10 = vsub.s32 %v5871_v2, %v7470_v27 }
0x5b45   :  { %v5835_v15 = vrot.slane %v5686_v51, %v9233_v9  ;;  %v5588_v30 = vpop.xlane.xlu1 %5587  ;;  %5566 = vadd.xlane.f32.xlu0 %v5565_v24 }
0x5b46   :  { %v5471_v29 = vpop.xlane.xlu0 %5470  ;;  %v5728_v49 = vadd.f32 %v9218_v13, %v5588_v30 }
0x5b47   :  { %v5842_v12 = vsel %vm5841_vm4, %v5840_v62, %v5835_v15  ;;  %v5689_v48 = vadd.f32 %v9218_v13, %v5471_v29 }
0x5b48   :  { %v5849_v57 = vsel %vm5848_vm5, %v5847_v50, %v5842_v12  ;;  %v6053_v3 = vrot.slane %v5728_v49, %v9237_v44 }
0x5b49   :  { %v5854_v38 = vrot.slane %v5689_v48, %v9249_v28  ;;  %v5582_v33 = vpop.xlane.xlu1 %5581  ;;  %5560 = vadd.xlane.f32.xlu0 %v5559_v63 }
0x5b4a   :  { %v5591_v39 = vpop.xlane.xlu0 %5590  ;;  %v5726_v52 = vadd.f32 %v9218_v13, %v5582_v33 }
0x5b4b   :  { %v5856_v59 = vsel %vm5855_vm6, %v5854_v38, %v5849_v57  ;;  %v5729_v19 = vadd.f32 %v9218_v13, %v5591_v39 }
0x5b4c   :  { %v6044_v17 = vrot.slane %v5726_v52, %v9233_v9 }
0x5b4d   :  { %v5480_v5 = vpop.xlane.xlu1 %5479  ;;  %5578 = vadd.xlane.f32.xlu0 %v5577_v37  ;;  %v6058_v6 = vrot.slane %v5729_v19, %v9249_v28 }
0x5b4e   :  { %v5585_v8 = vpop.xlane.xlu0 %5584  ;;  %v5692_v54 = vadd.f32 %v9218_v13, %v5480_v5 }
0x5b4f   :  { %v5727_v18 = vadd.f32 %v9218_v13, %v5585_v8 }
0x5b50   :  { %v5875_v15 = vrot.slane %v5692_v54, %v9293_v10 }
0x5b51   :  { %v6048_v1 = vrot.slane %v5727_v18, %v9228_v55  ;;  %v5474_v34 = vpop.xlane.xlu1 %5473  ;;  %5572 = vadd.xlane.f32.xlu0 %v5571_v7 }
0x5b52   :  { %v5690_v16 = vadd.f32 %v9218_v13, %v5474_v34  ;;  %v5483_v47 = vpop.xlane.xlu0 %5482 }
0x5b53   :  { %v6049_v40 = vsel %vm5841_vm4, %v6048_v1, %v6044_v17  ;;  %v5693_v51 = vadd.f32 %v9218_v13, %v5483_v47 }
0x5b54   :  { %v6054_v26 = vsel %vm5848_vm5, %v6053_v3, %v6049_v40  ;;  %v5861_v31 = vrot.slane %v5690_v16, %v9272_v4 }
0x5b55   :  { %v5600_v45 = vpop.xlane.xlu1 %5599  ;;  %5650 = vadd.xlane.f32.xlu0 %v5649_v22  ;;  %v6059_v0 = vsel %vm5855_vm6, %v6058_v6, %v6054_v26  ;;  %v5882_v50 = vrot.slane %v5693_v51, %v9298_v35 }
0x5b56   :  { %v5863_v53 = vsel %vm5862_vm7, %v5861_v31, %v5856_v59  ;;  %v5477_v23 = vpop.xlane.xlu0 %5476  ;;  %v5732_v38 = vadd.f32 %v9218_v13, %v5600_v45 }
0x5b57   :  { %v5691_v14 = vadd.f32 %v9218_v13, %v5477_v23 }
0x5b58   :  { %v6073_v46 = vrot.slane %v5732_v38, %v9293_v10 }
0x5b59   :  { %v5868_v62 = vrot.slane %v5691_v14, %v9289_v32  ;;  %v5492_v24 = vpop.xlane.xlu1 %5491  ;;  %5674 = vadd.xlane.f32.xlu0 %v5673_v21 }
0x5b5a   :  { %v5594_v30 = vpop.xlane.xlu0 %5593  ;;  %v5696_v18 = vadd.f32 %v9218_v13, %v5492_v24 }
0x5b5b   :  { %v5870_v27 = vsel %vm5869_vm8, %v5868_v62, %v5863_v53  ;;  %v5730_v29 = vadd.f32 %v9218_v13, %v5594_v30 }
0x5b5c   :  { %v5877_v60 = vsel %vm5876_vm9, %v5875_v15, %v5870_v27  ;;  %v5897_v61 = vrot.slane %v5696_v18, %v9237_v44 }
0x5b5d   :  { %v9310_v12 = vsel %vm5883_vm10, %v5882_v50, %v5877_v60  ;;  %v6063_v48 = vrot.slane %v5730_v29, %v9272_v4  ;;  %v5486_v25 = vpop.xlane.xlu1 %5485 }
0x5b5e   :  { %v5603_v42 = vpop.xlane.xlu0 %5602  ;;  %v5694_v49 = vadd.f32 %v9218_v13, %v5486_v25 }
0x5b5f   :  { %v6064_v57 = vsel %vm5862_vm7, %v6063_v48, %v6059_v0  ;;  %v5733_v39 = vadd.f32 %v9218_v13, %v5603_v42 }
0x5b60   :  { %v5888_v17 = vrot.slane %v5694_v49, %v9233_v9 }
0x5b61   :  { %v5612_v63 = vpop.xlane.xlu1 %5611  ;;  %v6078_v56 = vrot.slane %v5733_v39, %v9298_v35 }
0x5b62   :  { %v5597_v33 = vpop.xlane.xlu0 %5596  ;;  %v5736_v40 = vadd.f32 %v9218_v13, %v5612_v63 }
0x5b63   :  { %v5731_v36 = vadd.f32 %v9218_v13, %v5597_v33 }
0x5b64   :  { %v6092_v53 = vrot.slane %v5736_v40, %v9237_v44 }
0x5b65   :  { %v6068_v59 = vrot.slane %v5731_v36, %v9289_v32  ;;  %v5504_v11 = vpop.xlane.xlu1 %5503 }
0x5b66   :  { %v5495_v37 = vpop.xlane.xlu0 %5494  ;;  %v5700_v23 = vadd.f32 %v9218_v13, %v5504_v11 }
0x5b67   :  { %v6069_v52 = vsel %vm5869_vm8, %v6068_v59, %v6064_v57  ;;  %v5697_v43 = vadd.f32 %v9218_v13, %v5495_v37 }
0x5b68   :  { %v6074_v5 = vsel %vm5876_vm9, %v6073_v46, %v6069_v52  ;;  %v5917_v29 = vrot.slane %v5700_v23, %v9293_v10 }
0x5b69   :  { %v9324_v8 = vsel %vm5883_vm10, %v6078_v56, %v6074_v5  ;;  %v5615_v19 = vpop.xlane.xlu1 %5614  ;;  %v5902_v2 = vrot.slane %v5697_v43, %v9249_v28 }
0x5b6a   :  { %v5489_v41 = vpop.xlane.xlu0 %5488  ;;  %v5737_v26 = vadd.f32 %v9218_v13, %v5615_v19 }
0x5b6b   :  { %v5695_v7 = vadd.f32 %v9218_v13, %v5489_v41 }
0x5b6c   :  { %v6097_v51 = vrot.slane %v5737_v26, %v9249_v28 }
0x5b6d   :  { %v5892_v1 = vrot.slane %v5695_v7, %v9228_v55  ;;  %v5498_v34 = vpop.xlane.xlu1 %5497 }
0x5b6e   :  { %v5606_v3 = vpop.xlane.xlu0 %5605  ;;  %v5698_v31 = vadd.f32 %v9218_v13, %v5498_v34 }
0x5b6f   :  { %v5893_v16 = vsel %vm5841_vm4, %v5892_v1, %v5888_v17  ;;  %v5734_v6 = vadd.f32 %v9218_v13, %v5606_v3 }
0x5b70   :  { %v5898_v47 = vsel %vm5848_vm5, %v5897_v61, %v5893_v16  ;;  %v5907_v14 = vrot.slane %v5698_v31, %v9272_v4 }
0x5b71   :  { %v5903_v58 = vsel %vm5855_vm6, %v5902_v2, %v5898_v47  ;;  %v5609_v20 = vpop.xlane.xlu1 %5608  ;;  %v6083_v0 = vrot.slane %v5734_v6, %v9233_v9 }
0x5b72   :  { %v5735_v22 = vadd.f32 %v9218_v13, %v5609_v20  ;;  %v5507_v45 = vpop.xlane.xlu0 %5506  ;;  %v5908_v60 = vsel %vm5862_vm7, %v5907_v14, %v5903_v58 }
0x5b73   :  { %v5701_v15 = vadd.f32 %v9218_v13, %v5507_v45 }
0x5b74   :  { %v6087_v54 = vrot.slane %v5735_v22, %v9228_v55 }
0x5b75   :  { %v5516_v48 = vpop.xlane.xlu1 %5515  ;;  %v5922_v42 = vrot.slane %v5701_v15, %v9298_v35 }
0x5b76   :  { %v6088_v21 = vsel %vm5841_vm4, %v6087_v54, %v6083_v0  ;;  %v5501_v62 = vpop.xlane.xlu0 %5500  ;;  %v5704_v3 = vadd.f32 %v9218_v13, %v5516_v48 }
0x5b77   :  { %v6093_v24 = vsel %vm5848_vm5, %v6092_v53, %v6088_v21  ;;  %v5699_v30 = vadd.f32 %v9218_v13, %v5501_v62 }
0x5b78   :  { %v6098_v50 = vsel %vm5855_vm6, %v6097_v51, %v6093_v24  ;;  %v5936_v58 = vrot.slane %v5704_v3, %v9237_v44 }
0x5b79   :  { %v5912_v27 = vrot.slane %v5699_v30, %v9289_v32  ;;  %v5510_v59 = vpop.xlane.xlu1 %5509 }
0x5b7a   :  { %v5624_v25 = vpop.xlane.xlu0 %5623  ;;  %v5702_v34 = vadd.f32 %v9218_v13, %v5510_v59 }
0x5b7b   :  { %v5913_v57 = vsel %vm5869_vm8, %v5912_v27, %v5908_v60  ;;  %v5740_v56 = vadd.f32 %v9218_v13, %v5624_v25 }
0x5b7c   :  { %v5918_v63 = vsel %vm5876_vm9, %v5917_v29, %v5913_v57  ;;  %v5927_v6 = vrot.slane %v5702_v34, %v9233_v9 }
0x5b7d   :  { %v5923_v38 = vsel %vm5883_vm10, %v5922_v42, %v5918_v63  ;;  %v5528_v52 = vpop.xlane.xlu1 %5527  ;;  %v6112_v18 = vrot.slane %v5740_v56, %v9293_v10 }
0x5b7e   :  { %v9360_v33 = vsel %vm6197_vm11, %v5923_v38, %v9310_v12  ;;  %v5618_v39 = vpop.xlane.xlu0 %5617  ;;  %v5708_v25 = vadd.f32 %v9218_v13, %v5528_v52 }
0x5b7f   :  { %v5738_v36 = vadd.f32 %v9218_v13, %v5618_v39 }
0x5b80   :  { %v5956_v59 = vrot.slane %v5708_v25, %v9293_v10 }
0x5b81   :  { %v6102_v11 = vrot.slane %v5738_v36, %v9272_v4  ;;  %v5522_v17 = vpop.xlane.xlu1 %5521 }
0x5b82   :  { %v5627_v46 = vpop.xlane.xlu0 %5626  ;;  %v5706_v48 = vadd.f32 %v9218_v13, %v5522_v17 }
0x5b83   :  { %v6103_v37 = vsel %vm5862_vm7, %v6102_v11, %v6098_v50  ;;  %v5741_v49 = vadd.f32 %v9218_v13, %v5627_v46 }
0x5b84   :  { %v5946_v38 = vrot.slane %v5706_v48, %v9272_v4 }
0x5b85   :  { %v6117_v43 = vrot.slane %v5741_v49, %v9298_v35  ;;  %v5633_v20 = vpop.xlane.xlu1 %5632 }
0x5b86   :  { %v5621_v5 = vpop.xlane.xlu0 %5620  ;;  %v5743_v0 = vadd.f32 %v9218_v13, %v5633_v20 }
0x5b87   :  { %v5739_v19 = vadd.f32 %v9218_v13, %v5621_v5 }
0x5b88   :  { %v6126_v14 = vrot.slane %v5743_v0, %v9228_v55 }
0x5b89   :  { %v6107_v12 = vrot.slane %v5739_v19, %v9289_v32  ;;  %v5540_v39 = vpop.xlane.xlu1 %5539 }
0x5b8a   :  { %v5519_v41 = vpop.xlane.xlu0 %5518 }
0x5b8b   :  { %v6108_v7 = vsel %vm5869_vm8, %v6107_v12, %v6103_v37  ;;  %v5705_v16 = vadd.f32 %v9218_v13, %v5519_v41 }
0x5b8c   :  { %v6113_v1 = vsel %vm5876_vm9, %v6112_v18, %v6108_v7 }
0x5b8d   :  { %v9375_v61 = vsel %vm5883_vm10, %v6117_v43, %v6113_v1  ;;  %v5941_v31 = vrot.slane %v5705_v16, %v9249_v28  ;;  %v5534_v12 = vpop.xlane.xlu1 %5533 }
0x5b8e   :  { %v5513_v2 = vpop.xlane.xlu0 %5512 }
0x5b8f   :  { %v5703_v47 = vadd.f32 %v9218_v13, %v5513_v2 }
0x5b91   :  { %v5931_v40 = vrot.slane %v5703_v47, %v9228_v55  ;;  %v5654_v41 = vpop.xlane.xlu1 %5653 }
0x5b92   :  { %v5636_v26 = vpop.xlane.xlu0 %5635 }
0x5b93   :  { %v5932_v22 = vsel %vm5841_vm4, %v5931_v40, %v5927_v6  ;;  %v5744_v53 = vadd.f32 %v9218_v13, %v5636_v26 }
0x5b94   :  { %v5937_v45 = vsel %vm5848_vm5, %v5936_v58, %v5932_v22 }
0x5b95   :  { %v5942_v54 = vsel %vm5855_vm6, %v5941_v31, %v5937_v45  ;;  %v6131_v62 = vrot.slane %v5744_v53, %v9237_v44  ;;  %v5552_v17 = vpop.xlane.xlu1 %5551  ;;  %v5712_v31 = vadd.f32 %v9218_v13, %v5540_v39 }
0x5b96   :  { %v5630_v23 = vpop.xlane.xlu0 %5629  ;;  %v5947_v11 = vsel %vm5862_vm7, %v5946_v38, %v5942_v54  ;;  %v5716_v48 = vadd.f32 %v9218_v13, %v5552_v17 }
0x5b97   :  { %v5742_v51 = vadd.f32 %v9218_v13, %v5630_v23  ;;  %v5975_v23 = vrot.slane %v5712_v31, %v9237_v44 }
0x5b99   :  { %v6122_v21 = vrot.slane %v5742_v51, %v9233_v9  ;;  %v5546_v34 = vpop.xlane.xlu1 %5545 }
0x5b9a   :  { %v5639_v24 = vpop.xlane.xlu0 %5638  ;;  %v5714_v51 = vadd.f32 %v9218_v13, %v5546_v34 }
0x5b9b   :  { %v6127_v15 = vsel %vm5841_vm4, %v6126_v14, %v6122_v21  ;;  %v5745_v30 = vadd.f32 %v9218_v13, %v5639_v24 }
0x5b9c   :  { %v6132_v50 = vsel %vm5848_vm5, %v6131_v62, %v6127_v15 }
0x5b9d   :  { %v6136_v27 = vrot.slane %v5745_v30, %v9249_v28  ;;  %v5564_v16 = vpop.xlane.xlu1 %5563  ;;  %v5750_v30 = vadd.f32 %v9218_v13, %v5654_v41  ;;  %v5995_v41 = vrot.slane %v5716_v48, %v9293_v10 }
0x5b9e   :  { %v5531_v29 = vpop.xlane.xlu0 %5530 }
0x5b9f   :  { %v9398_v60 = vsel %vm5855_vm6, %v6136_v27, %v6132_v50  ;;  %v5709_v57 = vadd.f32 %v9218_v13, %v5531_v29  ;;  %v5720_v50 = vadd.f32 %v9218_v13, %v5564_v16 }
0x5ba1   :  { %v5961_v37 = vrot.slane %v5709_v57, %v9298_v35  ;;  %v5558_v6 = vpop.xlane.xlu1 %5557 }
0x5ba2   :  { %v5525_v42 = vpop.xlane.xlu0 %5524  ;;  %v5718_v14 = vadd.f32 %v9218_v13, %v5558_v6 }
0x5ba3   :  { %v5707_v63 = vadd.f32 %v9218_v13, %v5525_v42  ;;  %v5985_v42 = vrot.slane %v5714_v51, %v9272_v4 }
0x5ba4   :  { %v6005_v57 = vrot.slane %v5718_v14, %v9233_v9 }
0x5ba5   :  { %v5951_v36 = vrot.slane %v5707_v63, %v9289_v32  ;;  %v5576_v22 = vpop.xlane.xlu1 %5575 }
0x5ba6   :  { %v9408_v46 = vpop.xlane.xlu0 %5647 }
0x5ba7   :  { %v5952_v56 = vsel %vm5869_vm8, %v5951_v36, %v5947_v11 }
0x5ba8   :  { %v5957_v52 = vsel %vm5876_vm9, %v5956_v59, %v5952_v56  ;;  %v6014_v56 = vrot.slane %v5720_v50, %v9237_v44 }
0x5ba9   :  { %v5962_v5 = vsel %vm5883_vm10, %v5961_v37, %v5957_v52  ;;  %v5570_v62 = vpop.xlane.xlu1 %5569  ;;  %v6161_v37 = vrot.slane %v5750_v30, %v9233_v9 }
0x5baa   :  { %v9415_v49 = vsel %vm6199_vm12, %v5962_v5, %v9360_v33  ;;  %v5642_v19 = vpop.xlane.xlu0 %5641  ;;  %v5710_v33 = vadd.f32 %v9218_v13, %v5534_v12 }
0x5bab   :  { %v5746_v39 = vadd.f32 %v9218_v13, %v5642_v19  ;;  %v5722_v19 = vadd.f32 %v9218_v13, %v5570_v62 }
0x5bac   :  { %v5966_v45 = vrot.slane %v5710_v33, %v9233_v9 }
0x5bad   :  { %v6141_v34 = vrot.slane %v5746_v39, %v9272_v4 }
0x5bae   :  { %v5645_v18 = vpop.xlane.xlu0 %5644 }
0x5baf   :  { %v5747_v52 = vadd.f32 %v9218_v13, %v5645_v18 }
0x5bb2   :  { %v5543_v43 = vpop.xlane.xlu0 %5542 }
0x5bb3   :  { %v5713_v0 = vadd.f32 %v9218_v13, %v5543_v43  ;;  %v5669_v43 = vpop.xlane.xlu1 %5668 }
0x5bb5   :  { %v5980_v27 = vrot.slane %v5713_v0, %v9249_v28  ;;  %v6024_v0 = vrot.slane %v5722_v19, %v9272_v4 }
0x5bb6   :  { %v5537_v7 = vpop.xlane.xlu0 %5536 }
0x5bb7   :  { %v5711_v40 = vadd.f32 %v9218_v13, %v5537_v7 }
0x5bb9   :  { %v5970_v20 = vrot.slane %v5711_v40, %v9228_v55  ;;  %v5724_v40 = vadd.f32 %v9218_v13, %v5576_v22 }
0x5bba   :  { %v5660_v1 = vpop.xlane.xlu0 %5659 }
0x5bbb   :  { %v5971_v54 = vsel %vm5841_vm4, %v5970_v20, %v5966_v45  ;;  %v5752_v5 = vadd.f32 %v9218_v13, %v5660_v1 }
0x5bbc   :  { %v5976_v24 = vsel %vm5848_vm5, %v5975_v23, %v5971_v54  ;;  %v5672_v23 = vpop.xlane.xlu1 %5671 }
0x5bbd   :  { %v5981_v63 = vsel %vm5855_vm6, %v5980_v27, %v5976_v24  ;;  %v6170_v33 = vrot.slane %v5752_v5, %v9237_v44  ;;  %v6142_v44 = vsel %vm5862_vm7, %v6141_v34, %v9398_v60 }
0x5bbe   :  { %v5663_v3 = vpop.xlane.xlu0 %5662  ;;  %v5986_v7 = vsel %vm5862_vm7, %v5985_v42, %v5981_v63 }
0x5bc2   :  { %v5657_v2 = vpop.xlane.xlu0 %5656 }
0x5bc3   :  { %v5751_v15 = vadd.f32 %v9218_v13, %v5657_v2  ;;  %v5753_v2 = vadd.f32 %v9218_v13, %v5663_v3 }
0x5bc5   :  { %v6165_v36 = vrot.slane %v5751_v15, %v9228_v55  ;;  %v6175_v51 = vrot.slane %v5753_v2, %v9249_v28 }
0x5bc6   :  { %v5555_v47 = vpop.xlane.xlu0 %5554 }
0x5bc7   :  { %v6166_v16 = vsel %vm5841_vm4, %v6165_v36, %v6161_v37 }
0x5bc8   :  { %v6171_v22 = vsel %vm5848_vm5, %v6170_v33, %v6166_v16 }
0x5bca   :  { %v5549_v58 = vpop.xlane.xlu0 %5548 }
0x5bcb   :  { %v5715_v21 = vadd.f32 %v9218_v13, %v5549_v58  ;;  %v6146_v58 = vrot.slane %v5747_v52, %v9289_v32 }
0x5bcd   :  { %v5990_v38 = vrot.slane %v5715_v21, %v9289_v32  ;;  %v6034_v21 = vrot.slane %v5724_v40, %v9293_v10  ;;  %v6147_v62 = vsel %vm5869_vm8, %v6146_v58, %v6142_v44 }
0x5bce   :  { %v5666_v26 = vpop.xlane.xlu0 %5665 }
0x5bcf   :  { %v5991_v9 = vsel %vm5869_vm8, %v5990_v38, %v5986_v7  ;;  %v5754_v18 = vadd.f32 %v9218_v13, %v5666_v26 }
0x5bd0   :  { %v5996_v26 = vsel %vm5876_vm9, %v5995_v41, %v5991_v9 }
0x5bd2   :  { %v5567_v53 = vpop.xlane.xlu0 %5566 }
0x5bd3   :  { %v5721_v59 = vadd.f32 %v9218_v13, %v5567_v53  ;;  %v5755_v53 = vadd.f32 %v9218_v13, %v5669_v43 }
0x5bd5   :  { %v6019_v6 = vrot.slane %v5721_v59, %v9249_v28  ;;  %v6185_v42 = vrot.slane %v5755_v53, %v9289_v32 }
0x5bd6   :  { %v5561_v29 = vpop.xlane.xlu0 %5560 }
0x5bd7   :  { %v5719_v25 = vadd.f32 %v9218_v13, %v5561_v29  ;;  %v5756_v29 = vadd.f32 %v9218_v13, %v5672_v23 }
0x5bd9   :  { %v6009_v11 = vrot.slane %v5719_v25, %v9228_v55  ;;  %v5717_v55 = vadd.f32 %v9218_v13, %v5555_v47  ;;  %v5748_v47 = vadd.f32 %v9218_v13, %v9408_v46  ;;  %v6180_v46 = vrot.slane %v5754_v18, %v9272_v4 }
0x5bda   :  { %v5579_v12 = vpop.xlane.xlu0 %5578  ;;  %v6176_v4 = vsel %vm5855_vm6, %v6175_v51, %v6171_v22 }
0x5bdb   :  { %v6010_v17 = vsel %vm5841_vm4, %v6009_v11, %v6005_v57  ;;  %v5725_v31 = vadd.f32 %v9218_v13, %v5579_v12  ;;  %v6000_v54 = vrot.slane %v5717_v55, %v9298_v35  ;;  %v6151_v28 = vrot.slane %v5748_v47, %v9293_v10 }
0x5bdc   :  { %v6015_v1 = vsel %vm5848_vm5, %v6014_v56, %v6010_v17  ;;  %v6181_v48 = vsel %vm5862_vm7, %v6180_v46, %v6176_v4 }
0x5bdd   :  { %v6020_v3 = vsel %vm5855_vm6, %v6019_v6, %v6015_v1  ;;  %v6001_v24 = vsel %vm5883_vm10, %v6000_v54, %v5996_v26  ;;  %v6039_v60 = vrot.slane %v5725_v31, %v9298_v35  ;;  %v6152_v36 = vsel %vm5876_vm9, %v6151_v28, %v6147_v62 }
0x5bde   :  { %v5573_v20 = vpop.xlane.xlu0 %5572  ;;  %v6025_v15 = vsel %vm5862_vm7, %v6024_v0, %v6020_v3  ;;  %v6202_v57 = vsel %vm6201_vm13, %v6001_v24, %v9415_v49  ;;  %v6186_v11 = vsel %vm5869_vm8, %v6185_v42, %v6181_v48  ;;  %v6190_v49 = vrot.slane %v5756_v29, %v9293_v10 }
0x5bdf   :  { %v5723_v45 = vadd.f32 %v9218_v13, %v5573_v20 }
0x5be1   :  { %v6029_v14 = vrot.slane %v5723_v45, %v9289_v32 }
0x5be2   :  { %v5651_v30 = vpop.xlane.xlu0 %5650 }
0x5be3   :  { %v6030_v50 = vsel %vm5869_vm8, %v6029_v14, %v6025_v15  ;;  %v5749_v27 = vadd.f32 %v9218_v13, %v5651_v30 }
0x5be4   :  { %v6035_v25 = vsel %vm5876_vm9, %v6034_v21, %v6030_v50 }
0x5be5   :  { %v6040_v63 = vsel %vm5883_vm10, %v6039_v60, %v6035_v25  ;;  %v6156_v38 = vrot.slane %v5749_v27, %v9298_v35 }
0x5be6   :  { %v6204_v39 = vsel %vm6203_vm14, %v6040_v63, %v6202_v57  ;;  %v5675_v59 = vpop.xlane.xlu0 %5674 }
0x5be7   :  { %v6206_v37 = vsel %vm6205_vm15, %v9324_v8, %v6204_v39  ;;  %v6157_v32 = vsel %vm5883_vm10, %v6156_v38, %v6152_v36  ;;  %v5757_v56 = vadd.f32 %v9218_v13, %v5675_v59  ;;  %v6191_v8 = vsel %vm5876_vm9, %v6190_v49, %v6186_v11 }
0x5be8   :  { %v6208_v52 = vsel %vm6207_vm0, %v9375_v61, %v6206_v37 }
0x5be9   :  { %v6210_v5 = vsel %vm6209_vm1, %v6157_v32, %v6208_v52  ;;  %v6195_v12 = vrot.slane %v5757_v56, %v9298_v35 }
0x5bea   :  { %6213 = vst.msk [vmem:[%s9534_s20] sm:$0xff] %vm267_vm2, %v6210_v5 }
0x5beb   :  { %v6196_v41 = vsel %vm5883_vm10, %v6195_v12, %v6191_v8 }
0x5bec   :  { %6215 = vst.msk [vmem:[%s9534_s20 + $0x8] sm:$0x1] %vm6214_vm3, %v6196_v41 }

</bundles_post_ra>
